<compile_context>
chip_gen: v7x
topology: tpu7x:2x2x1
jax: 0.10.0
libtpu: 0.0.40
codegen_flags: <defaults>
</compile_context>

<pallas_src>
import math
import jax
import jax.numpy as jnp
from jax.experimental import pallas as pl
from jax.experimental.pallas import tpu as pltpu

# Use exact-f32 matmul passes everywhere (kernel + reference) so the
# kernel-vs-reference comparison is limited only by f32 associativity.
jax.config.update("jax_default_matmul_precision", "highest")

NUM_CHAMPS = 163
NUM_ROLES = 5
CHAMP_EMB = 32
ROLE_EMB = 3
PHI_OUT = 10
HALF_IN = math.floor((CHAMP_EMB + ROLE_EMB) / 2)  # 17
ROLE_OFFSET = NUM_CHAMPS + 1                      # 164 (role rows in fused table)


def _round_up(x, m):
    return (x + m - 1) // m * m


def deepset_kernel(idx_ref, e1t_ref, b1t_ref, w23bt_ref, w23rt_ref,
                   b3t_ref, w4t_ref, b4_ref, out_ref):
    """One tile of TB games, everything transposed (games on lanes).

    idx_ref : (20, TB) int32   rows 0-9 champion ids, rows 10-19 role ids
    e1t_ref : (17, 170) f32    fused (embedding @ w1)^T
    b1t_ref : (17, 1)   f32
    w23bt/w23rt : (5, 17) f32  (w2 @ w3_half)^T
    b3t_ref : (5, 1)    f32    b3 + 5*b2@(w3b+w3r), transposed
    w4t_ref : (1, 5)    f32
    b4_ref  : (1, 1)    f32
    out_ref : (1, TB)   f32
    """
    TB = out_ref.shape[1]
    V = e1t_ref.shape[1]                              # 170
    f32 = jnp.float32

    e1t = e1t_ref[...]                                # (17, 170)
    b1t = b1t_ref[...]                                # (17, 1)
    viota = jax.lax.broadcasted_iota(jnp.int32, (V, TB), 0)

    def member_h1(s):
        champ = idx_ref[s:s + 1, :]                   # (1, TB)
        role = idx_ref[10 + s:11 + s, :]              # (1, TB)
        # Exact gather of E1 rows via a one-hot matmul (champ row OR role row).
        oh = ((viota == champ) |
              (viota == role + ROLE_OFFSET)).astype(f32)        # (170, TB)
        return jax.nn.sigmoid(
            jnp.dot(e1t, oh, preferred_element_type=f32) + b1t)  # (17, TB)

    # Team pooling = plain VPU adds of the per-slot hidden activations.
    blue = member_h1(0)
    for s in range(1, 5):
        blue = blue + member_h1(s)
    red = member_h1(5)
    for s in range(6, 10):
        red = red + member_h1(s)

    # rho MLP, with w2 pre-folded into the w3 halves (b2 folded into b3).
    h2 = jnp.maximum(
        jnp.dot(w23bt_ref[...], blue, preferred_element_type=f32)
        + jnp.dot(w23rt_ref[...], red, preferred_element_type=f32)
        + b3t_ref[...], 0.0)                                     # (5, TB)

    # Final Linear(5, 1) as 5 VPU FMAs -> lane-dense (1, TB) output row.
    w4t = w4t_ref[...]                                           # (1, 5)
    logit = h2[0:1, :] * w4t[:, 0:1]
    for j in range(1, 5):
        logit = logit + h2[j:j + 1, :] * w4t[:, j:j + 1]
    out_ref[...] = jax.nn.sigmoid(logit + b4_ref[...])           # (1, TB)


def init_params(key):
    ks = jax.random.split(key, 10)

    def linear(kw, kb, fan_in, fan_out):
        bound = 1.0 / math.sqrt(fan_in)
        w = jax.random.uniform(kw, (fan_in, fan_out), jnp.float32, -bound, bound)
        b = jax.random.uniform(kb, (1, fan_out), jnp.float32, -bound, bound)
        return w, b

    champ_emb = jax.random.normal(ks[0], (NUM_CHAMPS + 1, CHAMP_EMB), jnp.float32)
    role_emb = jax.random.normal(ks[1], (NUM_ROLES + 1, ROLE_EMB), jnp.float32)
    w1, b1 = linear(ks[2], ks[3], CHAMP_EMB + ROLE_EMB, HALF_IN)
    w2, b2 = linear(ks[4], ks[5], HALF_IN, PHI_OUT)
    w3, b3 = linear(ks[6], ks[7], PHI_OUT * 2, 5)
    w4, b4 = linear(ks[8], ks[9], 5, 1)
    return dict(champ_emb=champ_emb, role_emb=role_emb,
                w1=w1, b1=b1, w2=w2, b2=b2, w3=w3, b3=b3, w4=w4, b4=b4)


def _fuse_params(p):
    hi = jax.lax.Precision.HIGHEST
    # E1 = block_diag(champ_emb, role_emb) @ w1  -> (170, 17)
    e1 = jnp.concatenate(
        [jnp.dot(p["champ_emb"], p["w1"][:CHAMP_EMB], precision=hi),
         jnp.dot(p["role_emb"], p["w1"][CHAMP_EMB:], precision=hi)], axis=0)
    w3b = p["w3"][:PHI_OUT]                       # (10, 5)
    w3r = p["w3"][PHI_OUT:]
    w23b = jnp.dot(p["w2"], w3b, precision=hi)    # (17, 5)  w2 folded into w3
    w23r = jnp.dot(p["w2"], w3r, precision=hi)
    # Team-sum of (phi + b2) over 5 members adds exactly 5*b2 -> fold into b3.
    b3p = p["b3"] + 5.0 * jnp.dot(p["b2"], w3b + w3r, precision=hi)   # (1, 5)
    return (e1.T, p["b1"].T,                      # (17,170), (17,1)
            w23b.T, w23r.T, b3p.T,                # (5,17), (5,17), (5,1)
            p["w4"].T, p["b4"])                   # (1,5), (1,1)


def _const_spec(arr):
    nd = arr.ndim
    return pl.BlockSpec(arr.shape, lambda i, _nd=nd: (0,) * _nd)


def _choose_tile(B, tb_max):
    """Games-per-tile (lane dim) and padded batch.

    Tiles are multiples of 128 (lane-dense blocks, satisfies the 128-lane
    block constraint) and there are >= 2 grid steps whenever B > 128 so the
    'parallel' axis can use both v7x TensorCores.
    """
    if B <= 128:
        tb = _round_up(max(B, 1), 8)          # single tile == full padded batch
        return tb, tb
    cap = max(128, _round_up(tb_max, 128))
    ntiles = max(2, pl.cdiv(B, cap))
    tb = min(cap, _round_up(pl.cdiv(B, ntiles), 128))
    return tb, _round_up(B, tb)


def deepset_forward(X, p, tb_max=512):
    """X: (B, 20) int32 (cols 0-9 champion ids, cols 10-19 role ids)."""
    B = X.shape[0]
    TB, Bp = _choose_tile(B, tb_max)

    Xp = jnp.pad(X.astype(jnp.int32), ((0, Bp - B), (0, 0)))
    idx = Xp.T                                   # (20, Bp), lane-dense tiles

    weights = _fuse_params(p)

    in_specs = [pl.BlockSpec((20, TB), lambda i: (0, i))]
    in_specs += [_const_spec(w) for w in weights]
    out_specs = pl.BlockSpec((1, TB), lambda i: (0, i))

    out = pl.pallas_call(
        deepset_kernel,
        out_shape=jax.ShapeDtypeStruct((1, Bp), jnp.float32),
        grid=(Bp // TB,),
        in_specs=in_specs,
        out_specs=out_specs,
        compiler_params=pltpu.CompilerParams(dimension_semantics=("parallel",)),
    )(idx, *weights)
    return out[0, :B].reshape(B, 1)


def reference_forward(X, p):
    champs = X[:, :10]
    roles = X[:, 10:]
    ce = p["champ_emb"][champs]                          # (B, 10, 32)
    re = p["role_emb"][roles]                            # (B, 10, 3)
    comb = jnp.concatenate([ce, re], axis=2)             # (B, 10, 35)
    h1 = jax.nn.sigmoid(comb @ p["w1"] + p["b1"][0])
    phi = h1 @ p["w2"] + p["b2"][0]                      # (B, 10, 10)
    blue = phi[:, :5].sum(axis=1)
    red = phi[:, 5:].sum(axis=1)
    agg = jnp.concatenate([blue, red], axis=1)           # (B, 20)
    h2 = jnp.maximum(agg @ p["w3"] + p["b3"][0], 0.0)
    return jax.nn.sigmoid(h2 @ p["w4"] + p["b4"][0])     # (B, 1)


if __name__ == "__main__":
    key = jax.random.PRNGKey(0)
    kp, kc, kr = jax.random.split(key, 3)
    params = init_params(kp)

    # Small deterministic batch (B=8 -> single grid step, TB == Bp == 8).
    B = 8
    champions = jax.random.randint(kc, (B, 10), 1, NUM_CHAMPS + 1, dtype=jnp.int32)
    roles = jax.random.randint(kr, (B, 10), 1, NUM_ROLES + 1, dtype=jnp.int32)
    X = jnp.concatenate([champions, roles], axis=1)      # (B, 20) int32

    out = jax.block_until_ready(deepset_forward(X, params))
    ref = reference_forward(X, params)
    assert out.shape == (B, 1)
    assert jnp.allclose(out, ref, atol=1e-4, rtol=1e-4), (out, ref)

    # Multi-tile + padding path: B=300, tb_max=128 -> TB=128, Bp=384, 3 tiles.
    kc2, kr2 = jax.random.split(jax.random.PRNGKey(1), 2)
    B2 = 300
    X2 = jnp.concatenate(
        [jax.random.randint(kc2, (B2, 10), 1, NUM_CHAMPS + 1, dtype=jnp.int32),
         jax.random.randint(kr2, (B2, 10), 1, NUM_ROLES + 1, dtype=jnp.int32)],
        axis=1)
    out2 = jax.block_until_ready(deepset_forward(X2, params, tb_max=128))
    ref2 = reference_forward(X2, params)
    assert out2.shape == (B2, 1)
    assert jnp.allclose(out2, ref2, atol=1e-4, rtol=1e-4), (out2, ref2)

    print("KERNEL_OK")
</pallas_src>

<mosaic_0001>
module attributes {stable_mosaic.version = 11 : i64} {
  func.func @deepset_kernel(%arg0: i32, %arg1: memref<20x8xi32, #tpu.memory_space<vmem>>, %arg2: memref<17x170xf32, #tpu.memory_space<vmem>>, %arg3: memref<17x1xf32, #tpu.memory_space<vmem>>, %arg4: memref<5x17xf32, #tpu.memory_space<vmem>>, %arg5: memref<5x17xf32, #tpu.memory_space<vmem>>, %arg6: memref<5x1xf32, #tpu.memory_space<vmem>>, %arg7: memref<1x5xf32, #tpu.memory_space<vmem>>, %arg8: memref<1x1xf32, #tpu.memory_space<vmem>>, %arg9: memref<1x8xf32, #tpu.memory_space<vmem>>) attributes {dimension_semantics = [#tpu.dimension_semantics<parallel>], iteration_bounds = array<i64: 1>, scalar_prefetch = 0 : i64, scratch_operands = 0 : i64, tpu.core_type = #tpu.core_type<tc>, window_params = [{transform_indices = @transform_0, window_bounds = array<i64: 20, 8>}, {pipeline_mode = #tpu.pipeline_mode<synchronous>, transform_indices = @transform_1, window_bounds = array<i64: 17, 170>}, {pipeline_mode = #tpu.pipeline_mode<synchronous>, transform_indices = @transform_2, window_bounds = array<i64: 17, 1>}, {pipeline_mode = #tpu.pipeline_mode<synchronous>, transform_indices = @transform_3, window_bounds = array<i64: 5, 17>}, {pipeline_mode = #tpu.pipeline_mode<synchronous>, transform_indices = @transform_4, window_bounds = array<i64: 5, 17>}, {pipeline_mode = #tpu.pipeline_mode<synchronous>, transform_indices = @transform_5, window_bounds = array<i64: 5, 1>}, {pipeline_mode = #tpu.pipeline_mode<synchronous>, transform_indices = @transform_6, window_bounds = array<i64: 1, 5>}, {pipeline_mode = #tpu.pipeline_mode<synchronous>, transform_indices = @transform_7, window_bounds = array<i64: 1, 1>}, {transform_indices = @transform_8, window_bounds = array<i64: 1, 8>}]} {
    %c0 = arith.constant 0 : index
    %c0_0 = arith.constant 0 : index
    %0 = vector.load %arg2[%c0, %c0_0] : memref<17x170xf32, #tpu.memory_space<vmem>>, vector<17x170xf32>
    %c0_1 = arith.constant 0 : index
    %c0_2 = arith.constant 0 : index
    %1 = vector.load %arg3[%c0_1, %c0_2] : memref<17x1xf32, #tpu.memory_space<vmem>>, vector<17x1xf32>
    %2 = tpu.iota {dimensions = array<i32: 0>} : vector<170x8xi32>
    %c0_3 = arith.constant 0 : index
    %c0_4 = arith.constant 0 : index
    %3 = vector.load %arg1[%c0_3, %c0_4] : memref<20x8xi32, #tpu.memory_space<vmem>>, vector<1x8xi32>
    %c10 = arith.constant 10 : index
    %c0_5 = arith.constant 0 : index
    %4 = vector.load %arg1[%c10, %c0_5] : memref<20x8xi32, #tpu.memory_space<vmem>>, vector<1x8xi32>
    %5 = vector.broadcast %3 : vector<1x8xi32> to vector<170x8xi32>
    %6 = arith.cmpi eq, %2, %5 : vector<170x8xi32>
    %c164_i32 = arith.constant 164 : i32
    %7 = vector.broadcast %c164_i32 : i32 to vector<1x8xi32>
    %8 = arith.addi %4, %7 : vector<1x8xi32>
    %9 = vector.broadcast %8 : vector<1x8xi32> to vector<170x8xi32>
    %10 = arith.cmpi eq, %2, %9 : vector<170x8xi32>
    %11 = arith.ori %6, %10 : vector<170x8xi1>
    %12 = arith.extui %11 : vector<170x8xi1> to vector<170x8xi32>
    %13 = arith.sitofp %12 : vector<170x8xi32> to vector<170x8xf32>
    %cst = arith.constant dense<0.000000e+00> : vector<17x8xf32>
    %14 = tpu.matmul %0, %13, %cst {dimension_numbers = #tpu.dot_dimension_numbers<[1], [0], [0], [1], [0, 0, 1, 1], [], []>, precision = #tpu.contract_precision<fp32>} : vector<17x170xf32>, vector<170x8xf32>, vector<17x8xf32> -> vector<17x8xf32>
    %15 = vector.broadcast %1 : vector<17x1xf32> to vector<17x8xf32>
    %16 = arith.addf %14, %15 : vector<17x8xf32>
    %17 = arith.negf %16 : vector<17x8xf32>
    %18 = math.exp %17 : vector<17x8xf32>
    %cst_6 = arith.constant 1.000000e+00 : f32
    %19 = vector.broadcast %cst_6 : f32 to vector<17x8xf32>
    %20 = arith.addf %19, %18 : vector<17x8xf32>
    %21 = arith.divf %19, %20 : vector<17x8xf32>
    %c1 = arith.constant 1 : index
    %c0_7 = arith.constant 0 : index
    %22 = vector.load %arg1[%c1, %c0_7] : memref<20x8xi32, #tpu.memory_space<vmem>>, vector<1x8xi32>
    %c11 = arith.constant 11 : index
    %c0_8 = arith.constant 0 : index
    %23 = vector.load %arg1[%c11, %c0_8] : memref<20x8xi32, #tpu.memory_space<vmem>>, vector<1x8xi32>
    %24 = vector.broadcast %22 : vector<1x8xi32> to vector<170x8xi32>
    %25 = arith.cmpi eq, %2, %24 : vector<170x8xi32>
    %c164_i32_9 = arith.constant 164 : i32
    %26 = vector.broadcast %c164_i32_9 : i32 to vector<1x8xi32>
    %27 = arith.addi %23, %26 : vector<1x8xi32>
    %28 = vector.broadcast %27 : vector<1x8xi32> to vector<170x8xi32>
    %29 = arith.cmpi eq, %2, %28 : vector<170x8xi32>
    %30 = arith.ori %25, %29 : vector<170x8xi1>
    %31 = arith.extui %30 : vector<170x8xi1> to vector<170x8xi32>
    %32 = arith.sitofp %31 : vector<170x8xi32> to vector<170x8xf32>
    %cst_10 = arith.constant dense<0.000000e+00> : vector<17x8xf32>
    %33 = tpu.matmul %0, %32, %cst_10 {dimension_numbers = #tpu.dot_dimension_numbers<[1], [0], [0], [1], [0, 0, 1, 1], [], []>, precision = #tpu.contract_precision<fp32>} : vector<17x170xf32>, vector<170x8xf32>, vector<17x8xf32> -> vector<17x8xf32>
    %34 = vector.broadcast %1 : vector<17x1xf32> to vector<17x8xf32>
    %35 = arith.addf %33, %34 : vector<17x8xf32>
    %36 = arith.negf %35 : vector<17x8xf32>
    %37 = math.exp %36 : vector<17x8xf32>
    %cst_11 = arith.constant 1.000000e+00 : f32
    %38 = vector.broadcast %cst_11 : f32 to vector<17x8xf32>
    %39 = arith.addf %38, %37 : vector<17x8xf32>
    %40 = arith.divf %38, %39 : vector<17x8xf32>
    %41 = arith.addf %21, %40 : vector<17x8xf32>
    %c2 = arith.constant 2 : index
    %c0_12 = arith.constant 0 : index
    %42 = vector.load %arg1[%c2, %c0_12] : memref<20x8xi32, #tpu.memory_space<vmem>>, vector<1x8xi32>
    %c12 = arith.constant 12 : index
    %c0_13 = arith.constant 0 : index
    %43 = vector.load %arg1[%c12, %c0_13] : memref<20x8xi32, #tpu.memory_space<vmem>>, vector<1x8xi32>
    %44 = vector.broadcast %42 : vector<1x8xi32> to vector<170x8xi32>
    %45 = arith.cmpi eq, %2, %44 : vector<170x8xi32>
    %c164_i32_14 = arith.constant 164 : i32
    %46 = vector.broadcast %c164_i32_14 : i32 to vector<1x8xi32>
    %47 = arith.addi %43, %46 : vector<1x8xi32>
    %48 = vector.broadcast %47 : vector<1x8xi32> to vector<170x8xi32>
    %49 = arith.cmpi eq, %2, %48 : vector<170x8xi32>
    %50 = arith.ori %45, %49 : vector<170x8xi1>
    %51 = arith.extui %50 : vector<170x8xi1> to vector<170x8xi32>
    %52 = arith.sitofp %51 : vector<170x8xi32> to vector<170x8xf32>
    %cst_15 = arith.constant dense<0.000000e+00> : vector<17x8xf32>
    %53 = tpu.matmul %0, %52, %cst_15 {dimension_numbers = #tpu.dot_dimension_numbers<[1], [0], [0], [1], [0, 0, 1, 1], [], []>, precision = #tpu.contract_precision<fp32>} : vector<17x170xf32>, vector<170x8xf32>, vector<17x8xf32> -> vector<17x8xf32>
    %54 = vector.broadcast %1 : vector<17x1xf32> to vector<17x8xf32>
    %55 = arith.addf %53, %54 : vector<17x8xf32>
    %56 = arith.negf %55 : vector<17x8xf32>
    %57 = math.exp %56 : vector<17x8xf32>
    %cst_16 = arith.constant 1.000000e+00 : f32
    %58 = vector.broadcast %cst_16 : f32 to vector<17x8xf32>
    %59 = arith.addf %58, %57 : vector<17x8xf32>
    %60 = arith.divf %58, %59 : vector<17x8xf32>
    %61 = arith.addf %41, %60 : vector<17x8xf32>
    %c3 = arith.constant 3 : index
    %c0_17 = arith.constant 0 : index
    %62 = vector.load %arg1[%c3, %c0_17] : memref<20x8xi32, #tpu.memory_space<vmem>>, vector<1x8xi32>
    %c13 = arith.constant 13 : index
    %c0_18 = arith.constant 0 : index
    %63 = vector.load %arg1[%c13, %c0_18] : memref<20x8xi32, #tpu.memory_space<vmem>>, vector<1x8xi32>
    %64 = vector.broadcast %62 : vector<1x8xi32> to vector<170x8xi32>
    %65 = arith.cmpi eq, %2, %64 : vector<170x8xi32>
    %c164_i32_19 = arith.constant 164 : i32
    %66 = vector.broadcast %c164_i32_19 : i32 to vector<1x8xi32>
    %67 = arith.addi %63, %66 : vector<1x8xi32>
    %68 = vector.broadcast %67 : vector<1x8xi32> to vector<170x8xi32>
    %69 = arith.cmpi eq, %2, %68 : vector<170x8xi32>
    %70 = arith.ori %65, %69 : vector<170x8xi1>
    %71 = arith.extui %70 : vector<170x8xi1> to vector<170x8xi32>
    %72 = arith.sitofp %71 : vector<170x8xi32> to vector<170x8xf32>
    %cst_20 = arith.constant dense<0.000000e+00> : vector<17x8xf32>
    %73 = tpu.matmul %0, %72, %cst_20 {dimension_numbers = #tpu.dot_dimension_numbers<[1], [0], [0], [1], [0, 0, 1, 1], [], []>, precision = #tpu.contract_precision<fp32>} : vector<17x170xf32>, vector<170x8xf32>, vector<17x8xf32> -> vector<17x8xf32>
    %74 = vector.broadcast %1 : vector<17x1xf32> to vector<17x8xf32>
    %75 = arith.addf %73, %74 : vector<17x8xf32>
    %76 = arith.negf %75 : vector<17x8xf32>
    %77 = math.exp %76 : vector<17x8xf32>
    %cst_21 = arith.constant 1.000000e+00 : f32
    %78 = vector.broadcast %cst_21 : f32 to vector<17x8xf32>
    %79 = arith.addf %78, %77 : vector<17x8xf32>
    %80 = arith.divf %78, %79 : vector<17x8xf32>
    %81 = arith.addf %61, %80 : vector<17x8xf32>
    %c4 = arith.constant 4 : index
    %c0_22 = arith.constant 0 : index
    %82 = vector.load %arg1[%c4, %c0_22] : memref<20x8xi32, #tpu.memory_space<vmem>>, vector<1x8xi32>
    %c14 = arith.constant 14 : index
    %c0_23 = arith.constant 0 : index
    %83 = vector.load %arg1[%c14, %c0_23] : memref<20x8xi32, #tpu.memory_space<vmem>>, vector<1x8xi32>
    %84 = vector.broadcast %82 : vector<1x8xi32> to vector<170x8xi32>
    %85 = arith.cmpi eq, %2, %84 : vector<170x8xi32>
    %c164_i32_24 = arith.constant 164 : i32
    %86 = vector.broadcast %c164_i32_24 : i32 to vector<1x8xi32>
    %87 = arith.addi %83, %86 : vector<1x8xi32>
    %88 = vector.broadcast %87 : vector<1x8xi32> to vector<170x8xi32>
    %89 = arith.cmpi eq, %2, %88 : vector<170x8xi32>
    %90 = arith.ori %85, %89 : vector<170x8xi1>
    %91 = arith.extui %90 : vector<170x8xi1> to vector<170x8xi32>
    %92 = arith.sitofp %91 : vector<170x8xi32> to vector<170x8xf32>
    %cst_25 = arith.constant dense<0.000000e+00> : vector<17x8xf32>
    %93 = tpu.matmul %0, %92, %cst_25 {dimension_numbers = #tpu.dot_dimension_numbers<[1], [0], [0], [1], [0, 0, 1, 1], [], []>, precision = #tpu.contract_precision<fp32>} : vector<17x170xf32>, vector<170x8xf32>, vector<17x8xf32> -> vector<17x8xf32>
    %94 = vector.broadcast %1 : vector<17x1xf32> to vector<17x8xf32>
    %95 = arith.addf %93, %94 : vector<17x8xf32>
    %96 = arith.negf %95 : vector<17x8xf32>
    %97 = math.exp %96 : vector<17x8xf32>
    %cst_26 = arith.constant 1.000000e+00 : f32
    %98 = vector.broadcast %cst_26 : f32 to vector<17x8xf32>
    %99 = arith.addf %98, %97 : vector<17x8xf32>
    %100 = arith.divf %98, %99 : vector<17x8xf32>
    %101 = arith.addf %81, %100 : vector<17x8xf32>
    %c5 = arith.constant 5 : index
    %c0_27 = arith.constant 0 : index
    %102 = vector.load %arg1[%c5, %c0_27] : memref<20x8xi32, #tpu.memory_space<vmem>>, vector<1x8xi32>
    %c15 = arith.constant 15 : index
    %c0_28 = arith.constant 0 : index
    %103 = vector.load %arg1[%c15, %c0_28] : memref<20x8xi32, #tpu.memory_space<vmem>>, vector<1x8xi32>
    %104 = vector.broadcast %102 : vector<1x8xi32> to vector<170x8xi32>
    %105 = arith.cmpi eq, %2, %104 : vector<170x8xi32>
    %c164_i32_29 = arith.constant 164 : i32
    %106 = vector.broadcast %c164_i32_29 : i32 to vector<1x8xi32>
    %107 = arith.addi %103, %106 : vector<1x8xi32>
    %108 = vector.broadcast %107 : vector<1x8xi32> to vector<170x8xi32>
    %109 = arith.cmpi eq, %2, %108 : vector<170x8xi32>
    %110 = arith.ori %105, %109 : vector<170x8xi1>
    %111 = arith.extui %110 : vector<170x8xi1> to vector<170x8xi32>
    %112 = arith.sitofp %111 : vector<170x8xi32> to vector<170x8xf32>
    %cst_30 = arith.constant dense<0.000000e+00> : vector<17x8xf32>
    %113 = tpu.matmul %0, %112, %cst_30 {dimension_numbers = #tpu.dot_dimension_numbers<[1], [0], [0], [1], [0, 0, 1, 1], [], []>, precision = #tpu.contract_precision<fp32>} : vector<17x170xf32>, vector<170x8xf32>, vector<17x8xf32> -> vector<17x8xf32>
    %114 = vector.broadcast %1 : vector<17x1xf32> to vector<17x8xf32>
    %115 = arith.addf %113, %114 : vector<17x8xf32>
    %116 = arith.negf %115 : vector<17x8xf32>
    %117 = math.exp %116 : vector<17x8xf32>
    %cst_31 = arith.constant 1.000000e+00 : f32
    %118 = vector.broadcast %cst_31 : f32 to vector<17x8xf32>
    %119 = arith.addf %118, %117 : vector<17x8xf32>
    %120 = arith.divf %118, %119 : vector<17x8xf32>
    %c6 = arith.constant 6 : index
    %c0_32 = arith.constant 0 : index
    %121 = vector.load %arg1[%c6, %c0_32] : memref<20x8xi32, #tpu.memory_space<vmem>>, vector<1x8xi32>
    %c16 = arith.constant 16 : index
    %c0_33 = arith.constant 0 : index
    %122 = vector.load %arg1[%c16, %c0_33] : memref<20x8xi32, #tpu.memory_space<vmem>>, vector<1x8xi32>
    %123 = vector.broadcast %121 : vector<1x8xi32> to vector<170x8xi32>
    %124 = arith.cmpi eq, %2, %123 : vector<170x8xi32>
    %c164_i32_34 = arith.constant 164 : i32
    %125 = vector.broadcast %c164_i32_34 : i32 to vector<1x8xi32>
    %126 = arith.addi %122, %125 : vector<1x8xi32>
    %127 = vector.broadcast %126 : vector<1x8xi32> to vector<170x8xi32>
    %128 = arith.cmpi eq, %2, %127 : vector<170x8xi32>
    %129 = arith.ori %124, %128 : vector<170x8xi1>
    %130 = arith.extui %129 : vector<170x8xi1> to vector<170x8xi32>
    %131 = arith.sitofp %130 : vector<170x8xi32> to vector<170x8xf32>
    %cst_35 = arith.constant dense<0.000000e+00> : vector<17x8xf32>
    %132 = tpu.matmul %0, %131, %cst_35 {dimension_numbers = #tpu.dot_dimension_numbers<[1], [0], [0], [1], [0, 0, 1, 1], [], []>, precision = #tpu.contract_precision<fp32>} : vector<17x170xf32>, vector<170x8xf32>, vector<17x8xf32> -> vector<17x8xf32>
    %133 = vector.broadcast %1 : vector<17x1xf32> to vector<17x8xf32>
    %134 = arith.addf %132, %133 : vector<17x8xf32>
    %135 = arith.negf %134 : vector<17x8xf32>
    %136 = math.exp %135 : vector<17x8xf32>
    %cst_36 = arith.constant 1.000000e+00 : f32
    %137 = vector.broadcast %cst_36 : f32 to vector<17x8xf32>
    %138 = arith.addf %137, %136 : vector<17x8xf32>
    %139 = arith.divf %137, %138 : vector<17x8xf32>
    %140 = arith.addf %120, %139 : vector<17x8xf32>
    %c7 = arith.constant 7 : index
    %c0_37 = arith.constant 0 : index
    %141 = vector.load %arg1[%c7, %c0_37] : memref<20x8xi32, #tpu.memory_space<vmem>>, vector<1x8xi32>
    %c17 = arith.constant 17 : index
    %c0_38 = arith.constant 0 : index
    %142 = vector.load %arg1[%c17, %c0_38] : memref<20x8xi32, #tpu.memory_space<vmem>>, vector<1x8xi32>
    %143 = vector.broadcast %141 : vector<1x8xi32> to vector<170x8xi32>
    %144 = arith.cmpi eq, %2, %143 : vector<170x8xi32>
    %c164_i32_39 = arith.constant 164 : i32
    %145 = vector.broadcast %c164_i32_39 : i32 to vector<1x8xi32>
    %146 = arith.addi %142, %145 : vector<1x8xi32>
    %147 = vector.broadcast %146 : vector<1x8xi32> to vector<170x8xi32>
    %148 = arith.cmpi eq, %2, %147 : vector<170x8xi32>
    %149 = arith.ori %144, %148 : vector<170x8xi1>
    %150 = arith.extui %149 : vector<170x8xi1> to vector<170x8xi32>
    %151 = arith.sitofp %150 : vector<170x8xi32> to vector<170x8xf32>
    %cst_40 = arith.constant dense<0.000000e+00> : vector<17x8xf32>
    %152 = tpu.matmul %0, %151, %cst_40 {dimension_numbers = #tpu.dot_dimension_numbers<[1], [0], [0], [1], [0, 0, 1, 1], [], []>, precision = #tpu.contract_precision<fp32>} : vector<17x170xf32>, vector<170x8xf32>, vector<17x8xf32> -> vector<17x8xf32>
    %153 = vector.broadcast %1 : vector<17x1xf32> to vector<17x8xf32>
    %154 = arith.addf %152, %153 : vector<17x8xf32>
    %155 = arith.negf %154 : vector<17x8xf32>
    %156 = math.exp %155 : vector<17x8xf32>
    %cst_41 = arith.constant 1.000000e+00 : f32
    %157 = vector.broadcast %cst_41 : f32 to vector<17x8xf32>
    %158 = arith.addf %157, %156 : vector<17x8xf32>
    %159 = arith.divf %157, %158 : vector<17x8xf32>
    %160 = arith.addf %140, %159 : vector<17x8xf32>
    %c8 = arith.constant 8 : index
    %c0_42 = arith.constant 0 : index
    %161 = vector.load %arg1[%c8, %c0_42] : memref<20x8xi32, #tpu.memory_space<vmem>>, vector<1x8xi32>
    %c18 = arith.constant 18 : index
    %c0_43 = arith.constant 0 : index
    %162 = vector.load %arg1[%c18, %c0_43] : memref<20x8xi32, #tpu.memory_space<vmem>>, vector<1x8xi32>
    %163 = vector.broadcast %161 : vector<1x8xi32> to vector<170x8xi32>
    %164 = arith.cmpi eq, %2, %163 : vector<170x8xi32>
    %c164_i32_44 = arith.constant 164 : i32
    %165 = vector.broadcast %c164_i32_44 : i32 to vector<1x8xi32>
    %166 = arith.addi %162, %165 : vector<1x8xi32>
    %167 = vector.broadcast %166 : vector<1x8xi32> to vector<170x8xi32>
    %168 = arith.cmpi eq, %2, %167 : vector<170x8xi32>
    %169 = arith.ori %164, %168 : vector<170x8xi1>
    %170 = arith.extui %169 : vector<170x8xi1> to vector<170x8xi32>
    %171 = arith.sitofp %170 : vector<170x8xi32> to vector<170x8xf32>
    %cst_45 = arith.constant dense<0.000000e+00> : vector<17x8xf32>
    %172 = tpu.matmul %0, %171, %cst_45 {dimension_numbers = #tpu.dot_dimension_numbers<[1], [0], [0], [1], [0, 0, 1, 1], [], []>, precision = #tpu.contract_precision<fp32>} : vector<17x170xf32>, vector<170x8xf32>, vector<17x8xf32> -> vector<17x8xf32>
    %173 = vector.broadcast %1 : vector<17x1xf32> to vector<17x8xf32>
    %174 = arith.addf %172, %173 : vector<17x8xf32>
    %175 = arith.negf %174 : vector<17x8xf32>
    %176 = math.exp %175 : vector<17x8xf32>
    %cst_46 = arith.constant 1.000000e+00 : f32
    %177 = vector.broadcast %cst_46 : f32 to vector<17x8xf32>
    %178 = arith.addf %177, %176 : vector<17x8xf32>
    %179 = arith.divf %177, %178 : vector<17x8xf32>
    %180 = arith.addf %160, %179 : vector<17x8xf32>
    %c9 = arith.constant 9 : index
    %c0_47 = arith.constant 0 : index
    %181 = vector.load %arg1[%c9, %c0_47] : memref<20x8xi32, #tpu.memory_space<vmem>>, vector<1x8xi32>
    %c19 = arith.constant 19 : index
    %c0_48 = arith.constant 0 : index
    %182 = vector.load %arg1[%c19, %c0_48] : memref<20x8xi32, #tpu.memory_space<vmem>>, vector<1x8xi32>
    %183 = vector.broadcast %181 : vector<1x8xi32> to vector<170x8xi32>
    %184 = arith.cmpi eq, %2, %183 : vector<170x8xi32>
    %c164_i32_49 = arith.constant 164 : i32
    %185 = vector.broadcast %c164_i32_49 : i32 to vector<1x8xi32>
    %186 = arith.addi %182, %185 : vector<1x8xi32>
    %187 = vector.broadcast %186 : vector<1x8xi32> to vector<170x8xi32>
    %188 = arith.cmpi eq, %2, %187 : vector<170x8xi32>
    %189 = arith.ori %184, %188 : vector<170x8xi1>
    %190 = arith.extui %189 : vector<170x8xi1> to vector<170x8xi32>
    %191 = arith.sitofp %190 : vector<170x8xi32> to vector<170x8xf32>
    %cst_50 = arith.constant dense<0.000000e+00> : vector<17x8xf32>
    %192 = tpu.matmul %0, %191, %cst_50 {dimension_numbers = #tpu.dot_dimension_numbers<[1], [0], [0], [1], [0, 0, 1, 1], [], []>, precision = #tpu.contract_precision<fp32>} : vector<17x170xf32>, vector<170x8xf32>, vector<17x8xf32> -> vector<17x8xf32>
    %193 = vector.broadcast %1 : vector<17x1xf32> to vector<17x8xf32>
    %194 = arith.addf %192, %193 : vector<17x8xf32>
    %195 = arith.negf %194 : vector<17x8xf32>
    %196 = math.exp %195 : vector<17x8xf32>
    %cst_51 = arith.constant 1.000000e+00 : f32
    %197 = vector.broadcast %cst_51 : f32 to vector<17x8xf32>
    %198 = arith.addf %197, %196 : vector<17x8xf32>
    %199 = arith.divf %197, %198 : vector<17x8xf32>
    %200 = arith.addf %180, %199 : vector<17x8xf32>
    %c0_52 = arith.constant 0 : index
    %c0_53 = arith.constant 0 : index
    %201 = vector.load %arg4[%c0_52, %c0_53] : memref<5x17xf32, #tpu.memory_space<vmem>>, vector<5x17xf32>
    %cst_54 = arith.constant dense<0.000000e+00> : vector<5x8xf32>
    %202 = tpu.matmul %201, %101, %cst_54 {dimension_numbers = #tpu.dot_dimension_numbers<[1], [0], [0], [1], [0, 0, 1, 1], [], []>, precision = #tpu.contract_precision<fp32>} : vector<5x17xf32>, vector<17x8xf32>, vector<5x8xf32> -> vector<5x8xf32>
    %c0_55 = arith.constant 0 : index
    %c0_56 = arith.constant 0 : index
    %203 = vector.load %arg5[%c0_55, %c0_56] : memref<5x17xf32, #tpu.memory_space<vmem>>, vector<5x17xf32>
    %cst_57 = arith.constant dense<0.000000e+00> : vector<5x8xf32>
    %204 = tpu.matmul %203, %200, %cst_57 {dimension_numbers = #tpu.dot_dimension_numbers<[1], [0], [0], [1], [0, 0, 1, 1], [], []>, precision = #tpu.contract_precision<fp32>} : vector<5x17xf32>, vector<17x8xf32>, vector<5x8xf32> -> vector<5x8xf32>
    %205 = arith.addf %202, %204 : vector<5x8xf32>
    %c0_58 = arith.constant 0 : index
    %c0_59 = arith.constant 0 : index
    %206 = vector.load %arg6[%c0_58, %c0_59] : memref<5x1xf32, #tpu.memory_space<vmem>>, vector<5x1xf32>
    %207 = vector.broadcast %206 : vector<5x1xf32> to vector<5x8xf32>
    %208 = arith.addf %205, %207 : vector<5x8xf32>
    %cst_60 = arith.constant 0.000000e+00 : f32
    %209 = vector.broadcast %cst_60 : f32 to vector<5x8xf32>
    %210 = arith.maximumf %208, %209 : vector<5x8xf32>
    %c0_61 = arith.constant 0 : index
    %c0_62 = arith.constant 0 : index
    %211 = vector.load %arg7[%c0_61, %c0_62] : memref<1x5xf32, #tpu.memory_space<vmem>>, vector<1x5xf32>
    %212 = vector.extract_strided_slice %210 {offsets = [0, 0], sizes = [1, 8], strides = [1, 1]} : vector<5x8xf32> to vector<1x8xf32>
    %213 = vector.extract_strided_slice %211 {offsets = [0, 0], sizes = [1, 1], strides = [1, 1]} : vector<1x5xf32> to vector<1x1xf32>
    %214 = vector.broadcast %213 : vector<1x1xf32> to vector<1x8xf32>
    %215 = arith.mulf %212, %214 : vector<1x8xf32>
    %216 = vector.extract_strided_slice %210 {offsets = [1, 0], sizes = [1, 8], strides = [1, 1]} : vector<5x8xf32> to vector<1x8xf32>
    %217 = vector.extract_strided_slice %211 {offsets = [0, 1], sizes = [1, 1], strides = [1, 1]} : vector<1x5xf32> to vector<1x1xf32>
    %218 = vector.broadcast %217 : vector<1x1xf32> to vector<1x8xf32>
    %219 = arith.mulf %216, %218 : vector<1x8xf32>
    %220 = arith.addf %215, %219 : vector<1x8xf32>
    %221 = vector.extract_strided_slice %210 {offsets = [2, 0], sizes = [1, 8], strides = [1, 1]} : vector<5x8xf32> to vector<1x8xf32>
    %222 = vector.extract_strided_slice %211 {offsets = [0, 2], sizes = [1, 1], strides = [1, 1]} : vector<1x5xf32> to vector<1x1xf32>
    %223 = vector.broadcast %222 : vector<1x1xf32> to vector<1x8xf32>
    %224 = arith.mulf %221, %223 : vector<1x8xf32>
    %225 = arith.addf %220, %224 : vector<1x8xf32>
    %226 = vector.extract_strided_slice %210 {offsets = [3, 0], sizes = [1, 8], strides = [1, 1]} : vector<5x8xf32> to vector<1x8xf32>
    %227 = vector.extract_strided_slice %211 {offsets = [0, 3], sizes = [1, 1], strides = [1, 1]} : vector<1x5xf32> to vector<1x1xf32>
    %228 = vector.broadcast %227 : vector<1x1xf32> to vector<1x8xf32>
    %229 = arith.mulf %226, %228 : vector<1x8xf32>
    %230 = arith.addf %225, %229 : vector<1x8xf32>
    %231 = vector.extract_strided_slice %210 {offsets = [4, 0], sizes = [1, 8], strides = [1, 1]} : vector<5x8xf32> to vector<1x8xf32>
    %232 = vector.extract_strided_slice %211 {offsets = [0, 4], sizes = [1, 1], strides = [1, 1]} : vector<1x5xf32> to vector<1x1xf32>
    %233 = vector.broadcast %232 : vector<1x1xf32> to vector<1x8xf32>
    %234 = arith.mulf %231, %233 : vector<1x8xf32>
    %235 = arith.addf %230, %234 : vector<1x8xf32>
    %c0_63 = arith.constant 0 : index
    %c0_64 = arith.constant 0 : index
    %236 = vector.load %arg8[%c0_63, %c0_64] : memref<1x1xf32, #tpu.memory_space<vmem>>, vector<1x1xf32>
    %237 = vector.broadcast %236 : vector<1x1xf32> to vector<1x8xf32>
    %238 = arith.addf %235, %237 : vector<1x8xf32>
    %239 = arith.negf %238 : vector<1x8xf32>
    %240 = math.exp %239 : vector<1x8xf32>
    %cst_65 = arith.constant 1.000000e+00 : f32
    %241 = vector.broadcast %cst_65 : f32 to vector<1x8xf32>
    %242 = arith.addf %241, %240 : vector<1x8xf32>
    %243 = arith.divf %241, %242 : vector<1x8xf32>
    %c0_66 = arith.constant 0 : index
    %c0_67 = arith.constant 0 : index
    %244 = vector.load %arg9[%c0_66, %c0_67] : memref<1x8xf32, #tpu.memory_space<vmem>>, vector<1x8xf32>
    tpu.vector_store %arg9[%c0_66, %c0_67], %243 {strides = array<i32>} : memref<1x8xf32, #tpu.memory_space<vmem>>, vector<1x8xf32>,
    return
  }
  func.func @transform_0(%arg0: i32) -> (i32, i32) {
    %c0_i32 = arith.constant 0 : i32
    %c0_i32_0 = arith.constant 0 : i32
    return %c0_i32, %arg0 : i32, i32
  }
  func.func @transform_1(%arg0: i32) -> (i32, i32) {
    %c0_i32 = arith.constant 0 : i32
    %c0_i32_0 = arith.constant 0 : i32
    %c0_i32_1 = arith.constant 0 : i32
    return %c0_i32, %c0_i32_0 : i32, i32
  }
  func.func @transform_2(%arg0: i32) -> (i32, i32) {
    %c0_i32 = arith.constant 0 : i32
    %c0_i32_0 = arith.constant 0 : i32
    %c0_i32_1 = arith.constant 0 : i32
    return %c0_i32, %c0_i32_0 : i32, i32
  }
  func.func @transform_3(%arg0: i32) -> (i32, i32) {
    %c0_i32 = arith.constant 0 : i32
    %c0_i32_0 = arith.constant 0 : i32
    %c0_i32_1 = arith.constant 0 : i32
    return %c0_i32, %c0_i32_0 : i32, i32
  }
  func.func @transform_4(%arg0: i32) -> (i32, i32) {
    %c0_i32 = arith.constant 0 : i32
    %c0_i32_0 = arith.constant 0 : i32
    %c0_i32_1 = arith.constant 0 : i32
    return %c0_i32, %c0_i32_0 : i32, i32
  }
  func.func @transform_5(%arg0: i32) -> (i32, i32) {
    %c0_i32 = arith.constant 0 : i32
    %c0_i32_0 = arith.constant 0 : i32
    %c0_i32_1 = arith.constant 0 : i32
    return %c0_i32, %c0_i32_0 : i32, i32
  }
  func.func @transform_6(%arg0: i32) -> (i32, i32) {
    %c0_i32 = arith.constant 0 : i32
    %c0_i32_0 = arith.constant 0 : i32
    %c0_i32_1 = arith.constant 0 : i32
    return %c0_i32, %c0_i32_0 : i32, i32
  }
  func.func @transform_7(%arg0: i32) -> (i32, i32) {
    %c0_i32 = arith.constant 0 : i32
    %c0_i32_0 = arith.constant 0 : i32
    %c0_i32_1 = arith.constant 0 : i32
    return %c0_i32, %c0_i32_0 : i32, i32
  }
  func.func @transform_8(%arg0: i32) -> (i32, i32) {
    %c0_i32 = arith.constant 0 : i32
    %c0_i32_0 = arith.constant 0 : i32
    return %c0_i32, %arg0 : i32, i32
  }
}

</mosaic_0001>

<bundles_post_ra>
// kernel: tpu_custom_call.1
= control target key start
LH: loop header
LB: loop body
LE: loop exit
PB: predicated region body
PF: predicated region fallthrough
CT: control target
= control target key end

     0   :  { %s23529_s0 = inlined_call_operand.vmem [shape: s32[20,8], index: 0, kind: input, shape index: {}]   ;;  %s23530_s1 = inlined_call_operand.vmem [shape: f32[17,170], index: 1, kind: input, shape index: {}]   ;;  %s23531_s2 = inlined_call_operand.vmem [shape: f32[17,1], index: 2, kind: input, shape index: {}]   ;;  %s23532_s3 = inlined_call_operand.vmem [shape: f32[5,17], index: 3, kind: input, shape index: {}]   ;;  %s23533_s4 = inlined_call_operand.vmem [shape: f32[5,17], index: 4, kind: input, shape index: {}]   ;;  %s23534_s5 = inlined_call_operand.vmem [shape: f32[5,1], index: 5, kind: input, shape index: {}]   ;;  %s23535_s6 = inlined_call_operand.vmem [shape: f32[1,5], index: 6, kind: input, shape index: {}]   ;;  %s23536_s7 = inlined_call_operand.<no memory space> [shape: f32[1,1], index: 7, kind: input, shape index: {}]   ;;  %s23537_s8 = inlined_call_operand.hbm [shape: f32[1,8], index: 8, kind: output, shape index: {}]  }
   0x1   :  { %v13_v0 = vstv %s23536_s7 }
   0x2   :  { %14 = vst [vmem:[#allocation2] sm:$0x1] %v13_v0 }
   0x3   :  { %v41_v1 = vlaneseq  ;;  %v65_v2 = vld [vmem:[%s23529_s0 + $0xa] sm:$0x1]  ;;  %v23552_v3 = vmov 0.0|0.0   ;;  %v1077_v6 = vld [vmem:[%s23529_s0 + $0xb] sm:$0x1] }
   0x4   :  { %12115 = vmatprep.subr.bf16.mxu0 %v23552_v3  ;;  %12316 = vmatprep.subr.bf16.mxu1 %v23552_v3  ;;  %v92_v5 = vadd.s32 164, %v65_v2  ;;  %v14730_v7 = vld [vmem:[%s23529_s0] ss:$0 sm:$0xff]  ;;  %v1104_v8 = vadd.s32 164, %v1077_v6 }
   0x5   :  { %v14722_v4 = vshrl.u32 %v41_v1, 7 }
   0x7   :  { %24375 = vst [vmem:[#allocation6_spill] sm:$0xff] %v14722_v4  ;;  %v14733_v9 = vadd.s32 8, %v14722_v4  ;;  %v14736_v10 = vsub.s32 0, %v14722_v4 }
   0x9   :  { %24376 = vst [vmem:[#allocation7_spill] sm:$0xff] %v14733_v9  ;;  %24377 = vst [vmem:[#allocation8_spill] sm:$0xff] %v14736_v10 }
   0xa   :  { %15 = vsyncpa [#allocation4], 0  ;;  %vm70_vm0 = vcmp.eq.s32.totalorder %v14722_v4, %v14730_v7  ;;  %v14741_v11 = vrot.slane %v92_v5, %v14736_v10  ;;  %v14746_v12 = vld [vmem:[%s23529_s0 + $0x1] ss:$0 sm:$0xff]  ;;  %v14749_v13 = vrot.slane %v1104_v8, %v14736_v10  ;;  %vm71_vm1 = vcmp.eq.s32.totalorder %v14733_v9, %v14730_v7  ;;  %v33_v41 = vld [vmem:[%s23530_s1 + $0x8] sm:$0xff] }
   0xb   :  { %v14758_v14 = vadd.s32 16, %v14722_v4  ;;  %vm1082_vm5 = vcmp.eq.s32.totalorder %v14722_v4, %v14746_v12  ;;  %v14765_v15 = vadd.s32 24, %v14722_v4  ;;  %vm1083_vm8 = vcmp.eq.s32.totalorder %v14733_v9, %v14746_v12 }
   0xc   :  { %vm97_vm2 = vcmp.eq.s32.totalorder %v14722_v4, %v14741_v11  ;;  %vm98_vm3 = vcmp.eq.s32.totalorder %v14733_v9, %v14741_v11  ;;  %vm1109_vm6 = vcmp.eq.s32.totalorder %v14722_v4, %v14749_v13  ;;  %vm1110_vm9 = vcmp.eq.s32.totalorder %v14733_v9, %v14749_v13 }
   0xd   :  { %24378 = vst [vmem:[#allocation9_spill] sm:$0xff] %v14758_v14  ;;  %vm119_vm4 = vmor %vm70_vm0, %vm97_vm2  ;;  %v23568_v16 = vmov 0.0   ;;  %v24380_v19 = vmov 0  ;;  %v23554_v20 = vmov 1.0|1.0   ;;  %vm72_vm12 = vcmp.eq.s32.totalorder %v14758_v14, %v14730_v7 }
   0xe   :  { %24379 = vst [vmem:[#allocation10_spill] sm:$0xff] %v14765_v15  ;;  %vm120_vm7 = vmor %vm71_vm1, %vm98_vm3  ;;  %v11039_v17 = vsel %vm119_vm4, 1.0, %v23568_v16  ;;  %vm99_vm13 = vcmp.eq.s32.totalorder %v14758_v14, %v14741_v11  ;;  %vm73_vm15 = vcmp.eq.s32.totalorder %v14765_v15, %v14730_v7  ;;  %vm100_vm0 = vcmp.eq.s32.totalorder %v14765_v15, %v14741_v11 }
   0xf   :  { %v11040_v18 = vsel %vm120_vm7, 1.0, %v23568_v16  ;;  %vm14773_vm10 = vmpackc.low %vm120_vm7, %vm119_vm4  ;;  %v14793_v22 = vsub.f32 %v11039_v17, %v11039_v17  ;;  %v24387_v25 = vmov 0  ;;  %v14805_v26 = vadd.s32 32, %v14722_v4 }
  0x10   :  { %v24381_v19 = vsel %vm14773_vm10, 4294967295, %v24380_v19  ;;  %12117 = vmatpush1.bf16.msk.msra.mxu0 %vm14773_vm10, %v23554_v20  ;;  %vm1131_vm11 = vmor %vm1082_vm5, %vm1109_vm6  ;;  %v14795_v23 = vsub.f32 %v11040_v18, %v11040_v18  ;;  %vm1084_vm3 = vcmp.eq.s32.totalorder %v14758_v14, %v14746_v12  ;;  %vm1111_vm4 = vcmp.eq.s32.totalorder %v14758_v14, %v14749_v13 }
  0x11   :  { %24382 = vst [vmem:[#allocation11_spill] sm:$0xff] %v24381_v19  ;;  %vm14784_vm14 = vmor %vm1083_vm8, %vm1110_vm9  ;;  %12118 = vmatprep.subr.bf16.mxu0 %v23552_v3  ;;  %v11131_v24 = vsel %vm1131_vm11, 1.0, %v23568_v16  ;;  %v14819_v28 = vadd.s32 40, %v14722_v4  ;;  %vm1085_vm6 = vcmp.eq.s32.totalorder %v14765_v15, %v14746_v12  ;;  %vm1112_vm7 = vcmp.eq.s32.totalorder %v14765_v15, %v14749_v13 }
  0x12   :  { %24385 = vst [vmem:[#allocation12_spill] sm:$0xff] %v14793_v22  ;;  %24386 = vst [vmem:[#allocation13_spill] sm:$0xff] %v14795_v23  ;;  %v11132_v30 = vsel %vm14784_vm14, 1.0, %v23568_v16  ;;  %v14833_v31 = vsub.f32 %v11131_v24, %v11131_v24  ;;  %v24397_v32 = vmov 0  ;;  %v23547_v33 = vand.u32 4294901760, %v14793_v22 }
  0x13   :  { %vm14800_vm1 = vmpackc.low %vm14784_vm14, %vm1131_vm11  ;;  %24390 = vst [vmem:[#allocation15_spill] sm:$0xff] %v14805_v26  ;;  %v23546_v34 = vand.u32 4294901760, %v14795_v23  ;;  %vm74_vm11 = vcmp.eq.s32.totalorder %v14805_v26, %v14730_v7  ;;  %vm75_vm14 = vcmp.eq.s32.totalorder %v14819_v28, %v14730_v7  ;;  %v14865_v37 = vsub.f32 %v11132_v30, %v11132_v30 }
  0x14   :  { %v24388_v25 = vsel %vm14800_vm1, 4294967295, %v24387_v25  ;;  %12318 = vmatpush1.bf16.msk.msra.mxu1 %vm14800_vm1, %v23554_v20  ;;  %vm14810_vm2 = vmor %vm72_vm12, %vm99_vm13  ;;  %24393 = vst [vmem:[#allocation16_spill] sm:$0xff] %v14819_v28  ;;  %vm101_vm12 = vcmp.eq.s32.totalorder %v14805_v26, %v14741_v11  ;;  %v24405_v38 = vmov 0  ;;  %v14878_v39 = vadd.s32 48, %v14722_v4 }
  0x15   :  { %24389 = vst [vmem:[#allocation14_spill] sm:$0xff] %v24388_v25  ;;  %12319 = vmatprep.subr.bf16.mxu1 %v23552_v3  ;;  %vm14822_vm5 = vmor %vm73_vm15, %vm100_vm0  ;;  %vm102_vm15 = vcmp.eq.s32.totalorder %v14819_v28, %v14741_v11  ;;  %v14881_v40 = vadd.s32 56, %v14722_v4  ;;  %v23545_v42 = vand.u32 4294901760, %v14833_v31  ;;  %vm1114_vm0 = vcmp.eq.s32.totalorder %v14819_v28, %v14749_v13 }
  0x16   :  { %24396 = vst [vmem:[#allocation17_spill] sm:$0xff] %v14833_v31  ;;  %vm14839_vm8 = vmpackc.low %vm14822_vm5, %vm14810_vm2  ;;  %v14906_v44 = vsub.f32 %v14793_v22, %v23547_v33  ;;  %v14911_v45 = vsub.f32 %v14795_v23, %v23546_v34  ;;  %v11041_v46 = vsel %vm14810_vm2, 1.0, %v23568_v16  ;;  %v11042_v47 = vsel %vm14822_vm5, 1.0, %v23568_v16 }
  0x17   :  { %v24398_v32 = vsel %vm14839_vm8, 4294967295, %v24397_v32  ;;  %12120 = vmatpush1.bf16.msk.msra.mxu0 %vm14839_vm8, %v23554_v20  ;;  %vm14848_vm9 = vmor %vm1084_vm3, %vm1111_vm4  ;;  %24404 = vst [vmem:[#allocation19_spill] sm:$0xff] %v14865_v37  ;;  %vm1113_vm4 = vcmp.eq.s32.totalorder %v14805_v26, %v14749_v13  ;;  %v24414_v49 = vmov 0  ;;  %vm24417_vm5 = vcmask 343040  }
  0x18   :  { %24399 = vst [vmem:[#allocation18_spill] sm:$0xff] %v24398_v32  ;;  %vm14856_vm13 = vmor %vm1085_vm6, %vm1112_vm7  ;;  %12121 = vmatprep.subr.bf16.mxu0 %v23552_v3  ;;  %v14939_v50 = vsel %vm24417_vm5, %v33_v41, 0  ;;  %v23544_v51 = vand.u32 4294901760, %v14865_v37  ;;  %vm103_vm7 = vcmp.eq.s32.totalorder %v14878_v39, %v14741_v11  ;;  %v14961_v53 = vsub.f32 %v14833_v31, %v23545_v42 }
  0x19   :  { %vm14871_vm3 = vmpackc.low %vm14856_vm13, %vm14848_vm9  ;;  %24408 = vst [vmem:[#allocation21_spill] sm:$0xff] %v14878_v39  ;;  %v14963_v54 = vsub.f32 %v11041_v46, %v11041_v46  ;;  %v14965_v55 = vsub.f32 %v11042_v47, %v11042_v47  ;;  %v11133_v59 = vsel %vm14848_vm9, 1.0, %v23568_v16  ;;  %v24424_v60 = vmov 0 }
  0x1a   :  { %v24406_v38 = vsel %vm14871_vm3, 4294967295, %v24405_v38  ;;  %24409 = vst [vmem:[#allocation22_spill] sm:$0xff] %v14881_v40  ;;  %12321 = vmatpush1.bf16.msk.msra.mxu1 %vm14871_vm3, %v23554_v20  ;;  %vm14893_vm6 = vmor %vm74_vm11, %vm101_vm12  ;;  %vm24418_vm12 = vcmp.eq.s32.totalorder %v14805_v26, %v14746_v12  ;;  %v14994_v61 = vadd.s32 64, %v14722_v4  ;;  %v11134_v62 = vsel %vm14856_vm13, 1.0, %v23568_v16 }
  0x1b   :  { %24407 = vst [vmem:[#allocation20_spill] sm:$0xff] %v24406_v38  ;;  %12322 = vmatprep.subr.bf16.mxu1 %v23552_v3  ;;  %vm14926_vm11 = vmor %vm75_vm14, %vm102_vm15  ;;  %vm76_vm15 = vcmp.eq.s32.totalorder %v14878_v39, %v14730_v7  ;;  %v15014_v0 = vadd.s32 72, %v14722_v4  ;;  %v15019_v1 = vsub.f32 %v14865_v37, %v23544_v51  ;;  %v11043_v2 = vsel %vm14893_vm6, 1.0, %v23568_v16 }
  0x1c   :  { %vm14934_vm2 = vmpackc.low %vm14926_vm11, %vm14893_vm6  ;;  %24427 = vst [vmem:[#allocation25_spill] sm:$0xff] %v14994_v61  ;;  %vm24431_vm13 = vcmp.eq.s32.totalorder %v14881_v40, %v14741_v11  ;;  %vm1116_vm5 = vcmp.eq.s32.totalorder %v14881_v40, %v14749_v13  ;;  %v11044_v18 = vsel %vm14926_vm11, 1.0, %v23568_v16  ;;  %v24435_v21 = vmov 0 }
  0x1d   :  { %v24415_v49 = vsel %vm14934_vm2, 4294967295, %v24414_v49  ;;  %12123 = vmatpush1.bf16.msk.msra.mxu0 %vm14934_vm2, %v23554_v20  ;;  %vm14948_vm14 = vmor %vm24418_vm12, %vm1113_vm4  ;;  %vm24421_vm4 = vcmp.eq.s32.totalorder %v14819_v28, %v14746_v12  ;;  %24430 = vst [vmem:[#allocation26_spill] sm:$0xff] %v15014_v0  ;;  %v15053_v24 = vsub.f32 %v11133_v59, %v11133_v59  ;;  %v15055_v27 = vsub.f32 %v11134_v62, %v11134_v62 }
  0x1e   :  { %24416 = vst [vmem:[#allocation23_spill] sm:$0xff] %v24415_v49  ;;  %vm14973_vm12 = vmor %vm24421_vm4, %vm1114_vm0  ;;  %12124 = vmatprep.subr.bf16.mxu0 %v23552_v3  ;;  %vm24439_vm11 = vcmp.eq.s32.totalorder %v14878_v39, %v14746_v12  ;;  %vm78_vm4 = vcmp.eq.s32.totalorder %v14994_v61, %v14730_v7  ;;  %v15074_v30 = vsub.f32 %v11043_v2, %v11043_v2  ;;  %v11135_v35 = vsel %vm14948_vm14, 1.0, %v23568_v16 }
  0x1f   :  { %vm14989_vm0 = vmpackc.low %vm14973_vm12, %vm14948_vm14  ;;  %v15092_v43 = vsub.f32 %v11044_v18, %v11044_v18  ;;  %v11136_v46 = vsel %vm14973_vm12, 1.0, %v23568_v16  ;;  %v24445_v47 = vmov 0  ;;  %v15106_v48 = vadd.s32 80, %v14722_v4 }
  0x20   :  { %v24425_v60 = vsel %vm14989_vm0, 4294967295, %v24424_v60  ;;  %12324 = vmatpush1.bf16.msk.msra.mxu1 %vm14989_vm0, %v23554_v20  ;;  %vm15005_vm9 = vmor %vm76_vm15, %vm103_vm7  ;;  %vm24432_vm7 = vcmp.eq.s32.totalorder %v14881_v40, %v14730_v7  ;;  %vm105_vm0 = vcmp.eq.s32.totalorder %v14994_v61, %v14741_v11  ;;  %vm1090_vm12 = vcmp.eq.s32.totalorder %v14994_v61, %v14746_v12 }
  0x21   :  { %24426 = vst [vmem:[#allocation24_spill] sm:$0xff] %v24425_v60  ;;  %12325 = vmatprep.subr.bf16.mxu1 %v23552_v3  ;;  %vm15031_vm15 = vmor %vm24432_vm7, %vm24431_vm13  ;;  %vm24438_vm13 = vcmp.eq.s32.totalorder %v14878_v39, %v14749_v13  ;;  %v11045_v52 = vsel %vm15005_vm9, 1.0, %v23568_v16  ;;  %v15126_v59 = vadd.s32 88, %v14722_v4  ;;  %v15128_v62 = vsub.f32 %v11135_v35, %v11135_v35 }
  0x22   :  { %vm15049_vm6 = vmpackc.low %vm15031_vm15, %vm15005_vm9  ;;  %24448 = vst [vmem:[#allocation29_spill] sm:$0xff] %v15106_v48  ;;  %v11046_v63 = vsel %vm15031_vm15, 1.0, %v23568_v16  ;;  %v15151_v51 = vsub.f32 %v11136_v46, %v11136_v46  ;;  %v24455_v42 = vmov 0  ;;  %v15162_v33 = vsub.f32 %v11045_v52, %v11045_v52 }
  0x23   :  { %v24436_v21 = vsel %vm15049_vm6, 4294967295, %v24435_v21  ;;  %12126 = vmatpush1.bf16.msk.msra.mxu0 %vm15049_vm6, %v23554_v20  ;;  %vm15066_vm7 = vmor %vm24439_vm11, %vm24438_vm13  ;;  %vm24442_vm6 = vcmp.eq.s32.totalorder %v14881_v40, %v14746_v12  ;;  %vm79_vm13 = vcmp.eq.s32.totalorder %v15014_v0, %v14730_v7  ;;  %vm106_vm11 = vcmp.eq.s32.totalorder %v15014_v0, %v14741_v11  ;;  %24451 = vst [vmem:[#allocation30_spill] sm:$0xff] %v15126_v59 }
  0x24   :  { %24437 = vst [vmem:[#allocation27_spill] sm:$0xff] %v24436_v21  ;;  %vm15082_vm2 = vmor %vm24442_vm6, %vm1116_vm5  ;;  %12127 = vmatprep.subr.bf16.mxu0 %v23552_v3  ;;  %vm1117_vm6 = vcmp.eq.s32.totalorder %v14994_v61, %v14749_v13  ;;  %vm107_vm9 = vcmp.eq.s32.totalorder %v15106_v48, %v14741_v11  ;;  %v15181_v52 = vsub.f32 %v11046_v63, %v11046_v63  ;;  %v11137_v34 = vsel %vm15066_vm7, 1.0, %v23568_v16 }
  0x25   :  { %vm15101_vm14 = vmpackc.low %vm15082_vm2, %vm15066_vm7  ;;  %24454 = vst [vmem:[#allocation31_spill] sm:$0xff] %v15151_v51  ;;  %v11138_v29 = vsel %vm15082_vm2, 1.0, %v23568_v16  ;;  %v24463_v18 = vmov 0  ;;  %v15211_v5 = vadd.s32 96, %v14722_v4  ;;  %v15214_v17 = vadd.s32 104, %v14722_v4 }
  0x26   :  { %v24446_v47 = vsel %vm15101_vm14, 4294967295, %v24445_v47  ;;  %12327 = vmatpush1.bf16.msk.msra.mxu1 %vm15101_vm14, %v23554_v20  ;;  %vm15117_vm5 = vmor %vm78_vm4, %vm105_vm0  ;;  %vm1118_vm4 = vcmp.eq.s32.totalorder %v15014_v0, %v14749_v13  ;;  %v15237_v56 = vsub.f32 %v11137_v34, %v11137_v34  ;;  %v15259_v6 = vsub.f32 %v11138_v29, %v11138_v29 }
  0x27   :  { %24447 = vst [vmem:[#allocation28_spill] sm:$0xff] %v24446_v47  ;;  %12328 = vmatprep.subr.bf16.mxu1 %v23552_v3  ;;  %vm15140_vm0 = vmor %vm79_vm13, %vm106_vm11  ;;  %vm80_vm11 = vcmp.eq.s32.totalorder %v15106_v48, %v14730_v7  ;;  %v11047_v36 = vsel %vm15117_vm5, 1.0, %v23568_v16  ;;  %v24472_v57 = vmov 0  ;;  %v24480_v34 = vmov 0.0|0.0  }
  0x28   :  { %vm15157_vm15 = vmpackc.low %vm15140_vm0, %vm15117_vm5  ;;  %24466 = vst [vmem:[#allocation34_spill] sm:$0xff] %v15211_v5  ;;  %vm1119_vm5 = vcmp.eq.s32.totalorder %v15106_v48, %v14749_v13  ;;  %v11048_v63 = vsel %vm15140_vm0, 1.0, %v23568_v16  ;;  %v24495_v41 = vmov 0  ;;  %v24499_v26 = vmov 0.0  }
  0x29   :  { %v24456_v42 = vsel %vm15157_vm15, 4294967295, %v24455_v42  ;;  %12129 = vmatpush1.bf16.msk.msra.mxu0 %vm15157_vm15, %v23554_v20  ;;  %vm15173_vm13 = vmor %vm1090_vm12, %vm1117_vm6  ;;  %vm24460_vm15 = vcmp.eq.s32.totalorder %v15014_v0, %v14746_v12  ;;  %vm81_vm12 = vcmp.eq.s32.totalorder %v15126_v59, %v14730_v7  ;;  %vm108_vm6 = vcmp.eq.s32.totalorder %v15126_v59, %v14741_v11  ;;  %24467 = vst [vmem:[#allocation35_spill] sm:$0xff] %v15214_v17 }
  0x2a   :  { %24457 = vst [vmem:[#allocation32_spill] sm:$0xff] %v24456_v42  ;;  %vm15189_vm14 = vmor %vm24460_vm15, %vm1118_vm4  ;;  %12130 = vmatprep.subr.bf16.mxu0 %v23552_v3  ;;  %vm1092_vm4 = vcmp.eq.s32.totalorder %v15106_v48, %v14746_v12  ;;  %v11139_v58 = vsel %vm15173_vm13, 1.0, %v23568_v16  ;;  %vm109_vm15 = vcmp.eq.s32.totalorder %v15211_v5, %v14741_v11  ;;  %v15290_v29 = vsub.f32 %v11048_v63, %v11048_v63 }
  0x2b   :  { %vm15206_vm7 = vmpackc.low %vm15189_vm14, %vm15173_vm13  ;;  %vm82_vm13 = vcmp.eq.s32.totalorder %v15211_v5, %v14730_v7  ;;  %v15309_v48 = vsub.f32 %v11139_v58, %v11139_v58  ;;  %v15323_v0 = vadd.s32 120, %v14722_v4  ;;  %v24487_v63 = vmov 1.0|1.0  }
  0x2c   :  { %v24464_v18 = vsel %vm15206_vm7, 4294967295, %v24463_v18  ;;  %12330 = vmatpush1.bf16.msk.msra.mxu1 %vm15206_vm7, %v23554_v20  ;;  %vm15229_vm2 = vmor %vm80_vm11, %vm107_vm9  ;;  %vm1120_vm11 = vcmp.eq.s32.totalorder %v15126_v59, %v14749_v13  ;;  %v15414_v15 = vadd.s32 136, %v14722_v4  ;;  %v24508_v2 = vmov 0 }
  0x2d   :  { %24465 = vst [vmem:[#allocation33_spill] sm:$0xff] %v24464_v18  ;;  %12331 = vmatprep.subr.bf16.mxu1 %v23552_v3  ;;  %vm15249_vm9 = vmor %vm81_vm12, %vm108_vm6  ;;  %v15272_v3 = vsub.f32 %v11047_v36, %v11047_v36  ;;  %v11140_v36 = vsel %vm15189_vm14, 1.0, %v23568_v16  ;;  %v11049_v35 = vsel %vm15229_vm2, 1.0, %v23568_v16  ;;  %vm1121_vm6 = vcmp.eq.s32.totalorder %v15211_v5, %v14749_v13 }
  0x2e   :  { %vm15268_vm0 = vmpackc.low %vm15249_vm9, %vm15229_vm2  ;;  %24482 = vst [vmem:[#allocation38_spill] sm:$0xff] %v15309_v48  ;;  %v15343_v61 = vsub.f32 %v11140_v36, %v11140_v36  ;;  %v11050_v40 = vsel %vm15249_vm9, 1.0, %v23568_v16  ;;  %v15362_v8 = vsub.f32 %v11049_v35, %v11049_v35  ;;  %v15375_v16 = vadd.s32 128, %v14722_v4  ;;  %v32_v36 = vld [vmem:[%s23530_s1] sm:$0xff] }
  0x2f   :  { %v24473_v57 = vsel %vm15268_vm0, 4294967295, %v24472_v57  ;;  %12132 = vmatpush1.bf16.msk.msra.mxu0 %vm15268_vm0, %v23554_v20  ;;  %vm15280_vm12 = vmor %vm1092_vm4, %vm1119_vm5  ;;  %vm24477_vm4 = vcmp.eq.s32.totalorder %v15126_v59, %v14746_v12  ;;  %v15306_v20 = vadd.s32 112, %v14722_v4  ;;  %v24483_v59 = vmov 0  ;;  %24486 = vst [vmem:[#allocation40_spill] sm:$0xff] %v15323_v0 }
  0x30   :  { %24474 = vst [vmem:[#allocation36_spill] sm:$0xff] %v24473_v57  ;;  %vm15298_vm5 = vmor %vm24477_vm4, %vm1120_vm11  ;;  %12133 = vmatprep.subr.bf16.mxu0 %v24480_v34  ;;  %vm1122_vm11 = vcmp.eq.s32.totalorder %v15214_v17, %v14749_v13  ;;  %v11141_v35 = vsel %vm15280_vm12, 1.0, %v24499_v26  ;;  %v15398_v46 = vsub.f32 %v11050_v40, %v11050_v40  ;;  %v24516_v39 = vmov 0 }
  0x31   :  { %24481 = vst [vmem:[#allocation37_spill] sm:$0xff] %v15306_v20  ;;  %vm15318_vm14 = vmpackc.low %vm15298_vm5, %vm15280_vm12  ;;  %vm111_vm12 = vcmp.eq.s32.totalorder %v15306_v20, %v14741_v11  ;;  %v11142_v28 = vsel %vm15298_vm5, 1.0, %v24499_v26  ;;  %v15432_v40 = vsub.f32 %v11141_v35, %v11141_v35  ;;  %v15565_v18 = vadd.s32 168, %v14722_v4 }
  0x32   :  { %v24484_v59 = vsel %vm15318_vm14, 4294967295, %v24483_v59  ;;  %12333 = vmatpush1.bf16.msk.msra.mxu1 %vm15318_vm14, %v24487_v63  ;;  %vm15332_vm2 = vmor %vm82_vm13, %vm109_vm15  ;;  %24490 = vst [vmem:[#allocation41_spill] sm:$0xff] %v15343_v61  ;;  %vm24491_vm15 = vcmp.eq.s32.totalorder %v15214_v17, %v14741_v11  ;;  %vm24492_vm13 = vcmp.eq.s32.totalorder %v15214_v17, %v14730_v7  ;;  %vm85_vm14 = vcmp.eq.s32.totalorder %v15323_v0, %v14730_v7 }
  0x33   :  { %24485 = vst [vmem:[#allocation39_spill] sm:$0xff] %v24484_v59  ;;  %12334 = vmatprep.subr.bf16.mxu1 %v24480_v34  ;;  %vm15355_vm4 = vmor %vm24492_vm13, %vm24491_vm15  ;;  %vm24500_vm13 = vcmp.eq.s32.totalorder %v15211_v5, %v14746_v12  ;;  %v11051_v14 = vsel %vm15332_vm2, 1.0, %v24499_v26  ;;  %v15452_v35 = vsub.f32 %v11142_v28, %v11142_v28  ;;  %v24529_v5 = vmov 0 }
  0x34   :  { %vm15368_vm9 = vmpackc.low %vm15355_vm4, %vm15332_vm2  ;;  %24498 = vst [vmem:[#allocation43_spill] sm:$0xff] %v15375_v16  ;;  %v11052_v58 = vsel %vm15355_vm4, 1.0, %v24499_v26  ;;  %v15487_v10 = vsub.f32 %v11051_v14, %v11051_v14  ;;  %v15508_v14 = vadd.s32 144, %v14722_v4  ;;  %v15570_v42 = vand.u32 4294901760, %v32_v36 }
  0x35   :  { %v24496_v41 = vsel %vm15368_vm9, 4294967295, %v24495_v41  ;;  %12135 = vmatpush1.bf16.msk.msra.mxu0 %vm15368_vm9, %v24487_v63  ;;  %vm15390_vm15 = vmor %vm24500_vm13, %vm1121_vm6  ;;  %24503 = vst [vmem:[#allocation44_spill] sm:$0xff] %v15398_v46  ;;  %vm24504_vm9 = vcmp.eq.s32.totalorder %v15214_v17, %v14746_v12  ;;  %vm112_vm6 = vcmp.eq.s32.totalorder %v15323_v0, %v14741_v11  ;;  %vm1124_vm13 = vcmp.eq.s32.totalorder %v15323_v0, %v14749_v13 }
  0x36   :  { %24497 = vst [vmem:[#allocation42_spill] sm:$0xff] %v24496_v41  ;;  %vm15406_vm0 = vmor %vm24504_vm9, %vm1122_vm11  ;;  %12136 = vmatprep.subr.bf16.mxu0 %v24480_v34  ;;  %vm24511_vm9 = vcmp.eq.s32.totalorder %v15306_v20, %v14730_v7  ;;  %v11143_v28 = vsel %vm15390_vm15, 1.0, %v24499_v26  ;;  %v15514_v41 = vsub.f32 %v11052_v58, %v11052_v58  ;;  %v24544_v21 = vmov 0 }
  0x37   :  { %24507 = vst [vmem:[#allocation45_spill] sm:$0xff] %v15414_v15  ;;  %vm15421_vm5 = vmpackc.low %vm15406_vm0, %vm15390_vm15  ;;  %vm24525_vm15 = vcmp.eq.s32.totalorder %v15323_v0, %v14746_v12  ;;  %v15547_v0 = vadd.s32 160, %v14722_v4  ;;  %v15549_v57 = vsub.f32 %v11143_v28, %v11143_v28  ;;  %v15568_v28 = vand.u32 4294901760, %v14939_v50 }
  0x38   :  { %v24509_v2 = vsel %vm15421_vm5, 4294967295, %v24508_v2  ;;  %12336 = vmatpush1.bf16.msk.msra.mxu1 %vm15421_vm5, %v24487_v63  ;;  %vm15446_vm11 = vmor %vm24511_vm9, %vm111_vm12  ;;  %24519 = vst [vmem:[#allocation48_spill] sm:$0xff] %v15487_v10  ;;  %vm24520_vm9 = vcmp.eq.s32.totalorder %v15306_v20, %v14749_v13  ;;  %vm24534_vm12 = vcmp.eq.s32.totalorder %v15375_v16, %v14730_v7  ;;  %vm24562_vm5 = vcmp.eq.s32.totalorder %v15508_v14, %v14730_v7 }
  0x39   :  { %24510 = vst [vmem:[#allocation46_spill] sm:$0xff] %v24509_v2  ;;  %12337 = vmatprep.subr.bf16.mxu1 %v24480_v34  ;;  %vm15464_vm2 = vmor %vm85_vm14, %vm112_vm6  ;;  %vm24521_vm14 = vcmp.eq.s32.totalorder %v15306_v20, %v14746_v12  ;;  %v11144_v20 = vsel %vm15406_vm0, 1.0, %v24499_v26  ;;  %v15606_v60 = vsub.f32 %v14939_v50, %v15568_v28  ;;  %v15649_v50 = vsub.f32 %v32_v36, %v15570_v42 }
  0x3a   :  { %vm15477_vm4 = vmpackc.low %vm15464_vm2, %vm15446_vm11  ;;  %24524 = vst [vmem:[#allocation49_spill] sm:$0xff] %v15508_v14  ;;  %v15573_v47 = vsub.f32 %v11144_v20, %v11144_v20  ;;  %v11054_v9 = vsel %vm15464_vm2, 1.0, %v24499_v26  ;;  %vm24576_vm2 = vcmp.eq.s32.totalorder %v15508_v14, %v14746_v12 }
  0x3b   :  { %v24517_v39 = vsel %vm15477_vm4, 4294967295, %v24516_v39  ;;  %12138 = vmatpush1.bf16.msk.msra.mxu0 %vm15477_vm4, %v24487_v63  ;;  %vm15501_vm6 = vmor %vm24521_vm14, %vm24520_vm9  ;;  %24532 = vst [vmem:[#allocation52_spill] sm:$0xff] %v15547_v0  ;;  %v15666_v36 = vsub.f32 %v11054_v9, %v11054_v9 }
  0x3c   :  { %24518 = vst [vmem:[#allocation47_spill] sm:$0xff] %v24517_v39  ;;  %vm15525_vm9 = vmor %vm24525_vm15, %vm1124_vm13  ;;  %12139 = vmatprep.subr.bf16.mxu0 %v24480_v34  ;;  %v15531_v39 = vadd.s32 152, %v14722_v4  ;;  %vm24533_vm15 = vcmp.eq.s32.totalorder %v15375_v16, %v14741_v11  ;;  %vm24549_vm13 = vcmp.eq.s32.totalorder %v15375_v16, %v14746_v12  ;;  %v11145_v17 = vsel %vm15501_vm6, 1.0, %v24499_v26 }
  0x3d   :  { %vm15538_vm0 = vmpackc.low %vm15525_vm9, %vm15501_vm6  ;;  %24537 = vst [vmem:[#allocation53_spill] sm:$0xff] %v15565_v18  ;;  %v15689_v38 = vsub.f32 %v11145_v17, %v11145_v17  ;;  %v24570_v4 = vmov 0 }
  0x3e   :  { %24528 = vst [vmem:[#allocation50_spill] sm:$0xff] %v15531_v39  ;;  %v24530_v5 = vsel %vm15538_vm0, 4294967295, %v24529_v5  ;;  %12339 = vmatpush1.bf16.msk.msra.mxu1 %vm15538_vm0, %v24487_v63  ;;  %vm15560_vm4 = vmor %vm24534_vm12, %vm24533_vm15  ;;  %vm24540_vm12 = vcmp.eq.s32.totalorder %v15414_v15, %v14741_v11  ;;  %vm24541_vm15 = vcmp.eq.s32.totalorder %v15414_v15, %v14730_v7 }
  0x3f   :  { %24531 = vst [vmem:[#allocation51_spill] sm:$0xff] %v24530_v5  ;;  %24538 = vst [vmem:[#allocation54_spill] sm:$0xff] %v15568_v28  ;;  %12340 = vmatprep.subr.bf16.mxu1 %v24480_v34  ;;  %v11053_v5 = vsel %vm15446_vm11, 1.0, %v24499_v26  ;;  %vm24548_vm11 = vcmp.eq.s32.totalorder %v15375_v16, %v14749_v13  ;;  %v11055_v2 = vsel %vm15560_vm4, 1.0, %v24499_v26 }
  0x40   :  { %24539 = vst [vmem:[#allocation55_spill] sm:$0xff] %v15570_v42  ;;  %vm15582_vm14 = vmor %vm24541_vm15, %vm24540_vm12  ;;  %v15652_v49 = vsub.f32 %v11053_v5, %v11053_v5  ;;  %v11146_v5 = vsel %vm15525_vm9, 1.0, %v24499_v26  ;;  %v15729_v19 = vsub.f32 %v11055_v2, %v11055_v2 }
  0x41   :  { %vm15598_vm12 = vmpackc.low %vm15582_vm14, %vm15560_vm4  ;;  %24547 = vst [vmem:[#allocation57_spill] sm:$0xff] %v15606_v60  ;;  %v11056_v58 = vsel %vm15582_vm14, 1.0, %v24499_v26  ;;  %vm24566_vm4 = vcmp.eq.s32.totalorder %v15531_v39, %v14741_v11  ;;  %v15727_v25 = vsub.f32 %v11146_v5, %v11146_v5 }
  0x42   :  { %v24545_v21 = vsel %vm15598_vm12, 4294967295, %v24544_v21  ;;  %12141 = vmatpush1.bf16.msk.msra.mxu0 %vm15598_vm12, %v24487_v63  ;;  %vm15620_vm0 = vmor %vm24549_vm13, %vm24548_vm11  ;;  %vm24552_vm13 = vcmp.eq.s32.totalorder %v15414_v15, %v14749_v13  ;;  %vm24553_vm11 = vcmp.eq.s32.totalorder %v15414_v15, %v14746_v12  ;;  %24557 = vst [vmem:[#allocation59_spill] sm:$0xff] %v15649_v50  ;;  %v24558_v15 = vmov 0 }
  0x43   :  { %24546 = vst [vmem:[#allocation56_spill] sm:$0xff] %v24545_v21  ;;  %vm15640_vm15 = vmor %vm24553_vm11, %vm24552_vm13  ;;  %12142 = vmatprep.subr.bf16.mxu0 %v24480_v34  ;;  %v15646_v21 = vand.u32 4294901760, %v15606_v60  ;;  %vm1127_vm13 = vcmp.eq.s32.totalorder %v15508_v14, %v14749_v13  ;;  %vm24561_vm12 = vcmp.eq.s32.totalorder %v15508_v14, %v14741_v11  ;;  %v15747_v5 = vsub.f32 %v11056_v58, %v11056_v58 }
  0x44   :  { %vm15658_vm6 = vmpackc.low %vm15640_vm15, %vm15620_vm0  ;;  %24565 = vst [vmem:[#allocation61_spill] sm:$0xff] %v15689_v38  ;;  %v11147_v2 = vsel %vm15620_vm0, 1.0, %v24499_v26  ;;  %v24586_v14 = vand.u32 4294901760, %v14906_v44  ;;  %v24587_v58 = vand.u32 4294901760, %v14911_v45  ;;  %vm24588_vm0 = vcmp.eq.s32.totalorder %v15547_v0, %v14741_v11 }
  0x45   :  { %24556 = vst [vmem:[#allocation58_spill] sm:$0xff] %v15646_v21  ;;  %v24559_v15 = vsel %vm15658_vm6, 4294967295, %v24558_v15  ;;  %12342 = vmatpush1.bf16.msk.msra.mxu1 %vm15658_vm6, %v24487_v63  ;;  %vm15683_vm11 = vmor %vm24562_vm5, %vm24561_vm12  ;;  %v303_v59 = vsub.f32 %v15606_v60, %v15646_v21  ;;  %vm24567_vm5 = vcmp.eq.s32.totalorder %v15531_v39, %v14730_v7  ;;  %v15724_v21 = vand.u32 4294901760, %v15649_v50 }
  0x46   :  { %24560 = vst [vmem:[#allocation60_spill] sm:$0xff] %v24559_v15  ;;  %12343 = vmatprep.subr.bf16.mxu1 %v24480_v34  ;;  %vm15701_vm9 = vmor %vm24567_vm5, %vm24566_vm4  ;;  %vm24579_vm4 = vcmp.eq.s32.totalorder %v15531_v39, %v14749_v13  ;;  %v24592_v45 = vand.u32 4294901760, %v14961_v53  ;;  %v24598_v53 = vand.u32 4294901760, %v15053_v24  ;;  %v11057_v16 = vsel %vm15683_vm11, 1.0, %v24499_v26 }
  0x47   :  { %vm15713_vm14 = vmpackc.low %vm15701_vm9, %vm15683_vm11  ;;  %v15721_v17 = vand.u32 4294901760, %v303_v59  ;;  %24574 = vst [vmem:[#allocation64_spill] sm:$0xff] %v15724_v21  ;;  %v309_v44 = vsub.f32 %v15649_v50, %v15724_v21  ;;  %v11148_v21 = vsel %vm15640_vm15, 1.0, %v24499_v26  ;;  %vm24599_vm15 = vcmask 1041408  }
  0x48   :  { %v24571_v4 = vsel %vm15713_vm14, 4294967295, %v24570_v4  ;;  %24575 = vst [vmem:[#allocation65_spill] sm:$0xff] %v15727_v25  ;;  %12144 = vmatpush1.bf16.msk.msra.mxu0 %vm15713_vm14, %v24487_v63  ;;  %vm15740_vm5 = vmor %vm24576_vm2, %vm1127_vm13  ;;  %vm24580_vm14 = vcmp.eq.s32.totalorder %v15531_v39, %v14746_v12  ;;  %v24583_v39 = vmov 0  ;;  %vm24589_vm2 = vcmp.eq.s32.totalorder %v15547_v0, %v14730_v7 }
  0x49   :  { %24572 = vst [vmem:[#allocation62_spill] sm:$0xff] %v24571_v4  ;;  %24573 = vst [vmem:[#allocation63_spill] sm:$0xff] %v15721_v17  ;;  %12145 = vmatprep.subr.bf16.mxu0 %v24480_v34  ;;  %305 = vmatprep.mubr.f32.mxu0 %v15721_v17  ;;  %v12150_v4 = vpack.c.bf16 %v24587_v58, %v24586_v14  ;;  %v24593_v14 = vand.u32 4294901760, %v15019_v1  ;;  %v1350_v1 = vsub.f32 %v15053_v24, %v24598_v53 }
  0x4a   :  { %vm15755_vm6 = vmor %vm24580_vm14, %vm24579_vm4  ;;  %1291 = vmatprep.mubr.f32.mxu1 %v15721_v17  ;;  %v24594_v17 = vand.u32 4294901760, %v14963_v54  ;;  %vm24604_vm11 = vcmp.eq.s32.totalorder %v15547_v0, %v14749_v13  ;;  %v24608_v15 = vand.u32 4294901760, %v15055_v27  ;;  %v15860_v59 = vsub.f32 %v11148_v21, %v11148_v21 }
  0x4b   :  { %vm15773_vm14 = vmpackc.low %vm15755_vm6, %vm15740_vm5  ;;  %v12351_v58 = vpack.c.bf16 %v24593_v14, %v24592_v45  ;;  %v23671_v14 = vmov 1.0   ;;  %v15868_v31 = vand.u32 4294901760, %v309_v44  ;;  %v1351_v50 = vand.u32 4294901760, %v1350_v1 }
  0x4c   :  { %v24584_v39 = vsel %vm15773_vm14, 4294967295, %v24583_v39  ;;  %12345 = vmatpush1.bf16.msk.msra.mxu1 %vm15773_vm14, %v24487_v63  ;;  %vm15793_vm12 = vmor %vm24589_vm2, %vm24588_vm0  ;;  %v24595_v63 = vand.u32 4294901760, %v14965_v55  ;;  %vm24596_vm2 = vcmp.eq.s32.totalorder %v15565_v18, %v14741_v11  ;;  %vm24597_vm0 = vcmp.eq.s32.totalorder %v15565_v18, %v14730_v7 }
  0x4d   :  { %24585 = vst [vmem:[#allocation66_spill] sm:$0xff] %v24584_v39  ;;  %v364_v39 = vsub.f32 %v14963_v54, %v24594_v17  ;;  %12346 = vmatprep.subr.bf16.mxu1 %v24480_v34  ;;  %vm140_vm4 = vmor %vm24597_vm0, %vm24596_vm2  ;;  %v15825_v17 = vsub.f32 %v11147_v2, %v11147_v2  ;;  %v24600_v7 = vmov 0  ;;  %v11058_v11 = vsel %vm15701_vm9, 1.0, %v24499_v26 }
  0x4e   :  { %v371_v60 = vsub.f32 %v14965_v55, %v24595_v63  ;;  %v11060_v45 = vsel %vm140_vm4, 1.0, %v24499_v26  ;;  %vm15834_vm13 = vmpackc.low %vm24599_vm15, %vm15793_vm12  ;;  %v11149_v2 = vsel %vm15740_vm5, 1.0, %v24499_v26  ;;  %vm24605_vm4 = vcmp.eq.s32.totalorder %v15547_v0, %v14746_v12  ;;  %24611 = vst [vmem:[#allocation69_spill] sm:$0xff] %v15868_v31 }
  0x4f   :  { %v24601_v7 = vsel %vm15834_vm13, 4294967295, %v24600_v7  ;;  %v15845_v9 = vpack.c.bf16 %v11060_v45, %v23671_v14  ;;  %vm15853_vm2 = vmor %vm24605_vm4, %vm24604_vm11  ;;  %v1357_v63 = vsub.f32 %v15055_v27, %v24608_v15  ;;  %vm24609_vm9 = vcmp.eq.s32.totalorder %v15565_v18, %v14749_v13 }
  0x50   :  { %24602 = vst [vmem:[#allocation67_spill] sm:$0xff] %v24601_v7  ;;  %vm24610_vm5 = vcmp.eq.s32.totalorder %v15565_v18, %v14746_v12  ;;  %v365_v37 = vand.u32 4294901760, %v364_v39  ;;  %v372_v14 = vand.u32 4294901760, %v371_v60  ;;  %v15870_v0 = vsub.f32 %v11057_v16, %v11057_v16  ;;  %vm15879_vm11 = vmpackc.low %vm24599_vm15, %vm15853_vm2 }
  0x51   :  { %24603 = vst [vmem:[#allocation68_spill] sm:$0xff] %v15845_v9  ;;  %vm1152_vm0 = vmor %vm24610_vm5, %vm24609_vm9  ;;  %12148 = vmatpush1.bf16.msk.msra.mxu0 %vm15834_vm13, %v15845_v9  ;;  %v24612_v13 = vmov 0  ;;  %v24615_v12 = vand.u32 4294901760, %v15074_v30  ;;  %v24616_v60 = vand.u32 4294901760, %v15092_v43  ;;  %v15889_v16 = vsub.f32 %v11058_v11, %v11058_v11 }
  0x52   :  { %v11152_v21 = vsel %vm1152_vm0, 1.0, %v24499_v26  ;;  %v24613_v13 = vsel %vm15879_vm11, 4294967295, %v24612_v13  ;;  %v11150_v15 = vsel %vm15755_vm6, 1.0, %v24499_v26  ;;  %v15894_v18 = vsub.f32 %v11149_v2, %v11149_v2  ;;  %12149 = vmatprep.subr.bf16.mxu0 %v24480_v34  ;;  %vm24623_vm6 = vmmov %vm24599_vm15 }
  0x53   :  { %24614 = vst [vmem:[#allocation70_spill] sm:$0xff] %v24613_v13  ;;  %v378_v39 = vsub.f32 %v15074_v30, %v24615_v12  ;;  %v385_v44 = vsub.f32 %v15092_v43, %v24616_v60  ;;  %v24617_v7 = vmov 1.0   ;;  %v1358_v42 = vand.u32 4294901760, %v1357_v63 }
  0x54   :  { %v15897_v9 = vpack.c.bf16 %v11152_v21, %v24617_v7  ;;  %v24619_v12 = vand.u32 4294901760, %v15128_v62  ;;  %v24620_v11 = vand.u32 4294901760, %v15151_v51  ;;  %311 = vmatmul.mubr.f32.vlgmr.msra.gmra.mrb[0].mxu0 %v15868_v31  ;;  %v24621_v1 = vand.u32 4294901760, %v15162_v33 }
  0x55   :  { %v15918_v22 = vsub.f32 %v11150_v15, %v11150_v15  ;;  %12151 = vmatpush1.bf16.msra.mxu0 %v12150_v4  ;;  %v379_v2 = vand.u32 4294901760, %v378_v39  ;;  %v386_v32 = vand.u32 4294901760, %v385_v44  ;;  %v212_v15 = vsel %vm24623_vm6, %v11060_v45, 0 }
  0x56   :  { %24618 = vst [vmem:[#allocation71_spill] sm:$0xff] %v15897_v9  ;;  %v1364_v23 = vsub.f32 %v15128_v62, %v24619_v12  ;;  %v1371_v60 = vsub.f32 %v15151_v51, %v24620_v11  ;;  %12349 = vmatpush1.bf16.msk.msra.mxu1 %vm15879_vm11, %v15897_v9  ;;  %v392_v63 = vsub.f32 %v15162_v33, %v24621_v1  ;;  %v24622_v12 = vand.u32 4294901760, %v15181_v52 }
  0x57   :  { %12350 = vmatprep.subr.bf16.mxu1 %v24480_v34  ;;  %v12153_v11 = vpack.c.bf16 %v372_v14, %v365_v37  ;;  %v11059_v1 = vsel %vm15793_vm12, 1.0, %v24499_v26  ;;  %12152 = vmatprep.subr.bf16.mxu0 %v24480_v34  ;;  %v12354_v4 = vpack.c.bf16 %v1358_v42, %v1351_v50  ;;  %v24625_v9 = vand.u32 4294901760, %v15259_v6  ;;  %vm24632_vm12 = vmmov %vm24623_vm6 }
  0x58   :  { %v399_v7 = vsub.f32 %v15181_v52, %v24622_v12  ;;  %v1365_v37 = vand.u32 4294901760, %v1364_v23  ;;  %v1372_v14 = vand.u32 4294901760, %v1371_v60  ;;  %v393_v39 = vand.u32 4294901760, %v392_v63 }
  0x59   :  { %1297 = vmatmul.mubr.f32.vlgmr.msra.gmra.mrb[0].mxu1 %v15868_v31  ;;  %v24624_v12 = vand.u32 4294901760, %v15237_v56  ;;  %v1385_v20 = vsub.f32 %v15259_v6, %v24625_v9  ;;  %12154 = vmatpush1.bf16.msra.mxu0 %v12153_v11  ;;  %v12156_v45 = vpack.c.bf16 %v386_v32, %v379_v2  ;;  %v24626_v23 = vand.u32 4294901760, %v15272_v3 }
  0x5a   :  { %12352 = vmatpush1.bf16.msra.mxu1 %v12351_v58  ;;  %v400_v44 = vand.u32 4294901760, %v399_v7  ;;  %v24627_v50 = vand.u32 4294901760, %v15290_v29  ;;  %12155 = vmatprep.subr.bf16.mxu0 %v24480_v34  ;;  %v24628_v7 = vand.u32 4294901760, %v15309_v48  ;;  %v24629_v60 = vand.u32 4294901760, %v15343_v61 }
  0x5b   :  { %v1378_v51 = vsub.f32 %v15237_v56, %v24624_v12  ;;  %12353 = vmatprep.subr.bf16.mxu1 %v24480_v34  ;;  %v406_v42 = vsub.f32 %v15272_v3, %v24626_v23  ;;  %v24630_v32 = vand.u32 4294901760, %v15362_v8  ;;  %v24631_v11 = vand.u32 4294901760, %v15398_v46 }
  0x5c   :  { %v413_v58 = vsub.f32 %v15290_v29, %v24627_v50  ;;  %v1392_v9 = vsub.f32 %v15309_v48, %v24628_v7  ;;  %v1399_v63 = vsub.f32 %v15343_v61, %v24629_v60  ;;  %v15957_v23 = vsub.f32 %v11059_v1, %v11059_v1 }
  0x5d   :  { %v420_v2 = vsub.f32 %v15362_v8, %v24630_v32  ;;  %v427_v12 = vsub.f32 %v15398_v46, %v24631_v11  ;;  %v15959_v50 = vsub.f32 %v212_v15, %v212_v15  ;;  %v11151_v7 = vsel %vm15853_vm2, 1.0, %v24499_v26  ;;  %12157 = vmatpush1.bf16.msra.mxu0 %v12156_v45 }
  0x5e   :  { %v12357_v13 = vpack.c.bf16 %v1372_v14, %v1365_v37  ;;  %v1198_v31 = vsel %vm24632_vm12, %v11152_v21, 0  ;;  %12355 = vmatpush1.bf16.msra.mxu1 %v12354_v4  ;;  %v12159_v60 = vpack.c.bf16 %v400_v44, %v393_v39  ;;  %v1379_v61 = vand.u32 4294901760, %v1378_v51  ;;  %v35_v21 = vld [vmem:[%s23530_s1 + $0x18] sm:$0xff]  ;;  %v34_v51 = vld [vmem:[%s23530_s1 + $0x10] sm:$0xff]  ;;  %12158 = vmatprep.subr.bf16.mxu0 %v24480_v34 }
  0x5f   :  { %v1386_v48 = vand.u32 4294901760, %v1385_v20  ;;  %12356 = vmatprep.subr.bf16.mxu1 %v24480_v34  ;;  %v407_v32 = vand.u32 4294901760, %v406_v42  ;;  %v414_v11 = vand.u32 4294901760, %v413_v58  ;;  %v24633_v1 = vand.u32 4294901760, %v15432_v40 }
  0x60   :  { %v24634_v46 = vand.u32 4294901760, %v15452_v35  ;;  %v1393_v4 = vand.u32 4294901760, %v1392_v9  ;;  %v1400_v37 = vand.u32 4294901760, %v1399_v63  ;;  %v421_v14 = vand.u32 4294901760, %v420_v2 }
  0x61   :  { %v1406_v15 = vsub.f32 %v15432_v40, %v24633_v1  ;;  %v428_v39 = vand.u32 4294901760, %v427_v12  ;;  %v15979_v44 = vsub.f32 %v11151_v7, %v11151_v7  ;;  %v24635_v20 = vand.u32 4294901760, %v15487_v10  ;;  %12160 = vmatpush1.bf16.msra.mxu0 %v12159_v60  ;;  %v36_v60 = vld [vmem:[%s23530_s1 + $0x20] sm:$0x1] }
  0x62   :  { %v1413_v53 = vsub.f32 %v15452_v35, %v24634_v46  ;;  %v24636_v45 = vand.u32 4294901760, %v15514_v41  ;;  %v24637_v58 = vand.u32 4294901760, %v15549_v57  ;;  %v15990_v26 = vsub.f32 %v1198_v31, %v1198_v31  ;;  %12358 = vmatpush1.bf16.msra.mxu1 %v12357_v13  ;;  %12161 = vmatprep.subr.bf16.mxu0 %v24480_v34 }
  0x63   :  { %v434_v46 = vsub.f32 %v15487_v10, %v24635_v20  ;;  %v12360_v9 = vpack.c.bf16 %v1386_v48, %v1379_v61  ;;  %vm24638_vm4 = vcmask 343040   ;;  %v15993_v2 = vand.u32 4294901760, %v34_v51  ;;  %12359 = vmatprep.subr.bf16.mxu1 %v24480_v34 }
  0x64   :  { %v441_v42 = vsub.f32 %v15514_v41, %v24636_v45  ;;  %v1420_v1 = vsub.f32 %v15549_v57, %v24637_v58  ;;  %v205_v63 = vsel %vm24638_vm4, %v35_v21, 0  ;;  %v12162_v12 = vpack.c.bf16 %v414_v11, %v407_v32  ;;  %v37_v45 = vld [vmem:[%s23530_s1 + $0x28] sm:$0x1]  ;;  %vm24647_vm2 = vmmov %vm24638_vm4 }
  0x65   :  { %24639 = vst [vmem:[#allocation72_spill] sm:$0xff] %v15993_v2  ;;  %v1407_v7 = vand.u32 4294901760, %v1406_v15  ;;  %v1414_v20 = vand.u32 4294901760, %v1413_v53  ;;  %v15996_v10 = vand.u32 4294901760, %v205_v63  ;;  %v12363_v31 = vpack.c.bf16 %v1400_v37, %v1393_v4 }
  0x66   :  { %v12165_v61 = vpack.c.bf16 %v428_v39, %v421_v14  ;;  %v24641_v48 = vand.u32 4294901760, %v15573_v47  ;;  %v16006_v21 = vsub.f32 %v34_v51, %v15993_v2  ;;  %v435_v32 = vand.u32 4294901760, %v434_v46  ;;  %12361 = vmatpush1.bf16.msra.mxu1 %v12360_v9  ;;  %12163 = vmatpush1.bf16.msra.mxu0 %v12162_v12 }
  0x67   :  { %24640 = vst [vmem:[#allocation73_spill] sm:$0xff] %v15996_v10  ;;  %v442_v11 = vand.u32 4294901760, %v441_v42  ;;  %v1421_v15 = vand.u32 4294901760, %v1420_v1  ;;  %v16012_v53 = vsub.f32 %v205_v63, %v15996_v10  ;;  %v24644_v4 = vand.u32 4294901760, %v15652_v49  ;;  %12362 = vmatprep.subr.bf16.mxu1 %v24480_v34  ;;  %12164 = vmatprep.subr.bf16.mxu0 %v24480_v34 }
  0x68   :  { %v1427_v13 = vsub.f32 %v15573_v47, %v24641_v48  ;;  %24642 = vst [vmem:[#allocation74_spill] sm:$0xff] %v16006_v21  ;;  %v24645_v14 = vand.u32 4294901760, %v15666_v36  ;;  %v16021_v39 = vand.u32 4294901760, %v16006_v21  ;;  %v208_v58 = vsel %vm24647_vm2, %v37_v45, 0 }
  0x69   :  { %24643 = vst [vmem:[#allocation75_spill] sm:$0xff] %v16012_v53  ;;  %v448_v37 = vsub.f32 %v15652_v49, %v24644_v4  ;;  %v12366_v46 = vpack.c.bf16 %v1414_v20, %v1407_v7  ;;  %v16026_v42 = vand.u32 4294901760, %v16012_v53  ;;  %v16028_v1 = vand.u32 4294901760, %v208_v58 }
  0x6a   :  { %v455_v51 = vsub.f32 %v15666_v36, %v24645_v14  ;;  %24646 = vst [vmem:[#allocation76_spill] sm:$0xff] %v16021_v39  ;;  %v16030_v9 = vand.u32 4294901760, %v36_v60  ;;  %v1428_v63 = vand.u32 4294901760, %v1427_v13  ;;  %v24651_v48 = vand.u32 4294901760, %v15689_v38  ;;  %12364 = vmatpush1.bf16.msra.mxu1 %v12363_v31  ;;  %12166 = vmatpush1.bf16.msra.mxu0 %v12165_v61 }
  0x6b   :  { %24648 = vst [vmem:[#allocation77_spill] sm:$0xff] %v16026_v42  ;;  %24649 = vst [vmem:[#allocation78_spill] sm:$0xff] %v16028_v1  ;;  %v24652_v45 = vand.u32 4294901760, %v15727_v25  ;;  %v324_v12 = vsub.f32 %v16006_v21, %v16021_v39  ;;  %v12168_v7 = vpack.c.bf16 %v442_v11, %v435_v32  ;;  %v318_v20 = vsub.f32 %v16012_v53, %v16026_v42 }
  0x6c   :  { %24650 = vst [vmem:[#allocation79_spill] sm:$0xff] %v16030_v9  ;;  %v1434_v4 = vsub.f32 %v15689_v38, %v24651_v48  ;;  %v16044_v2 = vsub.f32 %v208_v58, %v16028_v1  ;;  %v16047_v13 = vsub.f32 %v36_v60, %v16030_v9  ;;  %v449_v10 = vand.u32 4294901760, %v448_v37  ;;  %12365 = vmatprep.subr.bf16.mxu1 %v24480_v34 }
  0x6d   :  { %v1441_v14 = vsub.f32 %v15727_v25, %v24652_v45  ;;  %v456_v48 = vand.u32 4294901760, %v455_v51  ;;  %v24655_v38 = vand.u32 4294901760, %v15729_v19  ;;  %v16052_v25 = vand.u32 4294901760, %v324_v12  ;;  %12167 = vmatprep.subr.bf16.mxu0 %v24480_v34 }
  0x6e   :  { %24653 = vst [vmem:[#allocation80_spill] sm:$0xff] %v16044_v2  ;;  %24654 = vst [vmem:[#allocation81_spill] sm:$0xff] %v16047_v13  ;;  %v24657_v32 = vand.u32 4294901760, %v15747_v5  ;;  %v16058_v58 = vand.u32 4294901760, %v318_v20  ;;  %v16061_v60 = vand.u32 4294901760, %v16044_v2  ;;  %v16064_v31 = vand.u32 4294901760, %v16047_v13  ;;  %12367 = vmatpush1.bf16.msra.mxu1 %v12366_v46  ;;  %12169 = vmatpush1.bf16.msra.mxu0 %v12168_v7 }
  0x6f   :  { %v462_v45 = vsub.f32 %v15729_v19, %v24655_v38  ;;  %24656 = vst [vmem:[#allocation82_spill] sm:$0xff] %v16052_v25  ;;  %v12369_v38 = vpack.c.bf16 %v1428_v63, %v1421_v15  ;;  %v24661_v37 = vand.u32 4294901760, %v15825_v17  ;;  %v24662_v61 = vand.u32 4294901760, %v15860_v59  ;;  %12368 = vmatprep.subr.bf16.mxu1 %v24480_v34  ;;  %12170 = vmatprep.subr.bf16.mxu0 %v24480_v34 }
  0x70   :  { %v469_v11 = vsub.f32 %v15747_v5, %v24657_v32  ;;  %24658 = vst [vmem:[#allocation83_spill] sm:$0xff] %v16058_v58  ;;  %24659 = vst [vmem:[#allocation84_spill] sm:$0xff] %v16061_v60  ;;  %v24663_v20 = vand.u32 4294901760, %v15870_v0  ;;  %320 = vmatprep.mubr.f32.mxu0 %v16058_v58  ;;  %1306 = vmatprep.mubr.f32.mxu1 %v16058_v58  ;;  %v24664_v15 = vand.u32 4294901760, %v15889_v16  ;;  %v1435_v21 = vand.u32 4294901760, %v1434_v4 }
  0x71   :  { %24660 = vst [vmem:[#allocation85_spill] sm:$0xff] %v16064_v31  ;;  %v1448_v51 = vsub.f32 %v15825_v17, %v24661_v37  ;;  %v1455_v12 = vsub.f32 %v15860_v59, %v24662_v61  ;;  %v333_v37 = vsub.f32 %v16044_v2, %v16061_v60  ;;  %v339_v61 = vsub.f32 %v16047_v13, %v16064_v31  ;;  %v24713_v13 = vld [vmem:[#allocation61_spill] sm:$0xff] }
  0x72   :  { %v476_v32 = vsub.f32 %v15870_v0, %v24663_v20  ;;  %v483_v63 = vsub.f32 %v15889_v16, %v24664_v15  ;;  %v12171_v42 = vpack.c.bf16 %v456_v48, %v449_v10  ;;  %v1442_v20 = vand.u32 4294901760, %v1441_v14  ;;  %326 = vmatmul.mubr.f32.gmra.mrb[2].mxu0 %v16052_v25  ;;  %1312 = vmatmul.mubr.f32.gmra.mrb[2].mxu1 %v16052_v25 }
  0x73   :  { %v463_v53 = vand.u32 4294901760, %v462_v45  ;;  %v470_v39 = vand.u32 4294901760, %v469_v11  ;;  %v16088_v58 = vand.u32 4294901760, %v333_v37  ;;  %v16090_v15 = vand.u32 4294901760, %v339_v61  ;;  %12370 = vmatpush1.bf16.msra.mxu1 %v12369_v38 }
  0x74   :  { %v23729_v60 = vand.u32 4294901760, %v15959_v50  ;;  %v1449_v31 = vand.u32 4294901760, %v1448_v51  ;;  %v1456_v46 = vand.u32 4294901760, %v1455_v12  ;;  %v24667_v10 = vand.u32 4294901760, %v15894_v18  ;;  %12371 = vmatprep.subr.bf16.mxu1 %v24480_v34  ;;  %12172 = vmatpush1.bf16.msra.mxu0 %v12171_v42 }
  0x75   :  { %24665 = vst [vmem:[#allocation86_spill] sm:$0xff] %v16088_v58  ;;  %24666 = vst [vmem:[#allocation87_spill] sm:$0xff] %v16090_v15  ;;  %v477_v14 = vand.u32 4294901760, %v476_v32  ;;  %v484_v48 = vand.u32 4294901760, %v483_v63  ;;  %v24668_v7 = vand.u32 4294901760, %v15918_v22  ;;  %335 = vmatprep.mubr.f32.mxu0 %v16088_v58  ;;  %1321 = vmatprep.mubr.f32.mxu1 %v16088_v58  ;;  %v24669_v11 = vand.u32 4294901760, %v15957_v23 }
  0x76   :  { %v1462_v4 = vsub.f32 %v15894_v18, %v24667_v10  ;;  %v23728_v12 = vand.u32 4294901760, %v15979_v44  ;;  %v12372_v37 = vpack.c.bf16 %v1442_v20, %v1435_v21  ;;  %341 = vmatmul.mubr.f32.gmra.mrb[4].mxu0 %v16090_v15  ;;  %v1482_v32 = vand.u32 4294901760, %v15990_v26  ;;  %12173 = vmatprep.subr.bf16.mxu0 %v24480_v34 }
  0x77   :  { %v1469_v45 = vsub.f32 %v15918_v22, %v24668_v7  ;;  %v490_v51 = vsub.f32 %v15957_v23, %v24669_v11  ;;  %v12174_v63 = vpack.c.bf16 %v470_v39, %v463_v53  ;;  %v497_v61 = vsub.f32 %v15959_v50, %v23729_v60  ;;  %1327 = vmatmul.mubr.f32.gmra.mrb[4].mxu1 %v16090_v15 }
  0x78   :  { %v12375_v10 = vpack.c.bf16 %v1456_v46, %v1449_v31  ;;  %v12177_v7 = vpack.c.bf16 %v484_v48, %v477_v14  ;;  %v1463_v38 = vand.u32 4294901760, %v1462_v4  ;;  %521 = vmatprep.mubr.f32.mxu0 %v15568_v28  ;;  %1507 = vmatprep.mubr.f32.mxu1 %v15568_v28  ;;  %v1476_v53 = vsub.f32 %v15979_v44, %v23728_v12 }
  0x79   :  { %v1470_v21 = vand.u32 4294901760, %v1469_v45  ;;  %v491_v20 = vand.u32 4294901760, %v490_v51  ;;  %12373 = vmatpush1.bf16.msra.mxu1 %v12372_v37  ;;  %v1483_v39 = vsub.f32 %v15990_v26, %v1482_v32  ;;  %v24670_v42 = vand.u32 4294901760, %v14963_v54  ;;  %12175 = vmatpush1.bf16.msra.mxu0 %v12174_v63 }
  0x7a   :  { %v24671_v31 = vand.u32 4294901760, %v14965_v55  ;;  %v24673_v4 = vand.u32 4294901760, %v15053_v24  ;;  %v24674_v14 = vand.u32 4294901760, %v15055_v27  ;;  %12374 = vmatprep.subr.bf16.mxu1 %v24480_v34  ;;  %v498_v45 = vand.u32 4294901760, %v497_v61  ;;  %12176 = vmatprep.subr.bf16.mxu0 %v24480_v34 }
  0x7b   :  { %v24676_v11 = vand.u32 4294901760, %v15074_v30  ;;  %v24677_v51 = vand.u32 4294901760, %v15092_v43  ;;  %v24679_v12 = vand.u32 4294901760, %v15128_v62  ;;  %v24683_v15 = vand.u32 4294901760, %v15162_v33 }
  0x7c   :  { %v16125_v46 = vpack.c.bf16 %v24671_v31, %v24670_v42  ;;  %v16131_v48 = vpack.c.bf16 %v24674_v14, %v24673_v4  ;;  %v24680_v42 = vld [vmem:[#allocation31_spill] sm:$0xff]  ;;  %v24684_v4 = vand.u32 4294901760, %v15181_v52  ;;  %v24686_v63 = vand.u32 4294901760, %v15237_v56 }
  0x7d   :  { %v16138_v37 = vpack.c.bf16 %v24677_v51, %v24676_v11  ;;  %v24681_v31 = vand.u32 4294901760, %v24680_v42  ;;  %v24687_v61 = vand.u32 4294901760, %v15259_v6  ;;  %v24689_v51 = vand.u32 4294901760, %v15272_v3  ;;  %12376 = vmatpush1.bf16.msra.mxu1 %v12375_v10  ;;  %12178 = vmatpush1.bf16.msra.mxu0 %v12177_v7  ;;  %v24721_v7 = vld [vmem:[#allocation12_spill] sm:$0xff] }
  0x7e   :  { %24672 = vst [vmem:[#allocation88_spill] sm:$0xff] %v16125_v46  ;;  %24675 = vst [vmem:[#allocation89_spill] sm:$0xff] %v16131_v48  ;;  %v16150_v14 = vpack.c.bf16 %v24684_v4, %v24683_v15  ;;  %v24690_v58 = vand.u32 4294901760, %v15290_v29  ;;  %v24697_v4 = vand.u32 4294901760, %v15362_v8  ;;  %v24714_v2 = vand.u32 4294901760, %v24713_v13  ;;  %12377 = vmatprep.subr.bf16.mxu1 %v24480_v34  ;;  %12179 = vmatprep.subr.bf16.mxu0 %v24480_v34 }
  0x7f   :  { %24678 = vst [vmem:[#allocation90_spill] sm:$0xff] %v16138_v37  ;;  %v16144_v60 = vpack.c.bf16 %v24681_v31, %v24679_v12  ;;  %v16157_v11 = vpack.c.bf16 %v24687_v61, %v24686_v63  ;;  %v24692_v31 = vld [vmem:[#allocation38_spill] sm:$0xff]  ;;  %v24701_v63 = vand.u32 4294901760, %v15432_v40  ;;  %v24702_v61 = vand.u32 4294901760, %v15452_v35 }
  0x80   :  { %24685 = vst [vmem:[#allocation91_spill] sm:$0xff] %v16150_v14  ;;  %v16163_v12 = vpack.c.bf16 %v24690_v58, %v24689_v51  ;;  %v24693_v25 = vand.u32 4294901760, %v24692_v31  ;;  %v24698_v14 = vld [vmem:[#allocation44_spill] sm:$0xff]  ;;  %v24719_v10 = vand.u32 4294901760, %v15825_v17 }
  0x81   :  { %24682 = vst [vmem:[#allocation31_spill] sm:$0xff] %v16144_v60  ;;  %24688 = vst [vmem:[#allocation92_spill] sm:$0xff] %v16157_v11  ;;  %v24694_v60 = vld [vmem:[#allocation41_spill] sm:$0xff]  ;;  %v24699_v37 = vand.u32 4294901760, %v24698_v14  ;;  %v16181_v11 = vpack.c.bf16 %v24702_v61, %v24701_v63  ;;  %v24704_v58 = vld [vmem:[#allocation48_spill] sm:$0xff]  ;;  %v12378_v63 = vpack.c.bf16 %v1470_v21, %v1463_v38  ;;  %v1477_v61 = vand.u32 4294901760, %v1476_v53 }
  0x82   :  { %24691 = vst [vmem:[#allocation93_spill] sm:$0xff] %v16163_v12  ;;  %v24695_v28 = vand.u32 4294901760, %v24694_v60  ;;  %v24705_v51 = vand.u32 4294901760, %v24704_v58  ;;  %v24706_v12 = vand.u32 4294901760, %v15514_v41  ;;  %v24720_v38 = vand.u32 4294901760, %v15860_v59 }
  0x83   :  { %v16175_v48 = vpack.c.bf16 %v24699_v37, %v24697_v4  ;;  %24703 = vst [vmem:[#allocation44_spill] sm:$0xff] %v16181_v11  ;;  %v24711_v37 = vand.u32 4294901760, %v15652_v49  ;;  %v24712_v4 = vand.u32 4294901760, %v15666_v36  ;;  %v1484_v11 = vand.u32 4294901760, %v1483_v39  ;;  %12379 = vmatpush1.bf16.msra.mxu1 %v12378_v63  ;;  %v24728_v63 = vld [vmem:[#allocation17_spill] sm:$0xff] }
  0x84   :  { %v16169_v15 = vpack.c.bf16 %v24695_v28, %v24693_v25  ;;  %v16187_v46 = vpack.c.bf16 %v24706_v12, %v24705_v51  ;;  %v24708_v25 = vand.u32 4294901760, %v15549_v57  ;;  %v24709_v28 = vand.u32 4294901760, %v15573_v47  ;;  %v24715_v12 = vld [vmem:[#allocation65_spill] sm:$0xff]  ;;  %12380 = vmatprep.subr.bf16.mxu1 %v24480_v34 }
  0x85   :  { %24700 = vst [vmem:[#allocation41_spill] sm:$0xff] %v16175_v48  ;;  %v16199_v48 = vpack.c.bf16 %v24712_v4, %v24711_v37  ;;  %v24716_v51 = vand.u32 4294901760, %v24715_v12  ;;  %v16218_v21 = vpack.c.bf16 %v24720_v38, %v24719_v10  ;;  %v24723_v39 = vand.u32 4294901760, %v15870_v0 }
  0x86   :  { %24696 = vst [vmem:[#allocation38_spill] sm:$0xff] %v16169_v15  ;;  %24707 = vst [vmem:[#allocation48_spill] sm:$0xff] %v16187_v46  ;;  %v16193_v15 = vpack.c.bf16 %v24709_v28, %v24708_v25  ;;  %v12180_v25 = vpack.c.bf16 %v498_v45, %v491_v20  ;;  %v24717_v28 = vand.u32 4294901760, %v15729_v19  ;;  %v24722_v20 = vld [vmem:[#allocation13_spill] sm:$0xff]  ;;  %v24724_v45 = vand.u32 4294901760, %v15889_v16 }
  0x87   :  { %v16205_v46 = vpack.c.bf16 %v24716_v51, %v24714_v2  ;;  %v12381_v2 = vpack.c.bf16 %v1484_v11, %v1477_v61  ;;  %v12183_v53 = vpack.c.bf16 %v24722_v20, %v24721_v7  ;;  %v24725_v4 = vand.u32 4294901760, %v15894_v18  ;;  %v24727_v11 = vld [vmem:[#allocation55_spill] sm:$0xff] }
  0x88   :  { %24710 = vst [vmem:[#allocation94_spill] sm:$0xff] %v16193_v15  ;;  %v24718_v15 = vand.u32 4294901760, %v15747_v5  ;;  %12181 = vmatpush1.bf16.msra.mxu0 %v12180_v25  ;;  %v24726_v51 = vand.u32 4294901760, %v15918_v22  ;;  %v24729_v61 = vld [vmem:[#allocation19_spill] sm:$0xff]  ;;  %v12186_v10 = vpack.c.bf16 %v14965_v55, %v14963_v54  ;;  %v24730_v38 = vand.u32 4294901760, %v15957_v23 }
  0x89   :  { %12182 = vmatprep.subr.bf16.mxu0 %v24480_v34  ;;  %12382 = vmatpush1.bf16.msra.mxu1 %v12381_v2  ;;  %v12384_v25 = vpack.c.bf16 %v24729_v61, %v24728_v63  ;;  %v12387_v54 = vpack.c.bf16 %v15055_v27, %v15053_v24  ;;  %v12189_v55 = vpack.c.bf16 %v15092_v43, %v15074_v30  ;;  %v24735_v30 = vld [vmem:[#allocation57_spill] sm:$0xff] }
  0x8a   :  { %v16212_v37 = vpack.c.bf16 %v24718_v15, %v24717_v28  ;;  %v16228_v15 = vpack.c.bf16 %v24724_v45, %v24723_v39  ;;  %v16234_v28 = vpack.c.bf16 %v24726_v51, %v24725_v4  ;;  %12383 = vmatprep.subr.bf16.mxu1 %v24480_v34  ;;  %v24731_v39 = vand.u32 4294901760, %v15959_v50  ;;  %v24733_v51 = vld [vmem:[#allocation73_spill] sm:$0xff] }
  0x8b   :  { %523 = vmatmul.mubr.f32.vlgmr.msra.gmra.mrb[0].mxu0 %v24727_v11  ;;  %v24732_v4 = vand.u32 4294901760, %v15979_v44  ;;  %v12390_v24 = vpack.c.bf16 %v24680_v42, %v15128_v62  ;;  %v12192_v27 = vpack.c.bf16 %v15181_v52, %v15162_v33  ;;  %v12393_v43 = vpack.c.bf16 %v15259_v6, %v15237_v56  ;;  %v24755_v42 = vld [vmem:[#allocation32_spill] sm:$0xff] }
  0x8c   :  { %12184 = vmatpush1.bf16.msra.mxu0 %v12183_v53  ;;  %v16247_v45 = vpack.c.bf16 %v24731_v39, %v24730_v38  ;;  %528 = vmatprep.mubr.f32.mxu0 %v24733_v51  ;;  %v12195_v33 = vpack.c.bf16 %v15290_v29, %v15272_v3  ;;  %v12396_v62 = vpack.c.bf16 %v24694_v60, %v24692_v31  ;;  %v24753_v60 = vld [vmem:[#allocation28_spill] sm:$0xff]  ;;  %v24764_v53 = vld [vmem:[#allocation46_spill] sm:$0xff] }
  0x8d   :  { %v16251_v2 = vpack.c.bf16 %v1482_v32, %v24732_v4  ;;  %12185 = vmatprep.subr.bf16.mxu0 %v24480_v34  ;;  %1509 = vmatmul.mubr.f32.vlgmr.msra.gmra.mrb[0].mxu1 %v24727_v11  ;;  %v24734_v32 = vld [vmem:[#allocation72_spill] sm:$0xff]  ;;  %v12198_v6 = vpack.c.bf16 %v24698_v14, %v15362_v8  ;;  %v12399_v52 = vpack.c.bf16 %v15452_v35, %v15432_v40  ;;  %v24739_v35 = vld [vmem:[#allocation75_spill] sm:$0xff]  ;;  %v24757_v14 = vld [vmem:[#allocation33_spill] sm:$0xff] }
  0x8e   :  { %12385 = vmatpush1.bf16.msra.mxu1 %v12384_v25  ;;  %1514 = vmatprep.mubr.f32.mxu1 %v24733_v51  ;;  %v12201_v3 = vpack.c.bf16 %v15514_v41, %v24704_v58  ;;  %v12402_v56 = vpack.c.bf16 %v15573_v47, %v15549_v57  ;;  %v12204_v29 = vpack.c.bf16 %v15666_v36, %v15652_v49  ;;  %v24758_v31 = vld [vmem:[#allocation36_spill] sm:$0xff]  ;;  %v24760_v58 = vld [vmem:[#allocation39_spill] sm:$0xff]  ;;  %v24774_v4 = vld [vmem:[#allocation62_spill] sm:$0xff] }
  0x8f   :  { %12386 = vmatprep.subr.bf16.mxu1 %v24480_v34  ;;  %530 = vmatmul.mubr.f32.gmra.mrb[2].mxu0 %v24734_v32  ;;  %v12405_v8 = vpack.c.bf16 %v24715_v12, %v24713_v13  ;;  %v12207_v41 = vpack.c.bf16 %v15747_v5, %v15729_v19  ;;  %v12408_v57 = vpack.c.bf16 %v15860_v59, %v15825_v17  ;;  %v24742_v5 = vld [vmem:[#allocation74_spill] sm:$0xff]  ;;  %v24743_v17 = vld [vmem:[#allocation80_spill] sm:$0xff]  ;;  %v24751_v13 = vld [vmem:[#allocation27_spill] sm:$0xff] }
  0x90   :  { %12187 = vmatpush1.bf16.msra.mxu0 %v12186_v10  ;;  %535 = vmatprep.mubr.f32.mxu0 %v16028_v1  ;;  %v12210_v49 = vpack.c.bf16 %v15889_v16, %v15870_v0  ;;  %v12411_v47 = vpack.c.bf16 %v15918_v22, %v15894_v18  ;;  %v12213_v19 = vpack.c.bf16 %v15959_v50, %v15957_v23  ;;  %v24736_v0 = vld [vmem:[#allocation59_spill] sm:$0xff]  ;;  %v24737_v22 = vmov 1.0|1.0   ;;  %v24747_v23 = vld [vmem:[#allocation81_spill] sm:$0xff]  ;;  %v24748_v50 = vld [vmem:[#allocation58_spill] sm:$0xff] }
  0x91   :  { %12188 = vmatprep.subr.bf16.mxu0 %v24480_v34  ;;  %1516 = vmatmul.mubr.f32.gmra.mrb[2].mxu1 %v24734_v32  ;;  %v12414_v40 = vpack.c.bf16 %v15990_v26, %v15979_v44  ;;  %v24745_v16 = vld [vmem:[#allocation23_spill] sm:$0xff]  ;;  %v24749_v44 = vld [vmem:[#allocation24_spill] sm:$0xff]  ;;  %vm24752_vm0 = vnez %v24751_v13  ;;  %vm24754_vm15 = vnez %v24753_v60  ;;  %vm24756_vm6 = vnez %v24755_v42  ;;  %v24762_v12 = vld [vmem:[#allocation42_spill] sm:$0xff] }
  0x92   :  { %12388 = vmatpush1.bf16.msra.mxu1 %v12387_v54  ;;  %1521 = vmatprep.mubr.f32.mxu1 %v16028_v1  ;;  %vm24746_vm9 = vnez %v24745_v16  ;;  %vm24750_vm5 = vnez %v24749_v44  ;;  %vm24759_vm12 = vnez %v24758_v31  ;;  %vm24761_vm4 = vnez %v24760_v58  ;;  %v24766_v25 = vld [vmem:[#allocation47_spill] sm:$0xff]  ;;  %v24770_v38 = vld [vmem:[#allocation56_spill] sm:$0xff]  ;;  %v24776_v54 = vld [vmem:[#allocation66_spill] sm:$0xff] }
  0x93   :  { %12389 = vmatprep.subr.bf16.mxu1 %v24480_v34  ;;  %537 = vmatmul.mubr.f32.gmra.mrb[4].mxu0 %v16030_v9  ;;  %vm24763_vm2 = vnez %v24762_v12  ;;  %v24768_v10 = vld [vmem:[#allocation51_spill] sm:$0xff]  ;;  %v24772_v39 = vld [vmem:[#allocation60_spill] sm:$0xff]  ;;  %v16568_v36 = vld [vmem:[%s23529_s0 + $0x2] ss:$0 sm:$0xff]  ;;  %v24812_v60 = vmov 0  ;;  %v24814_v42 = vmov 0 }
  0x94   :  { %12190 = vmatpush1.bf16.msra.mxu0 %v12189_v55  ;;  %652 = vmatprep.mubr.f32.mxu0 %v24735_v30  ;;  %v24777_v55 = vld [vmem:[#allocation68_spill] sm:$0xff]  ;;  %v24808_v16 = vld [vmem:[#allocation6_spill] sm:$0xff]  ;;  %v24810_v13 = vld [vmem:[#allocation7_spill] sm:$0xff] }
  0x95   :  { %12191 = vmatprep.subr.bf16.mxu0 %v24480_v34  ;;  %1523 = vmatmul.mubr.f32.gmra.mrb[4].mxu1 %v16030_v9  ;;  %v24805_v18 = vld [vmem:[#allocation8_spill] sm:$0xff]  ;;  %v16585_v44 = vld [vmem:[%s23529_s0 + $0x3] ss:$0 sm:$0xff] }
  0x96   :  { %12391 = vmatpush1.bf16.msra.mxu1 %v12390_v24  ;;  %1638 = vmatprep.mubr.f32.mxu1 %v24735_v30  ;;  %v24778_v24 = vld [vmem:[#allocation67_spill] sm:$0xff] }
  0x97   :  { %12392 = vmatprep.subr.bf16.mxu1 %v24480_v34 }
  0x98   :  { %12193 = vmatpush1.bf16.msra.mxu0 %v12192_v27  ;;  %v24779_v27 = vand.u32 4294901760, %v24721_v7  ;;  %v24786_v7 = vld [vmem:[#allocation77_spill] sm:$0xff] }
  0x99   :  { %12194 = vmatprep.subr.bf16.mxu0 %v24480_v34 }
  0x9a   :  { %12394 = vmatpush1.bf16.msra.mxu1 %v12393_v43  ;;  %v24780_v43 = vand.u32 4294901760, %v24722_v20  ;;  %v24787_v20 = vld [vmem:[#allocation88_spill] sm:$0xff] }
  0x9b   :  { %12395 = vmatprep.subr.bf16.mxu1 %v24480_v34 }
  0x9c   :  { %12196 = vmatpush1.bf16.msra.mxu0 %v12195_v33  ;;  %v12250_v33 = vpack.c.bf16 %v24780_v43, %v24779_v27  ;;  %v24797_v27 = vld [vmem:[#allocation93_spill] sm:$0xff]  ;;  %v24798_v43 = vld [vmem:[#allocation38_spill] sm:$0xff] }
  0x9d   :  { %12197 = vmatprep.subr.bf16.mxu0 %v24480_v34 }
  0x9e   :  { %12397 = vmatpush1.bf16.msra.mxu1 %v12396_v62  ;;  %v24781_v62 = vld [vmem:[#allocation71_spill] sm:$0xff] }
  0x9f   :  { %12398 = vmatprep.subr.bf16.mxu1 %v24480_v34 }
  0xa0   :  { %12199 = vmatpush1.bf16.msra.mxu0 %v12198_v6  ;;  %v24782_v6 = vld [vmem:[#allocation70_spill] sm:$0xff] }
  0xa1   :  { %12200 = vmatprep.subr.bf16.mxu0 %v24480_v34 }
  0xa2   :  { %12400 = vmatpush1.bf16.msra.mxu1 %v12399_v52  ;;  %v24783_v52 = vld [vmem:[#allocation64_spill] sm:$0xff] }
  0xa3   :  { %12401 = vmatprep.subr.bf16.mxu1 %v24480_v34 }
  0xa4   :  { %12202 = vmatpush1.bf16.msra.mxu0 %v12201_v3  ;;  %v24784_v3 = vand.u32 4294901760, %v24728_v63  ;;  %v24788_v63 = vld [vmem:[#allocation76_spill] sm:$0xff] }
  0xa5   :  { %12203 = vmatprep.subr.bf16.mxu0 %v24480_v34 }
  0xa6   :  { %12403 = vmatpush1.bf16.msra.mxu1 %v12402_v56  ;;  %v24785_v56 = vand.u32 4294901760, %v24729_v61  ;;  %v24789_v61 = vld [vmem:[#allocation84_spill] sm:$0xff] }
  0xa7   :  { %12404 = vmatprep.subr.bf16.mxu1 %v24480_v34 }
  0xa8   :  { %12205 = vmatpush1.bf16.msra.mxu0 %v12204_v29  ;;  %v12451_v29 = vpack.c.bf16 %v24785_v56, %v24784_v3  ;;  %v24800_v3 = vld [vmem:[#allocation44_spill] sm:$0xff] }
  0xa9   :  { %12206 = vmatprep.subr.bf16.mxu0 %v24480_v34  ;;  %v24801_v56 = vld [vmem:[#allocation48_spill] sm:$0xff] }
  0xaa   :  { %12406 = vmatpush1.bf16.msra.mxu1 %v12405_v8  ;;  %v24790_v8 = vld [vmem:[#allocation89_spill] sm:$0xff] }
  0xab   :  { %12407 = vmatprep.subr.bf16.mxu1 %v24480_v34 }
  0xac   :  { %12208 = vmatpush1.bf16.msra.mxu0 %v12207_v41  ;;  %v24791_v41 = vld [vmem:[#allocation90_spill] sm:$0xff] }
  0xad   :  { %12209 = vmatprep.subr.bf16.mxu0 %v24480_v34 }
  0xae   :  { %12409 = vmatpush1.bf16.msra.mxu1 %v12408_v57  ;;  %v24792_v57 = vld [vmem:[#allocation85_spill] sm:$0xff] }
  0xaf   :  { %12410 = vmatprep.subr.bf16.mxu1 %v24480_v34 }
  0xb0   :  { %12211 = vmatpush1.bf16.msra.mxu0 %v12210_v49  ;;  %v24793_v49 = vld [vmem:[#allocation54_spill] sm:$0xff] }
  0xb1   :  { %12212 = vmatprep.subr.bf16.mxu0 %v24480_v34 }
  0xb2   :  { %12412 = vmatpush1.bf16.msra.mxu1 %v12411_v47  ;;  %v24794_v47 = vld [vmem:[#allocation31_spill] sm:$0xff] }
  0xb3   :  { %12413 = vmatprep.subr.bf16.mxu1 %v24480_v34 }
  0xb4   :  { %12214 = vmatpush1.bf16.msra.mxu0 %v12213_v19  ;;  %v24795_v19 = vld [vmem:[#allocation91_spill] sm:$0xff] }
  0xb5   :  { %12215 = vmatprep.subr.bf16.mxu0 %v24480_v34 }
  0xb6   :  { %12415 = vmatpush1.bf16.msra.mxu1 %v12414_v40  ;;  %v24796_v40 = vld [vmem:[#allocation92_spill] sm:$0xff] }
  0xb7   :  { %655 = vmatmul.mubr.f32.vlgmr.msra.gmra.mrb[0].mxu0 %v24736_v0  ;;  %12416 = vmatprep.subr.bf16.mxu1 %v24480_v34 }
  0xb8   :  { %12217 = vmatpush1.bf16.msk.msra.mxu0 %vm14773_vm10, %v24737_v22  ;;  %661 = vmatprep.mubr.f32.mxu0 %v24739_v35 }
  0xb9   :  { %12218 = vmatprep.subr.bf16.mxu0 %v24480_v34  ;;  %1641 = vmatmul.mubr.f32.vlgmr.msra.gmra.mrb[0].mxu1 %v24736_v0 }
  0xba   :  { %12418 = vmatpush1.bf16.msk.msra.mxu1 %vm14800_vm1, %v24737_v22  ;;  %1647 = vmatprep.mubr.f32.mxu1 %v24739_v35 }
  0xbb   :  { %12419 = vmatprep.subr.bf16.mxu1 %v24480_v34  ;;  %664 = vmatmul.mubr.f32.gmra.mrb[2].mxu0 %v24742_v5 }
  0xbc   :  { %12220 = vmatpush1.bf16.msk.msra.mxu0 %vm14839_vm8, %v24737_v22  ;;  %670 = vmatprep.mubr.f32.mxu0 %v24743_v17 }
  0xbd   :  { %12221 = vmatprep.subr.bf16.mxu0 %v24480_v34  ;;  %1650 = vmatmul.mubr.f32.gmra.mrb[2].mxu1 %v24742_v5  ;;  %v25030_v5 = vmov 0 }
  0xbe   :  { %12421 = vmatpush1.bf16.msk.msra.mxu1 %vm14871_vm3, %v24737_v22  ;;  %1656 = vmatprep.mubr.f32.mxu1 %v24743_v17 }
  0xbf   :  { %12422 = vmatprep.subr.bf16.mxu1 %v24480_v34  ;;  %673 = vmatmul.mubr.f32.gmra.mrb[4].mxu0 %v24747_v23 }
  0xc0   :  { %12223 = vmatpush1.bf16.msk.msra.mxu0 %vm24746_vm9, %v24737_v22  ;;  %767 = vmatprep.mubr.f32.mxu0 %v24748_v50 }
  0xc1   :  { %12224 = vmatprep.subr.bf16.mxu0 %v24480_v34  ;;  %1659 = vmatmul.mubr.f32.gmra.mrb[4].mxu1 %v24747_v23 }
  0xc2   :  { %12424 = vmatpush1.bf16.msk.msra.mxu1 %vm24750_vm5, %v24737_v22  ;;  %1753 = vmatprep.mubr.f32.mxu1 %v24748_v50 }
  0xc3   :  { %12425 = vmatprep.subr.bf16.mxu1 %v24480_v34 }
  0xc4   :  { %12226 = vmatpush1.bf16.msk.msra.mxu0 %vm24752_vm0, %v24737_v22 }
  0xc5   :  { %12227 = vmatprep.subr.bf16.mxu0 %v24480_v34 }
  0xc6   :  { %12427 = vmatpush1.bf16.msk.msra.mxu1 %vm24754_vm15, %v24737_v22 }
  0xc7   :  { %12428 = vmatprep.subr.bf16.mxu1 %v24480_v34 }
  0xc8   :  { %12229 = vmatpush1.bf16.msk.msra.mxu0 %vm24756_vm6, %v24737_v22 }
  0xc9   :  { %12230 = vmatprep.subr.bf16.mxu0 %v24480_v34 }
  0xca   :  { %12430 = vmatpush1.bf16.msk.msra.mxu1 %vm15206_vm7, %v24737_v22  ;;  %vm24765_vm7 = vnez %v24764_v53 }
  0xcb   :  { %12431 = vmatprep.subr.bf16.mxu1 %v24480_v34 }
  0xcc   :  { %12232 = vmatpush1.bf16.msk.msra.mxu0 %vm24759_vm12, %v24737_v22  ;;  %vm24767_vm12 = vnez %v24766_v25 }
  0xcd   :  { %12233 = vmatprep.subr.bf16.mxu0 %v24480_v34 }
  0xce   :  { %12433 = vmatpush1.bf16.msk.msra.mxu1 %vm24761_vm4, %v24737_v22  ;;  %vm24769_vm4 = vnez %v24768_v10  ;;  %v24827_v10 = vmov 0 }
  0xcf   :  { %12434 = vmatprep.subr.bf16.mxu1 %v24480_v34 }
  0xd0   :  { %12235 = vmatpush1.bf16.msk.msra.mxu0 %vm24763_vm2, %v24737_v22  ;;  %vm24771_vm2 = vnez %v24770_v38  ;;  %v24829_v38 = vld [vmem:[#allocation15_spill] sm:$0xff] }
  0xd1   :  { %12236 = vmatprep.subr.bf16.mxu0 %v24480_v34 }
  0xd2   :  { %12436 = vmatpush1.bf16.msk.msra.mxu1 %vm24765_vm7, %v24737_v22  ;;  %vm24773_vm7 = vnez %v24772_v39  ;;  %v24830_v39 = vmov 0 }
  0xd3   :  { %12437 = vmatprep.subr.bf16.mxu1 %v24480_v34 }
  0xd4   :  { %12238 = vmatpush1.bf16.msk.msra.mxu0 %vm24767_vm12, %v24737_v22  ;;  %vm24775_vm12 = vnez %v24774_v4  ;;  %v24836_v4 = vmov 0 }
  0xd5   :  { %12239 = vmatprep.subr.bf16.mxu0 %v24480_v34 }
  0xd6   :  { %12439 = vmatpush1.bf16.msk.msra.mxu1 %vm24769_vm4, %v24737_v22 }
  0xd7   :  { %12440 = vmatprep.subr.bf16.mxu1 %v24480_v34 }
  0xd8   :  { %12241 = vmatpush1.bf16.msk.msra.mxu0 %vm24771_vm2, %v24737_v22 }
  0xd9   :  { %12242 = vmatprep.subr.bf16.mxu0 %v24480_v34 }
  0xda   :  { %12442 = vmatpush1.bf16.msk.msra.mxu1 %vm24773_vm7, %v24737_v22 }
  0xdb   :  { %12443 = vmatprep.subr.bf16.mxu1 %v24480_v34 }
  0xdc   :  { %12244 = vmatpush1.bf16.msk.msra.mxu0 %vm24775_vm12, %v24737_v22 }
  0xdd   :  { %12245 = vmatprep.subr.bf16.mxu0 %v24480_v34 }
  0xde   :  { %12445 = vmatpush1.bf16.msk.msra.mxu1 %vm15773_vm14, %v24737_v22 }
  0xdf   :  { %12446 = vmatprep.subr.bf16.mxu1 %v24480_v34 }
  0xe0   :  { %12248 = vmatpush1.bf16.msk.msra.mxu0 %vm15834_vm13, %v24777_v55 }
  0xe1   :  { %12249 = vmatprep.subr.bf16.mxu0 %v24480_v34 }
  0xe2   :  { %12449 = vmatpush1.bf16.msk.msra.mxu1 %vm15879_vm11, %v24781_v62  ;;  %vm3061_vm11 = vcmp.eq.s32.totalorder %v24810_v13, %v16585_v44 }
  0xe3   :  { %771 = vmatmul.mubr.f32.vlgmr.msra.gmra.mrb[0].mxu0 %v24783_v52  ;;  %12450 = vmatprep.subr.bf16.mxu1 %v24480_v34 }
  0xe4   :  { %12251 = vmatpush1.bf16.msra.mxu0 %v12250_v33  ;;  %778 = vmatprep.mubr.f32.mxu0 %v24786_v7  ;;  %v24799_v33 = vld [vmem:[#allocation41_spill] sm:$0xff] }
  0xe5   :  { %12252 = vmatprep.subr.bf16.mxu0 %v24480_v34  ;;  %1757 = vmatmul.mubr.f32.vlgmr.msra.gmra.mrb[0].mxu1 %v24783_v52  ;;  %v24956_v52 = vmov 0 }
  0xe6   :  { %12452 = vmatpush1.bf16.msra.mxu1 %v12451_v29  ;;  %1764 = vmatprep.mubr.f32.mxu1 %v24786_v7  ;;  %v24802_v29 = vld [vmem:[#allocation94_spill] sm:$0xff]  ;;  %v24953_v7 = vld [vmem:[#allocation37_spill] sm:$0xff] }
  0xe7   :  { %12453 = vmatprep.subr.bf16.mxu1 %v24480_v34  ;;  %782 = vmatmul.mubr.f32.gmra.mrb[2].mxu0 %v24788_v63 }
  0xe8   :  { %12254 = vmatpush1.bf16.msra.mxu0 %v24787_v20  ;;  %789 = vmatprep.mubr.f32.mxu0 %v24789_v61  ;;  %v24833_v20 = vmov 0 }
  0xe9   :  { %12255 = vmatprep.subr.bf16.mxu0 %v24480_v34  ;;  %1768 = vmatmul.mubr.f32.gmra.mrb[2].mxu1 %v24788_v63 }
  0xea   :  { %12455 = vmatpush1.bf16.msra.mxu1 %v24790_v8  ;;  %1775 = vmatprep.mubr.f32.mxu1 %v24789_v61  ;;  %v24835_v8 = vld [vmem:[#allocation16_spill] sm:$0xff] }
  0xeb   :  { %12456 = vmatprep.subr.bf16.mxu1 %v24480_v34  ;;  %793 = vmatmul.mubr.f32.gmra.mrb[4].mxu0 %v24792_v57 }
  0xec   :  { %12257 = vmatpush1.bf16.msra.mxu0 %v24791_v41  ;;  %929 = vmatprep.mubr.f32.mxu0 %v24793_v49  ;;  %v24838_v41 = vmov 0 }
  0xed   :  { %12258 = vmatprep.subr.bf16.mxu0 %v24480_v34  ;;  %1779 = vmatmul.mubr.f32.gmra.mrb[4].mxu1 %v24792_v57  ;;  %v24940_v57 = vmov 0 }
  0xee   :  { %12458 = vmatpush1.bf16.msra.mxu1 %v24794_v47  ;;  %1915 = vmatprep.mubr.f32.mxu1 %v24793_v49  ;;  %v24938_v47 = vld [vmem:[#allocation63_spill] sm:$0xff] }
  0xef   :  { %12459 = vmatprep.subr.bf16.mxu1 %v24480_v34 }
  0xf0   :  { %12260 = vmatpush1.bf16.msra.mxu0 %v24795_v19 }
  0xf1   :  { %12261 = vmatprep.subr.bf16.mxu0 %v24480_v34 }
  0xf2   :  { %12461 = vmatpush1.bf16.msra.mxu1 %v24796_v40  ;;  %v24846_v40 = vld [vmem:[#allocation21_spill] sm:$0xff] }
  0xf3   :  { %12462 = vmatprep.subr.bf16.mxu1 %v24480_v34 }
  0xf4   :  { %12263 = vmatpush1.bf16.msra.mxu0 %v24797_v27 }
  0xf5   :  { %12264 = vmatprep.subr.bf16.mxu0 %v24480_v34 }
  0xf6   :  { %12464 = vmatpush1.bf16.msra.mxu1 %v24798_v43  ;;  %v24853_v43 = vld [vmem:[#allocation22_spill] sm:$0xff] }
  0xf7   :  { %12465 = vmatprep.subr.bf16.mxu1 %v24480_v34 }
  0xf8   :  { %12266 = vmatpush1.bf16.msra.mxu0 %v24799_v33 }
  0xf9   :  { %12267 = vmatprep.subr.bf16.mxu0 %v24480_v34 }
  0xfa   :  { %12467 = vmatpush1.bf16.msra.mxu1 %v24800_v3  ;;  %v24862_v3 = vmov 0.0  }
  0xfb   :  { %12468 = vmatprep.subr.bf16.mxu1 %v24480_v34 }
  0xfc   :  { %12269 = vmatpush1.bf16.msra.mxu0 %v24801_v56 }
  0xfd   :  { %12270 = vmatprep.subr.bf16.mxu0 %v24480_v34 }
  0xfe   :  { %12470 = vmatpush1.bf16.msra.mxu1 %v24802_v29  ;;  %v24864_v29 = vmov 0 }
  0xff   :  { %12471 = vmatprep.subr.bf16.mxu1 %v24480_v34 }
 0x100   :  { %12272 = vmatpush1.bf16.msra.mxu0 %v16199_v48  ;;  %v38_v48 = vld [vmem:[%s23531_s2] sm:$0xff] }
 0x101   :  { %12273 = vmatprep.subr.bf16.mxu0 %v24480_v34 }
 0x102   :  { %12473 = vmatpush1.bf16.msra.mxu1 %v16205_v46  ;;  %v23759_v46 = vmov 0  }
 0x103   :  { %12474 = vmatprep.subr.bf16.mxu1 %v24480_v34  ;;  %14502 = vset.pattern.permute.xlu0 %v23759_v46 }
 0x104   :  { %12275 = vmatpush1.bf16.msra.mxu0 %v16212_v37  ;;  %v40_v37 = vld [vmem:[%s23531_s2 + $0x10] sm:$0x1]  ;;  %187 = vperm.xlu0 %14502, %v38_v48   ;;  %v24866_v48 = vld [vmem:[#allocation25_spill] sm:$0xff] }
 0x105   :  { %12276 = vmatprep.subr.bf16.mxu0 %v24480_v34  ;;  %14503 = vset.pattern.permute.xlu1 %v23759_v46 }
 0x106   :  { %12476 = vmatpush1.bf16.msra.mxu1 %v16218_v21  ;;  %v39_v21 = vld [vmem:[%s23531_s2 + $0x8] sm:$0xff]  ;;  %197 = vperm.xlu1 %14503, %v40_v37  }
 0x107   :  { %12477 = vmatprep.subr.bf16.mxu1 %v24480_v34 }
 0x108   :  { %12278 = vmatpush1.bf16.msra.mxu0 %v16228_v15  ;;  %v2066_v15 = vld [vmem:[%s23529_s0 + $0xc] sm:$0x1]  ;;  %192 = vperm.xlu0 %14502, %v39_v21   ;;  %v24876_v21 = vld [vmem:[#allocation26_spill] sm:$0xff] }
 0x109   :  { %12279 = vmatprep.subr.bf16.mxu0 %v24480_v34 }
 0x10a   :  { %12479 = vmatpush1.bf16.msra.mxu1 %v16234_v28  ;;  %v2093_v28 = vadd.s32 164, %v2066_v15 }
 0x10b   :  { %12480 = vmatprep.subr.bf16.mxu1 %v24480_v34 }
 0x10c   :  { %12281 = vmatpush1.bf16.msra.mxu0 %v16247_v45  ;;  %v3055_v45 = vld [vmem:[%s23529_s0 + $0xd] sm:$0x1]  ;;  %v16560_v26 = vrot.slane %v2093_v28, %v24805_v18  ;;  %v24880_v28 = vmov 0 }
 0x10d   :  { %12282 = vmatprep.subr.bf16.mxu0 %v24480_v34 }
 0x10e   :  { %12482 = vmatpush1.bf16.msra.mxu1 %v16251_v2  ;;  %v3082_v2 = vadd.s32 164, %v3055_v45 }
 0x10f   :  { %931 = vmatmul.mubr.f32.vlgmr.msra.gmra.mrb[0].mxu0 %v24727_v11  ;;  %12483 = vmatprep.subr.bf16.mxu1 %v24480_v34 }
 0x110   :  { %12284 = vmatpush1.bf16.msk.msra.mxu0 %vm14773_vm10, %v24737_v22  ;;  %936 = vmatprep.mubr.f32.mxu0 %v24733_v51  ;;  %vm24803_vm10 = vnez %v24757_v14  ;;  %v16576_v59 = vrot.slane %v3082_v2, %v24805_v18  ;;  %v24816_v14 = vld [vmem:[#allocation9_spill] sm:$0xff] }
 0x111   :  { %12285 = vmatprep.subr.bf16.mxu0 %v24480_v34  ;;  %1917 = vmatmul.mubr.f32.vlgmr.msra.gmra.mrb[0].mxu1 %v24727_v11 }
 0x112   :  { %12485 = vmatpush1.bf16.msk.msra.mxu1 %vm14800_vm1, %v24737_v22  ;;  %1922 = vmatprep.mubr.f32.mxu1 %v24733_v51  ;;  %vm24804_vm1 = vnez %v24758_v31  ;;  %v24817_v31 = vmov 0 }
 0x113   :  { %12486 = vmatprep.subr.bf16.mxu1 %v24480_v34  ;;  %938 = vmatmul.mubr.f32.gmra.mrb[2].mxu0 %v24734_v32 }
 0x114   :  { %12287 = vmatpush1.bf16.msk.msra.mxu0 %vm14839_vm8, %v24737_v22  ;;  %943 = vmatprep.mubr.f32.mxu0 %v16028_v1  ;;  %vm24806_vm8 = vnez %v24760_v58  ;;  %v24819_v58 = vld [vmem:[#allocation10_spill] sm:$0xff] }
 0x115   :  { %12288 = vmatprep.subr.bf16.mxu0 %v24480_v34  ;;  %1924 = vmatmul.mubr.f32.gmra.mrb[2].mxu1 %v24734_v32 }
 0x116   :  { %12488 = vmatpush1.bf16.msk.msra.mxu1 %vm14871_vm3, %v24737_v22  ;;  %1929 = vmatprep.mubr.f32.mxu1 %v16028_v1  ;;  %vm24807_vm3 = vnez %v24762_v12  ;;  %v24820_v12 = vmov 0 }
 0x117   :  { %12489 = vmatprep.subr.bf16.mxu1 %v24480_v34  ;;  %945 = vmatmul.mubr.f32.gmra.mrb[4].mxu0 %v16030_v9 }
 0x118   :  { %12290 = vmatpush1.bf16.msk.msra.mxu0 %vm24746_vm9, %v24737_v22  ;;  %1037 = vmatprep.mubr.f32.mxu0 %v24793_v49  ;;  %vm2071_vm9 = vcmp.eq.s32.totalorder %v24808_v16, %v16568_v36 }
 0x119   :  { %12291 = vmatprep.subr.bf16.mxu0 %v24480_v34  ;;  %1931 = vmatmul.mubr.f32.gmra.mrb[4].mxu1 %v16030_v9 }
 0x11a   :  { %12491 = vmatpush1.bf16.msk.msra.mxu1 %vm24750_vm5, %v24737_v22  ;;  %2023 = vmatprep.mubr.f32.mxu1 %v24793_v49  ;;  %vm2098_vm5 = vcmp.eq.s32.totalorder %v24808_v16, %v16560_v26 }
 0x11b   :  { %12492 = vmatprep.subr.bf16.mxu1 %v24480_v34 }
 0x11c   :  { %12293 = vmatpush1.bf16.msk.msra.mxu0 %vm24752_vm0, %v24737_v22  ;;  %vm24809_vm0 = vnez %v24764_v53  ;;  %v24823_v53 = vmov 0 }
 0x11d   :  { %12294 = vmatprep.subr.bf16.mxu0 %v24480_v34 }
 0x11e   :  { %12494 = vmatpush1.bf16.msk.msra.mxu1 %vm24754_vm15, %v24737_v22  ;;  %vm2072_vm15 = vcmp.eq.s32.totalorder %v24810_v13, %v16568_v36 }
 0x11f   :  { %12495 = vmatprep.subr.bf16.mxu1 %v24480_v34 }
 0x120   :  { %12296 = vmatpush1.bf16.msk.msra.mxu0 %vm24756_vm6, %v24737_v22  ;;  %vm2099_vm6 = vcmp.eq.s32.totalorder %v24810_v13, %v16560_v26 }
 0x121   :  { %12297 = vmatprep.subr.bf16.mxu0 %v24480_v34 }
 0x122   :  { %12497 = vmatpush1.bf16.msk.msra.mxu1 %vm24803_vm10, %v24737_v22  ;;  %vm24811_vm10 = vnez %v24766_v25 }
 0x123   :  { %12498 = vmatprep.subr.bf16.mxu1 %v24480_v34 }
 0x124   :  { %12299 = vmatpush1.bf16.msk.msra.mxu0 %vm24804_vm1, %v24737_v22  ;;  %vm16599_vm1 = vmor %vm2071_vm9, %vm2098_vm5  ;;  %vm2073_vm9 = vcmp.eq.s32.totalorder %v24816_v14, %v16568_v36  ;;  %vm2100_vm5 = vcmp.eq.s32.totalorder %v24816_v14, %v16560_v26 }
 0x125   :  { %12300 = vmatprep.subr.bf16.mxu0 %v24480_v34  ;;  %v24813_v60 = vsel %vm16599_vm1, 4294967295, %v24812_v60  ;;  %vm16651_vm14 = vmor %vm2073_vm9, %vm2100_vm5  ;;  %vm2102_vm9 = vcmp.eq.s32.totalorder %v24829_v38, %v16560_v26 }
 0x126   :  { %12500 = vmatpush1.bf16.msk.msra.mxu1 %vm24806_vm8, %v24737_v22  ;;  %vm3060_vm8 = vcmp.eq.s32.totalorder %v24808_v16, %v16585_v44 }
 0x127   :  { %12501 = vmatprep.subr.bf16.mxu1 %v24480_v34 }
 0x128   :  { %12302 = vmatpush1.bf16.msk.msra.mxu0 %vm24807_vm3, %v24737_v22  ;;  %vm3087_vm3 = vcmp.eq.s32.totalorder %v24808_v16, %v16576_v59 }
 0x129   :  { %12303 = vmatprep.subr.bf16.mxu0 %v24480_v34 }
 0x12a   :  { %12503 = vmatpush1.bf16.msk.msra.mxu1 %vm24809_vm0, %v24737_v22  ;;  %vm16607_vm0 = vmor %vm2072_vm15, %vm2099_vm6  ;;  %vm2074_vm6 = vcmp.eq.s32.totalorder %v24819_v58, %v16568_v36 }
 0x12b   :  { %12504 = vmatprep.subr.bf16.mxu1 %v24480_v34  ;;  %v24815_v42 = vsel %vm16607_vm0, 4294967295, %v24814_v42  ;;  %vm16626_vm15 = vmor %vm3060_vm8, %vm3087_vm3  ;;  %vm3062_vm8 = vcmp.eq.s32.totalorder %v24816_v14, %v16585_v44  ;;  %vm3089_vm3 = vcmp.eq.s32.totalorder %v24816_v14, %v16576_v59 }
 0x12c   :  { %12305 = vmatpush1.bf16.msk.msra.mxu0 %vm24811_vm10, %v24737_v22  ;;  %vm3088_vm10 = vcmp.eq.s32.totalorder %v24810_v13, %v16576_v59  ;;  %v24818_v31 = vsel %vm16626_vm15, 4294967295, %v24817_v31  ;;  %vm16639_vm13 = vmpackc.low %vm16607_vm0, %vm16599_vm1  ;;  %vm3063_vm0 = vcmp.eq.s32.totalorder %v24819_v58, %v16585_v44  ;;  %v24926_v13 = vmov 0 }
 0x12d   :  { %12306 = vmatprep.subr.bf16.mxu0 %v24480_v34  ;;  %v24821_v12 = vsel %vm16639_vm13, 4294967295, %v24820_v12  ;;  %vm3090_vm13 = vcmp.eq.s32.totalorder %v24819_v58, %v16576_v59  ;;  %vm16682_vm5 = vmor %vm3062_vm8, %vm3089_vm3  ;;  %vm3091_vm8 = vcmp.eq.s32.totalorder %v24829_v38, %v16576_v59 }
 0x12e   :  { %12506 = vmatpush1.bf16.msk.msra.mxu1 %vm24769_vm4, %v24737_v22  ;;  %vm2101_vm4 = vcmp.eq.s32.totalorder %v24819_v58, %v16560_v26  ;;  %24822 = vst [vmem:[#allocation61_spill] sm:$0xff] %v24821_v12  ;;  %v24834_v20 = vsel %vm16682_vm5, 4294967295, %v24833_v20  ;;  %v24923_v58 = vld [vmem:[#allocation34_spill] sm:$0xff] }
 0x12f   :  { %12507 = vmatprep.subr.bf16.mxu1 %v24480_v34 }
 0x130   :  { %12308 = vmatpush1.bf16.msk.msra.mxu0 %vm24771_vm2, %v24737_v22  ;;  %vm16643_vm2 = vmor %vm3061_vm11, %vm3088_vm10  ;;  %vm2075_vm10 = vcmp.eq.s32.totalorder %v24829_v38, %v16568_v36 }
 0x131   :  { %12309 = vmatprep.subr.bf16.mxu0 %v24480_v34  ;;  %v24824_v53 = vsel %vm16643_vm2, 4294967295, %v24823_v53  ;;  %vm16662_vm11 = vmor %vm2074_vm6, %vm2101_vm4  ;;  %vm2076_vm6 = vcmp.eq.s32.totalorder %v24835_v8, %v16568_v36  ;;  %vm2103_vm4 = vcmp.eq.s32.totalorder %v24835_v8, %v16560_v26 }
 0x132   :  { %12509 = vmatpush1.bf16.msk.msra.mxu1 %vm24773_vm7, %v24737_v22  ;;  %v24828_v10 = vsel %vm16662_vm11, 4294967295, %v24827_v10  ;;  %vm16678_vm7 = vmpackc.low %vm16643_vm2, %vm16626_vm15  ;;  %vm3064_vm2 = vcmp.eq.s32.totalorder %v24829_v38, %v16585_v44  ;;  %vm24843_vm15 = vnez %v24776_v54  ;;  %v24848_v54 = vmov 0 }
 0x133   :  { %12510 = vmatprep.subr.bf16.mxu1 %v24480_v34  ;;  %v24831_v39 = vsel %vm16678_vm7, 4294967295, %v24830_v39  ;;  %vm16703_vm3 = vmpackc.low %vm16662_vm11, %vm16651_vm14  ;;  %vm2105_vm11 = vcmp.eq.s32.totalorder %v24853_v43, %v16560_v26 }
 0x134   :  { %12311 = vmatpush1.bf16.msk.msra.mxu0 %vm24775_vm12, %v24737_v22  ;;  %24832 = vst [vmem:[#allocation65_spill] sm:$0xff] %v24831_v39  ;;  %vm16691_vm12 = vmor %vm3063_vm0, %vm3090_vm13  ;;  %v24839_v41 = vsel %vm16703_vm3, 4294967295, %v24838_v41  ;;  %vm3065_vm13 = vcmp.eq.s32.totalorder %v24835_v8, %v16585_v44  ;;  %vm3092_vm0 = vcmp.eq.s32.totalorder %v24835_v8, %v16576_v59  ;;  %vm24847_vm3 = vnez %v24778_v24 }
 0x135   :  { %12312 = vmatprep.subr.bf16.mxu0 %v24480_v34  ;;  %v24837_v4 = vsel %vm16691_vm12, 4294967295, %v24836_v4  ;;  %24840 = vst [vmem:[#allocation12_spill] sm:$0xff] %v24839_v41  ;;  %vm16707_vm7 = vmor %vm2075_vm10, %vm2102_vm9  ;;  %vm2077_vm10 = vcmp.eq.s32.totalorder %v24846_v40, %v16568_v36  ;;  %vm2104_vm9 = vcmp.eq.s32.totalorder %v24846_v40, %v16560_v26  ;;  %v24856_v24 = vmov 0 }
 0x136   :  { %12512 = vmatpush1.bf16.msk.msra.mxu1 %vm24843_vm15, %v24737_v22  ;;  %vm16718_vm1 = vmor %vm2076_vm6, %vm2103_vm4  ;;  %vm2078_vm4 = vcmp.eq.s32.totalorder %v24853_v43, %v16568_v36  ;;  %v11227_v16 = vsel %vm16707_vm7, 1.0, %v24862_v3 }
 0x137   :  { %12513 = vmatprep.subr.bf16.mxu1 %v24480_v34  ;;  %vm16734_vm15 = vmpackc.low %vm16691_vm12, %vm16682_vm5  ;;  %vm24861_vm12 = vnez %v24782_v6  ;;  %v24869_v6 = vmov 0  ;;  %v11228_v18 = vsel %vm16718_vm1, 1.0, %v24862_v3  ;;  %v17121_v50 = vsub.f32 %v11227_v16, %v11227_v16 }
 0x138   :  { %12315 = vmatpush1.bf16.msk.msra.mxu0 %vm24847_vm3, %v24777_v55  ;;  %v24849_v54 = vsel %vm16734_vm15, 4294967295, %v24848_v54  ;;  %vm16738_vm6 = vmor %vm3064_vm2, %vm3091_vm8  ;;  %v24854_v55 = vmov 0  ;;  %vm24863_vm2 = vnez %v24813_v60  ;;  %v24883_v60 = vmov 0 }
 0x139   :  { %24850 = vst [vmem:[#allocation13_spill] sm:$0xff] %v24849_v54  ;;  %12517 = vmatprep.subr.bf16.mxu0 %v24480_v34  ;;  %vm16747_vm3 = vmor %vm3065_vm13, %vm3092_vm0  ;;  %v11223_v56 = vsel %vm24863_vm2, 1.0, %v24862_v3  ;;  %vm24868_vm0 = vnez %v24821_v12  ;;  %vm24873_vm2 = vcmp.eq.s32.totalorder %v24846_v40, %v16585_v44  ;;  %vm24882_vm13 = vnez %v24824_v53  ;;  %v24998_v54 = vld [vmem:[#allocation45_spill] sm:$0xff] }
 0x13a   :  { %v24855_v55 = vsel %vm16747_vm3, 4294967295, %v24854_v55  ;;  %vm16759_vm8 = vmpackc.low %vm16718_vm1, %vm16707_vm7  ;;  %12516 = vmatpush1.bf16.msk.msra.mxu1 %vm24861_vm12, %v24781_v62  ;;  %vm24867_vm12 = vnez %v24815_v42  ;;  %v16835_v45 = vsub.f32 %v11223_v56, %v11223_v56  ;;  %v11316_v2 = vsel %vm24882_vm13, 1.0, %v24862_v3 }
 0x13b   :  { %v24857_v24 = vsel %vm16759_vm8, 4294967295, %v24856_v24  ;;  %vm16763_vm5 = vmor %vm2077_vm10, %vm2104_vm9  ;;  %1039 = vmatmul.mubr.f32.vlgmr.msra.gmra.mrb[0].mxu0 %v24727_v11  ;;  %12718 = vmatprep.subr.bf16.mxu1 %v24480_v34  ;;  %v11224_v62 = vsel %vm24867_vm12, 1.0, %v24862_v3  ;;  %vm24887_vm12 = vcmp.eq.s32.totalorder %v24866_v48, %v16568_v36  ;;  %v11225_v53 = vsel %vm16651_vm14, 1.0, %v24862_v3 }
 0x13c   :  { %24858 = vst [vmem:[#allocation17_spill] sm:$0xff] %v24857_v24  ;;  %vm16778_vm10 = vmor %vm2078_vm4, %vm2105_vm11  ;;  %12519 = vmatpush1.bf16.msk.msra.mxu0 %vm24868_vm0, %v24737_v22  ;;  %vm24872_vm4 = vcmp.eq.s32.totalorder %v24846_v40, %v16576_v59  ;;  %vm24877_vm0 = vnez %v24818_v31  ;;  %1044 = vmatprep.mubr.f32.mxu0 %v24733_v51  ;;  %v16862_v31 = vsub.f32 %v11224_v62, %v11224_v62  ;;  %v24893_v56 = vmov 0  ;;  %v24895_v62 = vld [vmem:[#allocation29_spill] sm:$0xff] }
 0x13d   :  { %v24865_v29 = vsel %vm16778_vm10, 4294967295, %v24864_v29  ;;  %vm16797_vm11 = vmpackc.low %vm16747_vm3, %vm16738_vm6  ;;  %v11315_v15 = vsel %vm24877_vm0, 1.0, %v24862_v3  ;;  %12520 = vmatprep.subr.bf16.mxu0 %v24480_v34  ;;  %2025 = vmatmul.mubr.f32.vlgmr.msra.gmra.mrb[0].mxu1 %v24727_v11  ;;  %vm24896_vm14 = vnez %v24828_v10  ;;  %vm24901_vm3 = vcmp.eq.s32.totalorder %v24866_v48, %v16585_v44  ;;  %v24904_v10 = vld [vmem:[#allocation30_spill] sm:$0xff] }
 0x13e   :  { %v24870_v6 = vsel %vm16797_vm11, 4294967295, %v24869_v6  ;;  %vm16807_vm9 = vmor %vm24873_vm2, %vm24872_vm4  ;;  %vm24878_vm4 = vcmp.eq.s32.totalorder %v24853_v43, %v16576_v59  ;;  %vm24879_vm2 = vcmp.eq.s32.totalorder %v24853_v43, %v16585_v44  ;;  %2030 = vmatprep.mubr.f32.mxu1 %v24733_v51  ;;  %v16885_v46 = vsub.f32 %v11315_v15, %v11315_v15 }
 0x13f   :  { %24871 = vst [vmem:[#allocation19_spill] sm:$0xff] %v24870_v6  ;;  %vm16826_vm11 = vmor %vm24879_vm2, %vm24878_vm4  ;;  %vm24886_vm2 = vcmp.eq.s32.totalorder %v24866_v48, %v16560_v26  ;;  %1046 = vmatmul.mubr.f32.gmra.mrb[2].mxu0 %v24734_v32  ;;  %v11226_v25 = vsel %vm24896_vm14, 1.0, %v24862_v3  ;;  %v24897_v43 = vmov 0  ;;  %v16914_v40 = vsub.f32 %v11316_v2, %v11316_v2 }
 0x140   :  { %v24881_v28 = vsel %vm16826_vm11, 4294967295, %v24880_v28  ;;  %vm16844_vm4 = vmpackc.low %vm16778_vm10, %vm16763_vm5  ;;  %1051 = vmatprep.mubr.f32.mxu0 %v16028_v1  ;;  %v16935_v2 = vsub.f32 %v11225_v53, %v11225_v53  ;;  %vm24915_vm14 = vcmp.eq.s32.totalorder %v24895_v62, %v16568_v36  ;;  %v16960_v53 = vsub.f32 %v11226_v25, %v11226_v25 }
 0x141   :  { %v24884_v60 = vsel %vm16844_vm4, 4294967295, %v24883_v60  ;;  %vm16854_vm0 = vmor %vm24887_vm12, %vm24886_vm2  ;;  %vm24890_vm4 = vnez %v24831_v39  ;;  %vm24891_vm12 = vcmp.eq.s32.totalorder %v24876_v21, %v16560_v26  ;;  %vm24892_vm2 = vcmp.eq.s32.totalorder %v24876_v21, %v16568_v36  ;;  %2032 = vmatmul.mubr.f32.gmra.mrb[2].mxu1 %v24734_v32 }
 0x142   :  { %24885 = vst [vmem:[#allocation11_spill] sm:$0xff] %v24884_v60  ;;  %12720 = vmatpush1.bf16.msk.msra.mxu1 %vm24890_vm4, %v24737_v22  ;;  %vm16877_vm13 = vmor %vm24892_vm2, %vm24891_vm12  ;;  %vm24900_vm2 = vcmp.eq.s32.totalorder %v24866_v48, %v16576_v59  ;;  %2037 = vmatprep.mubr.f32.mxu1 %v16028_v1  ;;  %v11319_v19 = vsel %vm16738_vm6, 1.0, %v24862_v3  ;;  %vm24943_vm7 = vcmp.eq.s32.totalorder %v24923_v58, %v16560_v26  ;;  %v24980_v24 = vmov 0 }
 0x143   :  { %v24894_v56 = vsel %vm16877_vm13, 4294967295, %v24893_v56  ;;  %12721 = vmatprep.subr.bf16.mxu1 %v24480_v34  ;;  %vm16896_vm12 = vmpackc.low %vm16826_vm11, %vm16807_vm9  ;;  %24910 = vst [vmem:[#allocation18_spill] sm:$0xff] %v16935_v2  ;;  %1053 = vmatmul.mubr.f32.gmra.mrb[4].mxu0 %v16030_v9  ;;  %vm24944_vm6 = vcmp.eq.s32.totalorder %v24923_v58, %v16568_v36  ;;  %v17139_v16 = vsub.f32 %v11228_v18, %v11228_v18  ;;  %v25044_v35 = vand.u32 4294901760, %v16862_v31 }
 0x144   :  { %v24898_v43 = vsel %vm16896_vm12, 4294967295, %v24897_v43  ;;  %vm16906_vm4 = vmor %vm24901_vm3, %vm24900_vm2  ;;  %vm24905_vm12 = vnez %v24839_v41  ;;  %vm24906_vm3 = vcmp.eq.s32.totalorder %v24876_v21, %v16576_v59  ;;  %vm24907_vm2 = vcmp.eq.s32.totalorder %v24876_v21, %v16585_v44  ;;  %24918 = vst [vmem:[#allocation23_spill] sm:$0xff] %v16960_v53  ;;  %2280 = vmatprep.mubr.f32.mxu0 %v24938_v47 }
 0x145   :  { %24899 = vst [vmem:[#allocation14_spill] sm:$0xff] %v24898_v43  ;;  %12522 = vmatpush1.bf16.msk.msra.mxu0 %vm24905_vm12, %v24737_v22  ;;  %vm16926_vm11 = vmor %vm24907_vm2, %vm24906_vm3  ;;  %v24911_v21 = vmov 0  ;;  %vm24914_vm2 = vcmp.eq.s32.totalorder %v24895_v62, %v16560_v26  ;;  %2039 = vmatmul.mubr.f32.gmra.mrb[4].mxu1 %v16030_v9  ;;  %v2332_v12 = vsub.f32 %v16862_v31, %v25044_v35  ;;  %v25051_v35 = vand.u32 4294901760, %v16885_v46 }
 0x146   :  { %12523 = vmatprep.subr.bf16.mxu0 %v24480_v34  ;;  %vm16942_vm3 = vmpackc.low %vm16877_vm13, %vm16854_vm0  ;;  %12723 = vmatpush1.bf16.msk.msra.mxu1 %vm16734_vm15, %v24737_v22  ;;  %vm24924_vm15 = vnez %v24834_v20  ;;  %vm24925_vm13 = vnez %v24837_v4  ;;  %v24933_v4 = vld [vmem:[#allocation35_spill] sm:$0xff]  ;;  %v11324_v15 = vsel %vm16926_vm11, 1.0, %v24862_v3  ;;  %v25052_v9 = vand.u32 4294901760, %v16914_v40 }
 0x147   :  { %v24912_v21 = vsel %vm16942_vm3, 4294967295, %v24911_v21  ;;  %vm16952_vm10 = vmor %vm24915_vm14, %vm24914_vm2  ;;  %vm24919_vm14 = vcmp.eq.s32.totalorder %v24904_v10, %v16560_v26  ;;  %vm24920_vm2 = vcmp.eq.s32.totalorder %v24904_v10, %v16568_v36  ;;  %v11317_v25 = vsel %vm24924_vm15, 1.0, %v24862_v3  ;;  %12724 = vmatprep.subr.bf16.mxu1 %v24480_v34  ;;  %3269 = vmatprep.mubr.f32.mxu1 %v24938_v47 }
 0x148   :  { %24913 = vst [vmem:[#allocation20_spill] sm:$0xff] %v24912_v21  ;;  %vm16972_vm3 = vmor %vm24920_vm2, %vm24919_vm14  ;;  %v11318_v14 = vsel %vm24925_vm13, 1.0, %v24862_v3  ;;  %vm24929_vm2 = vcmp.eq.s32.totalorder %v24895_v62, %v16576_v59  ;;  %vm24930_vm15 = vcmp.eq.s32.totalorder %v24895_v62, %v16585_v44  ;;  %v24936_v62 = vmov 0 }
 0x149   :  { %vm16992_vm14 = vmpackc.low %vm16926_vm11, %vm16906_vm4  ;;  %12525 = vmatpush1.bf16.msk.msra.mxu0 %vm16759_vm8, %v24737_v22  ;;  %vm24947_vm8 = vnez %v24870_v6  ;;  %v17117_v47 = vsub.f32 %v11317_v25, %v11317_v25  ;;  %v17119_v6 = vsub.f32 %v11318_v14, %v11318_v14  ;;  %v17141_v14 = vsub.f32 %v11319_v19, %v11319_v19 }
 0x14a   :  { %v24927_v13 = vsel %vm16992_vm14, 4294967295, %v24926_v13  ;;  %vm17002_vm12 = vmor %vm24930_vm15, %vm24929_vm2  ;;  %vm24934_vm2 = vcmp.eq.s32.totalorder %v24904_v10, %v16576_v59  ;;  %vm24935_vm15 = vcmp.eq.s32.totalorder %v24904_v10, %v16585_v44  ;;  %12526 = vmatprep.subr.bf16.mxu0 %v24480_v34  ;;  %12726 = vmatpush1.bf16.msk.msra.mxu1 %vm24947_vm8, %v24737_v22  ;;  %v11233_v48 = vsel %vm16952_vm10, 1.0, %v24862_v3 }
 0x14b   :  { %24928 = vst [vmem:[#allocation24_spill] sm:$0xff] %v24927_v13  ;;  %vm17025_vm13 = vmor %vm24935_vm15, %vm24934_vm2  ;;  %vm24939_vm2 = vnez %v24855_v55  ;;  %v11229_v55 = vsel %vm16763_vm5, 1.0, %v24862_v3  ;;  %12727 = vmatprep.subr.bf16.mxu1 %v24480_v34  ;;  %vm24960_vm5 = vcmp.eq.s32.totalorder %v24923_v58, %v16585_v44  ;;  %v11325_v8 = vsel %vm17002_vm12, 1.0, %v24862_v3  ;;  %v25013_v13 = vld [vmem:[#allocation49_spill] sm:$0xff] }
 0x14c   :  { %v24937_v62 = vsel %vm17025_vm13, 4294967295, %v24936_v62  ;;  %v11320_v10 = vsel %vm24939_vm2, 1.0, %v24862_v3  ;;  %vm17046_vm15 = vmpackc.low %vm16972_vm3, %vm16952_vm10  ;;  %vm24950_vm2 = vcmp.eq.s32.totalorder %v24933_v4, %v16568_v36  ;;  %24964 = vst [vmem:[#allocation32_spill] sm:$0xff] %v17119_v6  ;;  %v17159_v18 = vsub.f32 %v11229_v55, %v11229_v55 }
 0x14d   :  { %v24941_v57 = vsel %vm17046_vm15, 4294967295, %v24940_v57  ;;  %vm17056_vm1 = vmor %vm24944_vm6, %vm24943_vm7  ;;  %vm24948_vm7 = vnez %v24865_v29  ;;  %vm24949_vm6 = vcmp.eq.s32.totalorder %v24933_v4, %v16560_v26  ;;  %v11323_v55 = vsel %vm16906_vm4, 1.0, %v24862_v3 }
 0x14e   :  { %24942 = vst [vmem:[#allocation27_spill] sm:$0xff] %v24941_v57  ;;  %v11230_v61 = vsel %vm24948_vm7, 1.0, %v24862_v3  ;;  %vm17079_vm15 = vmor %vm24950_vm2, %vm24949_vm6  ;;  %vm24955_vm2 = vnez %v24881_v28  ;;  %v24963_v28 = vld [vmem:[#allocation40_spill] sm:$0xff]  ;;  %v17240_v38 = vsub.f32 %v11323_v55, %v11323_v55  ;;  %vm24994_vm10 = vcmp.eq.s32.totalorder %v24953_v7, %v16576_v59 }
 0x14f   :  { %vm24954_vm7 = vmmov %vm16807_vm9  ;;  %v11322_v29 = vsel %vm24955_vm2, 1.0, %v24862_v3  ;;  %vm24959_vm9 = vcmp.eq.s32.totalorder %v24923_v58, %v16576_v59  ;;  %v11231_v58 = vsel %vm16854_vm0, 1.0, %v24862_v3  ;;  %vm24970_vm0 = vnez %v24894_v56  ;;  %24975 = vst [vmem:[#allocation33_spill] sm:$0xff] %v17159_v18 }
 0x150   :  { %v11321_v33 = vsel %vm24954_vm7, 1.0, %v24862_v3  ;;  %vm17099_vm6 = vmpackc.low %vm17025_vm13, %vm17002_vm12  ;;  %v11232_v42 = vsel %vm24970_vm0, 1.0, %v24862_v3  ;;  %vm24971_vm2 = vcmp.eq.s32.totalorder %v24953_v7, %v16560_v26  ;;  %v17168_v19 = vsub.f32 %v11322_v29, %v11322_v29 }
 0x151   :  { %v24957_v52 = vsel %vm17099_vm6, 4294967295, %v24956_v52  ;;  %vm17109_vm8 = vmor %vm24960_vm5, %vm24959_vm9  ;;  %vm24965_vm6 = vnez %v24884_v60  ;;  %vm24966_vm9 = vcmp.eq.s32.totalorder %v24933_v4, %v16576_v59  ;;  %vm24967_vm5 = vcmp.eq.s32.totalorder %v24933_v4, %v16585_v44 }
 0x152   :  { %24958 = vst [vmem:[#allocation28_spill] sm:$0xff] %v24957_v52  ;;  %12528 = vmatpush1.bf16.msk.msra.mxu0 %vm24965_vm6, %v24737_v22  ;;  %vm17135_vm7 = vmor %vm24967_vm5, %vm24966_vm9  ;;  %v17143_v60 = vsub.f32 %v11320_v10, %v11320_v10  ;;  %vm24972_vm9 = vcmp.eq.s32.totalorder %v24953_v7, %v16568_v36  ;;  %v24973_v4 = vmov 0  ;;  %v17161_v10 = vsub.f32 %v11230_v61, %v11230_v61 }
 0x153   :  { %12529 = vmatprep.subr.bf16.mxu0 %v24480_v34  ;;  %vm17155_vm5 = vmor %vm24972_vm9, %vm24971_vm2  ;;  %vm24976_vm6 = vnez %v24898_v43  ;;  %v17166_v56 = vsub.f32 %v11321_v33, %v11321_v33  ;;  %24977 = vst [vmem:[#allocation36_spill] sm:$0xff] %v17168_v19  ;;  %vm24978_vm0 = vcmp.eq.s32.totalorder %v24963_v28, %v16560_v26  ;;  %vm24979_vm2 = vcmp.eq.s32.totalorder %v24963_v28, %v16568_v36  ;;  %v24993_v43 = vld [vmem:[#allocation43_spill] sm:$0xff] }
 0x154   :  { %v24974_v4 = vsel %vm17155_vm5, 4294967295, %v24973_v4  ;;  %12729 = vmatpush1.bf16.msk.msra.mxu1 %vm24976_vm6, %v24737_v22  ;;  %vm17176_vm9 = vmor %vm24979_vm2, %vm24978_vm0  ;;  %v17181_v61 = vsub.f32 %v11231_v58, %v11231_v58  ;;  %v24983_v33 = vmov 0  ;;  %vm24986_vm13 = vnez %v24912_v21 }
 0x155   :  { %v24981_v24 = vsel %vm17176_vm9, 4294967295, %v24980_v24  ;;  %12730 = vmatprep.subr.bf16.mxu1 %v24480_v34  ;;  %vm17190_vm6 = vmpackc.low %vm17079_vm15, %vm17056_vm1  ;;  %v17201_v58 = vsub.f32 %v11232_v42, %v11232_v42  ;;  %v24987_v29 = vmov 0  ;;  %v11234_v42 = vsel %vm16972_vm3, 1.0, %v24862_v3 }
 0x156   :  { %24982 = vst [vmem:[#allocation39_spill] sm:$0xff] %v17181_v61  ;;  %v24984_v33 = vsel %vm17190_vm6, 4294967295, %v24983_v33  ;;  %12531 = vmatpush1.bf16.msk.msra.mxu0 %vm24986_vm13, %v24737_v22  ;;  %vm17210_vm4 = vmpackc.low %vm17135_vm7, %vm17109_vm8  ;;  %v24990_v21 = vmov 0  ;;  %vm24995_vm3 = vcmp.eq.s32.totalorder %v24953_v7, %v16585_v44  ;;  %v17259_v55 = vsub.f32 %v11324_v15, %v11324_v15 }
 0x157   :  { %24985 = vst [vmem:[#allocation42_spill] sm:$0xff] %v24984_v33  ;;  %v24988_v29 = vsel %vm17210_vm4, 4294967295, %v24987_v29  ;;  %12532 = vmatprep.subr.bf16.mxu0 %v24480_v34  ;;  %vm17229_vm11 = vmpackc.low %vm17176_vm9, %vm17155_vm5  ;;  %vm24999_vm12 = vnez %v24937_v62  ;;  %vm25004_vm9 = vnez %v24941_v57  ;;  %v17282_v62 = vsub.f32 %v11233_v48, %v11233_v48  ;;  %v25033_v33 = vld [vmem:[#allocation52_spill] sm:$0xff] }
 0x158   :  { %24989 = vst [vmem:[#allocation46_spill] sm:$0xff] %v24988_v29  ;;  %v24991_v21 = vsel %vm17229_vm11, 4294967295, %v24990_v21  ;;  %12732 = vmatpush1.bf16.msk.msra.mxu1 %vm16992_vm14, %v24737_v22  ;;  %vm17251_vm0 = vmor %vm24995_vm3, %vm24994_vm10  ;;  %v11326_v20 = vsel %vm24999_vm12, 1.0, %v24862_v3  ;;  %vm25000_vm10 = vcmp.eq.s32.totalorder %v24963_v28, %v16576_v59  ;;  %vm25001_vm3 = vcmp.eq.s32.totalorder %v24963_v28, %v16585_v44 }
 0x159   :  { %24992 = vst [vmem:[#allocation47_spill] sm:$0xff] %v24991_v21  ;;  %12733 = vmatprep.subr.bf16.mxu1 %v24480_v34  ;;  %vm17271_vm13 = vmor %vm25001_vm3, %vm25000_vm10  ;;  %v17284_v15 = vsub.f32 %v11234_v42, %v11234_v42  ;;  %vm25005_vm12 = vcmp.eq.s32.totalorder %v24993_v43, %v16560_v26  ;;  %vm25006_vm10 = vcmp.eq.s32.totalorder %v24993_v43, %v16568_v36  ;;  %v11235_v42 = vsel %vm17056_vm1, 1.0, %v24862_v3 }
 0x15a   :  { %12534 = vmatpush1.bf16.msk.msra.mxu0 %vm25004_vm9, %v24737_v22  ;;  %vm17292_vm3 = vmor %vm25006_vm10, %vm25005_vm12  ;;  %vm3104_vm14 = vcmp.eq.s32.totalorder %v24998_v54, %v16576_v59  ;;  %v17300_v48 = vsub.f32 %v11325_v8, %v11325_v8  ;;  %vm25009_vm12 = vcmp.eq.s32.totalorder %v24998_v54, %v16560_v26  ;;  %vm25010_vm10 = vcmp.eq.s32.totalorder %v24998_v54, %v16568_v36  ;;  %v25014_v8 = vld [vmem:[#allocation50_spill] sm:$0xff] }
 0x15b   :  { %12535 = vmatprep.subr.bf16.mxu0 %v24480_v34  ;;  %vm17312_vm9 = vmor %vm25010_vm10, %vm25009_vm12  ;;  %vm25015_vm11 = vnez %v24957_v52  ;;  %v17323_v27 = vsub.f32 %v11326_v20, %v11326_v20  ;;  %v11236_v17 = vsel %vm17079_vm15, 1.0, %v24862_v3  ;;  %vm25016_vm1 = vcmp.eq.s32.totalorder %v24993_v43, %v16576_v59 }
 0x15c   :  { %12735 = vmatpush1.bf16.msk.msra.mxu1 %vm25015_vm11, %v24737_v22  ;;  %vm25017_vm12 = vcmp.eq.s32.totalorder %v24993_v43, %v16585_v44  ;;  %vm25020_vm15 = vcmp.eq.s32.totalorder %v24998_v54, %v16585_v44  ;;  %v17361_v20 = vsub.f32 %v11235_v42, %v11235_v42  ;;  %v25023_v54 = vmov 0  ;;  %v25026_v43 = vld [vmem:[#allocation53_spill] sm:$0xff] }
 0x15d   :  { %vm17334_vm10 = vmor %vm25017_vm12, %vm25016_vm1  ;;  %12736 = vmatprep.subr.bf16.mxu1 %v24480_v34  ;;  %v17375_v39 = vsub.f32 %v11236_v17, %v11236_v17  ;;  %v25027_v42 = vmov 0  ;;  %v11327_v17 = vsel %vm17109_vm8, 1.0, %v24862_v3  ;;  %v11328_v52 = vsel %vm17135_vm7, 1.0, %v24862_v3 }
 0x15e   :  { %vm17346_vm11 = vmor %vm25020_vm15, %vm3104_vm14  ;;  %12537 = vmatpush1.bf16.msk.msra.mxu0 %vm17190_vm6, %v24737_v22  ;;  %vm25034_vm8 = vcmp.eq.s32.totalorder %v25013_v13, %v16560_v26  ;;  %vm25035_vm5 = vcmp.eq.s32.totalorder %v25013_v13, %v16568_v36  ;;  %vm25038_vm7 = vnez %v24991_v21  ;;  %vm25039_vm6 = vcmp.eq.s32.totalorder %v25014_v8, %v16560_v26 }
 0x15f   :  { %vm17367_vm14 = vmpackc.low %vm17271_vm13, %vm17251_vm0  ;;  %12538 = vmatprep.subr.bf16.mxu0 %v24480_v34  ;;  %v25043_v25 = vand.u32 4294901760, %v16835_v45  ;;  %vm25047_vm2 = vcmp.eq.s32.totalorder %v25013_v13, %v16576_v59  ;;  %vm25048_vm1 = vcmp.eq.s32.totalorder %v25013_v13, %v16585_v44  ;;  %v17474_v1 = vsub.f32 %v11327_v17, %v11327_v17 }
 0x160   :  { %v25024_v54 = vsel %vm17367_vm14, 4294967295, %v25023_v54  ;;  %vm17382_vm12 = vmpackc.low %vm17312_vm9, %vm17292_vm3  ;;  %12738 = vmatpush1.bf16.msk.msra.mxu1 %vm17210_vm4, %v24737_v22  ;;  %v17476_v32 = vsub.f32 %v11328_v52, %v11328_v52  ;;  %v11329_v13 = vsel %vm17251_vm0, 1.0, %v24862_v3  ;;  %v25057_v52 = vand.u32 4294901760, %v16935_v2 }
 0x161   :  { %25025 = vst [vmem:[#allocation51_spill] sm:$0xff] %v25024_v54  ;;  %v25028_v42 = vsel %vm17382_vm12, 4294967295, %v25027_v42  ;;  %vm17400_vm15 = vmpackc.low %vm17346_vm11, %vm17334_vm10  ;;  %12739 = vmatprep.subr.bf16.mxu1 %v24480_v34  ;;  %v2325_v21 = vsub.f32 %v16835_v45, %v25043_v25  ;;  %v11330_v23 = vsel %vm17271_vm13, 1.0, %v24862_v3  ;;  %vm25058_vm0 = vcmp.eq.s32.totalorder %v25014_v8, %v16576_v59 }
 0x162   :  { %25029 = vst [vmem:[#allocation56_spill] sm:$0xff] %v25028_v42  ;;  %v25031_v5 = vsel %vm17400_vm15, 4294967295, %v25030_v5  ;;  %vm17419_vm4 = vmor %vm25035_vm5, %vm25034_vm8  ;;  %12540 = vmatpush1.bf16.msk.msra.mxu0 %vm25038_vm7, %v24737_v22  ;;  %vm25040_vm5 = vcmp.eq.s32.totalorder %v25014_v8, %v16568_v36  ;;  %v2339_v17 = vsub.f32 %v16935_v2, %v25057_v52  ;;  %v25062_v54 = vand.u32 4294901760, %v16960_v53 }
 0x163   :  { %25032 = vst [vmem:[#allocation60_spill] sm:$0xff] %v25031_v5  ;;  %vm17437_vm8 = vmor %vm25040_vm5, %vm25039_vm6  ;;  %vm25045_vm6 = vnez %v24974_v4  ;;  %vm25046_vm5 = vnez %v24981_v24  ;;  %12541 = vmatprep.subr.bf16.mxu0 %v24480_v34  ;;  %v3314_v4 = vsub.f32 %v16885_v46, %v25051_v35  ;;  %v3321_v24 = vsub.f32 %v16914_v40, %v25052_v9 }
 0x164   :  { %v11237_v0 = vsel %vm25045_vm6, 1.0, %v24862_v3  ;;  %v11238_v30 = vsel %vm25046_vm5, 1.0, %v24862_v3  ;;  %vm17464_vm7 = vmor %vm25048_vm1, %vm25047_vm2  ;;  %12741 = vmatpush1.bf16.msk.msra.mxu1 %vm17367_vm14, %v24737_v22  ;;  %vm25053_vm2 = vcmp.eq.s32.totalorder %v25026_v43, %v16560_v26  ;;  %vm25054_vm1 = vcmp.eq.s32.totalorder %v25026_v43, %v16568_v36 }
 0x165   :  { %vm17490_vm6 = vmor %vm25054_vm1, %vm25053_vm2  ;;  %12742 = vmatprep.subr.bf16.mxu1 %v24480_v34  ;;  %vm25059_vm5 = vcmp.eq.s32.totalorder %v25014_v8, %v16585_v44  ;;  %v2346_v52 = vsub.f32 %v16960_v53, %v25062_v54  ;;  %v17516_v2 = vsub.f32 %v11237_v0, %v11237_v0  ;;  %v17518_v11 = vsub.f32 %v11238_v30, %v11238_v30 }
 0x166   :  { %vm17507_vm2 = vmor %vm25059_vm5, %vm25058_vm0  ;;  %12543 = vmatpush1.bf16.msk.msra.mxu0 %vm17382_vm12, %v24737_v22  ;;  %vm25063_vm13 = vcmp.eq.s32.totalorder %v25026_v43, %v16576_v59  ;;  %vm25064_vm1 = vcmp.eq.s32.totalorder %v25026_v43, %v16585_v44  ;;  %v2326_v51 = vand.u32 4294901760, %v2325_v21  ;;  %v2333_v7 = vand.u32 4294901760, %v2332_v12 }
 0x167   :  { %vm17529_vm0 = vmor %vm25064_vm1, %vm25063_vm13  ;;  %v17533_v0 = vsub.f32 %v11329_v13, %v11329_v13  ;;  %12544 = vmatprep.subr.bf16.mxu0 %v24480_v34  ;;  %v25067_v30 = vmov 0  ;;  %v17547_v43 = vsel %vm17490_vm6, 1.0, %v24862_v3  ;;  %v3315_v8 = vand.u32 4294901760, %v3314_v4 }
 0x168   :  { %vm17540_vm5 = vmpackc.low %vm17437_vm8, %vm17419_vm4  ;;  %v3322_v21 = vand.u32 4294901760, %v3321_v24  ;;  %v17549_v12 = vsub.f32 %v11330_v23, %v11330_v23  ;;  %v11239_v13 = vsel %vm17292_vm3, 1.0, %v24862_v3  ;;  %12744 = vmatpush1.bf16.msk.msra.mxu1 %vm17400_vm15, %v24737_v22  ;;  %vm25070_vm13 = vcmp.eq.s32.totalorder %v25033_v33, %v16560_v26 }
 0x169   :  { %v25068_v30 = vsel %vm17540_vm5, 4294967295, %v25067_v30  ;;  %vm25071_vm1 = vcmp.eq.s32.totalorder %v25033_v33, %v16568_v36  ;;  %v2340_v4 = vand.u32 4294901760, %v2339_v17  ;;  %12745 = vmatprep.subr.bf16.mxu1 %v24480_v34  ;;  %vm17573_vm3 = vmpackc.low %vm17507_vm2, %vm17464_vm7  ;;  %v25074_v28 = vmov 0 }
 0x16a   :  { %25069 = vst [vmem:[#allocation62_spill] sm:$0xff] %v25068_v30  ;;  %vm17563_vm6 = vmor %vm25071_vm1, %vm25070_vm13  ;;  %v25075_v28 = vsel %vm17573_vm3, 4294967295, %v25074_v28  ;;  %v17580_v26 = vsel %vm17529_vm0, 1.0, %v24862_v3  ;;  %v2347_v36 = vand.u32 4294901760, %v2346_v52  ;;  %v25077_v17 = vand.u32 4294901760, %v17117_v47  ;;  %12546 = vmatpush1.bf16.msk.msra.mxu0 %vm17540_vm5, %v24737_v22 }
 0x16b   :  { %25076 = vst [vmem:[#allocation66_spill] sm:$0xff] %v25075_v28  ;;  %v25078_v24 = vand.u32 4294901760, %v17119_v6  ;;  %v25079_v42 = vmov 1.0   ;;  %vm25081_vm0 = vcmp.eq.s32.totalorder %v25033_v33, %v16576_v59  ;;  %vm25082_vm13 = vcmp.eq.s32.totalorder %v25033_v33, %v16585_v44  ;;  %12547 = vmatprep.subr.bf16.mxu0 %v24480_v34 }
 0x16c   :  { %v3328_v23 = vsub.f32 %v17117_v47, %v25077_v17  ;;  %v17593_v53 = vpack.c.bf16 %v17547_v43, %v25079_v42  ;;  %vm17601_vm1 = vmor %vm25082_vm13, %vm25081_vm0  ;;  %v11240_v30 = vsel %vm17312_vm9, 1.0, %v24862_v3  ;;  %vm25085_vm0 = vcmask 1041408   ;;  %12747 = vmatpush1.bf16.msk.msra.mxu1 %vm17573_vm3, %v24737_v22 }
 0x16d   :  { %v3335_v5 = vsub.f32 %v17119_v6, %v25078_v24  ;;  %v17611_v6 = vsub.f32 %v11239_v13, %v11239_v13  ;;  %vm17617_vm13 = vmpackc.low %vm25085_vm0, %vm17563_vm6  ;;  %v25086_v59 = vmov 0  ;;  %v12552_v44 = vpack.c.bf16 %v2333_v7, %v2326_v51  ;;  %12748 = vmatprep.subr.bf16.mxu1 %v24480_v34 }
 0x16e   :  { %25080 = vst [vmem:[#allocation68_spill] sm:$0xff] %v17593_v53  ;;  %v25087_v59 = vsel %vm17617_vm13, 4294967295, %v25086_v59  ;;  %v12753_v54 = vpack.c.bf16 %v3322_v21, %v3315_v8  ;;  %v11331_v17 = vsel %vm17334_vm10, 1.0, %v24862_v3  ;;  %v17629_v57 = vpack.c.bf16 %v17580_v26, %v25079_v42  ;;  %vm25091_vm9 = vmmov %vm25085_vm0  ;;  %12550 = vmatpush1.bf16.msk.msra.mxu0 %vm17617_vm13, %v17593_v53 }
 0x16f   :  { %25088 = vst [vmem:[#allocation67_spill] sm:$0xff] %v25087_v59  ;;  %v25090_v13 = vand.u32 4294901760, %v17121_v50  ;;  %v11332_v51 = vsel %vm17346_vm11, 1.0, %v24862_v3  ;;  %vm17642_vm10 = vmpackc.low %vm25091_vm9, %vm17601_vm1  ;;  %v25092_v41 = vmov 0  ;;  %v12555_v8 = vpack.c.bf16 %v2347_v36, %v2340_v4  ;;  %12551 = vmatprep.subr.bf16.mxu0 %v24480_v34 }
 0x170   :  { %25089 = vst [vmem:[#allocation71_spill] sm:$0xff] %v17629_v57  ;;  %v25093_v41 = vsel %vm17642_vm10, 4294967295, %v25092_v41  ;;  %v3329_v7 = vand.u32 4294901760, %v3328_v23  ;;  %v25095_v63 = vand.u32 4294901760, %v17139_v16  ;;  %v25096_v42 = vand.u32 4294901760, %v17141_v14  ;;  %12751 = vmatpush1.bf16.msk.msra.mxu1 %vm17642_vm10, %v17629_v57  ;;  %vm25119_vm11 = vmmov %vm25085_vm0 }
 0x171   :  { %v2353_v24 = vsub.f32 %v17121_v50, %v25090_v13  ;;  %25094 = vst [vmem:[#allocation70_spill] sm:$0xff] %v25093_v41  ;;  %v3336_v13 = vand.u32 4294901760, %v3335_v5  ;;  %v25097_v22 = vand.u32 4294901760, %v17143_v60  ;;  %v17659_v36 = vsub.f32 %v11240_v30, %v11240_v30  ;;  %12752 = vmatprep.subr.bf16.mxu1 %v24480_v34 }
 0x172   :  { %v2360_v33 = vsub.f32 %v17139_v16, %v25095_v63  ;;  %v3342_v28 = vsub.f32 %v17141_v14, %v25096_v42  ;;  %v17661_v23 = vsub.f32 %v11331_v17, %v11331_v17  ;;  %v17666_v59 = vsub.f32 %v11332_v51, %v11332_v51  ;;  %v25099_v51 = vld [vmem:[#allocation69_spill] sm:$0xff] }
 0x173   :  { %v3349_v4 = vsub.f32 %v17143_v60, %v25097_v22  ;;  %v11241_v42 = vsel %vm17419_vm4, 1.0, %v24862_v3  ;;  %v2354_v22 = vand.u32 4294901760, %v2353_v24  ;;  %v25098_v30 = vand.u32 4294901760, %v17159_v18  ;;  %2286 = vmatmul.mubr.f32.vlgmr.msra.gmra.mrb[6].mxu0 %v25099_v51  ;;  %3275 = vmatmul.mubr.f32.vlgmr.msra.gmra.mrb[6].mxu1 %v25099_v51  ;;  %v25107_v51 = vld [vmem:[#allocation86_spill] sm:$0xff]  ;;  %vm25112_vm4 = vmmov %vm25085_vm0 }
 0x174   :  { %v11242_v63 = vsel %vm17437_vm8, 1.0, %v24862_v3  ;;  %v25100_v29 = vand.u32 4294901760, %v17161_v10  ;;  %12553 = vmatpush1.bf16.msra.mxu0 %v12552_v44  ;;  %v12756_v41 = vpack.c.bf16 %v3336_v13, %v3329_v7  ;;  %v2361_v57 = vand.u32 4294901760, %v2360_v33  ;;  %12754 = vmatpush1.bf16.msra.mxu1 %v12753_v54 }
 0x175   :  { %v2367_v17 = vsub.f32 %v17159_v18, %v25098_v30  ;;  %v3343_v30 = vand.u32 4294901760, %v3342_v28  ;;  %v3350_v53 = vand.u32 4294901760, %v3349_v4  ;;  %v25101_v18 = vld [vmem:[#allocation83_spill] sm:$0xff]  ;;  %v11333_v37 = vsel %vm17464_vm7, 1.0, %v24862_v3  ;;  %12554 = vmatprep.subr.bf16.mxu0 %v24480_v34  ;;  %12755 = vmatprep.subr.bf16.mxu1 %v24480_v34 }
 0x176   :  { %v2374_v21 = vsub.f32 %v17161_v10, %v25100_v29  ;;  %2295 = vmatprep.mubr.f32.mxu0 %v25101_v18  ;;  %v25102_v29 = vand.u32 4294901760, %v17166_v56  ;;  %v25103_v44 = vand.u32 4294901760, %v17168_v19  ;;  %v17700_v7 = vsub.f32 %v11241_v42, %v11241_v42  ;;  %3284 = vmatprep.mubr.f32.mxu1 %v25101_v18 }
 0x177   :  { %v17702_v13 = vsub.f32 %v11242_v63, %v11242_v63  ;;  %v2368_v25 = vand.u32 4294901760, %v2367_v17  ;;  %v25105_v63 = vand.u32 4294901760, %v17201_v58  ;;  %v25106_v17 = vld [vmem:[#allocation82_spill] sm:$0xff]  ;;  %v17717_v4 = vsub.f32 %v11333_v37, %v11333_v37 }
 0x178   :  { %v3356_v5 = vsub.f32 %v17166_v56, %v25102_v29  ;;  %v3363_v33 = vsub.f32 %v17168_v19, %v25103_v44  ;;  %v11334_v29 = vsel %vm17507_vm2, 1.0, %v24862_v3  ;;  %v2375_v24 = vand.u32 4294901760, %v2374_v21  ;;  %2301 = vmatmul.mubr.f32.gmra.mrb[8].mxu0 %v25106_v17  ;;  %3290 = vmatmul.mubr.f32.gmra.mrb[8].mxu1 %v25106_v17 }
 0x179   :  { %v25104_v44 = vand.u32 4294901760, %v17181_v61  ;;  %v2388_v54 = vsub.f32 %v17201_v58, %v25105_v63  ;;  %12556 = vmatpush1.bf16.msra.mxu0 %v12555_v8  ;;  %v12558_v28 = vpack.c.bf16 %v2361_v57, %v2354_v22  ;;  %v23890_v35 = vand.u32 4294901760, %v17282_v62  ;;  %2310 = vmatprep.mubr.f32.mxu0 %v25107_v51 }
 0x17a   :  { %12557 = vmatprep.subr.bf16.mxu0 %v24480_v34  ;;  %v12759_v21 = vpack.c.bf16 %v3350_v53, %v3343_v30  ;;  %v25108_v19 = vand.u32 4294901760, %v17240_v38  ;;  %v17727_v37 = vsub.f32 %v11334_v29, %v11334_v29  ;;  %12757 = vmatpush1.bf16.msra.mxu1 %v12756_v41  ;;  %v25109_v57 = vand.u32 4294901760, %v17259_v55  ;;  %v25110_v41 = vld [vmem:[#allocation87_spill] sm:$0xff] }
 0x17b   :  { %v2381_v42 = vsub.f32 %v17181_v61, %v25104_v44  ;;  %v3357_v44 = vand.u32 4294901760, %v3356_v5  ;;  %v3364_v61 = vand.u32 4294901760, %v3363_v33  ;;  %v23891_v22 = vand.u32 4294901760, %v17300_v48  ;;  %3299 = vmatprep.mubr.f32.mxu1 %v25107_v51  ;;  %12758 = vmatprep.subr.bf16.mxu1 %v24480_v34 }
 0x17c   :  { %v3370_v63 = vsub.f32 %v17240_v38, %v25108_v19  ;;  %v3377_v8 = vsub.f32 %v17259_v55, %v25109_v57  ;;  %v11243_v53 = vsel %vm17563_vm6, 1.0, %v24862_v3  ;;  %v12561_v19 = vpack.c.bf16 %v2375_v24, %v2368_v25  ;;  %2316 = vmatmul.mubr.f32.gmra.mrb[10].mxu0 %v25110_v41  ;;  %3305 = vmatmul.mubr.f32.gmra.mrb[10].mxu1 %v25110_v41 }
 0x17d   :  { %v2382_v5 = vand.u32 4294901760, %v2381_v42  ;;  %v2389_v30 = vand.u32 4294901760, %v2388_v54  ;;  %12559 = vmatpush1.bf16.msra.mxu0 %v12558_v28  ;;  %v2395_v33 = vsub.f32 %v17282_v62, %v23890_v35  ;;  %v25111_v29 = vand.u32 4294901760, %v17284_v15  ;;  %2496 = vmatprep.mubr.f32.mxu0 %v24793_v49 }
 0x17e   :  { %v23892_v18 = vand.u32 4294901760, %v17361_v20  ;;  %v2187_v24 = vsel %vm25112_vm4, %v17547_v43, 0  ;;  %12560 = vmatprep.subr.bf16.mxu0 %v24480_v34  ;;  %v12762_v28 = vpack.c.bf16 %v3364_v61, %v3357_v44  ;;  %v3371_v25 = vand.u32 4294901760, %v3370_v63  ;;  %12760 = vmatpush1.bf16.msra.mxu1 %v12759_v21 }
 0x17f   :  { %v2402_v57 = vsub.f32 %v17284_v15, %v25111_v29  ;;  %v3378_v54 = vand.u32 4294901760, %v3377_v8  ;;  %v3384_v29 = vsub.f32 %v17300_v48, %v23891_v22  ;;  %v25113_v35 = vand.u32 4294901760, %v17323_v27  ;;  %3485 = vmatprep.mubr.f32.mxu1 %v24793_v49  ;;  %12761 = vmatprep.subr.bf16.mxu1 %v24480_v34 }
 0x180   :  { %v17762_v61 = vsub.f32 %v11243_v53, %v11243_v53  ;;  %v12564_v44 = vpack.c.bf16 %v2389_v30, %v2382_v5  ;;  %v2396_v8 = vand.u32 4294901760, %v2395_v33  ;;  %v25114_v43 = vand.u32 4294901760, %v17375_v39 }
 0x181   :  { %v3391_v9 = vsub.f32 %v17323_v27, %v25113_v35  ;;  %12562 = vmatpush1.bf16.msra.mxu0 %v12561_v19  ;;  %v2403_v22 = vand.u32 4294901760, %v2402_v57  ;;  %v2409_v35 = vsub.f32 %v17361_v20, %v23892_v18  ;;  %v17773_v53 = vsub.f32 %v2187_v24, %v2187_v24 }
 0x182   :  { %v2416_v42 = vsub.f32 %v17375_v39, %v25114_v43  ;;  %12563 = vmatprep.subr.bf16.mxu0 %v24480_v34  ;;  %v25115_v5 = vand.u32 4294901760, %v17474_v1  ;;  %12763 = vmatpush1.bf16.msra.mxu1 %v12762_v28  ;;  %v12765_v57 = vpack.c.bf16 %v3378_v54, %v3371_v25  ;;  %v3385_v63 = vand.u32 4294901760, %v3384_v29 }
 0x183   :  { %v3392_v18 = vand.u32 4294901760, %v3391_v9  ;;  %v25116_v21 = vand.u32 4294901760, %v17476_v32  ;;  %12764 = vmatprep.subr.bf16.mxu1 %v24480_v34  ;;  %v25117_v24 = vand.u32 4294901760, %v17516_v2  ;;  %v11335_v9 = vsel %vm17601_vm1, 1.0, %v24862_v3 }
 0x184   :  { %v3398_v30 = vsub.f32 %v17474_v1, %v25115_v5  ;;  %v25118_v5 = vand.u32 4294901760, %v17518_v11  ;;  %v12567_v25 = vpack.c.bf16 %v2403_v22, %v2396_v8  ;;  %v2410_v54 = vand.u32 4294901760, %v2409_v35 }
 0x185   :  { %v3405_v43 = vsub.f32 %v17476_v32, %v25116_v21  ;;  %v2423_v41 = vsub.f32 %v17516_v2, %v25117_v24  ;;  %12565 = vmatpush1.bf16.msra.mxu0 %v12564_v44  ;;  %v2417_v29 = vand.u32 4294901760, %v2416_v42  ;;  %v3176_v21 = vsel %vm25119_vm11, %v17580_v26, 0 }
 0x186   :  { %v2430_v19 = vsub.f32 %v17518_v11, %v25118_v5  ;;  %12566 = vmatprep.subr.bf16.mxu0 %v24480_v34  ;;  %v25120_v24 = vand.u32 4294901760, %v17533_v0  ;;  %v25121_v33 = vand.u32 4294901760, %v17549_v12  ;;  %v23906_v52 = vand.u32 4294901760, %v17661_v23  ;;  %12766 = vmatpush1.bf16.msra.mxu1 %v12765_v57 }
 0x187   :  { %v12768_v44 = vpack.c.bf16 %v3392_v18, %v3385_v63  ;;  %v3399_v22 = vand.u32 4294901760, %v3398_v30  ;;  %v3406_v8 = vand.u32 4294901760, %v3405_v43  ;;  %v23897_v42 = vand.u32 4294901760, %v17666_v59  ;;  %12767 = vmatprep.subr.bf16.mxu1 %v24480_v34 }
 0x188   :  { %v3412_v5 = vsub.f32 %v17533_v0, %v25120_v24  ;;  %v3419_v28 = vsub.f32 %v17549_v12, %v25121_v33  ;;  %v2424_v26 = vand.u32 4294901760, %v2423_v41  ;;  %v2431_v35 = vand.u32 4294901760, %v2430_v19 }
 0x189   :  { %v25122_v51 = vand.u32 4294901760, %v17611_v6  ;;  %v25123_v17 = vand.u32 4294901760, %v17659_v36  ;;  %v17814_v3 = vsub.f32 %v11335_v9, %v11335_v9  ;;  %12568 = vmatpush1.bf16.msra.mxu0 %v12567_v25  ;;  %v12570_v18 = vpack.c.bf16 %v2417_v29, %v2410_v54 }
 0x18a   :  { %v23905_v63 = vand.u32 4294901760, %v17700_v7  ;;  %v23898_v30 = vand.u32 4294901760, %v17702_v13  ;;  %12569 = vmatprep.subr.bf16.mxu0 %v24480_v34  ;;  %v3413_v41 = vand.u32 4294901760, %v3412_v5  ;;  %v3420_v19 = vand.u32 4294901760, %v3419_v28  ;;  %12769 = vmatpush1.bf16.msra.mxu1 %v12768_v44 }
 0x18b   :  { %v2437_v24 = vsub.f32 %v17611_v6, %v25122_v51  ;;  %v2444_v33 = vsub.f32 %v17659_v36, %v25123_v17  ;;  %v3426_v51 = vsub.f32 %v17661_v23, %v23906_v52  ;;  %v23900_v57 = vand.u32 4294901760, %v17717_v4  ;;  %12770 = vmatprep.subr.bf16.mxu1 %v24480_v34  ;;  %v25152_v52 = vld [vmem:[#allocation58_spill] sm:$0xff] }
 0x18c   :  { %v17823_v43 = vsub.f32 %v3176_v21, %v3176_v21  ;;  %v12771_v17 = vpack.c.bf16 %v3406_v8, %v3399_v22  ;;  %v3433_v9 = vsub.f32 %v17666_v59, %v23897_v42  ;;  %v23899_v25 = vand.u32 4294901760, %v17727_v37 }
 0x18d   :  { %v12573_v54 = vpack.c.bf16 %v2431_v35, %v2424_v26  ;;  %v2438_v28 = vand.u32 4294901760, %v2437_v24  ;;  %v2445_v29 = vand.u32 4294901760, %v2444_v33  ;;  %12571 = vmatpush1.bf16.msra.mxu0 %v12570_v18  ;;  %v2451_v5 = vsub.f32 %v17700_v7, %v23905_v63  ;;  %v25150_v63 = vld [vmem:[#allocation17_spill] sm:$0xff] }
 0x18e   :  { %v2458_v21 = vsub.f32 %v17702_v13, %v23898_v30  ;;  %v23904_v44 = vand.u32 4294901760, %v17762_v61  ;;  %v23903_v22 = vand.u32 4294901760, %v17773_v53  ;;  %12572 = vmatprep.subr.bf16.mxu0 %v24480_v34  ;;  %v12774_v8 = vpack.c.bf16 %v3420_v19, %v3413_v41  ;;  %12772 = vmatpush1.bf16.msra.mxu1 %v12771_v17 }
 0x18f   :  { %v3427_v42 = vand.u32 4294901760, %v3426_v51  ;;  %v3440_v26 = vsub.f32 %v17717_v4, %v23900_v57  ;;  %v3434_v35 = vand.u32 4294901760, %v3433_v9  ;;  %v3447_v24 = vsub.f32 %v17727_v37, %v23899_v25  ;;  %12773 = vmatprep.subr.bf16.mxu1 %v24480_v34 }
 0x190   :  { %v23902_v33 = vand.u32 4294901760, %v17814_v3  ;;  %v23901_v18 = vand.u32 4294901760, %v17823_v43  ;;  %v12576_v30 = vpack.c.bf16 %v2445_v29, %v2438_v28  ;;  %v2452_v41 = vand.u32 4294901760, %v2451_v5 }
 0x191   :  { %12574 = vmatpush1.bf16.msra.mxu0 %v12573_v54  ;;  %v2459_v19 = vand.u32 4294901760, %v2458_v21  ;;  %v2465_v51 = vsub.f32 %v17762_v61, %v23904_v44  ;;  %v2472_v17 = vsub.f32 %v17773_v53, %v23903_v22  ;;  %v3441_v9 = vand.u32 4294901760, %v3440_v26  ;;  %v25147_v22 = vld [vmem:[#allocation13_spill] sm:$0xff] }
 0x192   :  { %12575 = vmatprep.subr.bf16.mxu0 %v24480_v34  ;;  %12775 = vmatpush1.bf16.msra.mxu1 %v12774_v8  ;;  %v12777_v25 = vpack.c.bf16 %v3434_v35, %v3427_v42  ;;  %v3448_v57 = vand.u32 4294901760, %v3447_v24  ;;  %v3454_v54 = vsub.f32 %v17814_v3, %v23902_v33  ;;  %v3461_v28 = vsub.f32 %v17823_v43, %v23901_v18  ;;  %v25140_v18 = vld [vmem:[#allocation75_spill] sm:$0xff]  ;;  %v25146_v33 = vld [vmem:[#allocation80_spill] sm:$0xff]  ;;  %v25149_v44 = vld [vmem:[#allocation81_spill] sm:$0xff] }
 0x193   :  { %12776 = vmatprep.subr.bf16.mxu1 %v24480_v34  ;;  %v12579_v29 = vpack.c.bf16 %v2459_v19, %v2452_v41  ;;  %v2466_v5 = vand.u32 4294901760, %v2465_v51  ;;  %v2473_v21 = vand.u32 4294901760, %v2472_v17  ;;  %v25125_v41 = vld [vmem:[#allocation18_spill] sm:$0xff]  ;;  %v25126_v19 = vld [vmem:[#allocation23_spill] sm:$0xff]  ;;  %v25127_v17 = vld [vmem:[#allocation73_spill] sm:$0xff]  ;;  %vm25148_vm6 = vnez %v25147_v22 }
 0x194   :  { %v12780_v8 = vpack.c.bf16 %v3448_v57, %v3441_v9  ;;  %v3455_v42 = vand.u32 4294901760, %v3454_v54  ;;  %v3462_v26 = vand.u32 4294901760, %v3461_v28  ;;  %v12786_v57 = vpack.c.bf16 %v16914_v40, %v16885_v46  ;;  %v25128_v9 = vld [vmem:[#allocation32_spill] sm:$0xff] }
 0x195   :  { %12577 = vmatpush1.bf16.msra.mxu0 %v12576_v30  ;;  %v12582_v35 = vpack.c.bf16 %v2473_v21, %v2466_v5  ;;  %v12585_v30 = vpack.c.bf16 %v16862_v31, %v16835_v45  ;;  %v12588_v51 = vpack.c.bf16 %v25126_v19, %v25125_v41  ;;  %v12789_v54 = vpack.c.bf16 %v25128_v9, %v17117_v47  ;;  %v25129_v28 = vld [vmem:[#allocation72_spill] sm:$0xff]  ;;  %v25130_v5 = vld [vmem:[#allocation78_spill] sm:$0xff] }
 0x196   :  { %12578 = vmatprep.subr.bf16.mxu0 %v24480_v34  ;;  %12778 = vmatpush1.bf16.msra.mxu1 %v12777_v25  ;;  %v12783_v24 = vpack.c.bf16 %v3462_v26, %v3455_v42  ;;  %v25124_v25 = vld [vmem:[#allocation55_spill] sm:$0xff]  ;;  %v12792_v21 = vpack.c.bf16 %v17143_v60, %v17141_v14  ;;  %v25132_v42 = vld [vmem:[#allocation33_spill] sm:$0xff]  ;;  %vm25151_vm1 = vnez %v25150_v63  ;;  %v25183_v63 = vld [vmem:[#allocation70_spill] sm:$0xff] }
 0x197   :  { %12779 = vmatprep.subr.bf16.mxu1 %v24480_v34  ;;  %v12594_v26 = vpack.c.bf16 %v17161_v10, %v25132_v42 }
 0x199   :  { %12580 = vmatpush1.bf16.msra.mxu0 %v12579_v29  ;;  %v12591_v29 = vpack.c.bf16 %v17139_v16, %v17121_v50 }
 0x19a   :  { %12581 = vmatprep.subr.bf16.mxu0 %v24480_v34  ;;  %12781 = vmatpush1.bf16.msra.mxu1 %v12780_v8  ;;  %v25131_v8 = vld [vmem:[#allocation79_spill] sm:$0xff] }
 0x19b   :  { %12782 = vmatprep.subr.bf16.mxu1 %v24480_v34 }
 0x19d   :  { %12583 = vmatpush1.bf16.msra.mxu0 %v12582_v35  ;;  %v25133_v35 = vld [vmem:[#allocation57_spill] sm:$0xff] }
 0x19e   :  { %12584 = vmatprep.subr.bf16.mxu0 %v24480_v34  ;;  %12784 = vmatpush1.bf16.msra.mxu1 %v12783_v24  ;;  %v25134_v24 = vld [vmem:[#allocation36_spill] sm:$0xff] }
 0x19f   :  { %12785 = vmatprep.subr.bf16.mxu1 %v24480_v34 }
 0x1a0   :  { %2498 = vmatmul.mubr.f32.vlgmr.msra.gmra.mrb[6].mxu0 %v25124_v25 }
 0x1a1   :  { %12586 = vmatpush1.bf16.msra.mxu0 %v12585_v30  ;;  %2503 = vmatprep.mubr.f32.mxu0 %v25127_v17  ;;  %v12795_v30 = vpack.c.bf16 %v25134_v24, %v17166_v56 }
 0x1a2   :  { %3487 = vmatmul.mubr.f32.vlgmr.msra.gmra.mrb[6].mxu1 %v25124_v25  ;;  %12587 = vmatprep.subr.bf16.mxu0 %v24480_v34 }
 0x1a3   :  { %12787 = vmatpush1.bf16.msra.mxu1 %v12786_v57  ;;  %3492 = vmatprep.mubr.f32.mxu1 %v25127_v17  ;;  %v25135_v57 = vld [vmem:[#allocation39_spill] sm:$0xff] }
 0x1a4   :  { %12788 = vmatprep.subr.bf16.mxu1 %v24480_v34  ;;  %2505 = vmatmul.mubr.f32.gmra.mrb[8].mxu0 %v25129_v28 }
 0x1a5   :  { %12589 = vmatpush1.bf16.msra.mxu0 %v12588_v51  ;;  %2510 = vmatprep.mubr.f32.mxu0 %v25130_v5  ;;  %v12597_v51 = vpack.c.bf16 %v17201_v58, %v25135_v57 }
 0x1a6   :  { %12590 = vmatprep.subr.bf16.mxu0 %v24480_v34  ;;  %3494 = vmatmul.mubr.f32.gmra.mrb[8].mxu1 %v25129_v28 }
 0x1a7   :  { %12790 = vmatpush1.bf16.msra.mxu1 %v12789_v54  ;;  %3499 = vmatprep.mubr.f32.mxu1 %v25130_v5  ;;  %v12798_v54 = vpack.c.bf16 %v17259_v55, %v17240_v38 }
 0x1a8   :  { %12791 = vmatprep.subr.bf16.mxu1 %v24480_v34  ;;  %2512 = vmatmul.mubr.f32.gmra.mrb[10].mxu0 %v25131_v8 }
 0x1a9   :  { %12592 = vmatpush1.bf16.msra.mxu0 %v12591_v29  ;;  %2627 = vmatprep.mubr.f32.mxu0 %v25133_v35  ;;  %v12600_v29 = vpack.c.bf16 %v17284_v15, %v17282_v62 }
 0x1aa   :  { %12593 = vmatprep.subr.bf16.mxu0 %v24480_v34  ;;  %3501 = vmatmul.mubr.f32.gmra.mrb[10].mxu1 %v25131_v8  ;;  %v25185_v8 = vand.u32 4294901760, %v16914_v40  ;;  %v25191_v40 = vand.u32 4294901760, %v25128_v9 }
 0x1ab   :  { %12793 = vmatpush1.bf16.msra.mxu1 %v12792_v21  ;;  %3616 = vmatprep.mubr.f32.mxu1 %v25133_v35  ;;  %v12801_v21 = vpack.c.bf16 %v17323_v27, %v17300_v48  ;;  %v25165_v35 = vld [vmem:[#allocation28_spill] sm:$0xff] }
 0x1ac   :  { %12794 = vmatprep.subr.bf16.mxu1 %v24480_v34 }
 0x1ad   :  { %12595 = vmatpush1.bf16.msra.mxu0 %v12594_v26  ;;  %v12603_v26 = vpack.c.bf16 %v17375_v39, %v17361_v20 }
 0x1ae   :  { %12596 = vmatprep.subr.bf16.mxu0 %v24480_v34 }
 0x1af   :  { %12796 = vmatpush1.bf16.msra.mxu1 %v12795_v30  ;;  %v12804_v30 = vpack.c.bf16 %v17476_v32, %v17474_v1 }
 0x1b0   :  { %12797 = vmatprep.subr.bf16.mxu1 %v24480_v34 }
 0x1b1   :  { %12598 = vmatpush1.bf16.msra.mxu0 %v12597_v51  ;;  %v12606_v51 = vpack.c.bf16 %v17518_v11, %v17516_v2 }
 0x1b2   :  { %12599 = vmatprep.subr.bf16.mxu0 %v24480_v34 }
 0x1b3   :  { %12799 = vmatpush1.bf16.msra.mxu1 %v12798_v54  ;;  %v12807_v54 = vpack.c.bf16 %v17549_v12, %v17533_v0 }
 0x1b4   :  { %12800 = vmatprep.subr.bf16.mxu1 %v24480_v34 }
 0x1b5   :  { %12601 = vmatpush1.bf16.msra.mxu0 %v12600_v29  ;;  %v12609_v29 = vpack.c.bf16 %v17659_v36, %v17611_v6 }
 0x1b6   :  { %12602 = vmatprep.subr.bf16.mxu0 %v24480_v34 }
 0x1b7   :  { %12802 = vmatpush1.bf16.msra.mxu1 %v12801_v21  ;;  %v12810_v21 = vpack.c.bf16 %v17666_v59, %v17661_v23 }
 0x1b8   :  { %12803 = vmatprep.subr.bf16.mxu1 %v24480_v34 }
 0x1b9   :  { %12604 = vmatpush1.bf16.msra.mxu0 %v12603_v26  ;;  %v12612_v26 = vpack.c.bf16 %v17702_v13, %v17700_v7 }
 0x1ba   :  { %12605 = vmatprep.subr.bf16.mxu0 %v24480_v34 }
 0x1bb   :  { %12805 = vmatpush1.bf16.msra.mxu1 %v12804_v30  ;;  %v12813_v30 = vpack.c.bf16 %v17727_v37, %v17717_v4 }
 0x1bc   :  { %12806 = vmatprep.subr.bf16.mxu1 %v24480_v34 }
 0x1bd   :  { %12607 = vmatpush1.bf16.msra.mxu0 %v12606_v51  ;;  %v12615_v51 = vpack.c.bf16 %v17773_v53, %v17762_v61 }
 0x1be   :  { %12608 = vmatprep.subr.bf16.mxu0 %v24480_v34 }
 0x1bf   :  { %12808 = vmatpush1.bf16.msra.mxu1 %v12807_v54  ;;  %v12816_v54 = vpack.c.bf16 %v17823_v43, %v17814_v3 }
 0x1c0   :  { %12809 = vmatprep.subr.bf16.mxu1 %v24480_v34 }
 0x1c1   :  { %12610 = vmatpush1.bf16.msra.mxu0 %v12609_v29  ;;  %v25136_v29 = vld [vmem:[#allocation59_spill] sm:$0xff] }
 0x1c2   :  { %12611 = vmatprep.subr.bf16.mxu0 %v24480_v34 }
 0x1c3   :  { %12811 = vmatpush1.bf16.msra.mxu1 %v12810_v21  ;;  %v25137_v21 = vmov 1.0|1.0  }
 0x1c4   :  { %12812 = vmatprep.subr.bf16.mxu1 %v24480_v34 }
 0x1c5   :  { %12613 = vmatpush1.bf16.msra.mxu0 %v12612_v26  ;;  %v25138_v26 = vld [vmem:[#allocation61_spill] sm:$0xff] }
 0x1c6   :  { %12614 = vmatprep.subr.bf16.mxu0 %v24480_v34  ;;  %vm25139_vm7 = vnez %v25138_v26 }
 0x1c7   :  { %12814 = vmatpush1.bf16.msra.mxu1 %v12813_v30  ;;  %v25141_v30 = vld [vmem:[#allocation65_spill] sm:$0xff] }
 0x1c8   :  { %12815 = vmatprep.subr.bf16.mxu1 %v24480_v34  ;;  %vm25142_vm8 = vnez %v25141_v30  ;;  %v25264_v30 = vld [vmem:[#allocation9_spill] sm:$0xff] }
 0x1c9   :  { %12616 = vmatpush1.bf16.msra.mxu0 %v12615_v51  ;;  %v25143_v51 = vld [vmem:[#allocation74_spill] sm:$0xff] }
 0x1ca   :  { %12617 = vmatprep.subr.bf16.mxu0 %v24480_v34 }
 0x1cb   :  { %12817 = vmatpush1.bf16.msra.mxu1 %v12816_v54  ;;  %v25144_v54 = vld [vmem:[#allocation12_spill] sm:$0xff] }
 0x1cc   :  { %12818 = vmatprep.subr.bf16.mxu1 %v24480_v34  ;;  %2630 = vmatmul.mubr.f32.vlgmr.msra.gmra.mrb[6].mxu0 %v25136_v29  ;;  %vm25145_vm2 = vnez %v25144_v54 }
 0x1cd   :  { %12619 = vmatpush1.bf16.msk.msra.mxu0 %vm25139_vm7, %v25137_v21  ;;  %2636 = vmatprep.mubr.f32.mxu0 %v25140_v18 }
 0x1ce   :  { %3619 = vmatmul.mubr.f32.vlgmr.msra.gmra.mrb[6].mxu1 %v25136_v29  ;;  %12620 = vmatprep.subr.bf16.mxu0 %v24480_v34  ;;  %v25163_v29 = vld [vmem:[#allocation27_spill] sm:$0xff] }
 0x1cf   :  { %12820 = vmatpush1.bf16.msk.msra.mxu1 %vm25142_vm8, %v25137_v21  ;;  %3625 = vmatprep.mubr.f32.mxu1 %v25140_v18  ;;  %v25157_v18 = vld [vmem:[#allocation14_spill] sm:$0xff] }
 0x1d0   :  { %12821 = vmatprep.subr.bf16.mxu1 %v24480_v34  ;;  %2639 = vmatmul.mubr.f32.gmra.mrb[8].mxu0 %v25143_v51  ;;  %vm25158_vm4 = vnez %v25157_v18  ;;  %v25186_v18 = vld [vmem:[#allocation64_spill] sm:$0xff] }
 0x1d1   :  { %12622 = vmatpush1.bf16.msk.msra.mxu0 %vm25145_vm2, %v25137_v21  ;;  %2645 = vmatprep.mubr.f32.mxu0 %v25146_v33 }
 0x1d2   :  { %12623 = vmatprep.subr.bf16.mxu0 %v24480_v34  ;;  %3628 = vmatmul.mubr.f32.gmra.mrb[8].mxu1 %v25143_v51  ;;  %v25153_v51 = vld [vmem:[#allocation19_spill] sm:$0xff] }
 0x1d3   :  { %12823 = vmatpush1.bf16.msk.msra.mxu1 %vm25148_vm6, %v25137_v21  ;;  %3634 = vmatprep.mubr.f32.mxu1 %v25146_v33  ;;  %vm25154_vm0 = vnez %v25153_v51  ;;  %v25155_v33 = vld [vmem:[#allocation11_spill] sm:$0xff] }
 0x1d4   :  { %12824 = vmatprep.subr.bf16.mxu1 %v24480_v34  ;;  %2648 = vmatmul.mubr.f32.gmra.mrb[10].mxu0 %v25149_v44  ;;  %vm25156_vm9 = vnez %v25155_v33  ;;  %v25181_v33 = vand.u32 4294901760, %v16862_v31  ;;  %v25188_v31 = vand.u32 4294901760, %v25126_v19  ;;  %v25193_v19 = vand.u32 4294901760, %v17121_v50  ;;  %v25198_v50 = vld [vmem:[#allocation85_spill] sm:$0xff] }
 0x1d5   :  { %12625 = vmatpush1.bf16.msk.msra.mxu0 %vm25151_vm1, %v25137_v21  ;;  %2742 = vmatprep.mubr.f32.mxu0 %v25152_v52 }
 0x1d6   :  { %12626 = vmatprep.subr.bf16.mxu0 %v24480_v34  ;;  %3637 = vmatmul.mubr.f32.gmra.mrb[10].mxu1 %v25149_v44  ;;  %v25159_v44 = vld [vmem:[#allocation20_spill] sm:$0xff] }
 0x1d7   :  { %12826 = vmatpush1.bf16.msk.msra.mxu1 %vm25154_vm0, %v25137_v21  ;;  %3731 = vmatprep.mubr.f32.mxu1 %v25152_v52  ;;  %vm25160_vm11 = vnez %v25159_v44  ;;  %v25161_v52 = vld [vmem:[#allocation24_spill] sm:$0xff]  ;;  %v25167_v44 = vld [vmem:[#allocation42_spill] sm:$0xff] }
 0x1d8   :  { %12827 = vmatprep.subr.bf16.mxu1 %v24480_v34  ;;  %vm25162_vm0 = vnez %v25161_v52  ;;  %v25169_v52 = vld [vmem:[#allocation46_spill] sm:$0xff] }
 0x1d9   :  { %12628 = vmatpush1.bf16.msk.msra.mxu0 %vm25156_vm9, %v25137_v21  ;;  %vm25164_vm9 = vnez %v25163_v29  ;;  %v25171_v29 = vld [vmem:[#allocation47_spill] sm:$0xff] }
 0x1da   :  { %12629 = vmatprep.subr.bf16.mxu0 %v24480_v34 }
 0x1db   :  { %12829 = vmatpush1.bf16.msk.msra.mxu1 %vm25158_vm4, %v25137_v21  ;;  %vm25166_vm4 = vnez %v25165_v35  ;;  %v25184_v35 = vand.u32 4294901760, %v16885_v46  ;;  %v25190_v46 = vand.u32 4294901760, %v17117_v47  ;;  %v25196_v47 = vand.u32 4294901760, %v17141_v14 }
 0x1dc   :  { %12830 = vmatprep.subr.bf16.mxu1 %v24480_v34  ;;  %v25202_v14 = vand.u32 4294901760, %v25134_v24  ;;  %v25207_v24 = vand.u32 4294901760, %v17282_v62  ;;  %v25213_v62 = vand.u32 4294901760, %v17474_v1  ;;  %v25219_v1 = vand.u32 4294901760, %v17611_v6 }
 0x1dd   :  { %12631 = vmatpush1.bf16.msk.msra.mxu0 %vm25160_vm11, %v25137_v21  ;;  %vm25168_vm11 = vnez %v25167_v44  ;;  %v25178_v44 = vld [vmem:[#allocation68_spill] sm:$0xff]  ;;  %v12853_v22 = vpack.c.bf16 %v25185_v8, %v25184_v35  ;;  %v12856_v8 = vpack.c.bf16 %v25191_v40, %v25190_v46  ;;  %v25194_v35 = vand.u32 4294901760, %v17139_v16 }
 0x1de   :  { %12632 = vmatprep.subr.bf16.mxu0 %v24480_v34  ;;  %v25199_v16 = vand.u32 4294901760, %v25132_v42  ;;  %v25204_v42 = vand.u32 4294901760, %v17201_v58  ;;  %v25209_v58 = vand.u32 4294901760, %v17300_v48  ;;  %v25215_v48 = vand.u32 4294901760, %v17516_v2 }
 0x1df   :  { %12832 = vmatpush1.bf16.msk.msra.mxu1 %vm25162_vm0, %v25137_v21  ;;  %vm25170_vm0 = vnez %v25169_v52  ;;  %v25180_v52 = vand.u32 4294901760, %v16835_v45  ;;  %v25187_v45 = vand.u32 4294901760, %v25125_v41  ;;  %v25192_v41 = vld [vmem:[#allocation76_spill] sm:$0xff]  ;;  %v25222_v2 = vand.u32 4294901760, %v17666_v59 }
 0x1e0   :  { %12833 = vmatprep.subr.bf16.mxu1 %v24480_v34  ;;  %v25225_v6 = vand.u32 4294901760, %v17702_v13  ;;  %v25226_v59 = vand.u32 4294901760, %v17717_v4  ;;  %v25229_v13 = vand.u32 4294901760, %v17762_v61 }
 0x1e1   :  { %12634 = vmatpush1.bf16.msk.msra.mxu0 %vm25164_vm9, %v25137_v21  ;;  %vm25172_vm9 = vnez %v25171_v29  ;;  %v12652_v51 = vpack.c.bf16 %v25181_v33, %v25180_v52  ;;  %v25182_v29 = vld [vmem:[#allocation71_spill] sm:$0xff]  ;;  %v12655_v52 = vpack.c.bf16 %v25188_v31, %v25187_v45  ;;  %v25189_v33 = vld [vmem:[#allocation77_spill] sm:$0xff]  ;;  %v25195_v45 = vld [vmem:[#allocation84_spill] sm:$0xff]  ;;  %v25200_v31 = vand.u32 4294901760, %v17161_v10 }
 0x1e2   :  { %12635 = vmatprep.subr.bf16.mxu0 %v24480_v34  ;;  %v25203_v10 = vand.u32 4294901760, %v25135_v57  ;;  %v25210_v57 = vand.u32 4294901760, %v17323_v27  ;;  %v25216_v27 = vand.u32 4294901760, %v17518_v11  ;;  %v25221_v11 = vand.u32 4294901760, %v17661_v23 }
 0x1e3   :  { %12835 = vmatpush1.bf16.msk.msra.mxu1 %vm25166_vm4, %v25137_v21 }
 0x1e4   :  { %12836 = vmatprep.subr.bf16.mxu1 %v24480_v34  ;;  %v12664_v40 = vpack.c.bf16 %v25204_v42, %v25203_v10  ;;  %v25227_v10 = vand.u32 4294901760, %v17727_v37  ;;  %v25231_v37 = vand.u32 4294901760, %v17814_v3 }
 0x1e5   :  { %12637 = vmatpush1.bf16.msk.msra.mxu0 %vm25168_vm11, %v25137_v21 }
 0x1e6   :  { %12638 = vmatprep.subr.bf16.mxu0 %v24480_v34  ;;  %v12880_v42 = vpack.c.bf16 %v25227_v10, %v25226_v59  ;;  %v4044_v10 = vld [vmem:[%s23529_s0 + $0xe] sm:$0x1] }
 0x1e7   :  { %12838 = vmatpush1.bf16.msk.msra.mxu1 %vm25170_vm0, %v25137_v21 }
 0x1e8   :  { %12839 = vmatprep.subr.bf16.mxu1 %v24480_v34 }
 0x1e9   :  { %12640 = vmatpush1.bf16.msk.msra.mxu0 %vm25172_vm9, %v25137_v21 }
 0x1ea   :  { %12641 = vmatprep.subr.bf16.mxu0 %v24480_v34 }
 0x1eb   :  { %12841 = vmatpush1.bf16.msk.msra.mxu1 %vm17367_vm14, %v25137_v21 }
 0x1ec   :  { %12842 = vmatprep.subr.bf16.mxu1 %v24480_v34 }
 0x1ed   :  { %12643 = vmatpush1.bf16.msk.msra.mxu0 %vm17382_vm12, %v25137_v21 }
 0x1ee   :  { %12644 = vmatprep.subr.bf16.mxu0 %v24480_v34 }
 0x1ef   :  { %12844 = vmatpush1.bf16.msk.msra.mxu1 %vm17400_vm15, %v25137_v21 }
 0x1f0   :  { %12845 = vmatprep.subr.bf16.mxu1 %v24480_v34 }
 0x1f1   :  { %12646 = vmatpush1.bf16.msk.msra.mxu0 %vm17540_vm5, %v25137_v21 }
 0x1f2   :  { %12647 = vmatprep.subr.bf16.mxu0 %v24480_v34 }
 0x1f3   :  { %12847 = vmatpush1.bf16.msk.msra.mxu1 %vm17573_vm3, %v25137_v21 }
 0x1f4   :  { %12848 = vmatprep.subr.bf16.mxu1 %v24480_v34 }
 0x1f5   :  { %12650 = vmatpush1.bf16.msk.msra.mxu0 %vm17617_vm13, %v25178_v44 }
 0x1f6   :  { %12651 = vmatprep.subr.bf16.mxu0 %v24480_v34 }
 0x1f7   :  { %12851 = vmatpush1.bf16.msk.msra.mxu1 %vm17642_vm10, %v25182_v29 }
 0x1f8   :  { %12852 = vmatprep.subr.bf16.mxu1 %v24480_v34  ;;  %2746 = vmatmul.mubr.f32.vlgmr.msra.gmra.mrb[6].mxu0 %v25186_v18 }
 0x1f9   :  { %12653 = vmatpush1.bf16.msra.mxu0 %v12652_v51  ;;  %2753 = vmatprep.mubr.f32.mxu0 %v25189_v33  ;;  %v12658_v51 = vpack.c.bf16 %v25194_v35, %v25193_v19  ;;  %v25208_v35 = vand.u32 4294901760, %v17284_v15  ;;  %v25214_v15 = vand.u32 4294901760, %v17476_v32  ;;  %v25220_v32 = vand.u32 4294901760, %v17659_v36 }
 0x1fa   :  { %3735 = vmatmul.mubr.f32.vlgmr.msra.gmra.mrb[6].mxu1 %v25186_v18  ;;  %12654 = vmatprep.subr.bf16.mxu0 %v24480_v34 }
 0x1fb   :  { %12854 = vmatpush1.bf16.msra.mxu1 %v12853_v22  ;;  %3742 = vmatprep.mubr.f32.mxu1 %v25189_v33  ;;  %v25197_v22 = vand.u32 4294901760, %v17143_v60  ;;  %v25201_v60 = vand.u32 4294901760, %v17166_v56  ;;  %v25206_v56 = vand.u32 4294901760, %v17259_v55  ;;  %v25212_v55 = vand.u32 4294901760, %v17375_v39  ;;  %v25447_v33 = vld [vmem:[#allocation43_spill] sm:$0xff] }
 0x1fc   :  { %12855 = vmatprep.subr.bf16.mxu1 %v24480_v34  ;;  %2757 = vmatmul.mubr.f32.gmra.mrb[8].mxu0 %v25192_v41  ;;  %v25217_v39 = vand.u32 4294901760, %v17533_v0  ;;  %v18145_v0 = vpop.permute.xlu0 %187 }
 0x1fd   :  { %12656 = vmatpush1.bf16.msra.mxu0 %v12655_v52  ;;  %2764 = vmatprep.mubr.f32.mxu0 %v25195_v45  ;;  %v12859_v9 = vpack.c.bf16 %v25197_v22, %v25196_v47  ;;  %v12661_v52 = vpack.c.bf16 %v25200_v31, %v25199_v16  ;;  %v12862_v46 = vpack.c.bf16 %v25202_v14, %v25201_v60 }
 0x1fe   :  { %12657 = vmatprep.subr.bf16.mxu0 %v24480_v34  ;;  %3746 = vmatmul.mubr.f32.gmra.mrb[8].mxu1 %v25192_v41  ;;  %v12868_v47 = vpack.c.bf16 %v25210_v57, %v25209_v58  ;;  %v12673_v16 = vpack.c.bf16 %v25216_v27, %v25215_v48  ;;  %v12877_v60 = vpack.c.bf16 %v25222_v2, %v25221_v11  ;;  %v25444_v41 = vmov 0 }
 0x1ff   :  { %12857 = vmatpush1.bf16.msra.mxu1 %v12856_v8  ;;  %3753 = vmatprep.mubr.f32.mxu1 %v25195_v45  ;;  %v25205_v8 = vand.u32 4294901760, %v17240_v38  ;;  %v25211_v38 = vand.u32 4294901760, %v17361_v20  ;;  %v25218_v20 = vand.u32 4294901760, %v17549_v12  ;;  %25223 = vst [vmem:[#allocation88_spill] sm:$0xff] %v18145_v0  ;;  %v25224_v12 = vand.u32 4294901760, %v17700_v7 }
 0x200   :  { %12858 = vmatprep.subr.bf16.mxu1 %v24480_v34  ;;  %2768 = vmatmul.mubr.f32.gmra.mrb[10].mxu0 %v25198_v50  ;;  %v18159_v7 = vpop.permute.xlu0 %192  ;;  %v25434_v45 = vmov 0 }
 0x201   :  { %12659 = vmatpush1.bf16.msra.mxu0 %v12658_v51  ;;  %2904 = vmatprep.mubr.f32.mxu0 %v24793_v49  ;;  %v12865_v19 = vpack.c.bf16 %v25206_v56, %v25205_v8  ;;  %v12667_v51 = vpack.c.bf16 %v25208_v35, %v25207_v24  ;;  %v12670_v22 = vpack.c.bf16 %v25212_v55, %v25211_v38  ;;  %v25230_v56 = vand.u32 4294901760, %v17773_v53  ;;  %v18173_v38 = vpop.permute.xlu1 %197 }
 0x202   :  { %12660 = vmatprep.subr.bf16.mxu0 %v24480_v34  ;;  %3757 = vmatmul.mubr.f32.gmra.mrb[10].mxu1 %v25198_v50  ;;  %v12874_v31 = vpack.c.bf16 %v25218_v20, %v25217_v39  ;;  %v12679_v14 = vpack.c.bf16 %v25225_v6, %v25224_v12  ;;  %25228 = vst [vmem:[#allocation89_spill] sm:$0xff] %v18159_v7  ;;  %25233 = vst [vmem:[#allocation90_spill] sm:$0xff] %v18173_v38 }
 0x203   :  { %12860 = vmatpush1.bf16.msra.mxu1 %v12859_v9  ;;  %3893 = vmatprep.mubr.f32.mxu1 %v24793_v49  ;;  %v12871_v9 = vpack.c.bf16 %v25214_v15, %v25213_v62 }
 0x204   :  { %12861 = vmatprep.subr.bf16.mxu1 %v24480_v34 }
 0x205   :  { %12662 = vmatpush1.bf16.msra.mxu0 %v12661_v52  ;;  %v12676_v52 = vpack.c.bf16 %v25220_v32, %v25219_v1  ;;  %v25235_v32 = vld [vmem:[#allocation79_spill] sm:$0xff] }
 0x206   :  { %12663 = vmatprep.subr.bf16.mxu0 %v24480_v34 }
 0x207   :  { %12863 = vmatpush1.bf16.msra.mxu1 %v12862_v46 }
 0x208   :  { %12864 = vmatprep.subr.bf16.mxu1 %v24480_v34 }
 0x209   :  { %12665 = vmatpush1.bf16.msra.mxu0 %v12664_v40 }
 0x20a   :  { %12666 = vmatprep.subr.bf16.mxu0 %v24480_v34 }
 0x20b   :  { %12866 = vmatpush1.bf16.msra.mxu1 %v12865_v19  ;;  %v12682_v19 = vpack.c.bf16 %v25230_v56, %v25229_v13  ;;  %v25245_v56 = vld [vmem:[#allocation24_spill] sm:$0xff] }
 0x20c   :  { %12867 = vmatprep.subr.bf16.mxu1 %v24480_v34 }
 0x20d   :  { %12668 = vmatpush1.bf16.msra.mxu0 %v12667_v51  ;;  %v25232_v51 = vand.u32 4294901760, %v17823_v43 }
 0x20e   :  { %12669 = vmatprep.subr.bf16.mxu0 %v24480_v34  ;;  %v1040_v36 = vpop.f32.mrb[0].mxu0 }
 0x20f   :  { %12869 = vmatpush1.bf16.msra.mxu1 %v12868_v47  ;;  %v14161_v46 = vadd.f32 %v1040_v36, %v18145_v0  ;;  %v1042_v23 = vpop.f32.mrb[1].mxu0  ;;  %v12883_v58 = vpack.c.bf16 %v25232_v51, %v25231_v37 }
 0x210   :  { %12870 = vmatprep.subr.bf16.mxu1 %v24480_v34  ;;  %v2026_v8 = vpop.f32.mrb[0].mxu1  ;;  %v25241_v23 = vld [vmem:[#allocation14_spill] sm:$0xff] }
 0x211   :  { %12671 = vmatpush1.bf16.msra.mxu0 %v12670_v22  ;;  %v11127_v40 = vmul.f32 -1.442695, %v14161_v46  ;;  %v14164_v24 = vadd.f32 %v2026_v8, %v18145_v0  ;;  %v2028_v35 = vpop.f32.mrb[1].mxu1  ;;  %v5033_v8 = vld [vmem:[%s23529_s0 + $0xf] sm:$0x1] }
 0x212   :  { %12672 = vmatprep.subr.bf16.mxu0 %v24480_v34  ;;  %v1047_v4 = vpop.f32.mrb[2].mxu0  ;;  %v25247_v35 = vld [vmem:[#allocation27_spill] sm:$0xff] }
 0x213   :  { %12872 = vmatpush1.bf16.msra.mxu1 %v12871_v9  ;;  %14510 = vpow2.f32 %v11127_v40  ;;  %v11219_v57 = vmul.f32 -1.442695, %v14164_v24  ;;  %v14162_v47 = vadd.f32 %v1047_v4, %v18159_v7  ;;  %v1049_v61 = vpop.f32.mrb[3].mxu0  ;;  %v25243_v40 = vld [vmem:[#allocation20_spill] sm:$0xff]  ;;  %v5060_v4 = vadd.s32 164, %v5033_v8  ;;  %v25295_v8 = vld [vmem:[#allocation66_spill] sm:$0xff] }
 0x214   :  { %12873 = vmatprep.subr.bf16.mxu1 %v24480_v34  ;;  %v2033_v53 = vpop.f32.mrb[2].mxu1  ;;  %v18254_v61 = vld [vmem:[%s23529_s0 + $0x4] ss:$0 sm:$0xff] }
 0x215   :  { %12674 = vmatpush1.bf16.msra.mxu0 %v12673_v16  ;;  %14512 = vpow2.f32 %v11219_v57  ;;  %v11128_v55 = vmul.f32 -1.442695, %v14162_v47  ;;  %v14165_v22 = vadd.f32 %v2033_v53, %v18159_v7  ;;  %v2035_v62 = vpop.f32.mrb[3].mxu1  ;;  %v25251_v57 = vld [vmem:[#allocation8_spill] sm:$0xff] }
 0x216   :  { %12675 = vmatprep.subr.bf16.mxu0 %v24480_v34  ;;  %v1054_v3 = vpop.f32.mrb[4].mxu0 }
 0x217   :  { %12875 = vmatpush1.bf16.msra.mxu1 %v12874_v31  ;;  %14514 = vpow2.f32 %v11128_v55  ;;  %v11220_v43 = vmul.f32 -1.442695, %v14165_v22  ;;  %v14163_v15 = vadd.f32 %v1054_v3, %v18173_v38  ;;  %v1056_v9 = vpop.f32.mrb[5].mxu0  ;;  %v18260_v22 = vrot.slane %v5060_v4, %v25251_v57  ;;  %v18268_v3 = vld [vmem:[%s23529_s0 + $0x5] ss:$0 sm:$0xff]  ;;  %v25306_v4 = vld [vmem:[#allocation67_spill] sm:$0xff] }
 0x218   :  { %12876 = vmatprep.subr.bf16.mxu1 %v24480_v34  ;;  %v2040_v48 = vpop.f32.mrb[4].mxu1  ;;  %v25255_v9 = vld [vmem:[#allocation6_spill] sm:$0xff] }
 0x219   :  { %12677 = vmatpush1.bf16.msra.mxu0 %v12676_v52  ;;  %14516 = vpow2.f32 %v11220_v43  ;;  %v11129_v27 = vmul.f32 -1.442695, %v14163_v15  ;;  %v14166_v16 = vadd.f32 %v2040_v48, %v18173_v38  ;;  %v2042_v39 = vpop.f32.mrb[5].mxu1  ;;  %v25256_v48 = vld [vmem:[#allocation7_spill] sm:$0xff]  ;;  %v25320_v15 = vld [vmem:[#allocation25_spill] sm:$0xff]  ;;  %v25337_v52 = vmov 0 }
 0x21a   :  { %12678 = vmatprep.subr.bf16.mxu0 %v24480_v34  ;;  %v25411_v38 = vmov 0 }
 0x21b   :  { %12878 = vmatpush1.bf16.msra.mxu1 %v12877_v60  ;;  %14518 = vpow2.f32 %v11129_v27  ;;  %v11221_v26 = vmul.f32 -1.442695, %v14166_v16  ;;  %v25237_v60 = vld [vmem:[#allocation19_spill] sm:$0xff]  ;;  %v25329_v16 = vld [vmem:[#allocation26_spill] sm:$0xff] }
 0x21c   :  { %12879 = vmatprep.subr.bf16.mxu1 %v24480_v34 }
 0x21d   :  { %12680 = vmatpush1.bf16.msra.mxu0 %v12679_v14  ;;  %v14511_v20 = vpop.eup %14510  ;;  %14520 = vpow2.f32 %v11221_v26  ;;  %v25239_v14 = vld [vmem:[#allocation11_spill] sm:$0xff]  ;;  %v25259_v26 = vmov 0 }
 0x21e   :  { %12681 = vmatprep.subr.bf16.mxu0 %v24480_v34  ;;  %v1067_v31 = vadd.f32 1.0, %v14511_v20  ;;  %v25334_v20 = vmov 0 }
 0x21f   :  { %12881 = vmatpush1.bf16.msra.mxu1 %v12880_v42  ;;  %v14513_v1 = vpop.eup %14512 }
 0x220   :  { %12882 = vmatprep.subr.bf16.mxu1 %v24480_v34  ;;  %14522 = vrcp.f32 %v1067_v31  ;;  %v2053_v54 = vadd.f32 1.0, %v14513_v1  ;;  %v25262_v31 = vmov 0  ;;  %v25265_v1 = vmov 0 }
 0x221   :  { %12683 = vmatpush1.bf16.msra.mxu0 %v12682_v19  ;;  %v14515_v11 = vpop.eup %14514  ;;  %v4071_v19 = vadd.s32 164, %v4044_v10  ;;  %v25288_v10 = vmov 0 }
 0x222   :  { %12684 = vmatprep.subr.bf16.mxu0 %v24480_v34  ;;  %14524 = vrcp.f32 %v2053_v54  ;;  %v1068_v2 = vadd.f32 1.0, %v14515_v11  ;;  %v25267_v54 = vld [vmem:[#allocation10_spill] sm:$0xff]  ;;  %v25269_v11 = vmov 0 }
 0x223   :  { %12884 = vmatpush1.bf16.msra.mxu1 %v12883_v58  ;;  %v14517_v12 = vpop.eup %14516  ;;  %v18248_v47 = vrot.slane %v4071_v19, %v25251_v57  ;;  %vm4052_vm3 = vcmp.eq.s32.totalorder %v25267_v54, %v18254_v61  ;;  %v25300_v19 = vmov 0  ;;  %v25310_v58 = vmov 0 }
 0x224   :  { %12885 = vmatprep.subr.bf16.mxu1 %v24480_v34  ;;  %2906 = vmatmul.mubr.f32.vlgmr.msra.gmra.mrb[6].mxu0 %v25124_v25  ;;  %14526 = vrcp.f32 %v1068_v2  ;;  %v2054_v6 = vadd.f32 1.0, %v14517_v12  ;;  %v25271_v2 = vmov 0 }
 0x225   :  { %12686 = vmatpush1.bf16.msk.msra.mxu0 %vm25139_vm7, %v25137_v21  ;;  %2911 = vmatprep.mubr.f32.mxu0 %v25127_v17  ;;  %vm25238_vm7 = vnez %v25237_v60  ;;  %v14519_v36 = vpop.eup %14518  ;;  %v25274_v60 = vmov 0 }
 0x226   :  { %3895 = vmatmul.mubr.f32.vlgmr.msra.gmra.mrb[6].mxu1 %v25124_v25  ;;  %12687 = vmatprep.subr.bf16.mxu0 %v24480_v34  ;;  %14528 = vrcp.f32 %v2054_v6  ;;  %v1069_v46 = vadd.f32 1.0, %v14519_v36  ;;  %v25277_v6 = vmov 0  ;;  %v25280_v36 = vmov 0 }
 0x227   :  { %12887 = vmatpush1.bf16.msk.msra.mxu1 %vm25142_vm8, %v25137_v21  ;;  %3900 = vmatprep.mubr.f32.mxu1 %v25127_v17  ;;  %vm25240_vm8 = vnez %v25239_v14  ;;  %v14521_v59 = vpop.eup %14520  ;;  %v25279_v14 = vld [vmem:[#allocation15_spill] sm:$0xff] }
 0x228   :  { %12888 = vmatprep.subr.bf16.mxu1 %v24480_v34  ;;  %2913 = vmatmul.mubr.f32.gmra.mrb[8].mxu0 %v25129_v28  ;;  %14530 = vrcp.f32 %v1069_v46  ;;  %v2055_v42 = vadd.f32 1.0, %v14521_v59  ;;  %v25286_v59 = vld [vmem:[#allocation62_spill] sm:$0xff] }
 0x229   :  { %12689 = vmatpush1.bf16.msk.msra.mxu0 %vm25145_vm2, %v25137_v21  ;;  %2918 = vmatprep.mubr.f32.mxu0 %v25130_v5  ;;  %vm25242_vm2 = vnez %v25241_v23  ;;  %v25285_v23 = vld [vmem:[#allocation16_spill] sm:$0xff] }
 0x22a   :  { %12690 = vmatprep.subr.bf16.mxu0 %v24480_v34  ;;  %3902 = vmatmul.mubr.f32.gmra.mrb[8].mxu1 %v25129_v28  ;;  %v14523_v13 = vpop.eup %14522  ;;  %14532 = vrcp.f32 %v2055_v42  ;;  %v25290_v42 = vmov 0 }
 0x22b   :  { %12890 = vmatpush1.bf16.msk.msra.mxu1 %vm25148_vm6, %v25137_v21  ;;  %3907 = vmatprep.mubr.f32.mxu1 %v25130_v5  ;;  %vm25244_vm6 = vnez %v25243_v40  ;;  %v25393_v40 = vld [vmem:[#allocation63_spill] sm:$0xff] }
 0x22c   :  { %12891 = vmatprep.subr.bf16.mxu1 %v24480_v34  ;;  %2920 = vmatmul.mubr.f32.gmra.mrb[10].mxu0 %v25235_v32  ;;  %v14525_v24 = vpop.eup %14524 }
 0x22d   :  { %12692 = vmatpush1.bf16.msk.msra.mxu0 %vm25151_vm1, %v25137_v21  ;;  %3012 = vmatprep.mubr.f32.mxu0 %v24793_v49  ;;  %vm25246_vm1 = vnez %v25245_v56  ;;  %v18241_v37 = vadd.f32 %v14525_v24, %v14523_v13  ;;  %v25297_v13 = vmov 0  ;;  %v25299_v56 = vld [vmem:[#allocation21_spill] sm:$0xff] }
 0x22e   :  { %12693 = vmatprep.subr.bf16.mxu0 %v24480_v34  ;;  %3909 = vmatmul.mubr.f32.gmra.mrb[10].mxu1 %v25235_v32  ;;  %v14527_v51 = vpop.eup %14526 }
 0x22f   :  { %12893 = vmatpush1.bf16.msk.msra.mxu1 %vm25238_vm7, %v25137_v21  ;;  %4001 = vmatprep.mubr.f32.mxu1 %v24793_v49  ;;  %vm25248_vm7 = vnez %v25247_v35  ;;  %25249 = vst [vmem:[#allocation54_spill] sm:$0xff] %v18241_v37  ;;  %v25305_v35 = vld [vmem:[#allocation22_spill] sm:$0xff]  ;;  %v25408_v37 = vld [vmem:[#allocation37_spill] sm:$0xff] }
 0x230   :  { %12894 = vmatprep.subr.bf16.mxu1 %v24480_v34  ;;  %v14529_v53 = vpop.eup %14528 }
 0x231   :  { %12695 = vmatpush1.bf16.msk.msra.mxu0 %vm25240_vm8, %v25137_v21  ;;  %v18262_v62 = vadd.f32 %v14529_v53, %v14527_v51  ;;  %vm4050_vm8 = vcmp.eq.s32.totalorder %v25256_v48, %v18254_v61  ;;  %v25316_v53 = vmov 0.0  }
 0x232   :  { %12696 = vmatprep.subr.bf16.mxu0 %v24480_v34  ;;  %v14531_v43 = vpop.eup %14530 }
 0x233   :  { %12896 = vmatpush1.bf16.msk.msra.mxu1 %vm25242_vm2, %v25137_v21  ;;  %25253 = vst [vmem:[#allocation31_spill] sm:$0xff] %v18262_v62  ;;  %vm4077_vm2 = vcmp.eq.s32.totalorder %v25256_v48, %v18248_v47 }
 0x234   :  { %12897 = vmatprep.subr.bf16.mxu1 %v24480_v34  ;;  %v14533_v27 = vpop.eup %14532  ;;  %vm18303_vm10 = vmor %vm4050_vm8, %vm4077_vm2  ;;  %vm5040_vm2 = vcmp.eq.s32.totalorder %v25264_v30, %v18268_v3 }
 0x235   :  { %12698 = vmatpush1.bf16.msk.msra.mxu0 %vm25244_vm6, %v25137_v21  ;;  %vm5065_vm6 = vcmp.eq.s32.totalorder %v25255_v9, %v18260_v22  ;;  %v18289_v39 = vadd.f32 %v14533_v27, %v14531_v43  ;;  %v25263_v31 = vsel %vm18303_vm10, 4294967295, %v25262_v31  ;;  %v25318_v43 = vmov 0 }
 0x236   :  { %12699 = vmatprep.subr.bf16.mxu0 %v24480_v34  ;;  %v25327_v27 = vmov 0 }
 0x237   :  { %12899 = vmatpush1.bf16.msk.msra.mxu1 %vm25246_vm1, %v25137_v21  ;;  %25258 = vst [vmem:[#allocation91_spill] sm:$0xff] %v18289_v39 }
 0x238   :  { %12900 = vmatprep.subr.bf16.mxu1 %v24480_v34 }
 0x239   :  { %12701 = vmatpush1.bf16.msk.msra.mxu0 %vm25248_vm7, %v25137_v21  ;;  %vm5039_vm7 = vcmp.eq.s32.totalorder %v25256_v48, %v18268_v3 }
 0x23a   :  { %12702 = vmatprep.subr.bf16.mxu0 %v24480_v34 }
 0x23b   :  { %12902 = vmatpush1.bf16.msk.msra.mxu1 %vm25166_vm4, %v25137_v21  ;;  %vm4049_vm4 = vcmp.eq.s32.totalorder %v25255_v9, %v18254_v61 }
 0x23c   :  { %12903 = vmatprep.subr.bf16.mxu1 %v24480_v34 }
 0x23d   :  { %12704 = vmatpush1.bf16.msk.msra.mxu0 %vm25168_vm11, %v25137_v21  ;;  %vm4076_vm11 = vcmp.eq.s32.totalorder %v25255_v9, %v18248_v47 }
 0x23e   :  { %12705 = vmatprep.subr.bf16.mxu0 %v24480_v34  ;;  %vm18292_vm1 = vmor %vm4049_vm4, %vm4076_vm11  ;;  %vm4051_vm4 = vcmp.eq.s32.totalorder %v25264_v30, %v18254_v61  ;;  %vm4078_vm11 = vcmp.eq.s32.totalorder %v25264_v30, %v18248_v47 }
 0x23f   :  { %12905 = vmatpush1.bf16.msk.msra.mxu1 %vm25170_vm0, %v25137_v21  ;;  %vm5038_vm0 = vcmp.eq.s32.totalorder %v25255_v9, %v18268_v3  ;;  %v25260_v26 = vsel %vm18292_vm1, 4294967295, %v25259_v26  ;;  %v25394_v9 = vmov 0 }
 0x240   :  { %12906 = vmatprep.subr.bf16.mxu1 %v24480_v34  ;;  %vm18312_vm13 = vmor %vm5038_vm0, %vm5065_vm6  ;;  %vm5067_vm0 = vcmp.eq.s32.totalorder %v25264_v30, %v18260_v22  ;;  %v25380_v30 = vmov 0 }
 0x241   :  { %12707 = vmatpush1.bf16.msk.msra.mxu0 %vm25172_vm9, %v25137_v21  ;;  %vm5066_vm9 = vcmp.eq.s32.totalorder %v25256_v48, %v18260_v22  ;;  %v25266_v1 = vsel %vm18312_vm13, 4294967295, %v25265_v1  ;;  %vm18336_vm6 = vmpackc.low %vm18303_vm10, %vm18292_vm1  ;;  %vm25287_vm10 = vnez %v25286_v59 }
 0x242   :  { %12708 = vmatprep.subr.bf16.mxu0 %v24480_v34  ;;  %vm18323_vm8 = vmor %vm5039_vm7, %vm5066_vm9  ;;  %v25272_v2 = vsel %vm18336_vm6, 4294967295, %v25271_v2  ;;  %vm5041_vm7 = vcmp.eq.s32.totalorder %v25267_v54, %v18268_v3  ;;  %vm5068_vm9 = vcmp.eq.s32.totalorder %v25267_v54, %v18260_v22 }
 0x243   :  { %12908 = vmatpush1.bf16.msk.msra.mxu1 %vm17367_vm14, %v25137_v21  ;;  %vm4079_vm14 = vcmp.eq.s32.totalorder %v25267_v54, %v18248_v47  ;;  %v25270_v11 = vsel %vm18323_vm8, 4294967295, %v25269_v11  ;;  %25273 = vst [vmem:[#allocation92_spill] sm:$0xff] %v25272_v2  ;;  %vm18364_vm6 = vmpackc.low %vm18323_vm8, %vm18312_vm13  ;;  %vm25296_vm8 = vnez %v25295_v8 }
 0x244   :  { %12909 = vmatprep.subr.bf16.mxu1 %v24480_v34  ;;  %vm18351_vm5 = vmor %vm4052_vm3, %vm4079_vm14  ;;  %v25281_v36 = vsel %vm18364_vm6, 4294967295, %v25280_v36  ;;  %vm4054_vm3 = vcmp.eq.s32.totalorder %v25285_v23, %v18254_v61  ;;  %vm4081_vm14 = vcmp.eq.s32.totalorder %v25285_v23, %v18248_v47 }
 0x245   :  { %12710 = vmatpush1.bf16.msk.msra.mxu0 %vm17382_vm12, %v25137_v21  ;;  %vm18340_vm12 = vmor %vm4051_vm4, %vm4078_vm11  ;;  %v25278_v6 = vsel %vm18351_vm5, 4294967295, %v25277_v6  ;;  %vm4053_vm4 = vcmp.eq.s32.totalorder %v25279_v14, %v18254_v61  ;;  %vm4080_vm11 = vcmp.eq.s32.totalorder %v25279_v14, %v18248_v47  ;;  %25282 = vst [vmem:[#allocation93_spill] sm:$0xff] %v25281_v36 }
 0x246   :  { %12711 = vmatprep.subr.bf16.mxu0 %v24480_v34  ;;  %v25275_v60 = vsel %vm18340_vm12, 4294967295, %v25274_v60  ;;  %vm18379_vm1 = vmor %vm5041_vm7, %vm5068_vm9  ;;  %vm5043_vm7 = vcmp.eq.s32.totalorder %v25285_v23, %v18268_v3  ;;  %vm5070_vm9 = vcmp.eq.s32.totalorder %v25285_v23, %v18260_v22 }
 0x247   :  { %12911 = vmatpush1.bf16.msk.msra.mxu1 %vm17400_vm15, %v25137_v21  ;;  %vm18368_vm15 = vmor %vm5040_vm2, %vm5067_vm0  ;;  %v25289_v10 = vsel %vm18379_vm1, 4294967295, %v25288_v10  ;;  %vm5042_vm2 = vcmp.eq.s32.totalorder %v25279_v14, %v18268_v3  ;;  %vm5069_vm0 = vcmp.eq.s32.totalorder %v25279_v14, %v18260_v22  ;;  %v25378_v14 = vld [vmem:[#allocation34_spill] sm:$0xff] }
 0x248   :  { %12912 = vmatprep.subr.bf16.mxu1 %v24480_v34  ;;  %vm18392_vm6 = vmpackc.low %vm18351_vm5, %vm18340_vm12  ;;  %vm25307_vm5 = vnez %v25306_v4  ;;  %v25350_v4 = vld [vmem:[#allocation29_spill] sm:$0xff] }
 0x249   :  { %12713 = vmatpush1.bf16.msk.msra.mxu0 %vm25287_vm10, %v25137_v21  ;;  %v25291_v42 = vsel %vm18392_vm6, 4294967295, %v25290_v42  ;;  %vm18396_vm10 = vmor %vm4053_vm4, %vm4080_vm11  ;;  %vm4055_vm4 = vcmp.eq.s32.totalorder %v25299_v56, %v18254_v61  ;;  %vm4082_vm11 = vcmp.eq.s32.totalorder %v25299_v56, %v18248_v47 }
 0x24a   :  { %12714 = vmatprep.subr.bf16.mxu0 %v24480_v34  ;;  %25292 = vst [vmem:[#allocation38_spill] sm:$0xff] %v25291_v42  ;;  %vm18407_vm13 = vmor %vm4054_vm3, %vm4081_vm14  ;;  %vm4056_vm3 = vcmp.eq.s32.totalorder %v25305_v35, %v18254_v61  ;;  %vm4083_vm14 = vcmp.eq.s32.totalorder %v25305_v35, %v18248_v47  ;;  %v11411_v39 = vsel %vm18396_vm10, 1.0, %v25316_v53 }
 0x24b   :  { %12914 = vmatpush1.bf16.msk.msra.mxu1 %vm25296_vm8, %v25137_v21  ;;  %v25298_v13 = vsel %vm18407_vm13, 4294967295, %v25297_v13  ;;  %vm18420_vm6 = vmpackc.low %vm18379_vm1, %vm18368_vm15  ;;  %v18810_v0 = vsub.f32 %v11411_v39, %v11411_v39 }
 0x24c   :  { %12915 = vmatprep.subr.bf16.mxu1 %v24480_v34  ;;  %v25301_v19 = vsel %vm18420_vm6, 4294967295, %v25300_v19  ;;  %vm18424_vm8 = vmor %vm5042_vm2, %vm5069_vm0  ;;  %vm25315_vm2 = vnez %v25183_v63  ;;  %vm25317_vm0 = vnez %v25260_v26 }
 0x24d   :  { %25302 = vst [vmem:[#allocation41_spill] sm:$0xff] %v25301_v19  ;;  %12717 = vmatpush1.bf16.msk.msra.mxu0 %vm25307_vm5, %v25178_v44  ;;  %vm18435_vm12 = vmor %vm5043_vm7, %vm5070_vm9  ;;  %v25313_v44 = vmov 0  ;;  %v11407_v55 = vsel %vm25317_vm0, 1.0, %v25316_v53  ;;  %vm25326_vm0 = vcmp.eq.s32.totalorder %v25299_v56, %v18268_v3  ;;  %vm25330_vm7 = vnez %v25272_v2 }
 0x24e   :  { %12919 = vmatprep.subr.bf16.mxu0 %v24480_v34  ;;  %vm18448_vm1 = vmpackc.low %vm18407_vm13, %vm18396_vm10  ;;  %vm25331_vm9 = vnez %v25266_v1 }
 0x24f   :  { %v25311_v58 = vsel %vm18448_vm1, 4294967295, %v25310_v58  ;;  %vm18452_vm5 = vmor %vm4055_vm4, %vm4082_vm11  ;;  %12918 = vmatpush1.bf16.msk.msra.mxu1 %vm25315_vm2, %v25182_v29  ;;  %vm25321_vm2 = vnez %v25263_v31  ;;  %v25322_v29 = vmov 0  ;;  %v11499_v26 = vsel %vm25331_vm9, 1.0, %v25316_v53 }
 0x250   :  { %25312 = vst [vmem:[#allocation44_spill] sm:$0xff] %v25311_v58  ;;  %v25314_v44 = vsel %vm18452_vm5, 4294967295, %v25313_v44  ;;  %vm18466_vm13 = vmor %vm4056_vm3, %vm4083_vm14  ;;  %3014 = vmatmul.mubr.f32.vlgmr.msra.gmra.mrb[6].mxu0 %v25124_v25  ;;  %13120 = vmatprep.subr.bf16.mxu1 %v24480_v34  ;;  %v11408_v63 = vsel %vm25321_vm2, 1.0, %v25316_v53  ;;  %vm25325_vm14 = vcmp.eq.s32.totalorder %v25299_v56, %v18260_v22  ;;  %v18523_v31 = vsub.f32 %v11407_v55, %v11407_v55 }
 0x251   :  { %v25319_v43 = vsel %vm18466_vm13, 4294967295, %v25318_v43  ;;  %vm18483_vm3 = vmpackc.low %vm18435_vm12, %vm18424_vm8  ;;  %12921 = vmatpush1.bf16.msk.msra.mxu0 %vm25330_vm7, %v25137_v21  ;;  %3019 = vmatprep.mubr.f32.mxu0 %v25127_v17  ;;  %vm25336_vm9 = vnez %v25270_v11  ;;  %vm25341_vm11 = vcmp.eq.s32.totalorder %v25320_v15, %v18254_v61  ;;  %v18551_v11 = vsub.f32 %v11408_v63, %v11408_v63 }
 0x252   :  { %v25323_v29 = vsel %vm18483_vm3, 4294967295, %v25322_v29  ;;  %vm18493_vm4 = vmor %vm25326_vm0, %vm25325_vm14  ;;  %vm25332_vm14 = vcmp.eq.s32.totalorder %v25305_v35, %v18260_v22  ;;  %vm25333_vm0 = vcmp.eq.s32.totalorder %v25305_v35, %v18268_v3  ;;  %4003 = vmatmul.mubr.f32.vlgmr.msra.gmra.mrb[6].mxu1 %v25124_v25  ;;  %v11500_v1 = vsel %vm25336_vm9, 1.0, %v25316_v53  ;;  %12922 = vmatprep.subr.bf16.mxu0 %v24480_v34 }
 0x253   :  { %25324 = vst [vmem:[#allocation48_spill] sm:$0xff] %v25323_v29  ;;  %v25328_v27 = vsel %vm18493_vm4, 4294967295, %v25327_v27  ;;  %vm18514_vm2 = vmor %vm25333_vm0, %vm25332_vm14  ;;  %vm25340_vm0 = vcmp.eq.s32.totalorder %v25320_v15, %v18248_v47  ;;  %4008 = vmatprep.mubr.f32.mxu1 %v25127_v17  ;;  %vm25347_vm9 = vcmp.eq.s32.totalorder %v25329_v16, %v18254_v61  ;;  %v18574_v55 = vsub.f32 %v11499_v26, %v11499_v26 }
 0x254   :  { %v25335_v20 = vsel %vm18514_vm2, 4294967295, %v25334_v20  ;;  %vm18533_vm14 = vmpackc.low %vm18466_vm13, %vm18452_vm5  ;;  %3021 = vmatmul.mubr.f32.gmra.mrb[8].mxu0 %v25129_v28  ;;  %v25352_v63 = vmov 0  ;;  %vm25356_vm3 = vcmp.eq.s32.totalorder %v25320_v15, %v18268_v3  ;;  %v18603_v35 = vsub.f32 %v11500_v1, %v11500_v1 }
 0x255   :  { %v25338_v52 = vsel %vm18533_vm14, 4294967295, %v25337_v52  ;;  %vm18543_vm7 = vmor %vm25341_vm11, %vm25340_vm0  ;;  %vm25344_vm14 = vnez %v25281_v36  ;;  %vm25345_vm11 = vnez %v25275_v60  ;;  %vm25346_vm0 = vcmp.eq.s32.totalorder %v25329_v16, %v18248_v47  ;;  %3026 = vmatprep.mubr.f32.mxu0 %v25130_v5 }
 0x256   :  { %25339 = vst [vmem:[#allocation94_spill] sm:$0xff] %v25338_v52  ;;  %13122 = vmatpush1.bf16.msk.msra.mxu1 %vm25344_vm14, %v25137_v21  ;;  %v11409_v59 = vsel %vm25345_vm11, 1.0, %v25316_v53  ;;  %vm18566_vm13 = vmor %vm25347_vm9, %vm25346_vm0  ;;  %vm25351_vm11 = vnez %v25278_v6  ;;  %vm25355_vm0 = vcmp.eq.s32.totalorder %v25320_v15, %v18260_v22  ;;  %v25359_v6 = vld [vmem:[#allocation30_spill] sm:$0xff]  ;;  %v25498_v19 = vand.u32 4294901760, %v18551_v11 }
 0x257   :  { %13123 = vmatprep.subr.bf16.mxu1 %v24480_v34  ;;  %v11410_v60 = vsel %vm25351_vm11, 1.0, %v25316_v53  ;;  %vm18585_vm9 = vmpackc.low %vm18514_vm2, %vm18493_vm4  ;;  %4010 = vmatmul.mubr.f32.gmra.mrb[8].mxu1 %v25129_v28  ;;  %v18624_v1 = vsub.f32 %v11409_v59, %v11409_v59  ;;  %vm25370_vm11 = vcmp.eq.s32.totalorder %v25350_v4, %v18254_v61  ;;  %vm25401_vm4 = vnez %v25323_v29 }
 0x258   :  { %v25353_v63 = vsel %vm18585_vm9, 4294967295, %v25352_v63  ;;  %vm18595_vm14 = vmor %vm25356_vm3, %vm25355_vm0  ;;  %vm25360_vm9 = vnez %v25291_v42  ;;  %vm25361_vm3 = vcmp.eq.s32.totalorder %v25329_v16, %v18260_v22  ;;  %vm25362_vm0 = vcmp.eq.s32.totalorder %v25329_v16, %v18268_v3  ;;  %4015 = vmatprep.mubr.f32.mxu1 %v25130_v5  ;;  %3028 = vmatmul.mubr.f32.gmra.mrb[10].mxu0 %v25235_v32 }
 0x259   :  { %25354 = vst [vmem:[#allocation18_spill] sm:$0xff] %v25353_v63  ;;  %12924 = vmatpush1.bf16.msk.msra.mxu0 %vm25360_vm9, %v25137_v21  ;;  %vm18615_vm2 = vmor %vm25362_vm0, %vm25361_vm3  ;;  %v25366_v16 = vmov 0  ;;  %vm25369_vm0 = vcmp.eq.s32.totalorder %v25350_v4, %v18248_v47  ;;  %v18649_v59 = vsub.f32 %v11410_v60, %v11410_v60  ;;  %v11501_v60 = vsel %vm18368_vm15, 1.0, %v25316_v53  ;;  %4258 = vmatprep.mubr.f32.mxu0 %v25393_v40 }
 0x25a   :  { %25365 = vst [vmem:[#allocation23_spill] sm:$0xff] %v18624_v1  ;;  %12925 = vmatprep.subr.bf16.mxu0 %v24480_v34  ;;  %vm18631_vm3 = vmpackc.low %vm18566_vm13, %vm18543_vm7  ;;  %13125 = vmatpush1.bf16.msk.msra.mxu1 %vm18420_vm6, %v25137_v21  ;;  %vm25379_vm6 = vnez %v25289_v10  ;;  %vm25384_vm15 = vcmp.eq.s32.totalorder %v25350_v4, %v18268_v3  ;;  %v25387_v10 = vld [vmem:[#allocation35_spill] sm:$0xff]  ;;  %v11416_v12 = vsel %vm18566_vm13, 1.0, %v25316_v53  ;;  %v11508_v26 = vsel %vm18615_vm2, 1.0, %v25316_v53 }
 0x25b   :  { %v25367_v16 = vsel %vm18631_vm3, 4294967295, %v25366_v16  ;;  %vm18641_vm5 = vmor %vm25370_vm11, %vm25369_vm0  ;;  %25373 = vst [vmem:[#allocation33_spill] sm:$0xff] %v18649_v59  ;;  %vm25374_vm11 = vcmp.eq.s32.totalorder %v25359_v6, %v18248_v47  ;;  %vm25375_vm0 = vcmp.eq.s32.totalorder %v25359_v6, %v18254_v61  ;;  %v11502_v54 = vsel %vm25379_vm6, 1.0, %v25316_v53  ;;  %13126 = vmatprep.subr.bf16.mxu1 %v24480_v34  ;;  %4017 = vmatmul.mubr.f32.gmra.mrb[10].mxu1 %v25235_v32 }
 0x25c   :  { %25368 = vst [vmem:[#allocation32_spill] sm:$0xff] %v25367_v16  ;;  %vm18661_vm3 = vmor %vm25375_vm0, %vm25374_vm11  ;;  %vm25383_vm0 = vcmp.eq.s32.totalorder %v25350_v4, %v18260_v22  ;;  %5247 = vmatprep.mubr.f32.mxu1 %v25393_v40  ;;  %v18806_v40 = vsub.f32 %v11501_v60, %v11501_v60  ;;  %v18808_v7 = vsub.f32 %v11502_v54, %v11502_v54  ;;  %v11417_v15 = vsel %vm18641_vm5, 1.0, %v25316_v53 }
 0x25d   :  { %vm18681_vm11 = vmpackc.low %vm18615_vm2, %vm18595_vm14  ;;  %12927 = vmatpush1.bf16.msk.msra.mxu0 %vm18448_vm1, %v25137_v21  ;;  %vm25402_vm1 = vnez %v25314_v44  ;;  %v18971_v4 = vsub.f32 %v11417_v15, %v11417_v15  ;;  %v25484_v29 = vmov 0  ;;  %v25497_v60 = vand.u32 4294901760, %v18523_v31 }
 0x25e   :  { %v25381_v30 = vsel %vm18681_vm11, 4294967295, %v25380_v30  ;;  %vm18691_vm9 = vmor %vm25384_vm15, %vm25383_vm0  ;;  %vm25388_vm11 = vnez %v25298_v13  ;;  %vm25389_vm0 = vcmp.eq.s32.totalorder %v25359_v6, %v18260_v22  ;;  %vm25390_vm15 = vcmp.eq.s32.totalorder %v25359_v6, %v18268_v3  ;;  %12928 = vmatprep.subr.bf16.mxu0 %v24480_v34  ;;  %13128 = vmatpush1.bf16.msk.msra.mxu1 %vm25401_vm4, %v25137_v21  ;;  %25419 = vst [vmem:[#allocation65_spill] sm:$0xff] %v18808_v7 }
 0x25f   :  { %25382 = vst [vmem:[#allocation36_spill] sm:$0xff] %v25381_v30  ;;  %v11412_v48 = vsel %vm25388_vm11, 1.0, %v25316_v53  ;;  %vm18714_vm6 = vmor %vm25390_vm15, %vm25389_vm0  ;;  %v11503_v13 = vsel %vm18424_vm8, 1.0, %v25316_v53  ;;  %v11504_v6 = vsel %vm18435_vm12, 1.0, %v25316_v53  ;;  %vm25397_vm15 = vcmp.eq.s32.totalorder %v25378_v14, %v18248_v47  ;;  %13129 = vmatprep.subr.bf16.mxu1 %v24480_v34 }
 0x260   :  { %vm18735_vm0 = vmpackc.low %vm18661_vm3, %vm18641_vm5  ;;  %vm25398_vm8 = vcmp.eq.s32.totalorder %v25378_v14, %v18254_v61  ;;  %v11413_v51 = vsel %vm25402_vm1, 1.0, %v25316_v53  ;;  %vm25405_vm12 = vcmp.eq.s32.totalorder %v25387_v10, %v18254_v61  ;;  %vm25414_vm11 = vcmp.eq.s32.totalorder %v25378_v14, %v18260_v22 }
 0x261   :  { %v25395_v9 = vsel %vm18735_vm0, 4294967295, %v25394_v9  ;;  %vm18745_vm10 = vmor %vm25398_vm8, %vm25397_vm15  ;;  %vm25403_vm15 = vnez %v25319_v43  ;;  %vm25404_vm8 = vcmp.eq.s32.totalorder %v25387_v10, %v18248_v47  ;;  %vm25415_vm1 = vcmp.eq.s32.totalorder %v25378_v14, %v18268_v3 }
 0x262   :  { %25396 = vst [vmem:[#allocation39_spill] sm:$0xff] %v25395_v9  ;;  %v11414_v62 = vsel %vm25403_vm15, 1.0, %v25316_v53  ;;  %vm18768_vm0 = vmor %vm25405_vm12, %vm25404_vm8  ;;  %vm25409_vm15 = vnez %v25328_v27  ;;  %vm25410_vm12 = vnez %v25335_v20  ;;  %v25418_v20 = vld [vmem:[#allocation40_spill] sm:$0xff]  ;;  %v11415_v14 = vsel %vm18543_vm7, 1.0, %v25316_v53 }
 0x263   :  { %v11505_v44 = vsel %vm25409_vm15, 1.0, %v25316_v53  ;;  %v11506_v43 = vsel %vm25410_vm12, 1.0, %v25316_v53  ;;  %vm18788_vm8 = vmpackc.low %vm18714_vm6, %vm18691_vm9  ;;  %v18828_v39 = vsub.f32 %v11412_v48, %v11412_v48  ;;  %v18830_v54 = vsub.f32 %v11503_v13, %v11503_v13 }
 0x264   :  { %v25412_v38 = vsel %vm18788_vm8, 4294967295, %v25411_v38  ;;  %vm18798_vm4 = vmor %vm25415_vm1, %vm25414_vm11  ;;  %vm25420_vm8 = vnez %v25338_v52  ;;  %vm25421_vm11 = vcmp.eq.s32.totalorder %v25387_v10, %v18260_v22  ;;  %vm25422_vm1 = vcmp.eq.s32.totalorder %v25387_v10, %v18268_v3 }
 0x265   :  { %25413 = vst [vmem:[#allocation61_spill] sm:$0xff] %v25412_v38  ;;  %12930 = vmatpush1.bf16.msk.msra.mxu0 %vm25420_vm8, %v25137_v21  ;;  %vm18824_vm15 = vmor %vm25422_vm1, %vm25421_vm11  ;;  %v18832_v50 = vsub.f32 %v11504_v6, %v11504_v6  ;;  %vm25425_vm7 = vcmp.eq.s32.totalorder %v25408_v37, %v18248_v47  ;;  %vm25426_vm11 = vcmp.eq.s32.totalorder %v25408_v37, %v18254_v61  ;;  %v25427_v10 = vmov 0 }
 0x266   :  { %12931 = vmatprep.subr.bf16.mxu0 %v24480_v34  ;;  %vm18844_vm1 = vmor %vm25426_vm11, %vm25425_vm7  ;;  %v18848_v48 = vsub.f32 %v11413_v51, %v11413_v51  ;;  %v18850_v6 = vsub.f32 %v11414_v62, %v11414_v62  ;;  %vm25430_vm12 = vnez %v25353_v63  ;;  %v18855_v8 = vsub.f32 %v11505_v44, %v11505_v44 }
 0x267   :  { %v25428_v10 = vsel %vm18844_vm1, 4294967295, %v25427_v10  ;;  %13131 = vmatpush1.bf16.msk.msra.mxu1 %vm25430_vm12, %v25137_v21  ;;  %v18857_v13 = vsub.f32 %v11506_v43, %v11506_v43  ;;  %vm25432_vm13 = vcmp.eq.s32.totalorder %v25418_v20, %v18248_v47  ;;  %vm25433_vm7 = vcmp.eq.s32.totalorder %v25418_v20, %v18254_v61  ;;  %vm18879_vm12 = vmpackc.low %vm18768_vm0, %vm18745_vm10 }
 0x268   :  { %25429 = vst [vmem:[#allocation12_spill] sm:$0xff] %v18848_v48  ;;  %vm18865_vm11 = vmor %vm25433_vm7, %vm25432_vm13  ;;  %13132 = vmatprep.subr.bf16.mxu1 %v24480_v34  ;;  %v18870_v62 = vsub.f32 %v11415_v14, %v11415_v14  ;;  %v11507_v51 = vsel %vm18595_vm14, 1.0, %v25316_v53  ;;  %v25437_v44 = vmov 0  ;;  %vm25440_vm8 = vnez %v25367_v16  ;;  %v25453_v16 = vld [vmem:[#allocation45_spill] sm:$0xff] }
 0x269   :  { %25431 = vst [vmem:[#allocation68_spill] sm:$0xff] %v18857_v13  ;;  %v25435_v45 = vsel %vm18865_vm11, 4294967295, %v25434_v45  ;;  %v25438_v44 = vsel %vm18879_vm12, 4294967295, %v25437_v44  ;;  %12933 = vmatpush1.bf16.msk.msra.mxu0 %vm25440_vm8, %v25137_v21  ;;  %v18890_v14 = vsub.f32 %v11416_v12, %v11416_v12  ;;  %vm18899_vm14 = vmpackc.low %vm18824_vm15, %vm18798_vm4  ;;  %v25441_v43 = vmov 0 }
 0x26a   :  { %25436 = vst [vmem:[#allocation71_spill] sm:$0xff] %v18870_v62  ;;  %25439 = vst [vmem:[#allocation70_spill] sm:$0xff] %v25438_v44  ;;  %v25442_v43 = vsel %vm18899_vm14, 4294967295, %v25441_v43  ;;  %12934 = vmatprep.subr.bf16.mxu0 %v24480_v34  ;;  %v11418_v12 = vsel %vm18661_vm3, 1.0, %v25316_v53  ;;  %vm25448_vm5 = vnez %v25381_v30  ;;  %v18929_v23 = vsub.f32 %v11507_v51, %v11507_v51  ;;  %v25467_v30 = vld [vmem:[#allocation49_spill] sm:$0xff]  ;;  %v25487_v44 = vld [vmem:[#allocation52_spill] sm:$0xff] }
 0x26b   :  { %25443 = vst [vmem:[#allocation13_spill] sm:$0xff] %v25442_v43  ;;  %vm18918_vm2 = vmpackc.low %vm18865_vm11, %vm18844_vm1  ;;  %13134 = vmatpush1.bf16.msk.msra.mxu1 %vm25448_vm5, %v25137_v21  ;;  %v11509_v56 = vsel %vm18691_vm9, 1.0, %v25316_v53  ;;  %vm25449_vm3 = vcmp.eq.s32.totalorder %v25408_v37, %v18260_v22  ;;  %vm25450_vm8 = vcmp.eq.s32.totalorder %v25408_v37, %v18268_v3  ;;  %v18948_v51 = vsub.f32 %v11508_v26, %v11508_v26 }
 0x26c   :  { %v25445_v41 = vsel %vm18918_vm2, 4294967295, %v25444_v41  ;;  %vm18940_vm13 = vmor %vm25450_vm8, %vm25449_vm3  ;;  %13135 = vmatprep.subr.bf16.mxu1 %v24480_v34  ;;  %v11510_v46 = vsel %vm18714_vm6, 1.0, %v25316_v53  ;;  %vm25454_vm9 = vcmp.eq.s32.totalorder %v25418_v20, %v18260_v22  ;;  %vm25455_vm8 = vcmp.eq.s32.totalorder %v25418_v20, %v18268_v3 }
 0x26d   :  { %25446 = vst [vmem:[#allocation17_spill] sm:$0xff] %v25445_v41  ;;  %vm18960_vm3 = vmor %vm25455_vm8, %vm25454_vm9  ;;  %vm25458_vm11 = vnez %v25395_v9  ;;  %v18973_v26 = vsub.f32 %v11418_v12, %v11418_v12  ;;  %vm25459_vm6 = vcmp.eq.s32.totalorder %v25447_v33, %v18248_v47  ;;  %vm25460_vm9 = vcmp.eq.s32.totalorder %v25447_v33, %v18254_v61 }
 0x26e   :  { %12936 = vmatpush1.bf16.msk.msra.mxu0 %vm25458_vm11, %v25137_v21  ;;  %vm18981_vm8 = vmor %vm25460_vm9, %vm25459_vm6  ;;  %vm5082_vm5 = vcmp.eq.s32.totalorder %v25453_v16, %v18260_v22  ;;  %v18989_v15 = vsub.f32 %v11509_v56, %v11509_v56  ;;  %v11419_v12 = vsel %vm18745_vm10, 1.0, %v25316_v53  ;;  %vm25463_vm6 = vcmp.eq.s32.totalorder %v25453_v16, %v18248_v47  ;;  %v25468_v56 = vld [vmem:[#allocation50_spill] sm:$0xff] }
 0x26f   :  { %12937 = vmatprep.subr.bf16.mxu0 %v24480_v34  ;;  %vm25464_vm9 = vcmp.eq.s32.totalorder %v25453_v16, %v18254_v61  ;;  %vm25469_vm2 = vnez %v25412_v38  ;;  %v19012_v24 = vsub.f32 %v11510_v46, %v11510_v46  ;;  %v11420_v63 = vsel %vm18768_vm0, 1.0, %v25316_v53 }
 0x270   :  { %vm19001_vm11 = vmor %vm25464_vm9, %vm25463_vm6  ;;  %13137 = vmatpush1.bf16.msk.msra.mxu1 %vm25469_vm2, %v25137_v21  ;;  %vm25470_vm10 = vcmp.eq.s32.totalorder %v25447_v33, %v18260_v22  ;;  %vm25471_vm6 = vcmp.eq.s32.totalorder %v25447_v33, %v18268_v3  ;;  %vm25474_vm0 = vcmp.eq.s32.totalorder %v25453_v16, %v18268_v3  ;;  %v19050_v46 = vsub.f32 %v11419_v12, %v11419_v12  ;;  %v25480_v33 = vld [vmem:[#allocation53_spill] sm:$0xff] }
 0x271   :  { %vm19023_vm9 = vmor %vm25471_vm6, %vm25470_vm10  ;;  %13138 = vmatprep.subr.bf16.mxu1 %v24480_v34  ;;  %v25477_v16 = vmov 0  ;;  %v19064_v58 = vsub.f32 %v11420_v63, %v11420_v63  ;;  %v25481_v12 = vmov 0  ;;  %v11511_v63 = vsel %vm18798_vm4, 1.0, %v25316_v53 }
 0x272   :  { %vm19035_vm2 = vmor %vm25474_vm0, %vm5082_vm5  ;;  %12939 = vmatpush1.bf16.msk.msra.mxu0 %vm18879_vm12, %v25137_v21  ;;  %v11512_v38 = vsel %vm18824_vm15, 1.0, %v25316_v53  ;;  %vm25488_vm4 = vcmp.eq.s32.totalorder %v25467_v30, %v18248_v47  ;;  %vm25489_vm1 = vcmp.eq.s32.totalorder %v25467_v30, %v18254_v61  ;;  %vm25492_vm15 = vnez %v25445_v41 }
 0x273   :  { %vm19056_vm5 = vmpackc.low %vm18960_vm3, %vm18940_vm13  ;;  %12940 = vmatprep.subr.bf16.mxu0 %v24480_v34  ;;  %vm25493_vm12 = vcmp.eq.s32.totalorder %v25468_v56, %v18248_v47  ;;  %v4303_v41 = vsub.f32 %v18523_v31, %v25497_v60  ;;  %v4310_v42 = vsub.f32 %v18551_v11, %v25498_v19  ;;  %vm25501_vm7 = vcmp.eq.s32.totalorder %v25467_v30, %v18260_v22 }
 0x274   :  { %v25478_v16 = vsel %vm19056_vm5, 4294967295, %v25477_v16  ;;  %vm19071_vm6 = vmpackc.low %vm19001_vm11, %vm18981_vm8  ;;  %13140 = vmatpush1.bf16.msk.msra.mxu1 %vm18899_vm14, %v25137_v21  ;;  %vm25502_vm10 = vcmp.eq.s32.totalorder %v25467_v30, %v18268_v3  ;;  %v25505_v19 = vand.u32 4294901760, %v18574_v55  ;;  %v25506_v32 = vand.u32 4294901760, %v18603_v35 }
 0x275   :  { %25479 = vst [vmem:[#allocation19_spill] sm:$0xff] %v25478_v16  ;;  %v25482_v12 = vsel %vm19071_vm6, 4294967295, %v25481_v12  ;;  %vm19089_vm0 = vmpackc.low %vm19035_vm2, %vm19023_vm9  ;;  %13141 = vmatprep.subr.bf16.mxu1 %v24480_v34  ;;  %v19163_v5 = vsub.f32 %v11511_v63, %v11511_v63  ;;  %v19165_v28 = vsub.f32 %v11512_v38, %v11512_v38  ;;  %v11513_v30 = vsel %vm18940_vm13, 1.0, %v25316_v53 }
 0x276   :  { %25483 = vst [vmem:[#allocation11_spill] sm:$0xff] %v25482_v12  ;;  %v25485_v29 = vsel %vm19089_vm0, 4294967295, %v25484_v29  ;;  %vm19108_vm14 = vmor %vm25489_vm1, %vm25488_vm4  ;;  %12942 = vmatpush1.bf16.msk.msra.mxu0 %vm25492_vm15, %v25137_v21  ;;  %vm25494_vm1 = vcmp.eq.s32.totalorder %v25468_v56, %v18254_v61  ;;  %v25511_v38 = vand.u32 4294901760, %v18624_v1  ;;  %v11514_v18 = vsel %vm18960_vm3, 1.0, %v25316_v53 }
 0x277   :  { %25486 = vst [vmem:[#allocation14_spill] sm:$0xff] %v25485_v29  ;;  %vm19126_vm4 = vmor %vm25494_vm1, %vm25493_vm12  ;;  %vm25499_vm12 = vnez %v25428_v10  ;;  %vm25500_vm1 = vnez %v25435_v45  ;;  %12943 = vmatprep.subr.bf16.mxu0 %v24480_v34  ;;  %v5292_v10 = vsub.f32 %v18574_v55, %v25505_v19  ;;  %v5299_v45 = vsub.f32 %v18603_v35, %v25506_v32 }
 0x278   :  { %v11421_v36 = vsel %vm25499_vm12, 1.0, %v25316_v53  ;;  %v11422_v2 = vsel %vm25500_vm1, 1.0, %v25316_v53  ;;  %vm19153_vm15 = vmor %vm25502_vm10, %vm25501_vm7  ;;  %13143 = vmatpush1.bf16.msk.msra.mxu1 %vm19056_vm5, %v25137_v21  ;;  %vm25507_vm7 = vcmp.eq.s32.totalorder %v25480_v33, %v18248_v47  ;;  %vm25508_vm10 = vcmp.eq.s32.totalorder %v25480_v33, %v18254_v61 }
 0x279   :  { %vm19179_vm12 = vmor %vm25508_vm10, %vm25507_vm7  ;;  %v4317_v63 = vsub.f32 %v18624_v1, %v25511_v38  ;;  %13144 = vmatprep.subr.bf16.mxu1 %v24480_v34  ;;  %vm25512_vm13 = vcmp.eq.s32.totalorder %v25468_v56, %v18260_v22  ;;  %vm25513_vm1 = vcmp.eq.s32.totalorder %v25468_v56, %v18268_v3  ;;  %v25516_v16 = vand.u32 4294901760, %v18649_v59 }
 0x27a   :  { %vm19196_vm7 = vmor %vm25513_vm1, %vm25512_vm13  ;;  %v19205_v1 = vsub.f32 %v11421_v36, %v11421_v36  ;;  %v19207_v25 = vsub.f32 %v11422_v2, %v11422_v2  ;;  %12945 = vmatpush1.bf16.msk.msra.mxu0 %vm19071_vm6, %v25137_v21  ;;  %vm25517_vm3 = vcmp.eq.s32.totalorder %v25480_v33, %v18260_v22  ;;  %vm25518_vm10 = vcmp.eq.s32.totalorder %v25480_v33, %v18268_v3 }
 0x27b   :  { %v4324_v38 = vsub.f32 %v18649_v59, %v25516_v16  ;;  %vm19218_vm13 = vmor %vm25518_vm10, %vm25517_vm3  ;;  %v4304_v17 = vand.u32 4294901760, %v4303_v41  ;;  %v4311_v37 = vand.u32 4294901760, %v4310_v42  ;;  %v19222_v36 = vsub.f32 %v11513_v30, %v11513_v30  ;;  %12946 = vmatprep.subr.bf16.mxu0 %v24480_v34 }
 0x27c   :  { %vm19229_vm1 = vmpackc.low %vm19126_vm4, %vm19108_vm14  ;;  %v25521_v2 = vmov 0  ;;  %v19236_v33 = vsel %vm19179_vm12, 1.0, %v25316_v53  ;;  %v5293_v56 = vand.u32 4294901760, %v5292_v10  ;;  %v5300_v41 = vand.u32 4294901760, %v5299_v45  ;;  %13146 = vmatpush1.bf16.msk.msra.mxu1 %vm19089_vm0, %v25137_v21 }
 0x27d   :  { %v25522_v2 = vsel %vm19229_vm1, 4294967295, %v25521_v2  ;;  %v19238_v42 = vsub.f32 %v11514_v18, %v11514_v18  ;;  %v11423_v30 = vsel %vm18981_vm8, 1.0, %v25316_v53  ;;  %vm25524_vm3 = vcmp.eq.s32.totalorder %v25487_v44, %v18248_v47  ;;  %13147 = vmatprep.subr.bf16.mxu1 %v24480_v34  ;;  %vm19262_vm8 = vmpackc.low %vm19196_vm7, %vm19153_vm15 }
 0x27e   :  { %25523 = vst [vmem:[#allocation20_spill] sm:$0xff] %v25522_v2  ;;  %vm25525_vm10 = vcmp.eq.s32.totalorder %v25487_v44, %v18254_v61  ;;  %v4318_v10 = vand.u32 4294901760, %v4317_v63  ;;  %v25528_v20 = vmov 0  ;;  %v19269_v47 = vsel %vm19218_vm13, 1.0, %v25316_v53  ;;  %12948 = vmatpush1.bf16.msk.msra.mxu0 %vm19229_vm1, %v25137_v21 }
 0x27f   :  { %vm19252_vm12 = vmor %vm25525_vm10, %vm25524_vm3  ;;  %v25529_v20 = vsel %vm19262_vm8, 4294967295, %v25528_v20  ;;  %v4325_v61 = vand.u32 4294901760, %v4324_v38  ;;  %v25531_v63 = vand.u32 4294901760, %v18806_v40  ;;  %v25532_v45 = vand.u32 4294901760, %v18808_v7  ;;  %12949 = vmatprep.subr.bf16.mxu0 %v24480_v34 }
 0x280   :  { %25530 = vst [vmem:[#allocation24_spill] sm:$0xff] %v25529_v20  ;;  %v25533_v12 = vmov 1.0   ;;  %vm25535_vm13 = vcmp.eq.s32.totalorder %v25487_v44, %v18260_v22  ;;  %vm25536_vm3 = vcmp.eq.s32.totalorder %v25487_v44, %v18268_v3  ;;  %v11424_v2 = vsel %vm19001_vm11, 1.0, %v25316_v53  ;;  %13149 = vmatpush1.bf16.msk.msra.mxu1 %vm19262_vm8, %v25137_v21 }
 0x281   :  { %v5306_v18 = vsub.f32 %v18806_v40, %v25531_v63  ;;  %v5313_v29 = vsub.f32 %v18808_v7, %v25532_v45  ;;  %v19282_v59 = vpack.c.bf16 %v19236_v33, %v25533_v12  ;;  %vm19290_vm10 = vmor %vm25536_vm3, %vm25535_vm13  ;;  %v19300_v7 = vsub.f32 %v11423_v30, %v11423_v30  ;;  %13150 = vmatprep.subr.bf16.mxu1 %v24480_v34 }
 0x282   :  { %vm25539_vm13 = vcmask 1041408   ;;  %v25540_v22 = vmov 0  ;;  %v12954_v3 = vpack.c.bf16 %v4311_v37, %v4304_v17  ;;  %v13155_v16 = vpack.c.bf16 %v5300_v41, %v5293_v56 }
 0x283   :  { %25534 = vst [vmem:[#allocation27_spill] sm:$0xff] %v19282_v59  ;;  %vm19306_vm3 = vmpackc.low %vm25539_vm13, %vm19252_vm12  ;;  %v11515_v63 = vsel %vm19023_vm9, 1.0, %v25316_v53  ;;  %v19318_v9 = vpack.c.bf16 %v19269_v47, %v25533_v12  ;;  %v25544_v30 = vand.u32 4294901760, %v18810_v0  ;;  %v11516_v17 = vsel %vm19035_vm2, 1.0, %v25316_v53 }
 0x284   :  { %v25541_v22 = vsel %vm19306_vm3, 4294967295, %v25540_v22  ;;  %vm25545_vm11 = vmmov %vm25539_vm13  ;;  %v25546_v52 = vmov 0  ;;  %v12957_v56 = vpack.c.bf16 %v4325_v61, %v4318_v10  ;;  %v5307_v37 = vand.u32 4294901760, %v5306_v18  ;;  %12952 = vmatpush1.bf16.msk.msra.mxu0 %vm19306_vm3, %v19282_v59 }
 0x285   :  { %25542 = vst [vmem:[#allocation28_spill] sm:$0xff] %v25541_v22  ;;  %25543 = vst [vmem:[#allocation42_spill] sm:$0xff] %v19318_v9  ;;  %v4331_v45 = vsub.f32 %v18810_v0, %v25544_v30  ;;  %v5314_v30 = vand.u32 4294901760, %v5313_v29  ;;  %v25549_v57 = vand.u32 4294901760, %v18828_v39  ;;  %v25550_v12 = vand.u32 4294901760, %v18830_v54  ;;  %12953 = vmatprep.subr.bf16.mxu0 %v24480_v34 }
 0x286   :  { %vm19331_vm9 = vmpackc.low %vm25545_vm11, %vm19290_vm10  ;;  %v25551_v21 = vand.u32 4294901760, %v18832_v50  ;;  %v19348_v61 = vsub.f32 %v11424_v2, %v11424_v2  ;;  %v19350_v18 = vsub.f32 %v11515_v63, %v11515_v63  ;;  %v19355_v22 = vsub.f32 %v11516_v17, %v11516_v17  ;;  %v25553_v17 = vld [vmem:[#allocation69_spill] sm:$0xff] }
 0x287   :  { %v25547_v52 = vsel %vm19331_vm9, 4294967295, %v25546_v52  ;;  %v4338_v44 = vsub.f32 %v18828_v39, %v25549_v57  ;;  %v5320_v20 = vsub.f32 %v18830_v54, %v25550_v12  ;;  %v11425_v12 = vsel %vm19108_vm14, 1.0, %v25316_v53  ;;  %13153 = vmatpush1.bf16.msk.msra.mxu1 %vm19331_vm9, %v19318_v9  ;;  %4264 = vmatmul.mubr.f32.vlgmr.msra.gmra.mrb[12].mxu0 %v25553_v17  ;;  %vm25566_vm14 = vmmov %vm25545_vm11 }
 0x288   :  { %25548 = vst [vmem:[#allocation46_spill] sm:$0xff] %v25547_v52  ;;  %v5327_v10 = vsub.f32 %v18832_v50, %v25551_v21  ;;  %v4332_v21 = vand.u32 4294901760, %v4331_v45  ;;  %v25552_v2 = vand.u32 4294901760, %v18848_v48  ;;  %v11426_v57 = vsel %vm19126_vm4, 1.0, %v25316_v53  ;;  %13154 = vmatprep.subr.bf16.mxu1 %v24480_v34  ;;  %12955 = vmatpush1.bf16.msra.mxu0 %v12954_v3  ;;  %vm25575_vm2 = vmmov %vm25545_vm11 }
 0x289   :  { %v25554_v43 = vand.u32 4294901760, %v18850_v6  ;;  %v13158_v52 = vpack.c.bf16 %v5314_v30, %v5307_v37  ;;  %v4339_v9 = vand.u32 4294901760, %v4338_v44  ;;  %v11517_v27 = vsel %vm19153_vm15, 1.0, %v25316_v53  ;;  %12956 = vmatprep.subr.bf16.mxu0 %v24480_v34 }
 0x28a   :  { %v4345_v63 = vsub.f32 %v18848_v48, %v25552_v2  ;;  %v5321_v2 = vand.u32 4294901760, %v5320_v20  ;;  %v5328_v59 = vand.u32 4294901760, %v5327_v10  ;;  %v25555_v48 = vld [vmem:[#allocation83_spill] sm:$0xff]  ;;  %5253 = vmatmul.mubr.f32.vlgmr.msra.gmra.mrb[12].mxu1 %v25553_v17  ;;  %v25557_v3 = vand.u32 4294901760, %v18857_v13  ;;  %v25561_v17 = vld [vmem:[#allocation86_spill] sm:$0xff] }
 0x28b   :  { %v4352_v41 = vsub.f32 %v18850_v6, %v25554_v43  ;;  %4273 = vmatprep.mubr.f32.mxu0 %v25555_v48  ;;  %v25556_v43 = vand.u32 4294901760, %v18855_v8  ;;  %v19389_v37 = vsub.f32 %v11425_v12, %v11425_v12  ;;  %v19391_v30 = vsub.f32 %v11426_v57, %v11426_v57  ;;  %13156 = vmatpush1.bf16.msra.mxu1 %v13155_v16 }
 0x28c   :  { %v5341_v44 = vsub.f32 %v18857_v13, %v25557_v3  ;;  %v4346_v60 = vand.u32 4294901760, %v4345_v63  ;;  %5262 = vmatprep.mubr.f32.mxu1 %v25555_v48  ;;  %13157 = vmatprep.subr.bf16.mxu1 %v24480_v34  ;;  %v25558_v3 = vand.u32 4294901760, %v18870_v62  ;;  %v25559_v57 = vand.u32 4294901760, %v18890_v14  ;;  %v25560_v63 = vld [vmem:[#allocation82_spill] sm:$0xff] }
 0x28d   :  { %v5334_v29 = vsub.f32 %v18855_v8, %v25556_v43  ;;  %v11518_v43 = vsel %vm19196_vm7, 1.0, %v25316_v53  ;;  %v4353_v45 = vand.u32 4294901760, %v4352_v41  ;;  %4279 = vmatmul.mubr.f32.gmra.mrb[14].mxu0 %v25560_v63  ;;  %v19406_v10 = vsub.f32 %v11517_v27, %v11517_v27 }
 0x28e   :  { %v4359_v12 = vsub.f32 %v18870_v62, %v25558_v3  ;;  %v4366_v16 = vsub.f32 %v18890_v14, %v25559_v57  ;;  %12958 = vmatpush1.bf16.msra.mxu0 %v12957_v56  ;;  %v12960_v20 = vpack.c.bf16 %v4339_v9, %v4332_v21  ;;  %v24056_v19 = vand.u32 4294901760, %v18971_v4  ;;  %4288 = vmatprep.mubr.f32.mxu0 %v25561_v17 }
 0x28f   :  { %12959 = vmatprep.subr.bf16.mxu0 %v24480_v34  ;;  %v13161_v41 = vpack.c.bf16 %v5328_v59, %v5321_v2  ;;  %v5335_v3 = vand.u32 4294901760, %v5334_v29  ;;  %v5342_v62 = vand.u32 4294901760, %v5341_v44  ;;  %v25562_v13 = vand.u32 4294901760, %v18929_v23  ;;  %5268 = vmatmul.mubr.f32.gmra.mrb[14].mxu1 %v25560_v63 }
 0x290   :  { %v19416_v27 = vsub.f32 %v11518_v43, %v11518_v43  ;;  %13159 = vmatpush1.bf16.msra.mxu1 %v13158_v52  ;;  %v25563_v9 = vand.u32 4294901760, %v18948_v51  ;;  %v24057_v21 = vand.u32 4294901760, %v18989_v15  ;;  %5277 = vmatprep.mubr.f32.mxu1 %v25561_v17  ;;  %v11427_v59 = vsel %vm19252_vm12, 1.0, %v25316_v53  ;;  %v25564_v52 = vld [vmem:[#allocation87_spill] sm:$0xff] }
 0x291   :  { %v5348_v57 = vsub.f32 %v18929_v23, %v25562_v13  ;;  %13160 = vmatprep.subr.bf16.mxu1 %v24480_v34  ;;  %v12963_v13 = vpack.c.bf16 %v4353_v45, %v4346_v60  ;;  %v4360_v29 = vand.u32 4294901760, %v4359_v12  ;;  %v4367_v2 = vand.u32 4294901760, %v4366_v16  ;;  %4294 = vmatmul.mubr.f32.gmra.mrb[16].mxu0 %v25564_v52 }
 0x292   :  { %v5355_v56 = vsub.f32 %v18948_v51, %v25563_v9  ;;  %12961 = vmatpush1.bf16.msra.mxu0 %v12960_v20  ;;  %v4373_v44 = vsub.f32 %v18971_v4, %v24056_v19  ;;  %v25565_v43 = vand.u32 4294901760, %v18973_v26  ;;  %v24058_v48 = vand.u32 4294901760, %v19050_v46  ;;  %4474 = vmatprep.mubr.f32.mxu0 %v24793_v49 }
 0x293   :  { %v4165_v45 = vsel %vm25566_vm14, %v19236_v33, 0  ;;  %12962 = vmatprep.subr.bf16.mxu0 %v24480_v34  ;;  %v13164_v20 = vpack.c.bf16 %v5342_v62, %v5335_v3  ;;  %v5349_v60 = vand.u32 4294901760, %v5348_v57  ;;  %5283 = vmatmul.mubr.f32.gmra.mrb[16].mxu1 %v25564_v52  ;;  %v25567_v19 = vand.u32 4294901760, %v19012_v24 }
 0x294   :  { %v4380_v9 = vsub.f32 %v18973_v26, %v25565_v43  ;;  %13162 = vmatpush1.bf16.msra.mxu1 %v13161_v41  ;;  %v5356_v16 = vand.u32 4294901760, %v5355_v56  ;;  %v5362_v43 = vsub.f32 %v18989_v15, %v24057_v21  ;;  %5463 = vmatprep.mubr.f32.mxu1 %v24793_v49  ;;  %v19451_v62 = vsub.f32 %v11427_v59, %v11427_v59 }
 0x295   :  { %v5369_v32 = vsub.f32 %v19012_v24, %v25567_v19  ;;  %13163 = vmatprep.subr.bf16.mxu1 %v24480_v34  ;;  %v12966_v3 = vpack.c.bf16 %v4367_v2, %v4360_v29  ;;  %v4374_v56 = vand.u32 4294901760, %v4373_v44  ;;  %v4387_v19 = vsub.f32 %v19050_v46, %v24058_v48 }
 0x296   :  { %12964 = vmatpush1.bf16.msra.mxu0 %v12963_v13  ;;  %v4381_v21 = vand.u32 4294901760, %v4380_v9  ;;  %v25568_v33 = vand.u32 4294901760, %v19064_v58  ;;  %v19462_v59 = vsub.f32 %v4165_v45, %v4165_v45  ;;  %v25569_v29 = vand.u32 4294901760, %v19163_v5 }
 0x297   :  { %12965 = vmatprep.subr.bf16.mxu0 %v24480_v34  ;;  %v13167_v9 = vpack.c.bf16 %v5356_v16, %v5349_v60  ;;  %v5363_v57 = vand.u32 4294901760, %v5362_v43  ;;  %v5370_v48 = vand.u32 4294901760, %v5369_v32  ;;  %v25570_v41 = vand.u32 4294901760, %v19165_v28 }
 0x298   :  { %v4394_v12 = vsub.f32 %v19064_v58, %v25568_v33  ;;  %v5376_v2 = vsub.f32 %v19163_v5, %v25569_v29  ;;  %13165 = vmatpush1.bf16.msra.mxu1 %v13164_v20  ;;  %v25571_v45 = vand.u32 4294901760, %v19205_v1  ;;  %v25572_v29 = vand.u32 4294901760, %v19207_v25 }
 0x299   :  { %v5383_v33 = vsub.f32 %v19165_v28, %v25570_v41  ;;  %13166 = vmatprep.subr.bf16.mxu1 %v24480_v34  ;;  %v11519_v32 = vsel %vm19290_vm10, 1.0, %v25316_v53  ;;  %v12969_v60 = vpack.c.bf16 %v4381_v21, %v4374_v56  ;;  %v4388_v16 = vand.u32 4294901760, %v4387_v19  ;;  %v25621_v53 = vld [vmem:[#allocation61_spill] sm:$0xff] }
 0x29a   :  { %v4401_v52 = vsub.f32 %v19205_v1, %v25571_v45  ;;  %v4408_v13 = vsub.f32 %v19207_v25, %v25572_v29  ;;  %12967 = vmatpush1.bf16.msra.mxu0 %v12966_v3  ;;  %v4395_v43 = vand.u32 4294901760, %v4394_v12  ;;  %v25573_v41 = vand.u32 4294901760, %v19222_v36 }
 0x29b   :  { %12968 = vmatprep.subr.bf16.mxu0 %v24480_v34  ;;  %v25574_v29 = vand.u32 4294901760, %v19238_v42  ;;  %v5154_v38 = vsel %vm25575_vm2, %v19269_v47, 0  ;;  %v13170_v21 = vpack.c.bf16 %v5370_v48, %v5363_v57  ;;  %v5377_v12 = vand.u32 4294901760, %v5376_v2 }
 0x29c   :  { %v5390_v45 = vsub.f32 %v19222_v36, %v25573_v41  ;;  %13168 = vmatpush1.bf16.msra.mxu1 %v13167_v9  ;;  %v5384_v3 = vand.u32 4294901760, %v5383_v33  ;;  %v4402_v56 = vand.u32 4294901760, %v4401_v52  ;;  %v4409_v19 = vand.u32 4294901760, %v4408_v13 }
 0x29d   :  { %v5397_v44 = vsub.f32 %v19238_v42, %v25574_v29  ;;  %13169 = vmatprep.subr.bf16.mxu1 %v24480_v34  ;;  %v25576_v41 = vand.u32 4294901760, %v19300_v7  ;;  %v25577_v29 = vand.u32 4294901760, %v19348_v61  ;;  %v19503_v17 = vsub.f32 %v11519_v32, %v11519_v32 }
 0x29e   :  { %12970 = vmatpush1.bf16.msra.mxu0 %v12969_v60  ;;  %v12972_v47 = vpack.c.bf16 %v4395_v43, %v4388_v16  ;;  %v24069_v48 = vand.u32 4294901760, %v19389_v37  ;;  %v24062_v57 = vand.u32 4294901760, %v19391_v30  ;;  %v5391_v52 = vand.u32 4294901760, %v5390_v45 }
 0x29f   :  { %v4415_v63 = vsub.f32 %v19300_v7, %v25576_v41  ;;  %v4422_v20 = vsub.f32 %v19348_v61, %v25577_v29  ;;  %12971 = vmatprep.subr.bf16.mxu0 %v24480_v34  ;;  %v5398_v2 = vand.u32 4294901760, %v5397_v44  ;;  %v25578_v13 = vand.u32 4294901760, %v19350_v18 }
 0x2a0   :  { %v25579_v33 = vand.u32 4294901760, %v19355_v22  ;;  %v19514_v32 = vsub.f32 %v5154_v38, %v5154_v38  ;;  %13171 = vmatpush1.bf16.msra.mxu1 %v13170_v21  ;;  %v13173_v60 = vpack.c.bf16 %v5384_v3, %v5377_v12  ;;  %v24064_v16 = vand.u32 4294901760, %v19406_v10 }
 0x2a1   :  { %v5404_v9 = vsub.f32 %v19350_v18, %v25578_v13  ;;  %v24063_v43 = vand.u32 4294901760, %v19416_v27  ;;  %13172 = vmatprep.subr.bf16.mxu1 %v24480_v34  ;;  %v12975_v45 = vpack.c.bf16 %v4409_v19, %v4402_v56  ;;  %v4416_v44 = vand.u32 4294901760, %v4415_v63 }
 0x2a2   :  { %v5411_v41 = vsub.f32 %v19355_v22, %v25579_v33  ;;  %v4423_v29 = vand.u32 4294901760, %v4422_v20  ;;  %12973 = vmatpush1.bf16.msra.mxu0 %v12972_v47  ;;  %v4429_v13 = vsub.f32 %v19389_v37, %v24069_v48  ;;  %v4436_v38 = vsub.f32 %v19391_v30, %v24062_v57  ;;  %v25606_v48 = vld [vmem:[#allocation44_spill] sm:$0xff] }
 0x2a3   :  { %v24068_v21 = vand.u32 4294901760, %v19451_v62  ;;  %v24067_v12 = vand.u32 4294901760, %v19462_v59  ;;  %12974 = vmatprep.subr.bf16.mxu0 %v24480_v34  ;;  %v13176_v3 = vpack.c.bf16 %v5398_v2, %v5391_v52  ;;  %v5405_v33 = vand.u32 4294901760, %v5404_v9 }
 0x2a4   :  { %v5412_v56 = vand.u32 4294901760, %v5411_v41  ;;  %13174 = vmatpush1.bf16.msra.mxu1 %v13173_v60  ;;  %v5418_v63 = vsub.f32 %v19406_v10, %v24064_v16  ;;  %v5425_v20 = vsub.f32 %v19416_v27, %v24063_v43  ;;  %v24066_v19 = vand.u32 4294901760, %v19503_v17 }
 0x2a5   :  { %v24065_v47 = vand.u32 4294901760, %v19514_v32  ;;  %13175 = vmatprep.subr.bf16.mxu1 %v24480_v34  ;;  %v12978_v57 = vpack.c.bf16 %v4423_v29, %v4416_v44  ;;  %v4430_v52 = vand.u32 4294901760, %v4429_v13  ;;  %v4437_v2 = vand.u32 4294901760, %v4436_v38 }
 0x2a6   :  { %12976 = vmatpush1.bf16.msra.mxu0 %v12975_v45  ;;  %v4443_v9 = vsub.f32 %v19451_v62, %v24068_v21  ;;  %v4450_v41 = vsub.f32 %v19462_v59, %v24067_v12  ;;  %v13179_v60 = vpack.c.bf16 %v5412_v56, %v5405_v33  ;;  %v5419_v43 = vand.u32 4294901760, %v5418_v63  ;;  %v25603_v12 = vld [vmem:[#allocation41_spill] sm:$0xff] }
 0x2a7   :  { %12977 = vmatprep.subr.bf16.mxu0 %v24480_v34  ;;  %v5426_v16 = vand.u32 4294901760, %v5425_v20  ;;  %v5432_v45 = vsub.f32 %v19503_v17, %v24066_v19  ;;  %v5439_v44 = vsub.f32 %v19514_v32, %v24065_v47  ;;  %v12981_v29 = vpack.c.bf16 %v4437_v2, %v4430_v52  ;;  %v25581_v52 = vld [vmem:[#allocation23_spill] sm:$0xff]  ;;  %v25582_v2 = vld [vmem:[#allocation33_spill] sm:$0xff]  ;;  %v25602_v19 = vld [vmem:[#allocation80_spill] sm:$0xff] }
 0x2a8   :  { %13177 = vmatpush1.bf16.msra.mxu1 %v13176_v3  ;;  %v4444_v13 = vand.u32 4294901760, %v4443_v9  ;;  %v4451_v38 = vand.u32 4294901760, %v4450_v41  ;;  %v12990_v9 = vpack.c.bf16 %v25582_v2, %v25581_v52  ;;  %v25583_v41 = vld [vmem:[#allocation73_spill] sm:$0xff]  ;;  %v25596_v47 = vld [vmem:[#allocation75_spill] sm:$0xff]  ;;  %vm25604_vm12 = vnez %v25603_v12 }
 0x2a9   :  { %13178 = vmatprep.subr.bf16.mxu1 %v24480_v34  ;;  %v13182_v3 = vpack.c.bf16 %v5426_v16, %v5419_v43  ;;  %v5433_v33 = vand.u32 4294901760, %v5432_v45  ;;  %v5440_v56 = vand.u32 4294901760, %v5439_v44  ;;  %v13188_v16 = vpack.c.bf16 %v18603_v35, %v18574_v55  ;;  %v25580_v43 = vld [vmem:[#allocation55_spill] sm:$0xff]  ;;  %v25585_v44 = vld [vmem:[#allocation72_spill] sm:$0xff]  ;;  %v25605_v21 = vld [vmem:[#allocation81_spill] sm:$0xff] }
 0x2aa   :  { %12979 = vmatpush1.bf16.msra.mxu0 %v12978_v57  ;;  %v12984_v63 = vpack.c.bf16 %v4451_v38, %v4444_v13  ;;  %v12987_v57 = vpack.c.bf16 %v18551_v11, %v18523_v31  ;;  %v25586_v13 = vld [vmem:[#allocation78_spill] sm:$0xff]  ;;  %v13194_v38 = vpack.c.bf16 %v18832_v50, %v18830_v54  ;;  %vm25607_vm10 = vnez %v25606_v48 }
 0x2ab   :  { %12980 = vmatprep.subr.bf16.mxu0 %v24480_v34  ;;  %v13185_v20 = vpack.c.bf16 %v5440_v56, %v5433_v33  ;;  %v25588_v33 = vld [vmem:[#allocation12_spill] sm:$0xff]  ;;  %v25639_v48 = vld [vmem:[#allocation46_spill] sm:$0xff] }
 0x2ac   :  { %13180 = vmatpush1.bf16.msra.mxu1 %v13179_v60  ;;  %v25584_v60 = vld [vmem:[#allocation65_spill] sm:$0xff]  ;;  %v12996_v56 = vpack.c.bf16 %v18850_v6, %v25588_v33 }
 0x2ad   :  { %13181 = vmatprep.subr.bf16.mxu1 %v24480_v34  ;;  %v13191_v45 = vpack.c.bf16 %v25584_v60, %v18806_v40 }
 0x2ae   :  { %12982 = vmatpush1.bf16.msra.mxu0 %v12981_v29  ;;  %v12993_v29 = vpack.c.bf16 %v18828_v39, %v18810_v0 }
 0x2af   :  { %12983 = vmatprep.subr.bf16.mxu0 %v24480_v34 }
 0x2b0   :  { %13183 = vmatpush1.bf16.msra.mxu1 %v13182_v3  ;;  %v25587_v3 = vld [vmem:[#allocation79_spill] sm:$0xff] }
 0x2b1   :  { %13184 = vmatprep.subr.bf16.mxu1 %v24480_v34 }
 0x2b2   :  { %12985 = vmatpush1.bf16.msra.mxu0 %v12984_v63  ;;  %v25589_v63 = vld [vmem:[#allocation57_spill] sm:$0xff] }
 0x2b3   :  { %12986 = vmatprep.subr.bf16.mxu0 %v24480_v34 }
 0x2b4   :  { %13186 = vmatpush1.bf16.msra.mxu1 %v13185_v20  ;;  %v25590_v20 = vld [vmem:[#allocation68_spill] sm:$0xff] }
 0x2b5   :  { %13187 = vmatprep.subr.bf16.mxu1 %v24480_v34  ;;  %4476 = vmatmul.mubr.f32.vlgmr.msra.gmra.mrb[12].mxu0 %v25580_v43 }
 0x2b6   :  { %12988 = vmatpush1.bf16.msra.mxu0 %v12987_v57  ;;  %4481 = vmatprep.mubr.f32.mxu0 %v25583_v41  ;;  %v13197_v57 = vpack.c.bf16 %v25590_v20, %v18855_v8 }
 0x2b7   :  { %5465 = vmatmul.mubr.f32.vlgmr.msra.gmra.mrb[12].mxu1 %v25580_v43  ;;  %12989 = vmatprep.subr.bf16.mxu0 %v24480_v34 }
 0x2b8   :  { %13189 = vmatpush1.bf16.msra.mxu1 %v13188_v16  ;;  %5470 = vmatprep.mubr.f32.mxu1 %v25583_v41  ;;  %v25591_v16 = vld [vmem:[#allocation71_spill] sm:$0xff] }
 0x2b9   :  { %13190 = vmatprep.subr.bf16.mxu1 %v24480_v34  ;;  %4483 = vmatmul.mubr.f32.gmra.mrb[14].mxu0 %v25585_v44 }
 0x2ba   :  { %12991 = vmatpush1.bf16.msra.mxu0 %v12990_v9  ;;  %4488 = vmatprep.mubr.f32.mxu0 %v25586_v13  ;;  %v12999_v9 = vpack.c.bf16 %v18890_v14, %v25591_v16 }
 0x2bb   :  { %12992 = vmatprep.subr.bf16.mxu0 %v24480_v34  ;;  %5472 = vmatmul.mubr.f32.gmra.mrb[14].mxu1 %v25585_v44 }
 0x2bc   :  { %13192 = vmatpush1.bf16.msra.mxu1 %v13191_v45  ;;  %5477 = vmatprep.mubr.f32.mxu1 %v25586_v13  ;;  %v13200_v45 = vpack.c.bf16 %v18948_v51, %v18929_v23 }
 0x2bd   :  { %13193 = vmatprep.subr.bf16.mxu1 %v24480_v34  ;;  %4490 = vmatmul.mubr.f32.gmra.mrb[16].mxu0 %v25587_v3 }
 0x2be   :  { %12994 = vmatpush1.bf16.msra.mxu0 %v12993_v29  ;;  %4605 = vmatprep.mubr.f32.mxu0 %v25589_v63  ;;  %v13002_v29 = vpack.c.bf16 %v18973_v26, %v18971_v4 }
 0x2bf   :  { %12995 = vmatprep.subr.bf16.mxu0 %v24480_v34  ;;  %5479 = vmatmul.mubr.f32.gmra.mrb[16].mxu1 %v25587_v3  ;;  %v25641_v3 = vand.u32 4294901760, %v18603_v35  ;;  %v25646_v35 = vand.u32 4294901760, %v18806_v40  ;;  %v25652_v40 = vand.u32 4294901760, %v18830_v54  ;;  %v25658_v54 = vand.u32 4294901760, %v25590_v20 }
 0x2c0   :  { %13195 = vmatpush1.bf16.msra.mxu1 %v13194_v38  ;;  %5594 = vmatprep.mubr.f32.mxu1 %v25589_v63  ;;  %v13203_v38 = vpack.c.bf16 %v19012_v24, %v18989_v15  ;;  %v25619_v63 = vld [vmem:[#allocation39_spill] sm:$0xff]  ;;  %v25663_v20 = vand.u32 4294901760, %v18971_v4  ;;  %v25669_v4 = vand.u32 4294901760, %v19163_v5 }
 0x2c1   :  { %13196 = vmatprep.subr.bf16.mxu1 %v24480_v34 }
 0x2c2   :  { %12997 = vmatpush1.bf16.msra.mxu0 %v12996_v56  ;;  %v13005_v56 = vpack.c.bf16 %v19064_v58, %v19050_v46 }
 0x2c3   :  { %12998 = vmatprep.subr.bf16.mxu0 %v24480_v34 }
 0x2c4   :  { %13198 = vmatpush1.bf16.msra.mxu1 %v13197_v57  ;;  %v13206_v57 = vpack.c.bf16 %v19165_v28, %v19163_v5  ;;  %v25676_v5 = vand.u32 4294901760, %v19348_v61 }
 0x2c5   :  { %13199 = vmatprep.subr.bf16.mxu1 %v24480_v34 }
 0x2c6   :  { %13000 = vmatpush1.bf16.msra.mxu0 %v12999_v9  ;;  %v13008_v9 = vpack.c.bf16 %v19207_v25, %v19205_v1 }
 0x2c7   :  { %13001 = vmatprep.subr.bf16.mxu0 %v24480_v34 }
 0x2c8   :  { %13201 = vmatpush1.bf16.msra.mxu1 %v13200_v45  ;;  %v13209_v45 = vpack.c.bf16 %v19238_v42, %v19222_v36 }
 0x2c9   :  { %13202 = vmatprep.subr.bf16.mxu1 %v24480_v34 }
 0x2ca   :  { %13003 = vmatpush1.bf16.msra.mxu0 %v13002_v29  ;;  %v13011_v29 = vpack.c.bf16 %v19348_v61, %v19300_v7  ;;  %v25681_v61 = vand.u32 4294901760, %v19406_v10 }
 0x2cb   :  { %13004 = vmatprep.subr.bf16.mxu0 %v24480_v34 }
 0x2cc   :  { %13204 = vmatpush1.bf16.msra.mxu1 %v13203_v38  ;;  %v13212_v38 = vpack.c.bf16 %v19355_v22, %v19350_v18 }
 0x2cd   :  { %13205 = vmatprep.subr.bf16.mxu1 %v24480_v34 }
 0x2ce   :  { %13006 = vmatpush1.bf16.msra.mxu0 %v13005_v56  ;;  %v13014_v56 = vpack.c.bf16 %v19391_v30, %v19389_v37 }
 0x2cf   :  { %13007 = vmatprep.subr.bf16.mxu0 %v24480_v34 }
 0x2d0   :  { %13207 = vmatpush1.bf16.msra.mxu1 %v13206_v57  ;;  %v13215_v57 = vpack.c.bf16 %v19416_v27, %v19406_v10 }
 0x2d1   :  { %13208 = vmatprep.subr.bf16.mxu1 %v24480_v34 }
 0x2d2   :  { %13009 = vmatpush1.bf16.msra.mxu0 %v13008_v9  ;;  %v13017_v9 = vpack.c.bf16 %v19462_v59, %v19451_v62 }
 0x2d3   :  { %13010 = vmatprep.subr.bf16.mxu0 %v24480_v34 }
 0x2d4   :  { %13210 = vmatpush1.bf16.msra.mxu1 %v13209_v45  ;;  %v13218_v45 = vpack.c.bf16 %v19514_v32, %v19503_v17 }
 0x2d5   :  { %13211 = vmatprep.subr.bf16.mxu1 %v24480_v34 }
 0x2d6   :  { %13012 = vmatpush1.bf16.msra.mxu0 %v13011_v29  ;;  %v25592_v29 = vld [vmem:[#allocation59_spill] sm:$0xff] }
 0x2d7   :  { %13013 = vmatprep.subr.bf16.mxu0 %v24480_v34 }
 0x2d8   :  { %13213 = vmatpush1.bf16.msra.mxu1 %v13212_v38  ;;  %v25593_v38 = vmov 1.0|1.0  }
 0x2d9   :  { %13214 = vmatprep.subr.bf16.mxu1 %v24480_v34 }
 0x2da   :  { %13015 = vmatpush1.bf16.msra.mxu0 %v13014_v56  ;;  %v25594_v56 = vld [vmem:[#allocation92_spill] sm:$0xff] }
 0x2db   :  { %13016 = vmatprep.subr.bf16.mxu0 %v24480_v34  ;;  %vm25595_vm15 = vnez %v25594_v56 }
 0x2dc   :  { %13216 = vmatpush1.bf16.msra.mxu1 %v13215_v57  ;;  %v25597_v57 = vld [vmem:[#allocation93_spill] sm:$0xff] }
 0x2dd   :  { %13217 = vmatprep.subr.bf16.mxu1 %v24480_v34  ;;  %vm25598_vm4 = vnez %v25597_v57 }
 0x2de   :  { %13018 = vmatpush1.bf16.msra.mxu0 %v13017_v9  ;;  %v25599_v9 = vld [vmem:[#allocation74_spill] sm:$0xff] }
 0x2df   :  { %13019 = vmatprep.subr.bf16.mxu0 %v24480_v34 }
 0x2e0   :  { %13219 = vmatpush1.bf16.msra.mxu1 %v13218_v45  ;;  %v25600_v45 = vld [vmem:[#allocation38_spill] sm:$0xff] }
 0x2e1   :  { %13220 = vmatprep.subr.bf16.mxu1 %v24480_v34  ;;  %4608 = vmatmul.mubr.f32.vlgmr.msra.gmra.mrb[12].mxu0 %v25592_v29  ;;  %vm25601_vm7 = vnez %v25600_v45  ;;  %v25691_v45 = vld [vmem:[#allocation79_spill] sm:$0xff] }
 0x2e2   :  { %13021 = vmatpush1.bf16.msk.msra.mxu0 %vm25595_vm15, %v25593_v38  ;;  %4614 = vmatprep.mubr.f32.mxu0 %v25596_v47 }
 0x2e3   :  { %5597 = vmatmul.mubr.f32.vlgmr.msra.gmra.mrb[12].mxu1 %v25592_v29  ;;  %13022 = vmatprep.subr.bf16.mxu0 %v24480_v34  ;;  %v25613_v29 = vld [vmem:[#allocation18_spill] sm:$0xff] }
 0x2e4   :  { %13222 = vmatpush1.bf16.msk.msra.mxu1 %vm25598_vm4, %v25593_v38  ;;  %5603 = vmatprep.mubr.f32.mxu1 %v25596_v47  ;;  %v25608_v47 = vld [vmem:[#allocation58_spill] sm:$0xff]  ;;  %vm25614_vm14 = vnez %v25613_v29  ;;  %v25642_v29 = vld [vmem:[#allocation64_spill] sm:$0xff] }
 0x2e5   :  { %13223 = vmatprep.subr.bf16.mxu1 %v24480_v34  ;;  %4617 = vmatmul.mubr.f32.gmra.mrb[14].mxu0 %v25599_v9 }
 0x2e6   :  { %13024 = vmatpush1.bf16.msk.msra.mxu0 %vm25601_vm7, %v25593_v38  ;;  %4623 = vmatprep.mubr.f32.mxu0 %v25602_v19 }
 0x2e7   :  { %13025 = vmatprep.subr.bf16.mxu0 %v24480_v34  ;;  %5606 = vmatmul.mubr.f32.gmra.mrb[14].mxu1 %v25599_v9  ;;  %v25609_v9 = vld [vmem:[#allocation48_spill] sm:$0xff] }
 0x2e8   :  { %13225 = vmatpush1.bf16.msk.msra.mxu1 %vm25604_vm12, %v25593_v38  ;;  %5612 = vmatprep.mubr.f32.mxu1 %v25602_v19  ;;  %vm25610_vm13 = vnez %v25609_v9  ;;  %v25611_v19 = vld [vmem:[#allocation94_spill] sm:$0xff] }
 0x2e9   :  { %13226 = vmatprep.subr.bf16.mxu1 %v24480_v34  ;;  %4626 = vmatmul.mubr.f32.gmra.mrb[16].mxu0 %v25605_v21  ;;  %vm25612_vm11 = vnez %v25611_v19  ;;  %v25637_v19 = vand.u32 4294901760, %v18551_v11  ;;  %v25644_v11 = vand.u32 4294901760, %v25582_v2  ;;  %v25649_v2 = vand.u32 4294901760, %v18810_v0  ;;  %v25654_v0 = vld [vmem:[#allocation85_spill] sm:$0xff] }
 0x2ea   :  { %13027 = vmatpush1.bf16.msk.msra.mxu0 %vm25607_vm10, %v25593_v38  ;;  %4720 = vmatprep.mubr.f32.mxu0 %v25608_v47 }
 0x2eb   :  { %13028 = vmatprep.subr.bf16.mxu0 %v24480_v34  ;;  %5615 = vmatmul.mubr.f32.gmra.mrb[16].mxu1 %v25605_v21  ;;  %v25615_v21 = vld [vmem:[#allocation32_spill] sm:$0xff] }
 0x2ec   :  { %13228 = vmatpush1.bf16.msk.msra.mxu1 %vm25610_vm13, %v25593_v38  ;;  %5709 = vmatprep.mubr.f32.mxu1 %v25608_v47  ;;  %vm25616_vm2 = vnez %v25615_v21  ;;  %v25617_v47 = vld [vmem:[#allocation36_spill] sm:$0xff]  ;;  %v25623_v21 = vld [vmem:[#allocation70_spill] sm:$0xff] }
 0x2ed   :  { %13229 = vmatprep.subr.bf16.mxu1 %v24480_v34  ;;  %vm25618_vm13 = vnez %v25617_v47  ;;  %v25625_v47 = vld [vmem:[#allocation13_spill] sm:$0xff] }
 0x2ee   :  { %13030 = vmatpush1.bf16.msk.msra.mxu0 %vm25612_vm11, %v25593_v38  ;;  %vm25620_vm11 = vnez %v25619_v63  ;;  %v25627_v63 = vld [vmem:[#allocation17_spill] sm:$0xff] }
 0x2ef   :  { %13031 = vmatprep.subr.bf16.mxu0 %v24480_v34 }
 0x2f0   :  { %13231 = vmatpush1.bf16.msk.msra.mxu1 %vm25614_vm14, %v25593_v38  ;;  %vm25622_vm14 = vnez %v25621_v53  ;;  %v25640_v53 = vand.u32 4294901760, %v18574_v55 }
 0x2f1   :  { %13232 = vmatprep.subr.bf16.mxu1 %v24480_v34 }
 0x2f2   :  { %13033 = vmatpush1.bf16.msk.msra.mxu0 %vm25616_vm2, %v25593_v38  ;;  %vm25624_vm2 = vnez %v25623_v21  ;;  %v25634_v21 = vld [vmem:[#allocation27_spill] sm:$0xff]  ;;  %v13255_v12 = vpack.c.bf16 %v25641_v3, %v25640_v53  ;;  %v25647_v53 = vand.u32 4294901760, %v25584_v60  ;;  %v25650_v3 = vand.u32 4294901760, %v18828_v39 }
 0x2f3   :  { %13034 = vmatprep.subr.bf16.mxu0 %v24480_v34  ;;  %v25655_v39 = vand.u32 4294901760, %v25588_v33  ;;  %v25660_v33 = vand.u32 4294901760, %v18890_v14  ;;  %v25665_v14 = vand.u32 4294901760, %v18989_v15  ;;  %v25671_v15 = vand.u32 4294901760, %v19205_v1 }
 0x2f4   :  { %13234 = vmatpush1.bf16.msk.msra.mxu1 %vm25618_vm13, %v25593_v38  ;;  %vm25626_vm13 = vnez %v25625_v47  ;;  %v25636_v47 = vand.u32 4294901760, %v18523_v31  ;;  %v25643_v31 = vand.u32 4294901760, %v25581_v52  ;;  %v13258_v55 = vpack.c.bf16 %v25647_v53, %v25646_v35  ;;  %v25648_v52 = vld [vmem:[#allocation76_spill] sm:$0xff] }
 0x2f5   :  { %13235 = vmatprep.subr.bf16.mxu1 %v24480_v34  ;;  %v25678_v1 = vand.u32 4294901760, %v19355_v22 }
 0x2f6   :  { %13036 = vmatpush1.bf16.msk.msra.mxu0 %vm25620_vm11, %v25593_v38  ;;  %vm25628_vm11 = vnez %v25627_v63  ;;  %v13054_v9 = vpack.c.bf16 %v25637_v19, %v25636_v47  ;;  %v25638_v63 = vld [vmem:[#allocation42_spill] sm:$0xff]  ;;  %v13057_v19 = vpack.c.bf16 %v25644_v11, %v25643_v31  ;;  %v25645_v47 = vld [vmem:[#allocation77_spill] sm:$0xff]  ;;  %v25651_v31 = vld [vmem:[#allocation84_spill] sm:$0xff]  ;;  %v25656_v11 = vand.u32 4294901760, %v18850_v6 }
 0x2f7   :  { %13037 = vmatprep.subr.bf16.mxu0 %v24480_v34  ;;  %v25659_v6 = vand.u32 4294901760, %v25591_v16  ;;  %v25666_v16 = vand.u32 4294901760, %v19012_v24  ;;  %v25672_v24 = vand.u32 4294901760, %v19207_v25  ;;  %v25677_v25 = vand.u32 4294901760, %v19350_v18 }
 0x2f8   :  { %13237 = vmatpush1.bf16.msk.msra.mxu1 %vm25622_vm14, %v25593_v38 }
 0x2f9   :  { %13238 = vmatprep.subr.bf16.mxu1 %v24480_v34  ;;  %v13066_v53 = vpack.c.bf16 %v25660_v33, %v25659_v6  ;;  %v25683_v6 = vld [vmem:[#allocation88_spill] sm:$0xff] }
 0x2fa   :  { %13039 = vmatpush1.bf16.msk.msra.mxu0 %vm25624_vm2, %v25593_v38 }
 0x2fb   :  { %13040 = vmatprep.subr.bf16.mxu0 %v24480_v34 }
 0x2fc   :  { %13240 = vmatpush1.bf16.msk.msra.mxu1 %vm25626_vm13, %v25593_v38 }
 0x2fd   :  { %13241 = vmatprep.subr.bf16.mxu1 %v24480_v34 }
 0x2fe   :  { %13042 = vmatpush1.bf16.msk.msra.mxu0 %vm25628_vm11, %v25593_v38 }
 0x2ff   :  { %13043 = vmatprep.subr.bf16.mxu0 %v24480_v34 }
 0x300   :  { %13243 = vmatpush1.bf16.msk.msra.mxu1 %vm19056_vm5, %v25593_v38 }
 0x301   :  { %13244 = vmatprep.subr.bf16.mxu1 %v24480_v34 }
 0x302   :  { %13045 = vmatpush1.bf16.msk.msra.mxu0 %vm19071_vm6, %v25593_v38 }
 0x303   :  { %13046 = vmatprep.subr.bf16.mxu0 %v24480_v34 }
 0x304   :  { %13246 = vmatpush1.bf16.msk.msra.mxu1 %vm19089_vm0, %v25593_v38 }
 0x305   :  { %13247 = vmatprep.subr.bf16.mxu1 %v24480_v34 }
 0x306   :  { %13048 = vmatpush1.bf16.msk.msra.mxu0 %vm19229_vm1, %v25593_v38 }
 0x307   :  { %13049 = vmatprep.subr.bf16.mxu0 %v24480_v34 }
 0x308   :  { %13249 = vmatpush1.bf16.msk.msra.mxu1 %vm19262_vm8, %v25593_v38 }
 0x309   :  { %13250 = vmatprep.subr.bf16.mxu1 %v24480_v34 }
 0x30a   :  { %13052 = vmatpush1.bf16.msk.msra.mxu0 %vm19306_vm3, %v25634_v21 }
 0x30b   :  { %13053 = vmatprep.subr.bf16.mxu0 %v24480_v34 }
 0x30c   :  { %13253 = vmatpush1.bf16.msk.msra.mxu1 %vm19331_vm9, %v25638_v63 }
 0x30d   :  { %13254 = vmatprep.subr.bf16.mxu1 %v24480_v34  ;;  %4724 = vmatmul.mubr.f32.vlgmr.msra.gmra.mrb[12].mxu0 %v25642_v29 }
 0x30e   :  { %13055 = vmatpush1.bf16.msra.mxu0 %v13054_v9  ;;  %4731 = vmatprep.mubr.f32.mxu0 %v25645_v47  ;;  %v13060_v9 = vpack.c.bf16 %v25650_v3, %v25649_v2  ;;  %v25664_v3 = vand.u32 4294901760, %v18973_v26  ;;  %v25670_v26 = vand.u32 4294901760, %v19165_v28  ;;  %v25675_v28 = vand.u32 4294901760, %v19300_v7 }
 0x30f   :  { %5713 = vmatmul.mubr.f32.vlgmr.msra.gmra.mrb[12].mxu1 %v25642_v29  ;;  %13056 = vmatprep.subr.bf16.mxu0 %v24480_v34 }
 0x310   :  { %13256 = vmatpush1.bf16.msra.mxu1 %v13255_v12  ;;  %5720 = vmatprep.mubr.f32.mxu1 %v25645_v47  ;;  %v25653_v12 = vand.u32 4294901760, %v18832_v50  ;;  %v25657_v50 = vand.u32 4294901760, %v18855_v8  ;;  %v25662_v8 = vand.u32 4294901760, %v18948_v51  ;;  %v25668_v51 = vand.u32 4294901760, %v19064_v58  ;;  %v25906_v47 = vld [vmem:[#allocation43_spill] sm:$0xff] }
 0x311   :  { %13257 = vmatprep.subr.bf16.mxu1 %v24480_v34  ;;  %4735 = vmatmul.mubr.f32.gmra.mrb[14].mxu0 %v25648_v52  ;;  %v25673_v58 = vand.u32 4294901760, %v19222_v36  ;;  %v25679_v36 = vand.u32 4294901760, %v19389_v37  ;;  %v25684_v37 = vand.u32 4294901760, %v19451_v62 }
 0x312   :  { %13058 = vmatpush1.bf16.msra.mxu0 %v13057_v19  ;;  %4742 = vmatprep.mubr.f32.mxu0 %v25651_v31  ;;  %v13261_v60 = vpack.c.bf16 %v25653_v12, %v25652_v40  ;;  %v13063_v19 = vpack.c.bf16 %v25656_v11, %v25655_v39  ;;  %v13264_v35 = vpack.c.bf16 %v25658_v54, %v25657_v50 }
 0x313   :  { %13059 = vmatprep.subr.bf16.mxu0 %v24480_v34  ;;  %5724 = vmatmul.mubr.f32.gmra.mrb[14].mxu1 %v25648_v52  ;;  %v13270_v40 = vpack.c.bf16 %v25666_v16, %v25665_v14  ;;  %v13075_v39 = vpack.c.bf16 %v25672_v24, %v25671_v15  ;;  %v13279_v50 = vpack.c.bf16 %v25678_v1, %v25677_v25  ;;  %v25688_v16 = vld [vmem:[#allocation89_spill] sm:$0xff]  ;;  %v25903_v52 = vmov 0 }
 0x314   :  { %13259 = vmatpush1.bf16.msra.mxu1 %v13258_v55  ;;  %5731 = vmatprep.mubr.f32.mxu1 %v25651_v31  ;;  %v25661_v55 = vand.u32 4294901760, %v18929_v23  ;;  %v25667_v23 = vand.u32 4294901760, %v19050_v46  ;;  %v25674_v46 = vand.u32 4294901760, %v19238_v42  ;;  %v25680_v42 = vand.u32 4294901760, %v19391_v30 }
 0x315   :  { %13260 = vmatprep.subr.bf16.mxu1 %v24480_v34  ;;  %4746 = vmatmul.mubr.f32.gmra.mrb[16].mxu0 %v25654_v0  ;;  %v25685_v30 = vand.u32 4294901760, %v19462_v59  ;;  %v25893_v31 = vmov 0 }
 0x316   :  { %13061 = vmatpush1.bf16.msra.mxu0 %v13060_v9  ;;  %4882 = vmatprep.mubr.f32.mxu0 %v24793_v49  ;;  %v13267_v2 = vpack.c.bf16 %v25662_v8, %v25661_v55  ;;  %v13069_v9 = vpack.c.bf16 %v25664_v3, %v25663_v20  ;;  %v13072_v12 = vpack.c.bf16 %v25668_v51, %v25667_v23  ;;  %v25687_v3 = vand.u32 4294901760, %v19514_v32 }
 0x317   :  { %13062 = vmatprep.subr.bf16.mxu0 %v24480_v34  ;;  %5735 = vmatmul.mubr.f32.gmra.mrb[16].mxu1 %v25654_v0  ;;  %v13276_v11 = vpack.c.bf16 %v25674_v46, %v25673_v58  ;;  %v13081_v54 = vpack.c.bf16 %v25680_v42, %v25679_v36  ;;  %v13084_v55 = vpack.c.bf16 %v25685_v30, %v25684_v37  ;;  %v7008_v37 = vld [vmem:[%s23529_s0 + $0x11] sm:$0x1] }
 0x318   :  { %13262 = vmatpush1.bf16.msra.mxu1 %v13261_v60  ;;  %5871 = vmatprep.mubr.f32.mxu1 %v24793_v49  ;;  %v13273_v60 = vpack.c.bf16 %v25670_v26, %v25669_v4  ;;  %v25689_v4 = vld [vmem:[#allocation90_spill] sm:$0xff] }
 0x319   :  { %13263 = vmatprep.subr.bf16.mxu1 %v24480_v34 }
 0x31a   :  { %13064 = vmatpush1.bf16.msra.mxu0 %v13063_v19  ;;  %v13078_v19 = vpack.c.bf16 %v25676_v5, %v25675_v28 }
 0x31b   :  { %13065 = vmatprep.subr.bf16.mxu0 %v24480_v34 }
 0x31c   :  { %13265 = vmatpush1.bf16.msra.mxu1 %v13264_v35  ;;  %v25682_v35 = vand.u32 4294901760, %v19416_v27  ;;  %v25686_v27 = vand.u32 4294901760, %v19503_v17 }
 0x31d   :  { %13266 = vmatprep.subr.bf16.mxu1 %v24480_v34 }
 0x31e   :  { %13067 = vmatpush1.bf16.msra.mxu0 %v13066_v53  ;;  %v13282_v18 = vpack.c.bf16 %v25682_v35, %v25681_v61  ;;  %v25697_v35 = vld [vmem:[#allocation18_spill] sm:$0xff] }
 0x31f   :  { %13068 = vmatprep.subr.bf16.mxu0 %v24480_v34 }
 0x320   :  { %13268 = vmatpush1.bf16.msra.mxu1 %v13267_v2 }
 0x321   :  { %13269 = vmatprep.subr.bf16.mxu1 %v24480_v34 }
 0x322   :  { %13070 = vmatpush1.bf16.msra.mxu0 %v13069_v9  ;;  %v13285_v9 = vpack.c.bf16 %v25687_v3, %v25686_v27  ;;  %v25704_v27 = vld [vmem:[#allocation39_spill] sm:$0xff]  ;;  %v7035_v3 = vadd.s32 164, %v7008_v37 }
 0x323   :  { %13071 = vmatprep.subr.bf16.mxu0 %v24480_v34  ;;  %v3015_v7 = vpop.f32.mrb[6].mxu0 }
 0x324   :  { %13271 = vmatpush1.bf16.msra.mxu1 %v13270_v40  ;;  %v14167_v22 = vadd.f32 %v3015_v7, %v25683_v6  ;;  %v3017_v33 = vpop.f32.mrb[7].mxu0 }
 0x325   :  { %13272 = vmatprep.subr.bf16.mxu1 %v24480_v34  ;;  %v4004_v53 = vpop.f32.mrb[6].mxu1 }
 0x326   :  { %13073 = vmatpush1.bf16.msra.mxu0 %v13072_v12  ;;  %v11311_v8 = vmul.f32 -1.442695, %v14167_v22  ;;  %v14170_v2 = vadd.f32 %v4004_v53, %v25683_v6  ;;  %v4006_v20 = vpop.f32.mrb[7].mxu1  ;;  %v6019_v22 = vld [vmem:[%s23529_s0 + $0x10] sm:$0x1]  ;;  %v25699_v53 = vld [vmem:[#allocation32_spill] sm:$0xff] }
 0x327   :  { %13074 = vmatprep.subr.bf16.mxu0 %v24480_v34  ;;  %v3022_v10 = vpop.f32.mrb[8].mxu0 }
 0x328   :  { %13274 = vmatpush1.bf16.msra.mxu1 %v13273_v60  ;;  %14534 = vpow2.f32 %v11311_v8  ;;  %v11403_v14 = vmul.f32 -1.442695, %v14170_v2  ;;  %v14168_v62 = vadd.f32 %v3022_v10, %v25688_v16  ;;  %v3024_v40 = vpop.f32.mrb[9].mxu0  ;;  %v6046_v8 = vadd.s32 164, %v6019_v22  ;;  %v25703_v2 = vld [vmem:[#allocation54_spill] sm:$0xff] }
 0x329   :  { %13275 = vmatprep.subr.bf16.mxu1 %v24480_v34  ;;  %v25708_v40 = vld [vmem:[#allocation8_spill] sm:$0xff]  ;;  %v25736_v22 = vmov 0 }
 0x32a   :  { %13076 = vmatpush1.bf16.msra.mxu0 %v13075_v39  ;;  %v4011_v59 = vpop.f32.mrb[8].mxu1  ;;  %14536 = vpow2.f32 %v11403_v14  ;;  %v11312_v23 = vmul.f32 -1.442695, %v14168_v62 }
 0x32b   :  { %13077 = vmatprep.subr.bf16.mxu0 %v24480_v34  ;;  %v14171_v51 = vadd.f32 %v4011_v59, %v25688_v16  ;;  %v4013_v12 = vpop.f32.mrb[9].mxu1  ;;  %v3029_v17 = vpop.f32.mrb[10].mxu0  ;;  %v19932_v59 = vrot.slane %v6046_v8, %v25708_v40  ;;  %v25747_v8 = vmov 0 }
 0x32c   :  { %13277 = vmatpush1.bf16.msra.mxu1 %v13276_v11  ;;  %14538 = vpow2.f32 %v11312_v23  ;;  %v14169_v26 = vadd.f32 %v3029_v17, %v25689_v4  ;;  %v3031_v60 = vpop.f32.mrb[11].mxu0  ;;  %v19938_v23 = vld [vmem:[%s23529_s0 + $0x6] ss:$0 sm:$0xff] }
 0x32d   :  { %13278 = vmatprep.subr.bf16.mxu1 %v24480_v34  ;;  %v11404_v32 = vmul.f32 -1.442695, %v14171_v51  ;;  %v25709_v51 = vld [vmem:[#allocation31_spill] sm:$0xff]  ;;  %v19951_v60 = vld [vmem:[%s23529_s0 + $0x7] ss:$0 sm:$0xff] }
 0x32e   :  { %13079 = vmatpush1.bf16.msra.mxu0 %v13078_v19  ;;  %v4018_v15 = vpop.f32.mrb[10].mxu1  ;;  %v11313_v24 = vmul.f32 -1.442695, %v14169_v26  ;;  %v19945_v26 = vrot.slane %v7035_v3, %v25708_v40  ;;  %v25758_v3 = vld [vmem:[#allocation21_spill] sm:$0xff] }
 0x32f   :  { %13080 = vmatprep.subr.bf16.mxu0 %v24480_v34  ;;  %14540 = vpow2.f32 %v11404_v32  ;;  %v14172_v39 = vadd.f32 %v4018_v15, %v25689_v4  ;;  %v4020_v58 = vpop.f32.mrb[11].mxu1  ;;  %v25769_v32 = vmov 0  ;;  %v25870_v4 = vmov 0 }
 0x330   :  { %13280 = vmatpush1.bf16.msra.mxu1 %v13279_v50  ;;  %14542 = vpow2.f32 %v11313_v24  ;;  %v25693_v50 = vld [vmem:[#allocation48_spill] sm:$0xff]  ;;  %v25713_v58 = vld [vmem:[#allocation6_spill] sm:$0xff] }
 0x331   :  { %13281 = vmatprep.subr.bf16.mxu1 %v24480_v34  ;;  %v11405_v56 = vmul.f32 -1.442695, %v14172_v39 }
 0x332   :  { %13082 = vmatpush1.bf16.msra.mxu0 %v13081_v54  ;;  %v14535_v46 = vpop.eup %14534  ;;  %v25695_v54 = vld [vmem:[#allocation94_spill] sm:$0xff] }
 0x333   :  { %13083 = vmatprep.subr.bf16.mxu0 %v24480_v34  ;;  %14544 = vpow2.f32 %v11405_v56  ;;  %v3042_v57 = vadd.f32 1.0, %v14535_v46  ;;  %v25714_v56 = vld [vmem:[#allocation7_spill] sm:$0xff] }
 0x334   :  { %13283 = vmatpush1.bf16.msra.mxu1 %v13282_v18  ;;  %v14537_v28 = vpop.eup %14536  ;;  %v25715_v46 = vld [vmem:[#allocation91_spill] sm:$0xff]  ;;  %vm7041_vm9 = vcmp.eq.s32.totalorder %v25714_v56, %v19945_v26 }
 0x335   :  { %13284 = vmatprep.subr.bf16.mxu1 %v24480_v34  ;;  %14546 = vrcp.f32 %v3042_v57  ;;  %v4031_v5 = vadd.f32 1.0, %v14537_v28  ;;  %v25788_v28 = vld [vmem:[#allocation26_spill] sm:$0xff] }
 0x336   :  { %13085 = vmatpush1.bf16.msra.mxu0 %v13084_v55  ;;  %v14539_v25 = vpop.eup %14538  ;;  %v25701_v55 = vld [vmem:[#allocation36_spill] sm:$0xff] }
 0x337   :  { %13086 = vmatprep.subr.bf16.mxu0 %v24480_v34  ;;  %14548 = vrcp.f32 %v4031_v5  ;;  %v3043_v1 = vadd.f32 1.0, %v14539_v25  ;;  %v25717_v5 = vmov 0  ;;  %v25793_v25 = vmov 0 }
 0x338   :  { %13286 = vmatpush1.bf16.msra.mxu1 %v13285_v9 }
 0x339   :  { %13287 = vmatprep.subr.bf16.mxu1 %v24480_v34  ;;  %4884 = vmatmul.mubr.f32.vlgmr.msra.gmra.mrb[12].mxu0 %v25580_v43  ;;  %v14541_v36 = vpop.eup %14540  ;;  %14550 = vrcp.f32 %v3043_v1  ;;  %v25721_v1 = vmov 0 }
 0x33a   :  { %13088 = vmatpush1.bf16.msk.msra.mxu0 %vm25595_vm15, %v25593_v38  ;;  %4889 = vmatprep.mubr.f32.mxu0 %v25583_v41  ;;  %vm25694_vm15 = vnez %v25693_v50  ;;  %v4032_v42 = vadd.f32 1.0, %v14541_v36  ;;  %v14543_v7 = vpop.eup %14542  ;;  %v25723_v50 = vld [vmem:[#allocation9_spill] sm:$0xff]  ;;  %v25724_v36 = vmov 0 }
 0x33b   :  { %5873 = vmatmul.mubr.f32.vlgmr.msra.gmra.mrb[12].mxu1 %v25580_v43  ;;  %13089 = vmatprep.subr.bf16.mxu0 %v24480_v34  ;;  %v3044_v61 = vadd.f32 1.0, %v14543_v7  ;;  %v25728_v7 = vmov 0 }
 0x33c   :  { %13289 = vmatpush1.bf16.msk.msra.mxu1 %vm25598_vm4, %v25593_v38  ;;  %5878 = vmatprep.mubr.f32.mxu1 %v25583_v41  ;;  %vm25696_vm4 = vnez %v25695_v54  ;;  %14552 = vrcp.f32 %v4032_v42  ;;  %v25726_v42 = vld [vmem:[#allocation10_spill] sm:$0xff]  ;;  %v25796_v54 = vmov 0 }
 0x33d   :  { %13290 = vmatprep.subr.bf16.mxu1 %v24480_v34  ;;  %4891 = vmatmul.mubr.f32.gmra.mrb[14].mxu0 %v25585_v44  ;;  %v14545_v18 = vpop.eup %14544  ;;  %14554 = vrcp.f32 %v3044_v61  ;;  %vm6027_vm8 = vcmp.eq.s32.totalorder %v25726_v42, %v19938_v23  ;;  %v25730_v61 = vmov 0 }
 0x33e   :  { %13091 = vmatpush1.bf16.msk.msra.mxu0 %vm25601_vm7, %v25593_v38  ;;  %4896 = vmatprep.mubr.f32.mxu0 %v25586_v13  ;;  %vm25698_vm7 = vnez %v25697_v35  ;;  %v4033_v33 = vadd.f32 1.0, %v14545_v18  ;;  %v25733_v35 = vmov 0 }
 0x33f   :  { %13092 = vmatprep.subr.bf16.mxu0 %v24480_v34  ;;  %5880 = vmatmul.mubr.f32.gmra.mrb[14].mxu1 %v25585_v44  ;;  %v14547_v30 = vpop.eup %14546 }
 0x340   :  { %13292 = vmatpush1.bf16.msk.msra.mxu1 %vm25604_vm12, %v25593_v38  ;;  %5885 = vmatprep.mubr.f32.mxu1 %v25586_v13  ;;  %vm25700_vm12 = vnez %v25699_v53  ;;  %14556 = vrcp.f32 %v4033_v33  ;;  %v3051_v20 = vadd.f32 %v14547_v30, %v25703_v2  ;;  %v25738_v33 = vld [vmem:[#allocation15_spill] sm:$0xff]  ;;  %v25739_v53 = vmov 0  ;;  %v25744_v30 = vld [vmem:[#allocation16_spill] sm:$0xff] }
 0x341   :  { %13293 = vmatprep.subr.bf16.mxu1 %v24480_v34  ;;  %4898 = vmatmul.mubr.f32.gmra.mrb[16].mxu0 %v25691_v45  ;;  %v14549_v10 = vpop.eup %14548  ;;  %v25749_v2 = vmov 0 }
 0x342   :  { %13094 = vmatpush1.bf16.msk.msra.mxu0 %vm25607_vm10, %v25593_v38  ;;  %4990 = vmatprep.mubr.f32.mxu0 %v24793_v49  ;;  %vm25702_vm10 = vnez %v25701_v55  ;;  %v19926_v9 = vadd.f32 %v14549_v10, %v3051_v20  ;;  %v25745_v55 = vld [vmem:[#allocation20_spill] sm:$0xff]  ;;  %v25852_v20 = vld [vmem:[#allocation63_spill] sm:$0xff] }
 0x343   :  { %13095 = vmatprep.subr.bf16.mxu0 %v24480_v34  ;;  %5887 = vmatmul.mubr.f32.gmra.mrb[16].mxu1 %v25691_v45  ;;  %v14551_v14 = vpop.eup %14550  ;;  %v25754_v10 = vld [vmem:[#allocation24_spill] sm:$0xff] }
 0x344   :  { %13295 = vmatpush1.bf16.msk.msra.mxu1 %vm25694_vm15, %v25593_v38  ;;  %5979 = vmatprep.mubr.f32.mxu1 %v24793_v49  ;;  %vm25705_vm15 = vnez %v25704_v27  ;;  %25706 = vst [vmem:[#allocation47_spill] sm:$0xff] %v19926_v9  ;;  %v3052_v12 = vadd.f32 %v14551_v14, %v25709_v51  ;;  %v25756_v27 = vmov 0  ;;  %v25759_v14 = vmov 0  ;;  %v25764_v51 = vld [vmem:[#allocation22_spill] sm:$0xff]  ;;  %v25867_v9 = vld [vmem:[#allocation37_spill] sm:$0xff] }
 0x345   :  { %13296 = vmatprep.subr.bf16.mxu1 %v24480_v34 }
 0x346   :  { %13097 = vmatpush1.bf16.msk.msra.mxu0 %vm25696_vm4, %v25593_v38  ;;  %v14553_v17 = vpop.eup %14552  ;;  %vm6025_vm4 = vcmp.eq.s32.totalorder %v25714_v56, %v19938_v23 }
 0x347   :  { %13098 = vmatprep.subr.bf16.mxu0 %v24480_v34  ;;  %v19953_v15 = vadd.f32 %v14553_v17, %v3052_v12  ;;  %v14555_v24 = vpop.eup %14554  ;;  %v25765_v12 = vld [vmem:[#allocation28_spill] sm:$0xff] }
 0x348   :  { %13298 = vmatpush1.bf16.msk.msra.mxu1 %vm25698_vm7, %v25593_v38  ;;  %vm6052_vm7 = vcmp.eq.s32.totalorder %v25714_v56, %v19932_v59  ;;  %v3053_v57 = vadd.f32 %v14555_v24, %v25715_v46  ;;  %v25775_v24 = vmov 0.0   ;;  %v25777_v46 = vmov 0 }
 0x349   :  { %13299 = vmatprep.subr.bf16.mxu1 %v24480_v34  ;;  %25711 = vst [vmem:[#allocation51_spill] sm:$0xff] %v19953_v15 }
 0x34a   :  { %13100 = vmatpush1.bf16.msk.msra.mxu0 %vm25700_vm12, %v25593_v38  ;;  %v14557_v11 = vpop.eup %14556  ;;  %vm7040_vm12 = vcmp.eq.s32.totalorder %v25713_v58, %v19945_v26 }
 0x34b   :  { %13101 = vmatprep.subr.bf16.mxu0 %v24480_v34  ;;  %v19984_v19 = vadd.f32 %v14557_v11, %v3053_v57  ;;  %v25779_v57 = vld [vmem:[#allocation25_spill] sm:$0xff]  ;;  %v25786_v11 = vmov 0 }
 0x34c   :  { %13301 = vmatpush1.bf16.msk.msra.mxu1 %vm25702_vm10, %v25593_v38 }
 0x34d   :  { %13302 = vmatprep.subr.bf16.mxu1 %v24480_v34  ;;  %25719 = vst [vmem:[#allocation56_spill] sm:$0xff] %v19984_v19 }
 0x34e   :  { %13103 = vmatpush1.bf16.msk.msra.mxu0 %vm25705_vm15, %v25593_v38  ;;  %vm7014_vm15 = vcmp.eq.s32.totalorder %v25714_v56, %v19951_v60 }
 0x34f   :  { %13104 = vmatprep.subr.bf16.mxu0 %v24480_v34 }
 0x350   :  { %13304 = vmatpush1.bf16.msk.msra.mxu1 %vm25622_vm14, %v25593_v38  ;;  %vm6024_vm14 = vcmp.eq.s32.totalorder %v25713_v58, %v19938_v23 }
 0x351   :  { %13305 = vmatprep.subr.bf16.mxu1 %v24480_v34 }
 0x352   :  { %13106 = vmatpush1.bf16.msk.msra.mxu0 %vm25624_vm2, %v25593_v38  ;;  %vm6051_vm2 = vcmp.eq.s32.totalorder %v25713_v58, %v19932_v59 }
 0x353   :  { %13107 = vmatprep.subr.bf16.mxu0 %v24480_v34  ;;  %vm19976_vm10 = vmor %vm6024_vm14, %vm6051_vm2  ;;  %vm6026_vm14 = vcmp.eq.s32.totalorder %v25723_v50, %v19938_v23  ;;  %vm6053_vm2 = vcmp.eq.s32.totalorder %v25723_v50, %v19932_v59 }
 0x354   :  { %13307 = vmatpush1.bf16.msk.msra.mxu1 %vm25626_vm13, %v25593_v38  ;;  %vm7013_vm13 = vcmp.eq.s32.totalorder %v25713_v58, %v19951_v60  ;;  %v25718_v5 = vsel %vm19976_vm10, 4294967295, %v25717_v5  ;;  %v25853_v58 = vmov 0 }
 0x355   :  { %13308 = vmatprep.subr.bf16.mxu1 %v24480_v34  ;;  %vm19998_vm3 = vmor %vm7013_vm13, %vm7040_vm12  ;;  %vm7042_vm13 = vcmp.eq.s32.totalorder %v25723_v50, %v19945_v26 }
 0x356   :  { %13109 = vmatpush1.bf16.msk.msra.mxu0 %vm25628_vm11, %v25593_v38  ;;  %vm19989_vm11 = vmor %vm6025_vm4, %vm6052_vm7  ;;  %v25725_v36 = vsel %vm19998_vm3, 4294967295, %v25724_v36  ;;  %vm7015_vm7 = vcmp.eq.s32.totalorder %v25723_v50, %v19951_v60  ;;  %v25839_v50 = vmov 0 }
 0x357   :  { %13110 = vmatprep.subr.bf16.mxu0 %v24480_v34  ;;  %v25722_v1 = vsel %vm19989_vm11, 4294967295, %v25721_v1  ;;  %vm20009_vm4 = vmor %vm7014_vm15, %vm7041_vm9  ;;  %vm7016_vm9 = vcmp.eq.s32.totalorder %v25726_v42, %v19951_v60  ;;  %vm7043_vm15 = vcmp.eq.s32.totalorder %v25726_v42, %v19945_v26 }
 0x358   :  { %13310 = vmatpush1.bf16.msk.msra.mxu1 %vm19056_vm5, %v25593_v38  ;;  %vm6054_vm5 = vcmp.eq.s32.totalorder %v25726_v42, %v19932_v59  ;;  %v25729_v7 = vsel %vm20009_vm4, 4294967295, %v25728_v7  ;;  %vm20022_vm12 = vmpackc.low %vm19989_vm11, %vm19976_vm10  ;;  %vm25746_vm11 = vnez %v25745_v55 }
 0x359   :  { %13311 = vmatprep.subr.bf16.mxu1 %v24480_v34  ;;  %v25731_v61 = vsel %vm20022_vm12, 4294967295, %v25730_v61  ;;  %vm20037_vm1 = vmor %vm6027_vm8, %vm6054_vm5  ;;  %vm6029_vm8 = vcmp.eq.s32.totalorder %v25744_v30, %v19938_v23  ;;  %vm6056_vm5 = vcmp.eq.s32.totalorder %v25744_v30, %v19932_v59 }
 0x35a   :  { %13112 = vmatpush1.bf16.msk.msra.mxu0 %vm19071_vm6, %v25593_v38  ;;  %25732 = vst [vmem:[#allocation60_spill] sm:$0xff] %v25731_v61  ;;  %vm20026_vm6 = vmor %vm6026_vm14, %vm6053_vm2  ;;  %v25737_v22 = vsel %vm20037_vm1, 4294967295, %v25736_v22  ;;  %vm6028_vm14 = vcmp.eq.s32.totalorder %v25738_v33, %v19938_v23  ;;  %vm6055_vm2 = vcmp.eq.s32.totalorder %v25738_v33, %v19932_v59 }
 0x35b   :  { %13113 = vmatprep.subr.bf16.mxu0 %v24480_v34  ;;  %v25734_v35 = vsel %vm20026_vm6, 4294967295, %v25733_v35  ;;  %vm20050_vm12 = vmpackc.low %vm20009_vm4, %vm19998_vm3  ;;  %vm25755_vm4 = vnez %v25754_v10 }
 0x35c   :  { %13313 = vmatpush1.bf16.msk.msra.mxu1 %vm19089_vm0, %v25593_v38  ;;  %v25740_v53 = vsel %vm20050_vm12, 4294967295, %v25739_v53  ;;  %vm20054_vm0 = vmor %vm7015_vm7, %vm7042_vm13  ;;  %vm7017_vm7 = vcmp.eq.s32.totalorder %v25738_v33, %v19951_v60  ;;  %vm7044_vm13 = vcmp.eq.s32.totalorder %v25738_v33, %v19945_v26  ;;  %v25837_v33 = vld [vmem:[#allocation34_spill] sm:$0xff] }
 0x35d   :  { %13314 = vmatprep.subr.bf16.mxu1 %v24480_v34  ;;  %25741 = vst [vmem:[#allocation62_spill] sm:$0xff] %v25740_v53  ;;  %vm20065_vm10 = vmor %vm7016_vm9, %vm7043_vm15  ;;  %vm7018_vm9 = vcmp.eq.s32.totalorder %v25744_v30, %v19951_v60  ;;  %vm7045_vm15 = vcmp.eq.s32.totalorder %v25744_v30, %v19945_v26 }
 0x35e   :  { %13115 = vmatpush1.bf16.msk.msra.mxu0 %vm25746_vm11, %v25593_v38  ;;  %v25748_v8 = vsel %vm20065_vm10, 4294967295, %v25747_v8  ;;  %vm20078_vm12 = vmpackc.low %vm20037_vm1, %vm20026_vm6  ;;  %vm25766_vm1 = vnez %v25765_v12  ;;  %v25809_v12 = vld [vmem:[#allocation29_spill] sm:$0xff] }
 0x35f   :  { %13116 = vmatprep.subr.bf16.mxu0 %v24480_v34  ;;  %v25750_v2 = vsel %vm20078_vm12, 4294967295, %v25749_v2  ;;  %vm20082_vm11 = vmor %vm6028_vm14, %vm6055_vm2  ;;  %vm6030_vm14 = vcmp.eq.s32.totalorder %v25758_v3, %v19938_v23  ;;  %vm6057_vm2 = vcmp.eq.s32.totalorder %v25758_v3, %v19932_v59 }
 0x360   :  { %25751 = vst [vmem:[#allocation66_spill] sm:$0xff] %v25750_v2  ;;  %13316 = vmatpush1.bf16.msk.msra.mxu1 %vm25755_vm4, %v25593_v38  ;;  %vm20093_vm3 = vmor %vm6029_vm8, %vm6056_vm5  ;;  %vm6031_vm8 = vcmp.eq.s32.totalorder %v25764_v51, %v19938_v23  ;;  %vm6058_vm5 = vcmp.eq.s32.totalorder %v25764_v51, %v19932_v59  ;;  %v11595_v19 = vsel %vm20082_vm11, 1.0, %v25775_v24 }
 0x361   :  { %v25757_v27 = vsel %vm20093_vm3, 4294967295, %v25756_v27  ;;  %13317 = vmatprep.subr.bf16.mxu1 %v24480_v34  ;;  %vm20106_vm12 = vmpackc.low %vm20065_vm10, %vm20054_vm0  ;;  %v20496_v6 = vsub.f32 %v11595_v19, %v11595_v19 }
 0x362   :  { %v25760_v14 = vsel %vm20106_vm12, 4294967295, %v25759_v14  ;;  %vm20110_vm4 = vmor %vm7017_vm7, %vm7044_vm13  ;;  %13119 = vmatpush1.bf16.msk.msra.mxu0 %vm25766_vm1, %v25634_v21  ;;  %v25772_v21 = vmov 0  ;;  %vm25774_vm7 = vnez %v25639_v48  ;;  %vm25776_vm13 = vnez %v25718_v5 }
 0x363   :  { %25761 = vst [vmem:[#allocation67_spill] sm:$0xff] %v25760_v14  ;;  %vm20121_vm6 = vmor %vm7018_vm9, %vm7045_vm15  ;;  %13321 = vmatprep.subr.bf16.mxu0 %v24480_v34  ;;  %v11591_v39 = vsel %vm25776_vm13, 1.0, %v25775_v24  ;;  %vm25785_vm13 = vcmp.eq.s32.totalorder %v25758_v3, %v19951_v60  ;;  %vm25789_vm9 = vnez %v25731_v61  ;;  %vm25790_vm15 = vnez %v25725_v36 }
 0x364   :  { %vm20134_vm10 = vmpackc.low %vm20093_vm3, %vm20082_vm11  ;;  %13320 = vmatpush1.bf16.msk.msra.mxu1 %vm25774_vm7, %v25638_v63  ;;  %vm25780_vm7 = vnez %v25722_v1  ;;  %v25781_v63 = vmov 0  ;;  %v11683_v5 = vsel %vm25790_vm15, 1.0, %v25775_v24  ;;  %v20209_v1 = vsub.f32 %v11591_v39, %v11591_v39 }
 0x365   :  { %v25770_v32 = vsel %vm20134_vm10, 4294967295, %v25769_v32  ;;  %vm20138_vm1 = vmor %vm6030_vm14, %vm6057_vm2  ;;  %4992 = vmatmul.mubr.f32.vlgmr.msra.gmra.mrb[12].mxu0 %v25580_v43  ;;  %13522 = vmatprep.subr.bf16.mxu1 %v24480_v34  ;;  %v11592_v48 = vsel %vm25780_vm7, 1.0, %v25775_v24  ;;  %vm25795_vm15 = vnez %v25729_v7  ;;  %vm25800_vm2 = vcmp.eq.s32.totalorder %v25779_v57, %v19938_v23 }
 0x366   :  { %25771 = vst [vmem:[#allocation23_spill] sm:$0xff] %v25770_v32  ;;  %v25773_v21 = vsel %vm20138_vm1, 4294967295, %v25772_v21  ;;  %vm20152_vm3 = vmor %vm6031_vm8, %vm6058_vm5  ;;  %vm25784_vm5 = vcmp.eq.s32.totalorder %v25758_v3, %v19945_v26  ;;  %13323 = vmatpush1.bf16.msk.msra.mxu0 %vm25789_vm9, %v25593_v38  ;;  %4997 = vmatprep.mubr.f32.mxu0 %v25583_v41  ;;  %v11684_v36 = vsel %vm25795_vm15, 1.0, %v25775_v24  ;;  %v20237_v7 = vsub.f32 %v11592_v48, %v11592_v48 }
 0x367   :  { %v25778_v46 = vsel %vm20152_vm3, 4294967295, %v25777_v46  ;;  %vm20169_vm8 = vmpackc.low %vm20121_vm6, %vm20110_vm4  ;;  %5981 = vmatmul.mubr.f32.vlgmr.msra.gmra.mrb[12].mxu1 %v25580_v43  ;;  %13324 = vmatprep.subr.bf16.mxu0 %v24480_v34  ;;  %vm25806_vm15 = vcmp.eq.s32.totalorder %v25788_v28, %v19938_v23  ;;  %v20260_v39 = vsub.f32 %v11683_v5, %v11683_v5  ;;  %v25811_v48 = vmov 0 }
 0x368   :  { %v25782_v63 = vsel %vm20169_vm8, 4294967295, %v25781_v63  ;;  %vm20179_vm14 = vmor %vm25785_vm13, %vm25784_vm5  ;;  %vm25791_vm5 = vcmp.eq.s32.totalorder %v25764_v51, %v19945_v26  ;;  %vm25792_vm13 = vcmp.eq.s32.totalorder %v25764_v51, %v19951_v60  ;;  %5986 = vmatprep.mubr.f32.mxu1 %v25583_v41  ;;  %vm25815_vm8 = vcmp.eq.s32.totalorder %v25779_v57, %v19951_v60 }
 0x369   :  { %25783 = vst [vmem:[#allocation33_spill] sm:$0xff] %v25782_v63  ;;  %v25787_v11 = vsel %vm20179_vm14, 4294967295, %v25786_v11  ;;  %vm20200_vm7 = vmor %vm25792_vm13, %vm25791_vm5  ;;  %vm25799_vm13 = vcmp.eq.s32.totalorder %v25779_v57, %v19932_v59  ;;  %4999 = vmatmul.mubr.f32.gmra.mrb[14].mxu0 %v25585_v44  ;;  %v20289_v51 = vsub.f32 %v11684_v36, %v11684_v36  ;;  %v25957_v14 = vand.u32 4294901760, %v20237_v7 }
 0x36a   :  { %v25794_v25 = vsel %vm20200_vm7, 4294967295, %v25793_v25  ;;  %vm20219_vm5 = vmpackc.low %vm20152_vm3, %vm20138_vm1  ;;  %5004 = vmatprep.mubr.f32.mxu0 %v25586_v13 }
 0x36b   :  { %v25797_v54 = vsel %vm20219_vm5, 4294967295, %v25796_v54  ;;  %vm20229_vm9 = vmor %vm25800_vm2, %vm25799_vm13  ;;  %vm25803_vm5 = vnez %v25740_v53  ;;  %vm25804_vm2 = vnez %v25734_v35  ;;  %vm25805_vm13 = vcmp.eq.s32.totalorder %v25788_v28, %v19932_v59  ;;  %5988 = vmatmul.mubr.f32.gmra.mrb[14].mxu1 %v25585_v44 }
 0x36c   :  { %25798 = vst [vmem:[#allocation65_spill] sm:$0xff] %v25797_v54  ;;  %13524 = vmatpush1.bf16.msk.msra.mxu1 %vm25803_vm5, %v25593_v38  ;;  %v11593_v55 = vsel %vm25804_vm2, 1.0, %v25775_v24  ;;  %vm20252_vm3 = vmor %vm25806_vm15, %vm25805_vm13  ;;  %vm25810_vm2 = vnez %v25737_v22  ;;  %vm25814_vm13 = vcmp.eq.s32.totalorder %v25779_v57, %v19945_v26  ;;  %v25818_v22 = vld [vmem:[#allocation30_spill] sm:$0xff]  ;;  %5993 = vmatprep.mubr.f32.mxu1 %v25586_v13 }
 0x36d   :  { %13525 = vmatprep.subr.bf16.mxu1 %v24480_v34  ;;  %v11594_v35 = vsel %vm25810_vm2, 1.0, %v25775_v24  ;;  %vm20271_vm15 = vmpackc.low %vm20200_vm7, %vm20179_vm14  ;;  %v20310_v36 = vsub.f32 %v11593_v55, %v11593_v55  ;;  %vm25829_vm2 = vcmp.eq.s32.totalorder %v25809_v12, %v19938_v23  ;;  %5006 = vmatmul.mubr.f32.gmra.mrb[16].mxu0 %v25691_v45  ;;  %vm25860_vm14 = vnez %v25782_v63 }
 0x36e   :  { %v25812_v48 = vsel %vm20271_vm15, 4294967295, %v25811_v48  ;;  %vm20281_vm5 = vmor %vm25815_vm8, %vm25814_vm13  ;;  %vm25819_vm15 = vnez %v25750_v2  ;;  %vm25820_vm8 = vcmp.eq.s32.totalorder %v25788_v28, %v19945_v26  ;;  %vm25821_vm13 = vcmp.eq.s32.totalorder %v25788_v28, %v19951_v60  ;;  %6233 = vmatprep.mubr.f32.mxu0 %v25852_v20 }
 0x36f   :  { %25813 = vst [vmem:[#allocation12_spill] sm:$0xff] %v25812_v48  ;;  %13326 = vmatpush1.bf16.msk.msra.mxu0 %vm25819_vm15, %v25593_v38  ;;  %vm20301_vm7 = vmor %vm25821_vm13, %vm25820_vm8  ;;  %v25825_v28 = vmov 0  ;;  %vm25828_vm13 = vcmp.eq.s32.totalorder %v25809_v12, %v19932_v59  ;;  %v20335_v55 = vsub.f32 %v11594_v35, %v11594_v35  ;;  %v11685_v35 = vsel %vm20054_vm0, 1.0, %v25775_v24  ;;  %5995 = vmatmul.mubr.f32.gmra.mrb[16].mxu1 %v25691_v45 }
 0x370   :  { %25824 = vst [vmem:[#allocation68_spill] sm:$0xff] %v20310_v36  ;;  %13327 = vmatprep.subr.bf16.mxu0 %v24480_v34  ;;  %vm20317_vm8 = vmpackc.low %vm20252_vm3, %vm20229_vm9  ;;  %13527 = vmatpush1.bf16.msk.msra.mxu1 %vm20106_vm12, %v25593_v38  ;;  %vm25838_vm12 = vnez %v25748_v8  ;;  %vm25843_vm0 = vcmp.eq.s32.totalorder %v25809_v12, %v19951_v60  ;;  %v25846_v8 = vld [vmem:[#allocation35_spill] sm:$0xff]  ;;  %v11600_v18 = vsel %vm20252_vm3, 1.0, %v25775_v24  ;;  %v11692_v5 = vsel %vm20301_vm7, 1.0, %v25775_v24 }
 0x371   :  { %v25826_v28 = vsel %vm20317_vm8, 4294967295, %v25825_v28  ;;  %vm20327_vm1 = vmor %vm25829_vm2, %vm25828_vm13  ;;  %25832 = vst [vmem:[#allocation92_spill] sm:$0xff] %v20335_v55  ;;  %vm25833_vm2 = vcmp.eq.s32.totalorder %v25818_v22, %v19932_v59  ;;  %vm25834_vm13 = vcmp.eq.s32.totalorder %v25818_v22, %v19938_v23  ;;  %v11686_v42 = vsel %vm25838_vm12, 1.0, %v25775_v24  ;;  %13528 = vmatprep.subr.bf16.mxu1 %v24480_v34  ;;  %7222 = vmatprep.mubr.f32.mxu1 %v25852_v20 }
 0x372   :  { %25827 = vst [vmem:[#allocation71_spill] sm:$0xff] %v25826_v28  ;;  %vm20347_vm8 = vmor %vm25834_vm13, %vm25833_vm2  ;;  %vm25842_vm13 = vcmp.eq.s32.totalorder %v25809_v12, %v19945_v26  ;;  %v20492_v20 = vsub.f32 %v11685_v35, %v11685_v35  ;;  %v20494_v16 = vsub.f32 %v11686_v42, %v11686_v42  ;;  %v11601_v57 = vsel %vm20327_vm1, 1.0, %v25775_v24 }
 0x373   :  { %vm20367_vm2 = vmpackc.low %vm20301_vm7, %vm20281_vm5  ;;  %13329 = vmatpush1.bf16.msk.msra.mxu0 %vm20134_vm10, %v25593_v38  ;;  %vm25861_vm10 = vnez %v25773_v21  ;;  %v20657_v12 = vsub.f32 %v11601_v57, %v11601_v57  ;;  %v25943_v63 = vmov 0  ;;  %v25956_v35 = vand.u32 4294901760, %v20209_v1 }
 0x374   :  { %v25840_v50 = vsel %vm20367_vm2, 4294967295, %v25839_v50  ;;  %vm20377_vm15 = vmor %vm25843_vm0, %vm25842_vm13  ;;  %vm25847_vm2 = vnez %v25757_v27  ;;  %vm25848_vm13 = vcmp.eq.s32.totalorder %v25818_v22, %v19945_v26  ;;  %vm25849_vm0 = vcmp.eq.s32.totalorder %v25818_v22, %v19951_v60  ;;  %13330 = vmatprep.subr.bf16.mxu0 %v24480_v34  ;;  %13530 = vmatpush1.bf16.msk.msra.mxu1 %vm25860_vm14, %v25593_v38  ;;  %25878 = vst [vmem:[#allocation42_spill] sm:$0xff] %v20494_v16 }
 0x375   :  { %25841 = vst [vmem:[#allocation93_spill] sm:$0xff] %v25840_v50  ;;  %v11596_v56 = vsel %vm25847_vm2, 1.0, %v25775_v24  ;;  %vm20400_vm12 = vmor %vm25849_vm0, %vm25848_vm13  ;;  %v11687_v27 = vsel %vm20110_vm4, 1.0, %v25775_v24  ;;  %v11688_v22 = vsel %vm20121_vm6, 1.0, %v25775_v24  ;;  %vm25856_vm0 = vcmp.eq.s32.totalorder %v25837_v33, %v19932_v59  ;;  %13531 = vmatprep.subr.bf16.mxu1 %v24480_v34 }
 0x376   :  { %vm20421_vm13 = vmpackc.low %vm20347_vm8, %vm20327_vm1  ;;  %vm25857_vm4 = vcmp.eq.s32.totalorder %v25837_v33, %v19938_v23  ;;  %v11597_v17 = vsel %vm25861_vm10, 1.0, %v25775_v24  ;;  %vm25864_vm6 = vcmp.eq.s32.totalorder %v25846_v8, %v19938_v23  ;;  %vm25873_vm2 = vcmp.eq.s32.totalorder %v25837_v33, %v19945_v26 }
 0x377   :  { %v25854_v58 = vsel %vm20421_vm13, 4294967295, %v25853_v58  ;;  %vm20431_vm11 = vmor %vm25857_vm4, %vm25856_vm0  ;;  %vm25862_vm0 = vnez %v25778_v46  ;;  %vm25863_vm4 = vcmp.eq.s32.totalorder %v25846_v8, %v19932_v59  ;;  %vm25874_vm10 = vcmp.eq.s32.totalorder %v25837_v33, %v19951_v60 }
 0x378   :  { %25855 = vst [vmem:[#allocation38_spill] sm:$0xff] %v25854_v58  ;;  %v11598_v15 = vsel %vm25862_vm0, 1.0, %v25775_v24  ;;  %vm20454_vm13 = vmor %vm25864_vm6, %vm25863_vm4  ;;  %vm25868_vm0 = vnez %v25787_v11  ;;  %vm25869_vm6 = vnez %v25794_v25  ;;  %v25877_v25 = vld [vmem:[#allocation40_spill] sm:$0xff]  ;;  %v11599_v33 = vsel %vm20229_vm9, 1.0, %v25775_v24 }
 0x379   :  { %v11689_v21 = vsel %vm25868_vm0, 1.0, %v25775_v24  ;;  %v11690_v46 = vsel %vm25869_vm6, 1.0, %v25775_v24  ;;  %vm20474_vm4 = vmpackc.low %vm20400_vm12, %vm20377_vm15  ;;  %v20514_v19 = vsub.f32 %v11596_v56, %v11596_v56  ;;  %v20516_v42 = vsub.f32 %v11687_v27, %v11687_v27 }
 0x37a   :  { %v25871_v4 = vsel %vm20474_vm4, 4294967295, %v25870_v4  ;;  %vm20484_vm14 = vmor %vm25874_vm10, %vm25873_vm2  ;;  %vm25879_vm4 = vnez %v25797_v54  ;;  %vm25880_vm2 = vcmp.eq.s32.totalorder %v25846_v8, %v19945_v26  ;;  %vm25881_vm10 = vcmp.eq.s32.totalorder %v25846_v8, %v19951_v60 }
 0x37b   :  { %25872 = vst [vmem:[#allocation27_spill] sm:$0xff] %v25871_v4  ;;  %13332 = vmatpush1.bf16.msk.msra.mxu0 %vm25879_vm4, %v25593_v38  ;;  %vm20510_vm0 = vmor %vm25881_vm10, %vm25880_vm2  ;;  %v20518_v0 = vsub.f32 %v11688_v22, %v11688_v22  ;;  %vm25884_vm9 = vcmp.eq.s32.totalorder %v25867_v9, %v19932_v59  ;;  %vm25885_vm2 = vcmp.eq.s32.totalorder %v25867_v9, %v19938_v23  ;;  %v25886_v8 = vmov 0 }
 0x37c   :  { %13333 = vmatprep.subr.bf16.mxu0 %v24480_v34  ;;  %vm20530_vm10 = vmor %vm25885_vm2, %vm25884_vm9  ;;  %v20534_v56 = vsub.f32 %v11597_v17, %v11597_v17  ;;  %v20536_v22 = vsub.f32 %v11598_v15, %v11598_v15  ;;  %vm25889_vm6 = vnez %v25812_v48  ;;  %v20541_v10 = vsub.f32 %v11689_v21, %v11689_v21 }
 0x37d   :  { %v25887_v8 = vsel %vm20530_vm10, 4294967295, %v25886_v8  ;;  %13533 = vmatpush1.bf16.msk.msra.mxu1 %vm25889_vm6, %v25593_v38  ;;  %v20543_v27 = vsub.f32 %v11690_v46, %v11690_v46  ;;  %vm25891_vm3 = vcmp.eq.s32.totalorder %v25877_v25, %v19932_v59  ;;  %vm25892_vm9 = vcmp.eq.s32.totalorder %v25877_v25, %v19938_v23  ;;  %vm20565_vm6 = vmpackc.low %vm20454_vm13, %vm20431_vm11 }
 0x37e   :  { %25888 = vst [vmem:[#allocation46_spill] sm:$0xff] %v20534_v56  ;;  %vm20551_vm2 = vmor %vm25892_vm9, %vm25891_vm3  ;;  %13534 = vmatprep.subr.bf16.mxu1 %v24480_v34  ;;  %v20556_v15 = vsub.f32 %v11599_v33, %v11599_v33  ;;  %v11691_v17 = vsel %vm20281_vm5, 1.0, %v25775_v24  ;;  %v25896_v21 = vmov 0  ;;  %vm25899_vm4 = vnez %v25826_v28  ;;  %v25912_v28 = vld [vmem:[#allocation45_spill] sm:$0xff] }
 0x37f   :  { %25890 = vst [vmem:[#allocation41_spill] sm:$0xff] %v20543_v27  ;;  %v25894_v31 = vsel %vm20551_vm2, 4294967295, %v25893_v31  ;;  %v25897_v21 = vsel %vm20565_vm6, 4294967295, %v25896_v21  ;;  %13335 = vmatpush1.bf16.msk.msra.mxu0 %vm25899_vm4, %v25593_v38  ;;  %v20576_v33 = vsub.f32 %v11600_v18, %v11600_v18  ;;  %vm20585_vm5 = vmpackc.low %vm20510_vm0, %vm20484_vm14  ;;  %v25900_v46 = vmov 0 }
 0x380   :  { %25895 = vst [vmem:[#allocation44_spill] sm:$0xff] %v20556_v15  ;;  %25898 = vst [vmem:[#allocation48_spill] sm:$0xff] %v25897_v21  ;;  %v25901_v46 = vsel %vm20585_vm5, 4294967295, %v25900_v46  ;;  %13336 = vmatprep.subr.bf16.mxu0 %v24480_v34  ;;  %v11602_v18 = vsel %vm20347_vm8, 1.0, %v25775_v24  ;;  %vm25907_vm1 = vnez %v25840_v50  ;;  %v20615_v30 = vsub.f32 %v11691_v17, %v11691_v17  ;;  %v25926_v50 = vld [vmem:[#allocation49_spill] sm:$0xff]  ;;  %v25946_v21 = vld [vmem:[#allocation52_spill] sm:$0xff] }
 0x381   :  { %25902 = vst [vmem:[#allocation94_spill] sm:$0xff] %v25901_v46  ;;  %vm20604_vm7 = vmpackc.low %vm20551_vm2, %vm20530_vm10  ;;  %13536 = vmatpush1.bf16.msk.msra.mxu1 %vm25907_vm1, %v25593_v38  ;;  %v11693_v3 = vsel %vm20377_vm15, 1.0, %v25775_v24  ;;  %vm25908_vm8 = vcmp.eq.s32.totalorder %v25867_v9, %v19945_v26  ;;  %vm25909_vm4 = vcmp.eq.s32.totalorder %v25867_v9, %v19951_v60  ;;  %v20634_v17 = vsub.f32 %v11692_v5, %v11692_v5 }
 0x382   :  { %v25904_v52 = vsel %vm20604_vm7, 4294967295, %v25903_v52  ;;  %vm20626_vm3 = vmor %vm25909_vm4, %vm25908_vm8  ;;  %13537 = vmatprep.subr.bf16.mxu1 %v24480_v34  ;;  %v11694_v37 = vsel %vm20400_vm12, 1.0, %v25775_v24  ;;  %vm25913_vm15 = vcmp.eq.s32.totalorder %v25877_v25, %v19945_v26  ;;  %vm25914_vm4 = vcmp.eq.s32.totalorder %v25877_v25, %v19951_v60 }
 0x383   :  { %25905 = vst [vmem:[#allocation18_spill] sm:$0xff] %v25904_v52  ;;  %vm20646_vm8 = vmor %vm25914_vm4, %vm25913_vm15  ;;  %vm25917_vm2 = vnez %v25854_v58  ;;  %v20659_v5 = vsub.f32 %v11602_v18, %v11602_v18  ;;  %vm25918_vm12 = vcmp.eq.s32.totalorder %v25906_v47, %v19932_v59  ;;  %vm25919_vm15 = vcmp.eq.s32.totalorder %v25906_v47, %v19938_v23 }
 0x384   :  { %13338 = vmatpush1.bf16.msk.msra.mxu0 %vm25917_vm2, %v25593_v38  ;;  %vm20667_vm4 = vmor %vm25919_vm15, %vm25918_vm12  ;;  %vm7057_vm1 = vcmp.eq.s32.totalorder %v25912_v28, %v19945_v26  ;;  %v20675_v57 = vsub.f32 %v11693_v3, %v11693_v3  ;;  %v11603_v18 = vsel %vm20431_vm11, 1.0, %v25775_v24  ;;  %vm25922_vm12 = vcmp.eq.s32.totalorder %v25912_v28, %v19932_v59  ;;  %v25927_v3 = vld [vmem:[#allocation50_spill] sm:$0xff] }
 0x385   :  { %13339 = vmatprep.subr.bf16.mxu0 %v24480_v34  ;;  %vm25923_vm15 = vcmp.eq.s32.totalorder %v25912_v28, %v19938_v23  ;;  %vm25928_vm7 = vnez %v25871_v4  ;;  %v20698_v62 = vsub.f32 %v11694_v37, %v11694_v37  ;;  %v11604_v48 = vsel %vm20454_vm13, 1.0, %v25775_v24 }
 0x386   :  { %vm20687_vm2 = vmor %vm25923_vm15, %vm25922_vm12  ;;  %13539 = vmatpush1.bf16.msk.msra.mxu1 %vm25928_vm7, %v25593_v38  ;;  %vm25929_vm11 = vcmp.eq.s32.totalorder %v25906_v47, %v19945_v26  ;;  %vm25930_vm12 = vcmp.eq.s32.totalorder %v25906_v47, %v19951_v60  ;;  %vm25933_vm13 = vcmp.eq.s32.totalorder %v25912_v28, %v19951_v60  ;;  %v20736_v37 = vsub.f32 %v11603_v18, %v11603_v18  ;;  %v25939_v47 = vld [vmem:[#allocation53_spill] sm:$0xff] }
 0x387   :  { %vm20709_vm15 = vmor %vm25930_vm12, %vm25929_vm11  ;;  %13540 = vmatprep.subr.bf16.mxu1 %v24480_v34  ;;  %v25936_v28 = vmov 0  ;;  %v20750_v32 = vsub.f32 %v11604_v48, %v11604_v48  ;;  %v25940_v18 = vmov 0  ;;  %v11695_v48 = vsel %vm20484_vm14, 1.0, %v25775_v24 }
 0x388   :  { %vm20721_vm7 = vmor %vm25933_vm13, %vm7057_vm1  ;;  %13341 = vmatpush1.bf16.msk.msra.mxu0 %vm20565_vm6, %v25593_v38  ;;  %v11696_v4 = vsel %vm20510_vm0, 1.0, %v25775_v24  ;;  %vm25947_vm14 = vcmp.eq.s32.totalorder %v25926_v50, %v19932_v59  ;;  %vm25948_vm10 = vcmp.eq.s32.totalorder %v25926_v50, %v19938_v23  ;;  %vm25951_vm0 = vnez %v25904_v52 }
 0x389   :  { %vm20742_vm1 = vmpackc.low %vm20646_vm8, %vm20626_vm3  ;;  %13342 = vmatprep.subr.bf16.mxu0 %v24480_v34  ;;  %vm25952_vm6 = vcmp.eq.s32.totalorder %v25927_v3, %v19932_v59  ;;  %v6278_v52 = vsub.f32 %v20209_v1, %v25956_v35  ;;  %v6285_v2 = vsub.f32 %v20237_v7, %v25957_v14  ;;  %vm25960_vm9 = vcmp.eq.s32.totalorder %v25926_v50, %v19945_v26 }
 0x38a   :  { %v25937_v28 = vsel %vm20742_vm1, 4294967295, %v25936_v28  ;;  %vm20757_vm12 = vmpackc.low %vm20687_vm2, %vm20667_vm4  ;;  %13542 = vmatpush1.bf16.msk.msra.mxu1 %vm20585_vm5, %v25593_v38  ;;  %vm25961_vm11 = vcmp.eq.s32.totalorder %v25926_v50, %v19951_v60  ;;  %v25964_v14 = vand.u32 4294901760, %v20260_v39  ;;  %v25965_v45 = vand.u32 4294901760, %v20289_v51 }
 0x38b   :  { %25938 = vst [vmem:[#allocation32_spill] sm:$0xff] %v25937_v28  ;;  %v25941_v18 = vsel %vm20757_vm12, 4294967295, %v25940_v18  ;;  %vm20775_vm13 = vmpackc.low %vm20721_vm7, %vm20709_vm15  ;;  %13543 = vmatprep.subr.bf16.mxu1 %v24480_v34  ;;  %v20849_v13 = vsub.f32 %v11695_v48, %v11695_v48  ;;  %v20851_v44 = vsub.f32 %v11696_v4, %v11696_v4  ;;  %v11697_v50 = vsel %vm20626_vm3, 1.0, %v25775_v24 }
 0x38c   :  { %25942 = vst [vmem:[#allocation36_spill] sm:$0xff] %v25941_v18  ;;  %v25944_v63 = vsel %vm20775_vm13, 4294967295, %v25943_v63  ;;  %vm20794_vm5 = vmor %vm25948_vm10, %vm25947_vm14  ;;  %13344 = vmatpush1.bf16.msk.msra.mxu0 %vm25951_vm0, %v25593_v38  ;;  %vm25953_vm10 = vcmp.eq.s32.totalorder %v25927_v3, %v19938_v23  ;;  %v25970_v4 = vand.u32 4294901760, %v20310_v36  ;;  %v11698_v29 = vsel %vm20646_vm8, 1.0, %v25775_v24 }
 0x38d   :  { %25945 = vst [vmem:[#allocation54_spill] sm:$0xff] %v25944_v63  ;;  %vm20812_vm14 = vmor %vm25953_vm10, %vm25952_vm6  ;;  %vm25958_vm6 = vnez %v25887_v8  ;;  %vm25959_vm10 = vnez %v25894_v31  ;;  %13345 = vmatprep.subr.bf16.mxu0 %v24480_v34  ;;  %v7267_v8 = vsub.f32 %v20260_v39, %v25964_v14  ;;  %v7274_v31 = vsub.f32 %v20289_v51, %v25965_v45 }
 0x38e   :  { %v11605_v53 = vsel %vm25958_vm6, 1.0, %v25775_v24  ;;  %v11606_v61 = vsel %vm25959_vm10, 1.0, %v25775_v24  ;;  %vm20839_vm0 = vmor %vm25961_vm11, %vm25960_vm9  ;;  %13545 = vmatpush1.bf16.msk.msra.mxu1 %vm20742_vm1, %v25593_v38  ;;  %vm25966_vm9 = vcmp.eq.s32.totalorder %v25939_v47, %v19932_v59  ;;  %vm25967_vm11 = vcmp.eq.s32.totalorder %v25939_v47, %v19938_v23 }
 0x38f   :  { %vm20865_vm6 = vmor %vm25967_vm11, %vm25966_vm9  ;;  %v6292_v48 = vsub.f32 %v20310_v36, %v25970_v4  ;;  %13546 = vmatprep.subr.bf16.mxu1 %v24480_v34  ;;  %vm25971_vm3 = vcmp.eq.s32.totalorder %v25927_v3, %v19945_v26  ;;  %vm25972_vm10 = vcmp.eq.s32.totalorder %v25927_v3, %v19951_v60  ;;  %v25975_v28 = vand.u32 4294901760, %v20335_v55 }
 0x390   :  { %vm20882_vm9 = vmor %vm25972_vm10, %vm25971_vm3  ;;  %v20891_v36 = vsub.f32 %v11605_v53, %v11605_v53  ;;  %v20893_v43 = vsub.f32 %v11606_v61, %v11606_v61  ;;  %13347 = vmatpush1.bf16.msk.msra.mxu0 %vm20757_vm12, %v25593_v38  ;;  %vm25976_vm8 = vcmp.eq.s32.totalorder %v25939_v47, %v19945_v26  ;;  %vm25977_vm11 = vcmp.eq.s32.totalorder %v25939_v47, %v19951_v60 }
 0x391   :  { %v6299_v4 = vsub.f32 %v20335_v55, %v25975_v28  ;;  %vm20904_vm3 = vmor %vm25977_vm11, %vm25976_vm8  ;;  %v6279_v41 = vand.u32 4294901760, %v6278_v52  ;;  %v6286_v9 = vand.u32 4294901760, %v6285_v2  ;;  %v20908_v53 = vsub.f32 %v11697_v50, %v11697_v50  ;;  %13348 = vmatprep.subr.bf16.mxu0 %v24480_v34 }
 0x392   :  { %vm20915_vm10 = vmpackc.low %vm20812_vm14, %vm20794_vm5  ;;  %v25980_v61 = vmov 0  ;;  %v20922_v47 = vsel %vm20865_vm6, 1.0, %v25775_v24  ;;  %v7268_v3 = vand.u32 4294901760, %v7267_v8  ;;  %v7275_v52 = vand.u32 4294901760, %v7274_v31  ;;  %13548 = vmatpush1.bf16.msk.msra.mxu1 %vm20775_vm13, %v25593_v38 }
 0x393   :  { %v25981_v61 = vsel %vm20915_vm10, 4294967295, %v25980_v61  ;;  %v20924_v2 = vsub.f32 %v11698_v29, %v11698_v29  ;;  %v11607_v50 = vsel %vm20667_vm4, 1.0, %v25775_v24  ;;  %vm25983_vm8 = vcmp.eq.s32.totalorder %v25946_v21, %v19932_v59  ;;  %13549 = vmatprep.subr.bf16.mxu1 %v24480_v34  ;;  %vm20948_vm4 = vmpackc.low %vm20882_vm9, %vm20839_vm0 }
 0x394   :  { %25982 = vst [vmem:[#allocation39_spill] sm:$0xff] %v25981_v61  ;;  %vm25984_vm11 = vcmp.eq.s32.totalorder %v25946_v21, %v19938_v23  ;;  %v6293_v8 = vand.u32 4294901760, %v6292_v48  ;;  %v25987_v25 = vmov 0  ;;  %v20955_v59 = vsel %vm20904_vm3, 1.0, %v25775_v24  ;;  %13350 = vmatpush1.bf16.msk.msra.mxu0 %vm20915_vm10, %v25593_v38 }
 0x395   :  { %vm20938_vm6 = vmor %vm25984_vm11, %vm25983_vm8  ;;  %v25988_v25 = vsel %vm20948_vm4, 4294967295, %v25987_v25  ;;  %v6300_v23 = vand.u32 4294901760, %v6299_v4  ;;  %v25990_v48 = vand.u32 4294901760, %v20492_v20  ;;  %v25991_v31 = vand.u32 4294901760, %v20494_v16  ;;  %13351 = vmatprep.subr.bf16.mxu0 %v24480_v34 }
 0x396   :  { %25989 = vst [vmem:[#allocation61_spill] sm:$0xff] %v25988_v25  ;;  %v25992_v18 = vmov 1.0   ;;  %vm25994_vm3 = vcmp.eq.s32.totalorder %v25946_v21, %v19945_v26  ;;  %vm25995_vm8 = vcmp.eq.s32.totalorder %v25946_v21, %v19951_v60  ;;  %v11608_v61 = vsel %vm20687_vm2, 1.0, %v25775_v24  ;;  %13551 = vmatpush1.bf16.msk.msra.mxu1 %vm20948_vm4, %v25593_v38 }
 0x397   :  { %v7281_v29 = vsub.f32 %v20492_v20, %v25990_v48  ;;  %v7288_v63 = vsub.f32 %v20494_v16, %v25991_v31  ;;  %v20968_v55 = vpack.c.bf16 %v20922_v47, %v25992_v18  ;;  %vm20976_vm11 = vmor %vm25995_vm8, %vm25994_vm3  ;;  %v20986_v16 = vsub.f32 %v11607_v50, %v11607_v50  ;;  %13552 = vmatprep.subr.bf16.mxu1 %v24480_v34 }
 0x398   :  { %vm25998_vm3 = vcmask 1041408   ;;  %v25999_v26 = vmov 0  ;;  %v13356_v60 = vpack.c.bf16 %v6286_v9, %v6279_v41  ;;  %v13557_v28 = vpack.c.bf16 %v7275_v52, %v7268_v3 }
 0x399   :  { %25993 = vst [vmem:[#allocation31_spill] sm:$0xff] %v20968_v55  ;;  %vm20992_vm8 = vmpackc.low %vm25998_vm3, %vm20938_vm6  ;;  %v11699_v48 = vsel %vm20709_vm15, 1.0, %v25775_v24  ;;  %v21004_v58 = vpack.c.bf16 %v20955_v59, %v25992_v18  ;;  %v26003_v50 = vand.u32 4294901760, %v20496_v6  ;;  %v11700_v41 = vsel %vm20721_vm7, 1.0, %v25775_v24 }
 0x39a   :  { %v26000_v26 = vsel %vm20992_vm8, 4294967295, %v25999_v26  ;;  %vm26004_vm2 = vmmov %vm25998_vm3  ;;  %v26005_v54 = vmov 0  ;;  %v13359_v3 = vpack.c.bf16 %v6300_v23, %v6293_v8  ;;  %v7282_v9 = vand.u32 4294901760, %v7281_v29  ;;  %13354 = vmatpush1.bf16.msk.msra.mxu0 %vm20992_vm8, %v20968_v55 }
 0x39b   :  { %26001 = vst [vmem:[#allocation70_spill] sm:$0xff] %v26000_v26  ;;  %26002 = vst [vmem:[#allocation13_spill] sm:$0xff] %v21004_v58  ;;  %v6306_v31 = vsub.f32 %v20496_v6, %v26003_v50  ;;  %v7289_v50 = vand.u32 4294901760, %v7288_v63  ;;  %v26008_v40 = vand.u32 4294901760, %v20514_v19  ;;  %v26009_v18 = vand.u32 4294901760, %v20516_v42  ;;  %13355 = vmatprep.subr.bf16.mxu0 %v24480_v34 }
 0x39c   :  { %vm21017_vm15 = vmpackc.low %vm26004_vm2, %vm20976_vm11  ;;  %v26010_v38 = vand.u32 4294901760, %v20518_v0  ;;  %v21034_v23 = vsub.f32 %v11608_v61, %v11608_v61  ;;  %v21036_v29 = vsub.f32 %v11699_v48, %v11699_v48  ;;  %v21041_v26 = vsub.f32 %v11700_v41, %v11700_v41  ;;  %v26012_v41 = vld [vmem:[#allocation69_spill] sm:$0xff] }
 0x39d   :  { %v26006_v54 = vsel %vm21017_vm15, 4294967295, %v26005_v54  ;;  %v6313_v21 = vsub.f32 %v20514_v19, %v26008_v40  ;;  %v7295_v25 = vsub.f32 %v20516_v42, %v26009_v18  ;;  %v11609_v18 = vsel %vm20794_vm5, 1.0, %v25775_v24  ;;  %13555 = vmatpush1.bf16.msk.msra.mxu1 %vm21017_vm15, %v21004_v58  ;;  %6239 = vmatmul.mubr.f32.vlgmr.msra.gmra.mrb[18].mxu0 %v26012_v41  ;;  %vm26025_vm5 = vmmov %vm26004_vm2 }
 0x39e   :  { %26007 = vst [vmem:[#allocation91_spill] sm:$0xff] %v26006_v54  ;;  %v7302_v8 = vsub.f32 %v20518_v0, %v26010_v38  ;;  %v6307_v38 = vand.u32 4294901760, %v6306_v31  ;;  %v26011_v61 = vand.u32 4294901760, %v20534_v56  ;;  %v11610_v40 = vsel %vm20812_vm14, 1.0, %v25775_v24  ;;  %13556 = vmatprep.subr.bf16.mxu1 %v24480_v34  ;;  %13357 = vmatpush1.bf16.msra.mxu0 %v13356_v60  ;;  %vm26034_vm7 = vmmov %vm26004_vm2 }
 0x39f   :  { %v26013_v46 = vand.u32 4294901760, %v20536_v22  ;;  %v13560_v54 = vpack.c.bf16 %v7289_v50, %v7282_v9  ;;  %v6314_v58 = vand.u32 4294901760, %v6313_v21  ;;  %v11701_v11 = vsel %vm20839_vm0, 1.0, %v25775_v24  ;;  %13358 = vmatprep.subr.bf16.mxu0 %v24480_v34 }
 0x3a0   :  { %v6320_v48 = vsub.f32 %v20534_v56, %v26011_v61  ;;  %v7296_v61 = vand.u32 4294901760, %v7295_v25  ;;  %v7303_v55 = vand.u32 4294901760, %v7302_v8  ;;  %v26014_v56 = vld [vmem:[#allocation83_spill] sm:$0xff]  ;;  %7228 = vmatmul.mubr.f32.vlgmr.msra.gmra.mrb[18].mxu1 %v26012_v41  ;;  %v26016_v60 = vand.u32 4294901760, %v20543_v27  ;;  %v26020_v41 = vld [vmem:[#allocation86_spill] sm:$0xff] }
 0x3a1   :  { %v6327_v52 = vsub.f32 %v20536_v22, %v26013_v46  ;;  %6248 = vmatprep.mubr.f32.mxu0 %v26014_v56  ;;  %v26015_v46 = vand.u32 4294901760, %v20541_v10  ;;  %v21075_v9 = vsub.f32 %v11609_v18, %v11609_v18  ;;  %v21077_v50 = vsub.f32 %v11610_v40, %v11610_v40  ;;  %13558 = vmatpush1.bf16.msra.mxu1 %v13557_v28 }
 0x3a2   :  { %v7316_v21 = vsub.f32 %v20543_v27, %v26016_v60  ;;  %v6321_v35 = vand.u32 4294901760, %v6320_v48  ;;  %7237 = vmatprep.mubr.f32.mxu1 %v26014_v56  ;;  %13559 = vmatprep.subr.bf16.mxu1 %v24480_v34  ;;  %v26017_v60 = vand.u32 4294901760, %v20556_v15  ;;  %v26018_v40 = vand.u32 4294901760, %v20576_v33  ;;  %v26019_v48 = vld [vmem:[#allocation82_spill] sm:$0xff] }
 0x3a3   :  { %v7309_v63 = vsub.f32 %v20541_v10, %v26015_v46  ;;  %v11702_v46 = vsel %vm20882_vm9, 1.0, %v25775_v24  ;;  %v6328_v31 = vand.u32 4294901760, %v6327_v52  ;;  %6254 = vmatmul.mubr.f32.gmra.mrb[20].mxu0 %v26019_v48  ;;  %v21092_v8 = vsub.f32 %v11701_v11, %v11701_v11 }
 0x3a4   :  { %v6334_v18 = vsub.f32 %v20556_v15, %v26017_v60  ;;  %v6341_v28 = vsub.f32 %v20576_v33, %v26018_v40  ;;  %13360 = vmatpush1.bf16.msra.mxu0 %v13359_v3  ;;  %v13362_v25 = vpack.c.bf16 %v6314_v58, %v6307_v38  ;;  %v24217_v14 = vand.u32 4294901760, %v20657_v12  ;;  %6263 = vmatprep.mubr.f32.mxu0 %v26020_v41 }
 0x3a5   :  { %13361 = vmatprep.subr.bf16.mxu0 %v24480_v34  ;;  %v13563_v52 = vpack.c.bf16 %v7303_v55, %v7296_v61  ;;  %v7310_v60 = vand.u32 4294901760, %v7309_v63  ;;  %v7317_v15 = vand.u32 4294901760, %v7316_v21  ;;  %v26021_v27 = vand.u32 4294901760, %v20615_v30  ;;  %7243 = vmatmul.mubr.f32.gmra.mrb[20].mxu1 %v26019_v48 }
 0x3a6   :  { %v21102_v11 = vsub.f32 %v11702_v46, %v11702_v46  ;;  %13561 = vmatpush1.bf16.msra.mxu1 %v13560_v54  ;;  %v26022_v58 = vand.u32 4294901760, %v20634_v17  ;;  %v24218_v38 = vand.u32 4294901760, %v20675_v57  ;;  %7252 = vmatprep.mubr.f32.mxu1 %v26020_v41  ;;  %v11611_v55 = vsel %vm20938_vm6, 1.0, %v25775_v24  ;;  %v26023_v54 = vld [vmem:[#allocation87_spill] sm:$0xff] }
 0x3a7   :  { %v7323_v40 = vsub.f32 %v20615_v30, %v26021_v27  ;;  %13562 = vmatprep.subr.bf16.mxu1 %v24480_v34  ;;  %v13365_v27 = vpack.c.bf16 %v6328_v31, %v6321_v35  ;;  %v6335_v63 = vand.u32 4294901760, %v6334_v18  ;;  %v6342_v61 = vand.u32 4294901760, %v6341_v28  ;;  %6269 = vmatmul.mubr.f32.gmra.mrb[22].mxu0 %v26023_v54 }
 0x3a8   :  { %v7330_v3 = vsub.f32 %v20634_v17, %v26022_v58  ;;  %13363 = vmatpush1.bf16.msra.mxu0 %v13362_v25  ;;  %v6348_v21 = vsub.f32 %v20657_v12, %v24217_v14  ;;  %v26024_v46 = vand.u32 4294901760, %v20659_v5  ;;  %v24219_v56 = vand.u32 4294901760, %v20736_v37  ;;  %6449 = vmatprep.mubr.f32.mxu0 %v24793_v49 }
 0x3a9   :  { %v6140_v31 = vsel %vm26025_vm5, %v20922_v47, 0  ;;  %13364 = vmatprep.subr.bf16.mxu0 %v24480_v34  ;;  %v13566_v25 = vpack.c.bf16 %v7317_v15, %v7310_v60  ;;  %v7324_v35 = vand.u32 4294901760, %v7323_v40  ;;  %7258 = vmatmul.mubr.f32.gmra.mrb[22].mxu1 %v26023_v54  ;;  %v26026_v14 = vand.u32 4294901760, %v20698_v62 }
 0x3aa   :  { %v6355_v58 = vsub.f32 %v20659_v5, %v26024_v46  ;;  %13564 = vmatpush1.bf16.msra.mxu1 %v13563_v52  ;;  %v7331_v28 = vand.u32 4294901760, %v7330_v3  ;;  %v7337_v46 = vsub.f32 %v20675_v57, %v24218_v38  ;;  %7438 = vmatprep.mubr.f32.mxu1 %v24793_v49  ;;  %v21137_v15 = vsub.f32 %v11611_v55, %v11611_v55 }
 0x3ab   :  { %v7344_v45 = vsub.f32 %v20698_v62, %v26026_v14  ;;  %13565 = vmatprep.subr.bf16.mxu1 %v24480_v34  ;;  %v13368_v60 = vpack.c.bf16 %v6342_v61, %v6335_v63  ;;  %v6349_v3 = vand.u32 4294901760, %v6348_v21  ;;  %v6362_v14 = vsub.f32 %v20736_v37, %v24219_v56 }
 0x3ac   :  { %13366 = vmatpush1.bf16.msra.mxu0 %v13365_v27  ;;  %v6356_v38 = vand.u32 4294901760, %v6355_v58  ;;  %v26027_v47 = vand.u32 4294901760, %v20750_v32  ;;  %v21148_v55 = vsub.f32 %v6140_v31, %v6140_v31  ;;  %v26028_v63 = vand.u32 4294901760, %v20849_v13 }
 0x3ad   :  { %13367 = vmatprep.subr.bf16.mxu0 %v24480_v34  ;;  %v13569_v58 = vpack.c.bf16 %v7331_v28, %v7324_v35  ;;  %v7338_v40 = vand.u32 4294901760, %v7337_v46  ;;  %v7345_v56 = vand.u32 4294901760, %v7344_v45  ;;  %v26029_v52 = vand.u32 4294901760, %v20851_v44 }
 0x3ae   :  { %v6369_v18 = vsub.f32 %v20750_v32, %v26027_v47  ;;  %v7351_v61 = vsub.f32 %v20849_v13, %v26028_v63  ;;  %13567 = vmatpush1.bf16.msra.mxu1 %v13566_v25  ;;  %v26030_v31 = vand.u32 4294901760, %v20891_v36  ;;  %v26031_v63 = vand.u32 4294901760, %v20893_v43 }
 0x3af   :  { %v7358_v47 = vsub.f32 %v20851_v44, %v26029_v52  ;;  %13568 = vmatprep.subr.bf16.mxu1 %v24480_v34  ;;  %v11703_v45 = vsel %vm20976_vm11, 1.0, %v25775_v24  ;;  %v13371_v35 = vpack.c.bf16 %v6356_v38, %v6349_v3  ;;  %v6363_v28 = vand.u32 4294901760, %v6362_v14  ;;  %v26080_v24 = vld [vmem:[#allocation27_spill] sm:$0xff] }
 0x3b0   :  { %v6376_v54 = vsub.f32 %v20891_v36, %v26030_v31  ;;  %v6383_v27 = vsub.f32 %v20893_v43, %v26031_v63  ;;  %13369 = vmatpush1.bf16.msra.mxu0 %v13368_v60  ;;  %v6370_v46 = vand.u32 4294901760, %v6369_v18  ;;  %v26032_v52 = vand.u32 4294901760, %v20908_v53 }
 0x3b1   :  { %13370 = vmatprep.subr.bf16.mxu0 %v24480_v34  ;;  %v26033_v63 = vand.u32 4294901760, %v20924_v2  ;;  %v7129_v4 = vsel %vm26034_vm7, %v20955_v59, 0  ;;  %v13572_v38 = vpack.c.bf16 %v7345_v56, %v7338_v40  ;;  %v7352_v18 = vand.u32 4294901760, %v7351_v61 }
 0x3b2   :  { %v7365_v31 = vsub.f32 %v20908_v53, %v26032_v52  ;;  %13570 = vmatpush1.bf16.msra.mxu1 %v13569_v58  ;;  %v7359_v60 = vand.u32 4294901760, %v7358_v47  ;;  %v6377_v3 = vand.u32 4294901760, %v6376_v54  ;;  %v6384_v14 = vand.u32 4294901760, %v6383_v27 }
 0x3b3   :  { %v7372_v21 = vsub.f32 %v20924_v2, %v26033_v63  ;;  %13571 = vmatprep.subr.bf16.mxu1 %v24480_v34  ;;  %v26035_v52 = vand.u32 4294901760, %v20986_v16  ;;  %v26036_v63 = vand.u32 4294901760, %v21034_v23  ;;  %v21189_v41 = vsub.f32 %v11703_v45, %v11703_v45 }
 0x3b4   :  { %13372 = vmatpush1.bf16.msra.mxu0 %v13371_v35  ;;  %v13374_v59 = vpack.c.bf16 %v6370_v46, %v6363_v28  ;;  %v24230_v56 = vand.u32 4294901760, %v21075_v9  ;;  %v24223_v40 = vand.u32 4294901760, %v21077_v50  ;;  %v7366_v54 = vand.u32 4294901760, %v7365_v31 }
 0x3b5   :  { %v6390_v48 = vsub.f32 %v20986_v16, %v26035_v52  ;;  %v6397_v25 = vsub.f32 %v21034_v23, %v26036_v63  ;;  %13373 = vmatprep.subr.bf16.mxu0 %v24480_v34  ;;  %v7373_v61 = vand.u32 4294901760, %v7372_v21  ;;  %v26037_v27 = vand.u32 4294901760, %v21036_v29 }
 0x3b6   :  { %v26038_v47 = vand.u32 4294901760, %v21041_v26  ;;  %v21200_v45 = vsub.f32 %v7129_v4, %v7129_v4  ;;  %13573 = vmatpush1.bf16.msra.mxu1 %v13572_v38  ;;  %v13575_v35 = vpack.c.bf16 %v7359_v60, %v7352_v18  ;;  %v24225_v28 = vand.u32 4294901760, %v21092_v8 }
 0x3b7   :  { %v7379_v58 = vsub.f32 %v21036_v29, %v26037_v27  ;;  %v24224_v46 = vand.u32 4294901760, %v21102_v11  ;;  %13574 = vmatprep.subr.bf16.mxu1 %v24480_v34  ;;  %v13377_v31 = vpack.c.bf16 %v6384_v14, %v6377_v3  ;;  %v6391_v21 = vand.u32 4294901760, %v6390_v48 }
 0x3b8   :  { %v7386_v52 = vsub.f32 %v21041_v26, %v26038_v47  ;;  %v6398_v63 = vand.u32 4294901760, %v6397_v25  ;;  %13375 = vmatpush1.bf16.msra.mxu0 %v13374_v59  ;;  %v6404_v27 = vsub.f32 %v21075_v9, %v24230_v56  ;;  %v6411_v4 = vsub.f32 %v21077_v50, %v24223_v40  ;;  %v26065_v56 = vld [vmem:[#allocation23_spill] sm:$0xff] }
 0x3b9   :  { %v24229_v38 = vand.u32 4294901760, %v21137_v15  ;;  %v24228_v18 = vand.u32 4294901760, %v21148_v55  ;;  %13376 = vmatprep.subr.bf16.mxu0 %v24480_v34  ;;  %v13578_v60 = vpack.c.bf16 %v7373_v61, %v7366_v54  ;;  %v7380_v47 = vand.u32 4294901760, %v7379_v58 }
 0x3ba   :  { %v7387_v3 = vand.u32 4294901760, %v7386_v52  ;;  %13576 = vmatpush1.bf16.msra.mxu1 %v13575_v35  ;;  %v7393_v48 = vsub.f32 %v21092_v8, %v24225_v28  ;;  %v7400_v25 = vsub.f32 %v21102_v11, %v24224_v46  ;;  %v24227_v14 = vand.u32 4294901760, %v21189_v41 }
 0x3bb   :  { %v24226_v59 = vand.u32 4294901760, %v21200_v45  ;;  %13577 = vmatprep.subr.bf16.mxu1 %v24480_v34  ;;  %v13380_v40 = vpack.c.bf16 %v6398_v63, %v6391_v21  ;;  %v6405_v54 = vand.u32 4294901760, %v6404_v27  ;;  %v6412_v61 = vand.u32 4294901760, %v6411_v4 }
 0x3bc   :  { %13378 = vmatpush1.bf16.msra.mxu0 %v13377_v31  ;;  %v6418_v58 = vsub.f32 %v21137_v15, %v24229_v38  ;;  %v6425_v52 = vsub.f32 %v21148_v55, %v24228_v18  ;;  %v13581_v35 = vpack.c.bf16 %v7387_v3, %v7380_v47  ;;  %v7394_v46 = vand.u32 4294901760, %v7393_v48  ;;  %v26062_v18 = vld [vmem:[#allocation67_spill] sm:$0xff]  ;;  %v26064_v38 = vld [vmem:[#allocation81_spill] sm:$0xff] }
 0x3bd   :  { %13379 = vmatprep.subr.bf16.mxu0 %v24480_v34  ;;  %v7401_v28 = vand.u32 4294901760, %v7400_v25  ;;  %v7407_v31 = vsub.f32 %v21189_v41, %v24227_v14  ;;  %v7414_v21 = vsub.f32 %v21200_v45, %v24226_v59  ;;  %v13383_v63 = vpack.c.bf16 %v6412_v61, %v6405_v54  ;;  %v26040_v54 = vld [vmem:[#allocation68_spill] sm:$0xff]  ;;  %v26055_v59 = vld [vmem:[#allocation75_spill] sm:$0xff] }
 0x3be   :  { %13579 = vmatpush1.bf16.msra.mxu1 %v13578_v60  ;;  %v6419_v27 = vand.u32 4294901760, %v6418_v58  ;;  %v6426_v4 = vand.u32 4294901760, %v6425_v52  ;;  %v26041_v61 = vld [vmem:[#allocation92_spill] sm:$0xff]  ;;  %v26042_v52 = vld [vmem:[#allocation73_spill] sm:$0xff]  ;;  %vm26063_vm6 = vnez %v26062_v18  ;;  %vm26066_vm11 = vnez %v26065_v56  ;;  %v26098_v56 = vld [vmem:[#allocation91_spill] sm:$0xff] }
 0x3bf   :  { %13580 = vmatprep.subr.bf16.mxu1 %v24480_v34  ;;  %v13584_v60 = vpack.c.bf16 %v7401_v28, %v7394_v46  ;;  %v7408_v47 = vand.u32 4294901760, %v7407_v31  ;;  %v7415_v3 = vand.u32 4294901760, %v7414_v21  ;;  %v13590_v28 = vpack.c.bf16 %v20289_v51, %v20260_v39  ;;  %v26039_v46 = vld [vmem:[#allocation55_spill] sm:$0xff]  ;;  %v26044_v21 = vld [vmem:[#allocation72_spill] sm:$0xff] }
 0x3c0   :  { %13381 = vmatpush1.bf16.msra.mxu0 %v13380_v40  ;;  %v13386_v48 = vpack.c.bf16 %v6426_v4, %v6419_v27  ;;  %v13389_v40 = vpack.c.bf16 %v20237_v7, %v20209_v1  ;;  %v13392_v58 = vpack.c.bf16 %v26041_v61, %v26040_v54  ;;  %v26045_v27 = vld [vmem:[#allocation78_spill] sm:$0xff]  ;;  %v13596_v4 = vpack.c.bf16 %v20518_v0, %v20516_v42  ;;  %v26061_v14 = vld [vmem:[#allocation80_spill] sm:$0xff] }
 0x3c1   :  { %13382 = vmatprep.subr.bf16.mxu0 %v24480_v34  ;;  %v13587_v25 = vpack.c.bf16 %v7415_v3, %v7408_v47  ;;  %v26047_v47 = vld [vmem:[#allocation46_spill] sm:$0xff] }
 0x3c2   :  { %13582 = vmatpush1.bf16.msra.mxu1 %v13581_v35  ;;  %v26043_v35 = vld [vmem:[#allocation42_spill] sm:$0xff]  ;;  %v13398_v3 = vpack.c.bf16 %v20536_v22, %v26047_v47 }
 0x3c3   :  { %13583 = vmatprep.subr.bf16.mxu1 %v24480_v34  ;;  %v13593_v31 = vpack.c.bf16 %v26043_v35, %v20492_v20 }
 0x3c4   :  { %13384 = vmatpush1.bf16.msra.mxu0 %v13383_v63  ;;  %v13395_v63 = vpack.c.bf16 %v20514_v19, %v20496_v6 }
 0x3c5   :  { %13385 = vmatprep.subr.bf16.mxu0 %v24480_v34 }
 0x3c6   :  { %13585 = vmatpush1.bf16.msra.mxu1 %v13584_v60  ;;  %v26046_v60 = vld [vmem:[#allocation79_spill] sm:$0xff] }
 0x3c7   :  { %13586 = vmatprep.subr.bf16.mxu1 %v24480_v34 }
 0x3c8   :  { %13387 = vmatpush1.bf16.msra.mxu0 %v13386_v48  ;;  %v26048_v48 = vld [vmem:[#allocation57_spill] sm:$0xff] }
 0x3c9   :  { %13388 = vmatprep.subr.bf16.mxu0 %v24480_v34 }
 0x3ca   :  { %13588 = vmatpush1.bf16.msra.mxu1 %v13587_v25  ;;  %v26049_v25 = vld [vmem:[#allocation41_spill] sm:$0xff] }
 0x3cb   :  { %13589 = vmatprep.subr.bf16.mxu1 %v24480_v34  ;;  %6451 = vmatmul.mubr.f32.vlgmr.msra.gmra.mrb[18].mxu0 %v26039_v46 }
 0x3cc   :  { %13390 = vmatpush1.bf16.msra.mxu0 %v13389_v40  ;;  %6456 = vmatprep.mubr.f32.mxu0 %v26042_v52  ;;  %v13599_v40 = vpack.c.bf16 %v26049_v25, %v20541_v10 }
 0x3cd   :  { %7440 = vmatmul.mubr.f32.vlgmr.msra.gmra.mrb[18].mxu1 %v26039_v46  ;;  %13391 = vmatprep.subr.bf16.mxu0 %v24480_v34 }
 0x3ce   :  { %13591 = vmatpush1.bf16.msra.mxu1 %v13590_v28  ;;  %7445 = vmatprep.mubr.f32.mxu1 %v26042_v52  ;;  %v26050_v28 = vld [vmem:[#allocation44_spill] sm:$0xff] }
 0x3cf   :  { %13592 = vmatprep.subr.bf16.mxu1 %v24480_v34  ;;  %6458 = vmatmul.mubr.f32.gmra.mrb[20].mxu0 %v26044_v21 }
 0x3d0   :  { %13393 = vmatpush1.bf16.msra.mxu0 %v13392_v58  ;;  %6463 = vmatprep.mubr.f32.mxu0 %v26045_v27  ;;  %v13401_v58 = vpack.c.bf16 %v20576_v33, %v26050_v28 }
 0x3d1   :  { %13394 = vmatprep.subr.bf16.mxu0 %v24480_v34  ;;  %7447 = vmatmul.mubr.f32.gmra.mrb[20].mxu1 %v26044_v21 }
 0x3d2   :  { %13594 = vmatpush1.bf16.msra.mxu1 %v13593_v31  ;;  %7452 = vmatprep.mubr.f32.mxu1 %v26045_v27  ;;  %v13602_v31 = vpack.c.bf16 %v20634_v17, %v20615_v30 }
 0x3d3   :  { %13595 = vmatprep.subr.bf16.mxu1 %v24480_v34  ;;  %6465 = vmatmul.mubr.f32.gmra.mrb[22].mxu0 %v26046_v60 }
 0x3d4   :  { %13396 = vmatpush1.bf16.msra.mxu0 %v13395_v63  ;;  %6580 = vmatprep.mubr.f32.mxu0 %v26048_v48  ;;  %v13404_v63 = vpack.c.bf16 %v20659_v5, %v20657_v12 }
 0x3d5   :  { %13397 = vmatprep.subr.bf16.mxu0 %v24480_v34  ;;  %7454 = vmatmul.mubr.f32.gmra.mrb[22].mxu1 %v26046_v60  ;;  %v26100_v60 = vand.u32 4294901760, %v20289_v51  ;;  %v26105_v51 = vand.u32 4294901760, %v20492_v20  ;;  %v26111_v20 = vand.u32 4294901760, %v20516_v42  ;;  %v26117_v42 = vand.u32 4294901760, %v26049_v25 }
 0x3d6   :  { %13597 = vmatpush1.bf16.msra.mxu1 %v13596_v4  ;;  %7569 = vmatprep.mubr.f32.mxu1 %v26048_v48  ;;  %v13605_v4 = vpack.c.bf16 %v20698_v62, %v20675_v57  ;;  %v26078_v48 = vld [vmem:[#allocation38_spill] sm:$0xff]  ;;  %v26122_v25 = vand.u32 4294901760, %v20657_v12  ;;  %v26128_v12 = vand.u32 4294901760, %v20849_v13 }
 0x3d7   :  { %13598 = vmatprep.subr.bf16.mxu1 %v24480_v34 }
 0x3d8   :  { %13399 = vmatpush1.bf16.msra.mxu0 %v13398_v3  ;;  %v13407_v3 = vpack.c.bf16 %v20750_v32, %v20736_v37 }
 0x3d9   :  { %13400 = vmatprep.subr.bf16.mxu0 %v24480_v34 }
 0x3da   :  { %13600 = vmatpush1.bf16.msra.mxu1 %v13599_v40  ;;  %v13608_v40 = vpack.c.bf16 %v20851_v44, %v20849_v13  ;;  %v26135_v13 = vand.u32 4294901760, %v21034_v23 }
 0x3db   :  { %13601 = vmatprep.subr.bf16.mxu1 %v24480_v34 }
 0x3dc   :  { %13402 = vmatpush1.bf16.msra.mxu0 %v13401_v58  ;;  %v13410_v58 = vpack.c.bf16 %v20893_v43, %v20891_v36 }
 0x3dd   :  { %13403 = vmatprep.subr.bf16.mxu0 %v24480_v34 }
 0x3de   :  { %13603 = vmatpush1.bf16.msra.mxu1 %v13602_v31  ;;  %v13611_v31 = vpack.c.bf16 %v20924_v2, %v20908_v53 }
 0x3df   :  { %13604 = vmatprep.subr.bf16.mxu1 %v24480_v34 }
 0x3e0   :  { %13405 = vmatpush1.bf16.msra.mxu0 %v13404_v63  ;;  %v13413_v63 = vpack.c.bf16 %v21034_v23, %v20986_v16  ;;  %v26140_v23 = vand.u32 4294901760, %v21092_v8 }
 0x3e1   :  { %13406 = vmatprep.subr.bf16.mxu0 %v24480_v34 }
 0x3e2   :  { %13606 = vmatpush1.bf16.msra.mxu1 %v13605_v4  ;;  %v13614_v4 = vpack.c.bf16 %v21041_v26, %v21036_v29 }
 0x3e3   :  { %13607 = vmatprep.subr.bf16.mxu1 %v24480_v34 }
 0x3e4   :  { %13408 = vmatpush1.bf16.msra.mxu0 %v13407_v3  ;;  %v13416_v3 = vpack.c.bf16 %v21077_v50, %v21075_v9 }
 0x3e5   :  { %13409 = vmatprep.subr.bf16.mxu0 %v24480_v34 }
 0x3e6   :  { %13609 = vmatpush1.bf16.msra.mxu1 %v13608_v40  ;;  %v13617_v40 = vpack.c.bf16 %v21102_v11, %v21092_v8 }
 0x3e7   :  { %13610 = vmatprep.subr.bf16.mxu1 %v24480_v34 }
 0x3e8   :  { %13411 = vmatpush1.bf16.msra.mxu0 %v13410_v58  ;;  %v13419_v58 = vpack.c.bf16 %v21148_v55, %v21137_v15 }
 0x3e9   :  { %13412 = vmatprep.subr.bf16.mxu0 %v24480_v34 }
 0x3ea   :  { %13612 = vmatpush1.bf16.msra.mxu1 %v13611_v31  ;;  %v13620_v31 = vpack.c.bf16 %v21200_v45, %v21189_v41 }
 0x3eb   :  { %13613 = vmatprep.subr.bf16.mxu1 %v24480_v34 }
 0x3ec   :  { %13414 = vmatpush1.bf16.msra.mxu0 %v13413_v63  ;;  %v26051_v63 = vld [vmem:[#allocation59_spill] sm:$0xff] }
 0x3ed   :  { %13415 = vmatprep.subr.bf16.mxu0 %v24480_v34 }
 0x3ee   :  { %13615 = vmatpush1.bf16.msra.mxu1 %v13614_v4  ;;  %v26052_v4 = vmov 1.0|1.0  }
 0x3ef   :  { %13616 = vmatprep.subr.bf16.mxu1 %v24480_v34 }
 0x3f0   :  { %13417 = vmatpush1.bf16.msra.mxu0 %v13416_v3  ;;  %v26053_v3 = vld [vmem:[#allocation60_spill] sm:$0xff] }
 0x3f1   :  { %13418 = vmatprep.subr.bf16.mxu0 %v24480_v34  ;;  %vm26054_vm0 = vnez %v26053_v3 }
 0x3f2   :  { %13618 = vmatpush1.bf16.msra.mxu1 %v13617_v40  ;;  %v26056_v40 = vld [vmem:[#allocation62_spill] sm:$0xff] }
 0x3f3   :  { %13619 = vmatprep.subr.bf16.mxu1 %v24480_v34  ;;  %vm26057_vm14 = vnez %v26056_v40 }
 0x3f4   :  { %13420 = vmatpush1.bf16.msra.mxu0 %v13419_v58  ;;  %v26058_v58 = vld [vmem:[#allocation74_spill] sm:$0xff] }
 0x3f5   :  { %13421 = vmatprep.subr.bf16.mxu0 %v24480_v34 }
 0x3f6   :  { %13621 = vmatpush1.bf16.msra.mxu1 %v13620_v31  ;;  %v26059_v31 = vld [vmem:[#allocation66_spill] sm:$0xff] }
 0x3f7   :  { %13622 = vmatprep.subr.bf16.mxu1 %v24480_v34  ;;  %6583 = vmatmul.mubr.f32.vlgmr.msra.gmra.mrb[18].mxu0 %v26051_v63  ;;  %vm26060_vm9 = vnez %v26059_v31 }
 0x3f8   :  { %13423 = vmatpush1.bf16.msk.msra.mxu0 %vm26054_vm0, %v26052_v4  ;;  %6589 = vmatprep.mubr.f32.mxu0 %v26055_v59 }
 0x3f9   :  { %7572 = vmatmul.mubr.f32.vlgmr.msra.gmra.mrb[18].mxu1 %v26051_v63  ;;  %13424 = vmatprep.subr.bf16.mxu0 %v24480_v34  ;;  %v26072_v63 = vld [vmem:[#allocation12_spill] sm:$0xff] }
 0x3fa   :  { %13624 = vmatpush1.bf16.msk.msra.mxu1 %vm26057_vm14, %v26052_v4  ;;  %7578 = vmatprep.mubr.f32.mxu1 %v26055_v59  ;;  %v26067_v59 = vld [vmem:[#allocation58_spill] sm:$0xff]  ;;  %vm26073_vm5 = vnez %v26072_v63  ;;  %v26101_v63 = vld [vmem:[#allocation64_spill] sm:$0xff] }
 0x3fb   :  { %13625 = vmatprep.subr.bf16.mxu1 %v24480_v34  ;;  %6592 = vmatmul.mubr.f32.gmra.mrb[20].mxu0 %v26058_v58 }
 0x3fc   :  { %13426 = vmatpush1.bf16.msk.msra.mxu0 %vm26060_vm9, %v26052_v4  ;;  %6598 = vmatprep.mubr.f32.mxu0 %v26061_v14 }
 0x3fd   :  { %13427 = vmatprep.subr.bf16.mxu0 %v24480_v34  ;;  %7581 = vmatmul.mubr.f32.gmra.mrb[20].mxu1 %v26058_v58  ;;  %v26068_v58 = vld [vmem:[#allocation33_spill] sm:$0xff] }
 0x3fe   :  { %13627 = vmatpush1.bf16.msk.msra.mxu1 %vm26063_vm6, %v26052_v4  ;;  %7587 = vmatprep.mubr.f32.mxu1 %v26061_v14  ;;  %vm26069_vm3 = vnez %v26068_v58  ;;  %v26070_v14 = vld [vmem:[#allocation65_spill] sm:$0xff] }
 0x3ff   :  { %13628 = vmatprep.subr.bf16.mxu1 %v24480_v34  ;;  %6601 = vmatmul.mubr.f32.gmra.mrb[22].mxu0 %v26064_v38  ;;  %vm26071_vm2 = vnez %v26070_v14  ;;  %v26096_v14 = vand.u32 4294901760, %v20237_v7  ;;  %v26103_v7 = vand.u32 4294901760, %v26041_v61  ;;  %v26108_v61 = vand.u32 4294901760, %v20496_v6  ;;  %v26113_v6 = vld [vmem:[#allocation85_spill] sm:$0xff] }
 0x400   :  { %13429 = vmatpush1.bf16.msk.msra.mxu0 %vm26066_vm11, %v26052_v4  ;;  %6695 = vmatprep.mubr.f32.mxu0 %v26067_v59 }
 0x401   :  { %13430 = vmatprep.subr.bf16.mxu0 %v24480_v34  ;;  %7590 = vmatmul.mubr.f32.gmra.mrb[22].mxu1 %v26064_v38  ;;  %v26074_v38 = vld [vmem:[#allocation71_spill] sm:$0xff] }
 0x402   :  { %13630 = vmatpush1.bf16.msk.msra.mxu1 %vm26069_vm3, %v26052_v4  ;;  %7684 = vmatprep.mubr.f32.mxu1 %v26067_v59  ;;  %vm26075_vm7 = vnez %v26074_v38  ;;  %v26076_v59 = vld [vmem:[#allocation93_spill] sm:$0xff]  ;;  %v26082_v38 = vld [vmem:[#allocation48_spill] sm:$0xff] }
 0x403   :  { %13631 = vmatprep.subr.bf16.mxu1 %v24480_v34  ;;  %vm26077_vm3 = vnez %v26076_v59  ;;  %v26084_v59 = vld [vmem:[#allocation94_spill] sm:$0xff] }
 0x404   :  { %13432 = vmatpush1.bf16.msk.msra.mxu0 %vm26071_vm2, %v26052_v4  ;;  %vm26079_vm2 = vnez %v26078_v48  ;;  %v26086_v48 = vld [vmem:[#allocation18_spill] sm:$0xff] }
 0x405   :  { %13433 = vmatprep.subr.bf16.mxu0 %v24480_v34 }
 0x406   :  { %13633 = vmatpush1.bf16.msk.msra.mxu1 %vm26073_vm5, %v26052_v4  ;;  %vm26081_vm5 = vnez %v26080_v24  ;;  %v26099_v24 = vand.u32 4294901760, %v20260_v39 }
 0x407   :  { %13634 = vmatprep.subr.bf16.mxu1 %v24480_v34 }
 0x408   :  { %13435 = vmatpush1.bf16.msk.msra.mxu0 %vm26075_vm7, %v26052_v4  ;;  %vm26083_vm7 = vnez %v26082_v38  ;;  %v26093_v38 = vld [vmem:[#allocation31_spill] sm:$0xff]  ;;  %v13657_v18 = vpack.c.bf16 %v26100_v60, %v26099_v24  ;;  %v26106_v24 = vand.u32 4294901760, %v26043_v35  ;;  %v26109_v60 = vand.u32 4294901760, %v20514_v19 }
 0x409   :  { %13436 = vmatprep.subr.bf16.mxu0 %v24480_v34  ;;  %v26114_v19 = vand.u32 4294901760, %v26047_v47  ;;  %v26119_v47 = vand.u32 4294901760, %v20576_v33  ;;  %v26124_v33 = vand.u32 4294901760, %v20675_v57  ;;  %v26130_v57 = vand.u32 4294901760, %v20891_v36 }
 0x40a   :  { %13636 = vmatpush1.bf16.msk.msra.mxu1 %vm26077_vm3, %v26052_v4  ;;  %vm26085_vm3 = vnez %v26084_v59  ;;  %v26095_v59 = vand.u32 4294901760, %v20209_v1  ;;  %v26102_v1 = vand.u32 4294901760, %v26040_v54  ;;  %v13660_v39 = vpack.c.bf16 %v26106_v24, %v26105_v51  ;;  %v26107_v54 = vld [vmem:[#allocation76_spill] sm:$0xff] }
 0x40b   :  { %13637 = vmatprep.subr.bf16.mxu1 %v24480_v34  ;;  %v26137_v36 = vand.u32 4294901760, %v21041_v26 }
 0x40c   :  { %13438 = vmatpush1.bf16.msk.msra.mxu0 %vm26079_vm2, %v26052_v4  ;;  %vm26087_vm2 = vnez %v26086_v48  ;;  %v13456_v58 = vpack.c.bf16 %v26096_v14, %v26095_v59  ;;  %v26097_v48 = vld [vmem:[#allocation13_spill] sm:$0xff]  ;;  %v13459_v14 = vpack.c.bf16 %v26103_v7, %v26102_v1  ;;  %v26110_v1 = vld [vmem:[#allocation84_spill] sm:$0xff]  ;;  %v26115_v7 = vand.u32 4294901760, %v20536_v22 }
 0x40d   :  { %13439 = vmatprep.subr.bf16.mxu0 %v24480_v34  ;;  %v26104_v59 = vld [vmem:[#allocation77_spill] sm:$0xff]  ;;  %v26118_v22 = vand.u32 4294901760, %v26050_v28  ;;  %v26125_v28 = vand.u32 4294901760, %v20698_v62  ;;  %v26131_v62 = vand.u32 4294901760, %v20893_v43  ;;  %v26136_v43 = vand.u32 4294901760, %v21036_v29 }
 0x40e   :  { %13639 = vmatpush1.bf16.msk.msra.mxu1 %vm26081_vm5, %v26052_v4 }
 0x40f   :  { %13640 = vmatprep.subr.bf16.mxu1 %v24480_v34  ;;  %v13468_v24 = vpack.c.bf16 %v26119_v47, %v26118_v22  ;;  %v26142_v22 = vld [vmem:[#allocation88_spill] sm:$0xff] }
 0x410   :  { %13441 = vmatpush1.bf16.msk.msra.mxu0 %vm26083_vm7, %v26052_v4 }
 0x411   :  { %13442 = vmatprep.subr.bf16.mxu0 %v24480_v34 }
 0x412   :  { %13642 = vmatpush1.bf16.msk.msra.mxu1 %vm26085_vm3, %v26052_v4 }
 0x413   :  { %13643 = vmatprep.subr.bf16.mxu1 %v24480_v34 }
 0x414   :  { %13444 = vmatpush1.bf16.msk.msra.mxu0 %vm26087_vm2, %v26052_v4 }
 0x415   :  { %13445 = vmatprep.subr.bf16.mxu0 %v24480_v34 }
 0x416   :  { %13645 = vmatpush1.bf16.msk.msra.mxu1 %vm20742_vm1, %v26052_v4 }
 0x417   :  { %13646 = vmatprep.subr.bf16.mxu1 %v24480_v34 }
 0x418   :  { %13447 = vmatpush1.bf16.msk.msra.mxu0 %vm20757_vm12, %v26052_v4 }
 0x419   :  { %13448 = vmatprep.subr.bf16.mxu0 %v24480_v34 }
 0x41a   :  { %13648 = vmatpush1.bf16.msk.msra.mxu1 %vm20775_vm13, %v26052_v4 }
 0x41b   :  { %13649 = vmatprep.subr.bf16.mxu1 %v24480_v34 }
 0x41c   :  { %13450 = vmatpush1.bf16.msk.msra.mxu0 %vm20915_vm10, %v26052_v4 }
 0x41d   :  { %13451 = vmatprep.subr.bf16.mxu0 %v24480_v34 }
 0x41e   :  { %13651 = vmatpush1.bf16.msk.msra.mxu1 %vm20948_vm4, %v26052_v4 }
 0x41f   :  { %13652 = vmatprep.subr.bf16.mxu1 %v24480_v34 }
 0x420   :  { %13454 = vmatpush1.bf16.msk.msra.mxu0 %vm20992_vm8, %v26093_v38 }
 0x421   :  { %13455 = vmatprep.subr.bf16.mxu0 %v24480_v34 }
 0x422   :  { %13655 = vmatpush1.bf16.msk.msra.mxu1 %vm21017_vm15, %v26097_v48 }
 0x423   :  { %13656 = vmatprep.subr.bf16.mxu1 %v24480_v34  ;;  %6699 = vmatmul.mubr.f32.vlgmr.msra.gmra.mrb[18].mxu0 %v26101_v63 }
 0x424   :  { %13457 = vmatpush1.bf16.msra.mxu0 %v13456_v58  ;;  %6706 = vmatprep.mubr.f32.mxu0 %v26104_v59  ;;  %v13462_v58 = vpack.c.bf16 %v26109_v60, %v26108_v61  ;;  %v26123_v60 = vand.u32 4294901760, %v20659_v5  ;;  %v26129_v5 = vand.u32 4294901760, %v20851_v44  ;;  %v26134_v44 = vand.u32 4294901760, %v20986_v16 }
 0x425   :  { %7688 = vmatmul.mubr.f32.vlgmr.msra.gmra.mrb[18].mxu1 %v26101_v63  ;;  %13458 = vmatprep.subr.bf16.mxu0 %v24480_v34 }
 0x426   :  { %13658 = vmatpush1.bf16.msra.mxu1 %v13657_v18  ;;  %7695 = vmatprep.mubr.f32.mxu1 %v26104_v59  ;;  %v26112_v18 = vand.u32 4294901760, %v20518_v0  ;;  %v26116_v0 = vand.u32 4294901760, %v20541_v10  ;;  %v26121_v10 = vand.u32 4294901760, %v20634_v17  ;;  %v26127_v17 = vand.u32 4294901760, %v20750_v32  ;;  %v26376_v59 = vld [vmem:[#allocation43_spill] sm:$0xff] }
 0x427   :  { %13659 = vmatprep.subr.bf16.mxu1 %v24480_v34  ;;  %6710 = vmatmul.mubr.f32.gmra.mrb[20].mxu0 %v26107_v54  ;;  %v26132_v32 = vand.u32 4294901760, %v20908_v53  ;;  %v26138_v53 = vand.u32 4294901760, %v21075_v9  ;;  %v26144_v9 = vand.u32 4294901760, %v21137_v15 }
 0x428   :  { %13460 = vmatpush1.bf16.msra.mxu0 %v13459_v14  ;;  %6717 = vmatprep.mubr.f32.mxu0 %v26110_v1  ;;  %v13663_v35 = vpack.c.bf16 %v26112_v18, %v26111_v20  ;;  %v13465_v14 = vpack.c.bf16 %v26115_v7, %v26114_v19  ;;  %v13666_v51 = vpack.c.bf16 %v26117_v42, %v26116_v0 }
 0x429   :  { %13461 = vmatprep.subr.bf16.mxu0 %v24480_v34  ;;  %7699 = vmatmul.mubr.f32.gmra.mrb[20].mxu1 %v26107_v54  ;;  %v13672_v20 = vpack.c.bf16 %v26125_v28, %v26124_v33  ;;  %v13477_v19 = vpack.c.bf16 %v26131_v62, %v26130_v57  ;;  %v13681_v0 = vpack.c.bf16 %v26137_v36, %v26136_v43  ;;  %v26153_v57 = vld [vmem:[#allocation79_spill] sm:$0xff]  ;;  %v8986_v36 = vld [vmem:[%s23529_s0 + $0x13] sm:$0x1]  ;;  %v26373_v54 = vmov 0 }
 0x42a   :  { %13661 = vmatpush1.bf16.msra.mxu1 %v13660_v39  ;;  %7706 = vmatprep.mubr.f32.mxu1 %v26110_v1  ;;  %v26120_v39 = vand.u32 4294901760, %v20615_v30  ;;  %v26126_v30 = vand.u32 4294901760, %v20736_v37  ;;  %v26133_v37 = vand.u32 4294901760, %v20924_v2  ;;  %v26139_v2 = vand.u32 4294901760, %v21077_v50  ;;  %v26161_v43 = vld [vmem:[#allocation71_spill] sm:$0xff] }
 0x42b   :  { %13662 = vmatprep.subr.bf16.mxu1 %v24480_v34  ;;  %6721 = vmatmul.mubr.f32.gmra.mrb[22].mxu0 %v26113_v6  ;;  %v26145_v50 = vand.u32 4294901760, %v21148_v55  ;;  %v26363_v1 = vmov 0 }
 0x42c   :  { %13463 = vmatpush1.bf16.msra.mxu0 %v13462_v58  ;;  %6857 = vmatprep.mubr.f32.mxu0 %v24793_v49  ;;  %v13669_v61 = vpack.c.bf16 %v26121_v10, %v26120_v39  ;;  %v13471_v58 = vpack.c.bf16 %v26123_v60, %v26122_v25  ;;  %v13474_v18 = vpack.c.bf16 %v26127_v17, %v26126_v30  ;;  %v26147_v25 = vand.u32 4294901760, %v21200_v45 }
 0x42d   :  { %13464 = vmatprep.subr.bf16.mxu0 %v24480_v34  ;;  %7710 = vmatmul.mubr.f32.gmra.mrb[22].mxu1 %v26113_v6  ;;  %v13678_v7 = vpack.c.bf16 %v26133_v37, %v26132_v32  ;;  %v13483_v42 = vpack.c.bf16 %v26139_v2, %v26138_v53  ;;  %v13486_v39 = vpack.c.bf16 %v26145_v50, %v26144_v9  ;;  %v26155_v32 = vld [vmem:[#allocation33_spill] sm:$0xff]  ;;  %v26169_v9 = vld [vmem:[#allocation8_spill] sm:$0xff] }
 0x42e   :  { %13664 = vmatpush1.bf16.msra.mxu1 %v13663_v35  ;;  %7846 = vmatprep.mubr.f32.mxu1 %v24793_v49  ;;  %v13675_v35 = vpack.c.bf16 %v26129_v5, %v26128_v12  ;;  %v26157_v37 = vld [vmem:[#allocation65_spill] sm:$0xff] }
 0x42f   :  { %13665 = vmatprep.subr.bf16.mxu1 %v24480_v34  ;;  %v26163_v53 = vld [vmem:[#allocation93_spill] sm:$0xff] }
 0x430   :  { %13466 = vmatpush1.bf16.msra.mxu0 %v13465_v14  ;;  %v13480_v14 = vpack.c.bf16 %v26135_v13, %v26134_v44  ;;  %v26159_v13 = vld [vmem:[#allocation12_spill] sm:$0xff] }
 0x431   :  { %13467 = vmatprep.subr.bf16.mxu0 %v24480_v34 }
 0x432   :  { %13667 = vmatpush1.bf16.msra.mxu1 %v13666_v51  ;;  %v26141_v51 = vand.u32 4294901760, %v21102_v11  ;;  %v26146_v11 = vand.u32 4294901760, %v21189_v41  ;;  %v26150_v41 = vld [vmem:[#allocation90_spill] sm:$0xff] }
 0x433   :  { %13668 = vmatprep.subr.bf16.mxu1 %v24480_v34 }
 0x434   :  { %13469 = vmatpush1.bf16.msra.mxu0 %v13468_v24  ;;  %v13684_v29 = vpack.c.bf16 %v26141_v51, %v26140_v23  ;;  %v13687_v60 = vpack.c.bf16 %v26147_v25, %v26146_v11  ;;  %v26166_v23 = vld [vmem:[#allocation38_spill] sm:$0xff]  ;;  %v9013_v51 = vadd.s32 164, %v8986_v36  ;;  %v26247_v36 = vmov 0 }
 0x435   :  { %13470 = vmatprep.subr.bf16.mxu0 %v24480_v34 }
 0x436   :  { %13670 = vmatpush1.bf16.msra.mxu1 %v13669_v61  ;;  %v21634_v25 = vrot.slane %v9013_v51, %v26169_v9  ;;  %v26205_v51 = vmov 0 }
 0x437   :  { %13671 = vmatprep.subr.bf16.mxu1 %v24480_v34 }
 0x438   :  { %13472 = vmatpush1.bf16.msra.mxu0 %v13471_v58  ;;  %v4993_v16 = vpop.f32.mrb[12].mxu0  ;;  %v26148_v58 = vld [vmem:[#allocation89_spill] sm:$0xff] }
 0x439   :  { %13473 = vmatprep.subr.bf16.mxu0 %v24480_v34  ;;  %v14173_v26 = vadd.f32 %v4993_v16, %v26142_v22  ;;  %v4995_v47 = vpop.f32.mrb[13].mxu0 }
 0x43a   :  { %13673 = vmatpush1.bf16.msra.mxu1 %v13672_v20  ;;  %v21532_v24 = vpop.f32.mrb[12].mxu1 }
 0x43b   :  { %13674 = vmatprep.subr.bf16.mxu1 %v24480_v34  ;;  %26143 = vst [vmem:[#allocation17_spill] sm:$0xff] %v21532_v24  ;;  %v11495_v10 = vmul.f32 -1.442695, %v14173_v26  ;;  %v5984_v61 = vpop.f32.mrb[13].mxu1 }
 0x43c   :  { %13475 = vmatpush1.bf16.msra.mxu0 %v13474_v18  ;;  %v5000_v8 = vpop.f32.mrb[14].mxu0 }
 0x43d   :  { %13476 = vmatprep.subr.bf16.mxu0 %v24480_v34  ;;  %14558 = vpow2.f32 %v11495_v10  ;;  %v14174_v33 = vadd.f32 %v5000_v8, %v26148_v58  ;;  %v5002_v28 = vpop.f32.mrb[15].mxu0  ;;  %v26170_v10 = vld [vmem:[#allocation51_spill] sm:$0xff]  ;;  %v26340_v58 = vmov 0 }
 0x43e   :  { %13676 = vmatpush1.bf16.msra.mxu1 %v13675_v35  ;;  %v21545_v15 = vpop.f32.mrb[14].mxu1  ;;  %v26181_v35 = vmov 0 }
 0x43f   :  { %13677 = vmatprep.subr.bf16.mxu1 %v24480_v34  ;;  %26149 = vst [vmem:[#allocation19_spill] sm:$0xff] %v21545_v15  ;;  %v11496_v55 = vmul.f32 -1.442695, %v14174_v33  ;;  %v5991_v20 = vpop.f32.mrb[15].mxu1  ;;  %v26337_v15 = vld [vmem:[#allocation37_spill] sm:$0xff] }
 0x440   :  { %13478 = vmatpush1.bf16.msra.mxu0 %v13477_v19  ;;  %v5007_v30 = vpop.f32.mrb[16].mxu0 }
 0x441   :  { %13479 = vmatprep.subr.bf16.mxu0 %v24480_v34  ;;  %14560 = vpow2.f32 %v11496_v55  ;;  %v14175_v17 = vadd.f32 %v5007_v30, %v26150_v41  ;;  %v5009_v45 = vpop.f32.mrb[17].mxu0  ;;  %v26174_v30 = vld [vmem:[#allocation6_spill] sm:$0xff] }
 0x442   :  { %13679 = vmatpush1.bf16.msra.mxu1 %v13678_v7  ;;  %v21551_v18 = vpop.f32.mrb[16].mxu1 }
 0x443   :  { %13680 = vmatprep.subr.bf16.mxu1 %v24480_v34  ;;  %26151 = vst [vmem:[#allocation11_spill] sm:$0xff] %v21551_v18  ;;  %v11497_v12 = vmul.f32 -1.442695, %v14175_v17  ;;  %v5998_v5 = vpop.f32.mrb[17].mxu1  ;;  %v26175_v17 = vld [vmem:[#allocation7_spill] sm:$0xff] }
 0x444   :  { %13481 = vmatpush1.bf16.msra.mxu0 %v13480_v14  ;;  %v7997_v14 = vld [vmem:[%s23529_s0 + $0x12] sm:$0x1]  ;;  %v26178_v5 = vld [vmem:[#allocation56_spill] sm:$0xff] }
 0x445   :  { %13482 = vmatprep.subr.bf16.mxu0 %v24480_v34  ;;  %14562 = vpow2.f32 %v11497_v12  ;;  %v8024_v2 = vadd.s32 164, %v7997_v14 }
 0x446   :  { %13682 = vmatpush1.bf16.msra.mxu1 %v13681_v0 }
 0x447   :  { %13683 = vmatprep.subr.bf16.mxu1 %v24480_v34  ;;  %v14559_v3 = vpop.eup %14558  ;;  %v21619_v50 = vrot.slane %v8024_v2, %v26169_v9  ;;  %v26200_v2 = vmov 0 }
 0x448   :  { %13484 = vmatpush1.bf16.msra.mxu0 %v13483_v42  ;;  %v5020_v40 = vadd.f32 1.0, %v14559_v3  ;;  %v26165_v42 = vld [vmem:[#allocation47_spill] sm:$0xff] }
 0x449   :  { %13485 = vmatprep.subr.bf16.mxu0 %v24480_v34 }
 0x44a   :  { %13685 = vmatpush1.bf16.msra.mxu1 %v13684_v29  ;;  %14564 = vrcp.f32 %v5020_v40 }
 0x44b   :  { %13686 = vmatprep.subr.bf16.mxu1 %v24480_v34  ;;  %v14561_v62 = vpop.eup %14560 }
 0x44c   :  { %13487 = vmatpush1.bf16.msra.mxu0 %v13486_v39  ;;  %v5021_v19 = vadd.f32 1.0, %v14561_v62  ;;  %v21625_v39 = vld [vmem:[%s23529_s0 + $0x8] ss:$0 sm:$0xff] }
 0x44d   :  { %13488 = vmatprep.subr.bf16.mxu0 %v24480_v34 }
 0x44e   :  { %13688 = vmatpush1.bf16.msra.mxu1 %v13687_v60  ;;  %14566 = vrcp.f32 %v5021_v19  ;;  %v21640_v60 = vld [vmem:[%s23529_s0 + $0x9] ss:$0 sm:$0xff] }
 0x44f   :  { %13689 = vmatprep.subr.bf16.mxu1 %v24480_v34  ;;  %6859 = vmatmul.mubr.f32.vlgmr.msra.gmra.mrb[18].mxu0 %v26039_v46  ;;  %v14563_v7 = vpop.eup %14562 }
 0x450   :  { %13490 = vmatpush1.bf16.msk.msra.mxu0 %vm26054_vm0, %v26052_v4  ;;  %6864 = vmatprep.mubr.f32.mxu0 %v26042_v52  ;;  %vm26156_vm0 = vnez %v26155_v32  ;;  %v5022_v44 = vadd.f32 1.0, %v14563_v7  ;;  %v26187_v7 = vld [vmem:[#allocation9_spill] sm:$0xff] }
 0x451   :  { %7848 = vmatmul.mubr.f32.vlgmr.msra.gmra.mrb[18].mxu1 %v26039_v46  ;;  %13491 = vmatprep.subr.bf16.mxu0 %v24480_v34 }
 0x452   :  { %13691 = vmatpush1.bf16.msk.msra.mxu1 %vm26057_vm14, %v26052_v4  ;;  %7853 = vmatprep.mubr.f32.mxu1 %v26042_v52  ;;  %vm26158_vm14 = vnez %v26157_v37  ;;  %14568 = vrcp.f32 %v5022_v44  ;;  %v26185_v37 = vmov 0  ;;  %v26188_v44 = vmov 0 }
 0x453   :  { %13692 = vmatprep.subr.bf16.mxu1 %v24480_v34  ;;  %6866 = vmatmul.mubr.f32.gmra.mrb[20].mxu0 %v26044_v21 }
 0x454   :  { %13493 = vmatpush1.bf16.msk.msra.mxu0 %vm26060_vm9, %v26052_v4  ;;  %6871 = vmatprep.mubr.f32.mxu0 %v26045_v27  ;;  %vm26160_vm9 = vnez %v26159_v13  ;;  %v14565_v0 = vpop.eup %14564  ;;  %v26190_v13 = vld [vmem:[#allocation10_spill] sm:$0xff] }
 0x455   :  { %13494 = vmatprep.subr.bf16.mxu0 %v24480_v34  ;;  %7855 = vmatmul.mubr.f32.gmra.mrb[20].mxu1 %v26044_v21  ;;  %v5029_v16 = vadd.f32 %v14565_v0, %v26165_v42  ;;  %v26195_v0 = vmov 0 }
 0x456   :  { %13694 = vmatpush1.bf16.msk.msra.mxu1 %vm26063_vm6, %v26052_v4  ;;  %7860 = vmatprep.mubr.f32.mxu1 %v26045_v27  ;;  %vm26162_vm6 = vnez %v26161_v43 }
 0x457   :  { %13695 = vmatprep.subr.bf16.mxu1 %v24480_v34  ;;  %6873 = vmatmul.mubr.f32.gmra.mrb[22].mxu0 %v26153_v57  ;;  %v10463_v29 = vand.u32 4294901760, %v5029_v16 }
 0x458   :  { %13496 = vmatpush1.bf16.msk.msra.mxu0 %vm26066_vm11, %v26052_v4  ;;  %6965 = vmatprep.mubr.f32.mxu0 %v24793_v49  ;;  %vm26164_vm11 = vnez %v26163_v53  ;;  %v14567_v26 = vpop.eup %14566  ;;  %v26197_v53 = vmov 0 }
 0x459   :  { %13497 = vmatprep.subr.bf16.mxu0 %v24480_v34  ;;  %7862 = vmatmul.mubr.f32.gmra.mrb[22].mxu1 %v26153_v57  ;;  %v5030_v61 = vadd.f32 %v14567_v26, %v26170_v10  ;;  %v21628_v8 = vsub.f32 %v5029_v16, %v10463_v29  ;;  %v26208_v26 = vmov 0  ;;  %v26214_v10 = vld [vmem:[#allocation16_spill] sm:$0xff] }
 0x45a   :  { %13697 = vmatpush1.bf16.msk.msra.mxu1 %vm26156_vm0, %v26052_v4  ;;  %7954 = vmatprep.mubr.f32.mxu1 %v24793_v49  ;;  %vm26167_vm0 = vnez %v26166_v23  ;;  %vm8034_vm15 = vcmp.eq.s32.totalorder %v26214_v10, %v21619_v50  ;;  %v26263_v23 = vmov 0 }
 0x45b   :  { %13698 = vmatprep.subr.bf16.mxu1 %v24480_v34  ;;  %26171 = vst [vmem:[#allocation14_spill] sm:$0xff] %v21628_v8  ;;  %v10466_v33 = vand.u32 4294901760, %v5030_v61  ;;  %v10543_v28 = vand.u32 4294901760, %v21628_v8 }
 0x45c   :  { %13499 = vmatpush1.bf16.msk.msra.mxu0 %vm26158_vm14, %v26052_v4  ;;  %v14569_v55 = vpop.eup %14568  ;;  %vm8029_vm14 = vcmp.eq.s32.totalorder %v26174_v30, %v21619_v50 }
 0x45d   :  { %13500 = vmatprep.subr.bf16.mxu0 %v24480_v34  ;;  %v21655_v45 = vpack.c.bf16 %v10466_v33, %v10463_v29  ;;  %v21657_v12 = vsub.f32 %v5030_v61, %v10466_v33  ;;  %v21660_v3 = vadd.f32 %v14569_v55, %v26178_v5  ;;  %v10544_v62 = vsub.f32 %v21628_v8, %v10543_v28  ;;  %v26207_v29 = vld [vmem:[#allocation15_spill] sm:$0xff] }
 0x45e   :  { %13700 = vmatpush1.bf16.msk.msra.mxu1 %vm26160_vm9, %v26052_v4  ;;  %vm8030_vm9 = vcmp.eq.s32.totalorder %v26175_v17, %v21619_v50  ;;  %v26218_v33 = vmov 0  ;;  %v26229_v5 = vmov 0  ;;  %v26309_v8 = vmov 0  ;;  %v26322_v55 = vld [vmem:[#allocation63_spill] sm:$0xff] }
 0x45f   :  { %13701 = vmatprep.subr.bf16.mxu1 %v24480_v34  ;;  %26176 = vst [vmem:[#allocation20_spill] sm:$0xff] %v21655_v45  ;;  %26177 = vst [vmem:[#allocation24_spill] sm:$0xff] %v21657_v12  ;;  %v10550_v19 = vand.u32 4294901760, %v21657_v12  ;;  %v10545_v42 = vand.u32 4294901760, %v10544_v62  ;;  %v26234_v62 = vld [vmem:[#allocation22_spill] sm:$0xff] }
 0x460   :  { %13502 = vmatpush1.bf16.msk.msra.mxu0 %vm26162_vm6, %v26052_v4  ;;  %26179 = vst [vmem:[#allocation28_spill] sm:$0xff] %v21660_v3  ;;  %vm8031_vm6 = vcmp.eq.s32.totalorder %v26187_v7, %v21619_v50  ;;  %v26323_v3 = vmov 0 }
 0x461   :  { %13503 = vmatprep.subr.bf16.mxu0 %v24480_v34  ;;  %v10551_v14 = vsub.f32 %v21657_v12, %v10550_v19  ;;  %v21709_v43 = vpack.c.bf16 %v10550_v19, %v10543_v28  ;;  %v26220_v28 = vmov 0  ;;  %v26235_v19 = vld [vmem:[#allocation70_spill] sm:$0xff] }
 0x462   :  { %13703 = vmatpush1.bf16.msk.msra.mxu1 %vm26164_vm11, %v26052_v4  ;;  %vm9018_vm11 = vcmp.eq.s32.totalorder %v26174_v30, %v21634_v25 }
 0x463   :  { %13704 = vmatprep.subr.bf16.mxu1 %v24480_v34  ;;  %26191 = vst [vmem:[#allocation68_spill] sm:$0xff] %v21709_v43  ;;  %v10552_v16 = vand.u32 4294901760, %v10551_v14  ;;  %v26307_v43 = vld [vmem:[#allocation34_spill] sm:$0xff] }
 0x464   :  { %13505 = vmatpush1.bf16.msk.msra.mxu0 %vm26167_vm0, %v26052_v4 }
 0x465   :  { %13506 = vmatprep.subr.bf16.mxu0 %v24480_v34  ;;  %v21782_v61 = vpack.c.bf16 %v10552_v16, %v10545_v42  ;;  %v26249_v42 = vld [vmem:[#allocation25_spill] sm:$0xff] }
 0x466   :  { %13706 = vmatpush1.bf16.msk.msra.mxu1 %vm26081_vm5, %v26052_v4  ;;  %vm8002_vm5 = vcmp.eq.s32.totalorder %v26174_v30, %v21625_v39 }
 0x467   :  { %13707 = vmatprep.subr.bf16.mxu1 %v24480_v34  ;;  %vm21672_vm0 = vmor %vm8002_vm5, %vm8029_vm14  ;;  %vm8004_vm14 = vcmp.eq.s32.totalorder %v26187_v7, %v21625_v39  ;;  %26215 = vst [vmem:[#allocation46_spill] sm:$0xff] %v21782_v61 }
 0x468   :  { %13508 = vmatpush1.bf16.msk.msra.mxu0 %vm26083_vm7, %v26052_v4  ;;  %v26182_v35 = vsel %vm21672_vm0, 4294967295, %v26181_v35 }
 0x469   :  { %13509 = vmatprep.subr.bf16.mxu0 %v24480_v34 }
 0x46a   :  { %13709 = vmatpush1.bf16.msk.msra.mxu1 %vm26085_vm3, %v26052_v4  ;;  %vm8991_vm3 = vcmp.eq.s32.totalorder %v26174_v30, %v21640_v60  ;;  %v26226_v30 = vmov 0 }
 0x46b   :  { %13710 = vmatprep.subr.bf16.mxu1 %v24480_v34  ;;  %vm21700_vm7 = vmor %vm8991_vm3, %vm9018_vm11  ;;  %vm26193_vm3 = vcmp.eq.s32.totalorder %v26175_v17, %v21634_v25  ;;  %vm26194_vm11 = vcmp.eq.s32.totalorder %v26175_v17, %v21640_v60 }
 0x46c   :  { %13511 = vmatpush1.bf16.msk.msra.mxu0 %vm26087_vm2, %v26052_v4  ;;  %vm26184_vm2 = vcmp.eq.s32.totalorder %v26175_v17, %v21625_v39  ;;  %v26189_v44 = vsel %vm21700_vm7, 4294967295, %v26188_v44  ;;  %v26228_v17 = vld [vmem:[#allocation21_spill] sm:$0xff] }
 0x46d   :  { %13512 = vmatprep.subr.bf16.mxu0 %v24480_v34  ;;  %vm21691_vm5 = vmor %vm26184_vm2, %vm8030_vm9  ;;  %vm9020_vm9 = vcmp.eq.s32.totalorder %v26187_v7, %v21634_v25 }
 0x46e   :  { %13712 = vmatpush1.bf16.msk.msra.mxu1 %vm20742_vm1, %v26052_v4  ;;  %v26186_v37 = vsel %vm21691_vm5, 4294967295, %v26185_v37  ;;  %vm21720_vm2 = vmor %vm26194_vm11, %vm26193_vm3  ;;  %vm9021_vm1 = vcmp.eq.s32.totalorder %v26190_v13, %v21634_v25  ;;  %vm8006_vm11 = vcmp.eq.s32.totalorder %v26207_v29, %v21625_v39 }
 0x46f   :  { %13713 = vmatprep.subr.bf16.mxu1 %v24480_v34  ;;  %v26196_v0 = vsel %vm21720_vm2, 4294967295, %v26195_v0  ;;  %vm21737_vm3 = vmor %vm8004_vm14, %vm8031_vm6  ;;  %vm26204_vm6 = vcmp.eq.s32.totalorder %v26190_v13, %v21625_v39 }
 0x470   :  { %13514 = vmatpush1.bf16.msk.msra.mxu0 %vm20757_vm12, %v26052_v4  ;;  %vm21733_vm12 = vmpackc.low %vm21691_vm5, %vm21672_vm0  ;;  %v26201_v2 = vsel %vm21737_vm3, 4294967295, %v26200_v2  ;;  %vm26203_vm5 = vcmp.eq.s32.totalorder %v26190_v13, %v21619_v50  ;;  %vm8007_vm0 = vcmp.eq.s32.totalorder %v26214_v10, %v21625_v39 }
 0x471   :  { %13515 = vmatprep.subr.bf16.mxu0 %v24480_v34  ;;  %v26198_v53 = vsel %vm21733_vm12, 4294967295, %v26197_v53  ;;  %vm21754_vm14 = vmor %vm26204_vm6, %vm26203_vm5  ;;  %vm8033_vm12 = vcmp.eq.s32.totalorder %v26207_v29, %v21619_v50  ;;  %vm26211_vm5 = vcmp.eq.s32.totalorder %v26187_v7, %v21640_v60  ;;  %v26239_v7 = vmov 0 }
 0x472   :  { %26199 = vst [vmem:[#allocation92_spill] sm:$0xff] %v26198_v53  ;;  %13715 = vmatpush1.bf16.msk.msra.mxu1 %vm20775_vm13, %v26052_v4  ;;  %v26206_v51 = vsel %vm21754_vm14, 4294967295, %v26205_v51  ;;  %vm21767_vm13 = vmpackc.low %vm21720_vm2, %vm21700_vm7  ;;  %vm9023_vm7 = vcmp.eq.s32.totalorder %v26214_v10, %v21634_v25 }
 0x473   :  { %13716 = vmatprep.subr.bf16.mxu1 %v24480_v34  ;;  %v26209_v26 = vsel %vm21767_vm13, 4294967295, %v26208_v26  ;;  %vm21774_vm6 = vmor %vm26211_vm5, %vm9020_vm9  ;;  %vm26217_vm13 = vcmp.eq.s32.totalorder %v26190_v13, %v21640_v60  ;;  %vm8995_vm9 = vcmp.eq.s32.totalorder %v26207_v29, %v21640_v60  ;;  %vm9022_vm5 = vcmp.eq.s32.totalorder %v26207_v29, %v21634_v25 }
 0x474   :  { %26210 = vst [vmem:[#allocation42_spill] sm:$0xff] %v26209_v26  ;;  %13517 = vmatpush1.bf16.msk.msra.mxu0 %vm20915_vm10, %v26052_v4  ;;  %vm21790_vm2 = vmor %vm26217_vm13, %vm9021_vm1  ;;  %vm8996_vm13 = vcmp.eq.s32.totalorder %v26214_v10, %v21640_v60  ;;  %v26245_v13 = vmov 0.0   ;;  %v26266_v10 = vmov 0 }
 0x475   :  { %v26219_v33 = vsel %vm21790_vm2, 4294967295, %v26218_v33  ;;  %13518 = vmatprep.subr.bf16.mxu0 %v24480_v34  ;;  %vm21803_vm10 = vmpackc.low %vm21754_vm14, %vm21737_vm3  ;;  %vm26236_vm14 = vnez %v26235_v19 }
 0x476   :  { %v26221_v28 = vsel %vm21803_vm10, 4294967295, %v26220_v28  ;;  %vm21807_vm1 = vmor %vm8006_vm11, %vm8033_vm12  ;;  %13718 = vmatpush1.bf16.msk.msra.mxu1 %vm20948_vm4, %v26052_v4  ;;  %vm8008_vm12 = vcmp.eq.s32.totalorder %v26228_v17, %v21625_v39  ;;  %vm8035_vm11 = vcmp.eq.s32.totalorder %v26228_v17, %v21619_v50 }
 0x477   :  { %26222 = vst [vmem:[#allocation41_spill] sm:$0xff] %v26221_v28  ;;  %vm21818_vm8 = vmor %vm8007_vm0, %vm8034_vm15  ;;  %13719 = vmatprep.subr.bf16.mxu1 %v24480_v34  ;;  %vm8009_vm15 = vcmp.eq.s32.totalorder %v26234_v62, %v21625_v39  ;;  %vm8036_vm0 = vcmp.eq.s32.totalorder %v26234_v62, %v21619_v50  ;;  %v11779_v12 = vsel %vm21807_vm1, 1.0, %v26245_v13 }
 0x478   :  { %v26227_v30 = vsel %vm21818_vm8, 4294967295, %v26226_v30  ;;  %vm21831_vm10 = vmpackc.low %vm21790_vm2, %vm21774_vm6  ;;  %13521 = vmatpush1.bf16.msk.msra.mxu0 %vm26236_vm14, %v26093_v38  ;;  %v26242_v38 = vmov 0  ;;  %vm26259_vm14 = vnez %v26198_v53  ;;  %v22221_v22 = vsub.f32 %v11779_v12, %v11779_v12 }
 0x479   :  { %v26230_v5 = vsel %vm21831_vm10, 4294967295, %v26229_v5  ;;  %vm21835_vm4 = vmor %vm8995_vm9, %vm9022_vm5  ;;  %13723 = vmatprep.subr.bf16.mxu0 %v24480_v34  ;;  %vm26244_vm9 = vnez %v26098_v56  ;;  %vm26246_vm5 = vnez %v26182_v35  ;;  %v26256_v35 = vmov 0 }
 0x47a   :  { %26231 = vst [vmem:[#allocation44_spill] sm:$0xff] %v26230_v5  ;;  %vm21846_vm3 = vmor %vm8996_vm13, %vm9023_vm7  ;;  %13722 = vmatpush1.bf16.msk.msra.mxu1 %vm26244_vm9, %v26097_v48  ;;  %v11775_v14 = vsel %vm26246_vm5, 1.0, %v26245_v13  ;;  %vm26250_vm9 = vnez %v26186_v37  ;;  %v26251_v48 = vmov 0  ;;  %vm26255_vm5 = vcmp.eq.s32.totalorder %v26228_v17, %v21640_v60  ;;  %v26258_v37 = vld [vmem:[#allocation26_spill] sm:$0xff] }
 0x47b   :  { %vm21859_vm2 = vmpackc.low %vm21818_vm8, %vm21807_vm1  ;;  %6967 = vmatmul.mubr.f32.vlgmr.msra.gmra.mrb[18].mxu0 %v26039_v46  ;;  %13924 = vmatprep.subr.bf16.mxu1 %v24480_v34  ;;  %v11776_v56 = vsel %vm26250_vm9, 1.0, %v26245_v13  ;;  %vm26260_vm13 = vnez %v26189_v44  ;;  %v21934_v44 = vsub.f32 %v11775_v14, %v11775_v14  ;;  %v26281_v14 = vmov 0 }
 0x47c   :  { %v26240_v7 = vsel %vm21859_vm2, 4294967295, %v26239_v7  ;;  %vm21863_vm7 = vmor %vm8008_vm12, %vm8035_vm11  ;;  %13725 = vmatpush1.bf16.msk.msra.mxu0 %vm26259_vm14, %v26052_v4  ;;  %v11867_v16 = vsel %vm26260_vm13, 1.0, %v26245_v13  ;;  %6972 = vmatprep.mubr.f32.mxu0 %v26042_v52  ;;  %vm26265_vm13 = vnez %v26196_v0  ;;  %vm26270_vm11 = vcmp.eq.s32.totalorder %v26249_v42, %v21625_v39 }
 0x47d   :  { %26241 = vst [vmem:[#allocation60_spill] sm:$0xff] %v26240_v7  ;;  %v26243_v38 = vsel %vm21863_vm7, 4294967295, %v26242_v38  ;;  %vm21877_vm8 = vmor %vm8009_vm15, %vm8036_vm0  ;;  %vm26254_vm0 = vcmp.eq.s32.totalorder %v26228_v17, %v21634_v25  ;;  %7956 = vmatmul.mubr.f32.vlgmr.msra.gmra.mrb[18].mxu1 %v26039_v46  ;;  %v11868_v29 = vsel %vm26265_vm13, 1.0, %v26245_v13  ;;  %13726 = vmatprep.subr.bf16.mxu0 %v24480_v34  ;;  %v21962_v0 = vsub.f32 %v11776_v56, %v11776_v56 }
 0x47e   :  { %v26248_v36 = vsel %vm21877_vm8, 4294967295, %v26247_v36  ;;  %vm21894_vm15 = vmpackc.low %vm21846_vm3, %vm21835_vm4  ;;  %7961 = vmatprep.mubr.f32.mxu1 %v26042_v52  ;;  %vm26276_vm13 = vcmp.eq.s32.totalorder %v26258_v37, %v21625_v39  ;;  %v21985_v19 = vsub.f32 %v11867_v16, %v11867_v16  ;;  %v22014_v16 = vsub.f32 %v11868_v29, %v11868_v29 }
 0x47f   :  { %v26252_v48 = vsel %vm21894_vm15, 4294967295, %v26251_v48  ;;  %vm21904_vm12 = vmor %vm26255_vm5, %vm26254_vm0  ;;  %vm26261_vm0 = vcmp.eq.s32.totalorder %v26234_v62, %v21634_v25  ;;  %vm26262_vm5 = vcmp.eq.s32.totalorder %v26234_v62, %v21640_v60  ;;  %v26279_v62 = vld [vmem:[#allocation29_spill] sm:$0xff]  ;;  %6974 = vmatmul.mubr.f32.gmra.mrb[20].mxu0 %v26044_v21  ;;  %vm26285_vm15 = vcmp.eq.s32.totalorder %v26249_v42, %v21640_v60 }
 0x480   :  { %26253 = vst [vmem:[#allocation62_spill] sm:$0xff] %v26252_v48  ;;  %v26257_v35 = vsel %vm21904_vm12, 4294967295, %v26256_v35  ;;  %vm21925_vm9 = vmor %vm26262_vm5, %vm26261_vm0  ;;  %vm26269_vm5 = vcmp.eq.s32.totalorder %v26249_v42, %v21619_v50  ;;  %6979 = vmatprep.mubr.f32.mxu0 %v26045_v27  ;;  %v26427_v5 = vand.u32 4294901760, %v21962_v0 }
 0x481   :  { %v26264_v23 = vsel %vm21925_vm9, 4294967295, %v26263_v23  ;;  %vm21944_vm0 = vmpackc.low %vm21877_vm8, %vm21863_vm7  ;;  %7963 = vmatmul.mubr.f32.gmra.mrb[20].mxu1 %v26044_v21 }
 0x482   :  { %v26267_v10 = vsel %vm21944_vm0, 4294967295, %v26266_v10  ;;  %vm21954_vm14 = vmor %vm26270_vm11, %vm26269_vm5  ;;  %vm26273_vm0 = vnez %v26209_v26  ;;  %vm26274_vm11 = vnez %v26201_v2  ;;  %vm26275_vm5 = vcmp.eq.s32.totalorder %v26258_v37, %v21619_v50  ;;  %7968 = vmatprep.mubr.f32.mxu1 %v26045_v27 }
 0x483   :  { %26268 = vst [vmem:[#allocation66_spill] sm:$0xff] %v26267_v10  ;;  %13926 = vmatpush1.bf16.msk.msra.mxu1 %vm26273_vm0, %v26052_v4  ;;  %v11777_v20 = vsel %vm26274_vm11, 1.0, %v26245_v13  ;;  %vm21977_vm8 = vmor %vm26276_vm13, %vm26275_vm5  ;;  %vm26280_vm11 = vnez %v26206_v51  ;;  %vm26284_vm5 = vcmp.eq.s32.totalorder %v26249_v42, %v21634_v25  ;;  %v26288_v51 = vld [vmem:[#allocation30_spill] sm:$0xff]  ;;  %6981 = vmatmul.mubr.f32.gmra.mrb[22].mxu0 %v26153_v57 }
 0x484   :  { %13927 = vmatprep.subr.bf16.mxu1 %v24480_v34  ;;  %v11778_v2 = vsel %vm26280_vm11, 1.0, %v26245_v13  ;;  %vm21996_vm13 = vmpackc.low %vm21925_vm9, %vm21904_vm12  ;;  %v22035_v29 = vsub.f32 %v11777_v20, %v11777_v20  ;;  %vm26299_vm11 = vcmp.eq.s32.totalorder %v26279_v62, %v21625_v39  ;;  %8211 = vmatprep.mubr.f32.mxu0 %v26322_v55  ;;  %vm26330_vm12 = vnez %v26252_v48 }
 0x485   :  { %v26282_v14 = vsel %vm21996_vm13, 4294967295, %v26281_v14  ;;  %vm22006_vm0 = vmor %vm26285_vm15, %vm26284_vm5  ;;  %vm26289_vm13 = vnez %v26221_v28  ;;  %vm26290_vm15 = vcmp.eq.s32.totalorder %v26258_v37, %v21634_v25  ;;  %vm26291_vm5 = vcmp.eq.s32.totalorder %v26258_v37, %v21640_v60  ;;  %7970 = vmatmul.mubr.f32.gmra.mrb[22].mxu1 %v26153_v57 }
 0x486   :  { %26283 = vst [vmem:[#allocation31_spill] sm:$0xff] %v26282_v14  ;;  %13728 = vmatpush1.bf16.msk.msra.mxu0 %vm26289_vm13, %v26052_v4  ;;  %vm22026_vm9 = vmor %vm26291_vm5, %vm26290_vm15  ;;  %v26295_v37 = vmov 0  ;;  %vm26298_vm5 = vcmp.eq.s32.totalorder %v26279_v62, %v21619_v50  ;;  %v22060_v20 = vsub.f32 %v11778_v2, %v11778_v2  ;;  %v11869_v2 = vsel %vm21774_vm6, 1.0, %v26245_v13  ;;  %9200 = vmatprep.mubr.f32.mxu1 %v26322_v55 }
 0x487   :  { %26294 = vst [vmem:[#allocation13_spill] sm:$0xff] %v22035_v29  ;;  %13729 = vmatprep.subr.bf16.mxu0 %v24480_v34  ;;  %vm22042_vm15 = vmpackc.low %vm21977_vm8, %vm21954_vm14  ;;  %13929 = vmatpush1.bf16.msk.msra.mxu1 %vm21831_vm10, %v26052_v4  ;;  %vm26308_vm10 = vnez %v26219_v33  ;;  %vm26313_vm6 = vcmp.eq.s32.totalorder %v26279_v62, %v21640_v60  ;;  %v26316_v33 = vld [vmem:[#allocation35_spill] sm:$0xff]  ;;  %v22217_v55 = vsub.f32 %v11869_v2, %v11869_v2  ;;  %v11784_v11 = vsel %vm21977_vm8, 1.0, %v26245_v13 }
 0x488   :  { %v26296_v37 = vsel %vm22042_vm15, 4294967295, %v26295_v37  ;;  %vm22052_vm7 = vmor %vm26299_vm11, %vm26298_vm5  ;;  %26302 = vst [vmem:[#allocation67_spill] sm:$0xff] %v22060_v20  ;;  %vm26303_vm11 = vcmp.eq.s32.totalorder %v26288_v51, %v21619_v50  ;;  %vm26304_vm5 = vcmp.eq.s32.totalorder %v26288_v51, %v21625_v39  ;;  %v11870_v61 = vsel %vm26308_vm10, 1.0, %v26245_v13  ;;  %13930 = vmatprep.subr.bf16.mxu1 %v24480_v34 }
 0x489   :  { %26297 = vst [vmem:[#allocation91_spill] sm:$0xff] %v26296_v37  ;;  %vm22072_vm15 = vmor %vm26304_vm5, %vm26303_vm11  ;;  %vm26312_vm5 = vcmp.eq.s32.totalorder %v26279_v62, %v21634_v25  ;;  %v22219_v24 = vsub.f32 %v11870_v61, %v11870_v61  ;;  %v22301_v56 = vsub.f32 %v11784_v11, %v11784_v11  ;;  %v11785_v42 = vsel %vm22052_vm7, 1.0, %v26245_v13 }
 0x48a   :  { %vm22092_vm11 = vmpackc.low %vm22026_vm9, %vm22006_vm0  ;;  %13731 = vmatpush1.bf16.msk.msra.mxu0 %vm21859_vm2, %v26052_v4  ;;  %vm26331_vm2 = vnez %v26243_v38  ;;  %v11786_v11 = vsel %vm22072_vm15, 1.0, %v26245_v13  ;;  %v22382_v62 = vsub.f32 %v11785_v42, %v11785_v42  ;;  %v26413_v48 = vmov 0 }
 0x48b   :  { %v26310_v8 = vsel %vm22092_vm11, 4294967295, %v26309_v8  ;;  %vm22102_vm13 = vmor %vm26313_vm6, %vm26312_vm5  ;;  %vm26317_vm11 = vnez %v26227_v30  ;;  %vm26318_vm5 = vcmp.eq.s32.totalorder %v26288_v51, %v21634_v25  ;;  %vm26319_vm6 = vcmp.eq.s32.totalorder %v26288_v51, %v21640_v60  ;;  %13732 = vmatprep.subr.bf16.mxu0 %v24480_v34  ;;  %13932 = vmatpush1.bf16.msk.msra.mxu1 %vm26330_vm12, %v26052_v4  ;;  %26348 = vst [vmem:[#allocation12_spill] sm:$0xff] %v22219_v24 }
 0x48c   :  { %26311 = vst [vmem:[#allocation23_spill] sm:$0xff] %v26310_v8  ;;  %v11780_v45 = vsel %vm26317_vm11, 1.0, %v26245_v13  ;;  %vm22125_vm10 = vmor %vm26319_vm6, %vm26318_vm5  ;;  %v11871_v30 = vsel %vm21835_vm4, 1.0, %v26245_v13  ;;  %v11872_v51 = vsel %vm21846_vm3, 1.0, %v26245_v13  ;;  %vm26326_vm6 = vcmp.eq.s32.totalorder %v26307_v43, %v21619_v50  ;;  %13933 = vmatprep.subr.bf16.mxu1 %v24480_v34 }
 0x48d   :  { %vm22146_vm5 = vmpackc.low %vm22072_vm15, %vm22052_vm7  ;;  %vm26327_vm4 = vcmp.eq.s32.totalorder %v26307_v43, %v21625_v39  ;;  %v11781_v32 = vsel %vm26331_vm2, 1.0, %v26245_v13  ;;  %vm26334_vm3 = vcmp.eq.s32.totalorder %v26316_v33, %v21625_v39  ;;  %vm26343_vm11 = vcmp.eq.s32.totalorder %v26307_v43, %v21634_v25 }
 0x48e   :  { %v26324_v3 = vsel %vm22146_vm5, 4294967295, %v26323_v3  ;;  %vm22156_vm1 = vmor %vm26327_vm4, %vm26326_vm6  ;;  %vm26332_vm6 = vnez %v26248_v36  ;;  %vm26333_vm4 = vcmp.eq.s32.totalorder %v26316_v33, %v21619_v50  ;;  %vm26344_vm2 = vcmp.eq.s32.totalorder %v26307_v43, %v21640_v60 }
 0x48f   :  { %26325 = vst [vmem:[#allocation33_spill] sm:$0xff] %v26324_v3  ;;  %v11782_v18 = vsel %vm26332_vm6, 1.0, %v26245_v13  ;;  %vm22179_vm5 = vmor %vm26334_vm3, %vm26333_vm4  ;;  %vm26338_vm6 = vnez %v26257_v35  ;;  %vm26339_vm3 = vnez %v26264_v23  ;;  %v26347_v23 = vld [vmem:[#allocation40_spill] sm:$0xff]  ;;  %v11783_v43 = vsel %vm21954_vm14, 1.0, %v26245_v13 }
 0x490   :  { %v11873_v38 = vsel %vm26338_vm6, 1.0, %v26245_v13  ;;  %v11874_v36 = vsel %vm26339_vm3, 1.0, %v26245_v13  ;;  %vm22199_vm4 = vmpackc.low %vm22125_vm10, %vm22102_vm13  ;;  %v22239_v12 = vsub.f32 %v11780_v45, %v11780_v45  ;;  %v22241_v61 = vsub.f32 %v11871_v30, %v11871_v30 }
 0x491   :  { %v26341_v58 = vsel %vm22199_vm4, 4294967295, %v26340_v58  ;;  %vm22209_vm12 = vmor %vm26344_vm2, %vm26343_vm11  ;;  %vm26349_vm4 = vnez %v26267_v10  ;;  %vm26350_vm11 = vcmp.eq.s32.totalorder %v26316_v33, %v21634_v25  ;;  %vm26351_vm2 = vcmp.eq.s32.totalorder %v26316_v33, %v21640_v60 }
 0x492   :  { %26342 = vst [vmem:[#allocation65_spill] sm:$0xff] %v26341_v58  ;;  %13734 = vmatpush1.bf16.msk.msra.mxu0 %vm26349_vm4, %v26052_v4  ;;  %vm22235_vm6 = vmor %vm26351_vm2, %vm26350_vm11  ;;  %v22243_v6 = vsub.f32 %v11872_v51, %v11872_v51  ;;  %vm26354_vm14 = vcmp.eq.s32.totalorder %v26337_v15, %v21619_v50  ;;  %vm26355_vm11 = vcmp.eq.s32.totalorder %v26337_v15, %v21625_v39  ;;  %v26356_v33 = vmov 0 }
 0x493   :  { %13735 = vmatprep.subr.bf16.mxu0 %v24480_v34  ;;  %vm22255_vm2 = vmor %vm26355_vm11, %vm26354_vm14  ;;  %v22259_v45 = vsub.f32 %v11781_v32, %v11781_v32  ;;  %v22261_v30 = vsub.f32 %v11782_v18, %v11782_v18  ;;  %vm26359_vm3 = vnez %v26282_v14  ;;  %v22266_v17 = vsub.f32 %v11873_v38, %v11873_v38 }
 0x494   :  { %v26357_v33 = vsel %vm22255_vm2, 4294967295, %v26356_v33  ;;  %13935 = vmatpush1.bf16.msk.msra.mxu1 %vm26359_vm3, %v26052_v4  ;;  %v22268_v51 = vsub.f32 %v11874_v36, %v11874_v36  ;;  %vm26361_vm8 = vcmp.eq.s32.totalorder %v26347_v23, %v21619_v50  ;;  %vm26362_vm14 = vcmp.eq.s32.totalorder %v26347_v23, %v21625_v39  ;;  %vm22290_vm3 = vmpackc.low %vm22179_vm5, %vm22156_vm1 }
 0x495   :  { %26358 = vst [vmem:[#allocation71_spill] sm:$0xff] %v22259_v45  ;;  %vm22276_vm11 = vmor %vm26362_vm14, %vm26361_vm8  ;;  %13936 = vmatprep.subr.bf16.mxu1 %v24480_v34  ;;  %v22281_v18 = vsub.f32 %v11783_v43, %v11783_v43  ;;  %v11875_v32 = vsel %vm22006_vm0, 1.0, %v26245_v13  ;;  %v26366_v38 = vmov 0  ;;  %vm26369_vm4 = vnez %v26296_v37  ;;  %v26382_v37 = vld [vmem:[#allocation45_spill] sm:$0xff] }
 0x496   :  { %26360 = vst [vmem:[#allocation93_spill] sm:$0xff] %v22268_v51  ;;  %v26364_v1 = vsel %vm22276_vm11, 4294967295, %v26363_v1  ;;  %v26367_v38 = vsel %vm22290_vm3, 4294967295, %v26366_v38  ;;  %13737 = vmatpush1.bf16.msk.msra.mxu0 %vm26369_vm4, %v26052_v4  ;;  %v11876_v36 = vsel %vm22026_vm9, 1.0, %v26245_v13  ;;  %vm22310_vm0 = vmpackc.low %vm22235_vm6, %vm22209_vm12  ;;  %v26370_v43 = vmov 0 }
 0x497   :  { %26365 = vst [vmem:[#allocation47_spill] sm:$0xff] %v22281_v18  ;;  %26368 = vst [vmem:[#allocation38_spill] sm:$0xff] %v26367_v38  ;;  %v26371_v43 = vsel %vm22310_vm0, 4294967295, %v26370_v43  ;;  %13738 = vmatprep.subr.bf16.mxu0 %v24480_v34  ;;  %vm26377_vm7 = vnez %v26310_v8  ;;  %v22340_v9 = vsub.f32 %v11875_v32, %v11875_v32  ;;  %v11877_v31 = vsel %vm22102_vm13, 1.0, %v26245_v13  ;;  %v26396_v8 = vld [vmem:[#allocation49_spill] sm:$0xff]  ;;  %v26416_v38 = vld [vmem:[#allocation52_spill] sm:$0xff] }
 0x498   :  { %26372 = vst [vmem:[#allocation27_spill] sm:$0xff] %v26371_v43  ;;  %vm22329_vm9 = vmpackc.low %vm22276_vm11, %vm22255_vm2  ;;  %13938 = vmatpush1.bf16.msk.msra.mxu1 %vm26377_vm7, %v26052_v4  ;;  %vm26378_vm15 = vcmp.eq.s32.totalorder %v26337_v15, %v21634_v25  ;;  %vm26379_vm4 = vcmp.eq.s32.totalorder %v26337_v15, %v21640_v60  ;;  %v22359_v32 = vsub.f32 %v11876_v36, %v11876_v36  ;;  %v11878_v47 = vsel %vm22125_vm10, 1.0, %v26245_v13 }
 0x499   :  { %v26374_v54 = vsel %vm22329_vm9, 4294967295, %v26373_v54  ;;  %vm22351_vm8 = vmor %vm26379_vm4, %vm26378_vm15  ;;  %13939 = vmatprep.subr.bf16.mxu1 %v24480_v34  ;;  %vm26383_vm13 = vcmp.eq.s32.totalorder %v26347_v23, %v21634_v25  ;;  %vm26384_vm4 = vcmp.eq.s32.totalorder %v26347_v23, %v21640_v60  ;;  %vm26387_vm11 = vnez %v26324_v3 }
 0x49a   :  { %26375 = vst [vmem:[#allocation51_spill] sm:$0xff] %v26374_v54  ;;  %vm22371_vm15 = vmor %vm26384_vm4, %vm26383_vm13  ;;  %13740 = vmatpush1.bf16.msk.msra.mxu0 %vm26387_vm11, %v26052_v4  ;;  %v22384_v36 = vsub.f32 %v11786_v11, %v11786_v11  ;;  %vm26388_vm10 = vcmp.eq.s32.totalorder %v26376_v59, %v21619_v50  ;;  %vm26389_vm13 = vcmp.eq.s32.totalorder %v26376_v59, %v21625_v39  ;;  %v11787_v11 = vsel %vm22156_vm1, 1.0, %v26245_v13 }
 0x49b   :  { %vm22392_vm4 = vmor %vm26389_vm13, %vm26388_vm10  ;;  %vm9035_vm7 = vcmp.eq.s32.totalorder %v26382_v37, %v21634_v25  ;;  %v22400_v42 = vsub.f32 %v11877_v31, %v11877_v31  ;;  %13741 = vmatprep.subr.bf16.mxu0 %v24480_v34  ;;  %vm26392_vm10 = vcmp.eq.s32.totalorder %v26382_v37, %v21619_v50  ;;  %vm26393_vm13 = vcmp.eq.s32.totalorder %v26382_v37, %v21625_v39  ;;  %v26397_v31 = vld [vmem:[#allocation50_spill] sm:$0xff] }
 0x49c   :  { %vm22412_vm11 = vmor %vm26393_vm13, %vm26392_vm10  ;;  %vm26398_vm9 = vnez %v26341_v58  ;;  %v22423_v40 = vsub.f32 %v11878_v47, %v11878_v47  ;;  %v11788_v14 = vsel %vm22179_vm5, 1.0, %v26245_v13  ;;  %vm26399_vm1 = vcmp.eq.s32.totalorder %v26376_v59, %v21634_v25  ;;  %v26409_v47 = vld [vmem:[#allocation53_spill] sm:$0xff] }
 0x49d   :  { %13941 = vmatpush1.bf16.msk.msra.mxu1 %vm26398_vm9, %v26052_v4  ;;  %vm26400_vm10 = vcmp.eq.s32.totalorder %v26376_v59, %v21640_v60  ;;  %vm26403_vm5 = vcmp.eq.s32.totalorder %v26382_v37, %v21640_v60  ;;  %v22461_v59 = vsub.f32 %v11787_v11, %v11787_v11  ;;  %v26406_v37 = vmov 0 }
 0x49e   :  { %vm22434_vm13 = vmor %vm26400_vm10, %vm26399_vm1  ;;  %13942 = vmatprep.subr.bf16.mxu1 %v24480_v34  ;;  %13743 = vmatpush1.bf16.msk.msra.mxu0 %vm22290_vm3, %v26052_v4  ;;  %v22475_v7 = vsub.f32 %v11788_v14, %v11788_v14  ;;  %v26410_v11 = vmov 0  ;;  %v11879_v14 = vsel %vm22209_vm12, 1.0, %v26245_v13  ;;  %v11880_v58 = vsel %vm22235_vm6, 1.0, %v26245_v13 }
 0x49f   :  { %vm22446_vm9 = vmor %vm26403_vm5, %vm9035_vm7  ;;  %13744 = vmatprep.subr.bf16.mxu0 %v24480_v34  ;;  %vm26417_vm12 = vcmp.eq.s32.totalorder %v26396_v8, %v21619_v50  ;;  %vm26418_vm2 = vcmp.eq.s32.totalorder %v26396_v8, %v21625_v39  ;;  %vm26421_vm6 = vnez %v26374_v54  ;;  %vm26422_vm3 = vcmp.eq.s32.totalorder %v26397_v31, %v21619_v50 }
 0x4a0   :  { %vm22467_vm7 = vmpackc.low %vm22371_vm15, %vm22351_vm8  ;;  %v26426_v2 = vand.u32 4294901760, %v21934_v44  ;;  %v8263_v28 = vsub.f32 %v21962_v0, %v26427_v5  ;;  %vm26430_vm14 = vcmp.eq.s32.totalorder %v26396_v8, %v21634_v25  ;;  %vm26431_vm1 = vcmp.eq.s32.totalorder %v26396_v8, %v21640_v60 }
 0x4a1   :  { %v26407_v37 = vsel %vm22467_vm7, 4294967295, %v26406_v37  ;;  %vm22482_vm10 = vmpackc.low %vm22412_vm11, %vm22392_vm4  ;;  %13944 = vmatpush1.bf16.msk.msra.mxu1 %vm22310_vm0, %v26052_v4  ;;  %v26434_v5 = vand.u32 4294901760, %v21985_v19  ;;  %v26435_v57 = vand.u32 4294901760, %v22014_v16  ;;  %v22574_v27 = vsub.f32 %v11879_v14, %v11879_v14 }
 0x4a2   :  { %26408 = vst [vmem:[#allocation48_spill] sm:$0xff] %v26407_v37  ;;  %v26411_v11 = vsel %vm22482_vm10, 4294967295, %v26410_v11  ;;  %vm22500_vm5 = vmpackc.low %vm22446_vm9, %vm22434_vm13  ;;  %13945 = vmatprep.subr.bf16.mxu1 %v24480_v34  ;;  %13746 = vmatpush1.bf16.msk.msra.mxu0 %vm26421_vm6, %v26052_v4  ;;  %v8256_v54 = vsub.f32 %v21934_v44, %v26426_v2  ;;  %v22576_v21 = vsub.f32 %v11880_v58, %v11880_v58  ;;  %v11881_v8 = vsel %vm22351_vm8, 1.0, %v26245_v13 }
 0x4a3   :  { %26412 = vst [vmem:[#allocation94_spill] sm:$0xff] %v26411_v11  ;;  %v26414_v48 = vsel %vm22500_vm5, 4294967295, %v26413_v48  ;;  %vm22519_vm0 = vmor %vm26418_vm2, %vm26417_vm12  ;;  %vm26423_vm2 = vcmp.eq.s32.totalorder %v26397_v31, %v21625_v39  ;;  %13747 = vmatprep.subr.bf16.mxu0 %v24480_v34  ;;  %v26440_v58 = vand.u32 4294901760, %v22035_v29  ;;  %v11882_v63 = vsel %vm22371_vm15, 1.0, %v26245_v13 }
 0x4a4   :  { %26415 = vst [vmem:[#allocation6_spill] sm:$0xff] %v26414_v48  ;;  %vm22537_vm12 = vmor %vm26423_vm2, %vm26422_vm3  ;;  %vm26428_vm3 = vnez %v26357_v33  ;;  %vm26429_vm2 = vnez %v26364_v1  ;;  %v9245_v33 = vsub.f32 %v21985_v19, %v26434_v5  ;;  %v9252_v1 = vsub.f32 %v22014_v16, %v26435_v57 }
 0x4a5   :  { %v11789_v26 = vsel %vm26428_vm3, 1.0, %v26245_v13  ;;  %v11790_v53 = vsel %vm26429_vm2, 1.0, %v26245_v13  ;;  %vm22564_vm6 = vmor %vm26431_vm1, %vm26430_vm14  ;;  %13947 = vmatpush1.bf16.msk.msra.mxu1 %vm22467_vm7, %v26052_v4  ;;  %vm26436_vm14 = vcmp.eq.s32.totalorder %v26409_v47, %v21619_v50  ;;  %vm26437_vm1 = vcmp.eq.s32.totalorder %v26409_v47, %v21625_v39 }
 0x4a6   :  { %vm22590_vm3 = vmor %vm26437_vm1, %vm26436_vm14  ;;  %v8270_v14 = vsub.f32 %v22035_v29, %v26440_v58  ;;  %13948 = vmatprep.subr.bf16.mxu1 %v24480_v34  ;;  %vm26441_vm8 = vcmp.eq.s32.totalorder %v26397_v31, %v21634_v25  ;;  %vm26442_vm2 = vcmp.eq.s32.totalorder %v26397_v31, %v21640_v60  ;;  %v26445_v37 = vand.u32 4294901760, %v22060_v20  ;;  %13749 = vmatpush1.bf16.msk.msra.mxu0 %vm22482_vm10, %v26052_v4 }
 0x4a7   :  { %vm22607_vm14 = vmor %vm26442_vm2, %vm26441_vm8  ;;  %v22616_v29 = vsub.f32 %v11789_v26, %v11789_v26  ;;  %v22618_v46 = vsub.f32 %v11790_v53, %v11790_v53  ;;  %vm26446_vm15 = vcmp.eq.s32.totalorder %v26409_v47, %v21634_v25  ;;  %vm26447_vm1 = vcmp.eq.s32.totalorder %v26409_v47, %v21640_v60  ;;  %13750 = vmatprep.subr.bf16.mxu0 %v24480_v34 }
 0x4a8   :  { %v8277_v58 = vsub.f32 %v22060_v20, %v26445_v37  ;;  %vm22629_vm8 = vmor %vm26447_vm1, %vm26446_vm15  ;;  %v8257_v37 = vand.u32 4294901760, %v8256_v54  ;;  %v8264_v15 = vand.u32 4294901760, %v8263_v28  ;;  %v22633_v26 = vsub.f32 %v11881_v8, %v11881_v8 }
 0x4a9   :  { %vm22640_vm2 = vmpackc.low %vm22537_vm12, %vm22519_vm0  ;;  %v26450_v53 = vmov 0  ;;  %v22647_v47 = vsel %vm22590_vm3, 1.0, %v26245_v13  ;;  %v9246_v52 = vand.u32 4294901760, %v9245_v33  ;;  %v9253_v54 = vand.u32 4294901760, %v9252_v1  ;;  %13950 = vmatpush1.bf16.msk.msra.mxu1 %vm22500_vm5, %v26052_v4 }
 0x4aa   :  { %v26451_v53 = vsel %vm22640_vm2, 4294967295, %v26450_v53  ;;  %v22649_v28 = vsub.f32 %v11882_v63, %v11882_v63  ;;  %v11791_v8 = vsel %vm22392_vm4, 1.0, %v26245_v13  ;;  %vm26453_vm15 = vcmp.eq.s32.totalorder %v26416_v38, %v21619_v50  ;;  %13951 = vmatprep.subr.bf16.mxu1 %v24480_v34  ;;  %vm22673_vm4 = vmpackc.low %vm22607_vm14, %vm22564_vm6  ;;  %13752 = vmatpush1.bf16.msk.msra.mxu0 %vm22640_vm2, %v26052_v4 }
 0x4ab   :  { %26452 = vst [vmem:[#allocation7_spill] sm:$0xff] %v26451_v53  ;;  %vm26454_vm1 = vcmp.eq.s32.totalorder %v26416_v38, %v21625_v39  ;;  %v8271_v33 = vand.u32 4294901760, %v8270_v14  ;;  %v26457_v23 = vmov 0  ;;  %v22680_v50 = vsel %vm22629_vm8, 1.0, %v26245_v13  ;;  %13753 = vmatprep.subr.bf16.mxu0 %v24480_v34 }
 0x4ac   :  { %vm22663_vm3 = vmor %vm26454_vm1, %vm26453_vm15  ;;  %v26458_v23 = vsel %vm22673_vm4, 4294967295, %v26457_v23  ;;  %v8278_v39 = vand.u32 4294901760, %v8277_v58  ;;  %v26460_v14 = vand.u32 4294901760, %v22217_v55  ;;  %v26461_v1 = vand.u32 4294901760, %v22219_v24 }
 0x4ad   :  { %26459 = vst [vmem:[#allocation56_spill] sm:$0xff] %v26458_v23  ;;  %v26462_v11 = vmov 1.0   ;;  %vm26464_vm8 = vcmp.eq.s32.totalorder %v26416_v38, %v21634_v25  ;;  %vm26465_vm15 = vcmp.eq.s32.totalorder %v26416_v38, %v21640_v60  ;;  %v11792_v53 = vsel %vm22412_vm11, 1.0, %v26245_v13  ;;  %13953 = vmatpush1.bf16.msk.msra.mxu1 %vm22673_vm4, %v26052_v4 }
 0x4ae   :  { %v9259_v63 = vsub.f32 %v22217_v55, %v26460_v14  ;;  %v9266_v48 = vsub.f32 %v22219_v24, %v26461_v1  ;;  %v22693_v20 = vpack.c.bf16 %v22647_v47, %v26462_v11  ;;  %vm22701_vm1 = vmor %vm26465_vm15, %vm26464_vm8  ;;  %v22711_v24 = vsub.f32 %v11791_v8, %v11791_v8  ;;  %13954 = vmatprep.subr.bf16.mxu1 %v24480_v34 }
 0x4af   :  { %vm26468_vm8 = vcmask 1041408   ;;  %v26469_v25 = vmov 0  ;;  %v13758_v60 = vpack.c.bf16 %v8264_v15, %v8257_v37  ;;  %v13959_v38 = vpack.c.bf16 %v9253_v54, %v9246_v52 }
 0x4b0   :  { %26463 = vst [vmem:[#allocation18_spill] sm:$0xff] %v22693_v20  ;;  %vm22717_vm15 = vmpackc.low %vm26468_vm8, %vm22663_vm3  ;;  %v11883_v14 = vsel %vm22434_vm13, 1.0, %v26245_v13  ;;  %v22729_v3 = vpack.c.bf16 %v22680_v50, %v26462_v11  ;;  %v26473_v8 = vand.u32 4294901760, %v22221_v22  ;;  %v11884_v52 = vsel %vm22446_vm9, 1.0, %v26245_v13 }
 0x4b1   :  { %v26470_v25 = vsel %vm22717_vm15, 4294967295, %v26469_v25  ;;  %vm26474_vm11 = vmmov %vm26468_vm8  ;;  %v26475_v10 = vmov 0  ;;  %v13761_v11 = vpack.c.bf16 %v8278_v39, %v8271_v33  ;;  %v9260_v15 = vand.u32 4294901760, %v9259_v63  ;;  %13756 = vmatpush1.bf16.msk.msra.mxu0 %vm22717_vm15, %v22693_v20 }
 0x4b2   :  { %26471 = vst [vmem:[#allocation32_spill] sm:$0xff] %v26470_v25  ;;  %26472 = vst [vmem:[#allocation9_spill] sm:$0xff] %v22729_v3  ;;  %v8284_v1 = vsub.f32 %v22221_v22, %v26473_v8  ;;  %v9267_v54 = vand.u32 4294901760, %v9266_v48  ;;  %v26478_v41 = vand.u32 4294901760, %v22239_v12  ;;  %v26479_v31 = vand.u32 4294901760, %v22241_v61  ;;  %13757 = vmatprep.subr.bf16.mxu0 %v24480_v34 }
 0x4b3   :  { %vm22742_vm13 = vmpackc.low %vm26474_vm11, %vm22701_vm1  ;;  %v26480_v4 = vand.u32 4294901760, %v22243_v6  ;;  %v22759_v39 = vsub.f32 %v11792_v53, %v11792_v53  ;;  %v22761_v63 = vsub.f32 %v11883_v14, %v11883_v14  ;;  %v22766_v25 = vsub.f32 %v11884_v52, %v11884_v52  ;;  %v26482_v52 = vld [vmem:[#allocation69_spill] sm:$0xff] }
 0x4b4   :  { %v26476_v10 = vsel %vm22742_vm13, 4294967295, %v26475_v10  ;;  %v8291_v8 = vsub.f32 %v22239_v12, %v26478_v41  ;;  %v9273_v23 = vsub.f32 %v22241_v61, %v26479_v31  ;;  %v11793_v31 = vsel %vm22519_vm0, 1.0, %v26245_v13  ;;  %13957 = vmatpush1.bf16.msk.msra.mxu1 %vm22742_vm13, %v22729_v3  ;;  %8217 = vmatmul.mubr.f32.vlgmr.msra.gmra.mrb[24].mxu0 %v26482_v52  ;;  %vm26494_vm0 = vmmov %vm26468_vm8 }
 0x4b5   :  { %26477 = vst [vmem:[#allocation10_spill] sm:$0xff] %v26476_v10  ;;  %v9280_v33 = vsub.f32 %v22243_v6, %v26480_v4  ;;  %v8285_v4 = vand.u32 4294901760, %v8284_v1  ;;  %v26481_v53 = vand.u32 4294901760, %v22259_v45  ;;  %v11794_v41 = vsel %vm22537_vm12, 1.0, %v26245_v13  ;;  %13958 = vmatprep.subr.bf16.mxu1 %v24480_v34  ;;  %13759 = vmatpush1.bf16.msra.mxu0 %v13758_v60  ;;  %vm26495_vm9 = vmmov %vm26494_vm0 }
 0x4b6   :  { %v26483_v43 = vand.u32 4294901760, %v22261_v30  ;;  %v24350_v1 = vand.u32 4294901760, %v22301_v56  ;;  %v13962_v10 = vpack.c.bf16 %v9267_v54, %v9260_v15  ;;  %v8292_v3 = vand.u32 4294901760, %v8291_v8  ;;  %13760 = vmatprep.subr.bf16.mxu0 %v24480_v34 }
 0x4b7   :  { %v8298_v14 = vsub.f32 %v22259_v45, %v26481_v53  ;;  %v9274_v53 = vand.u32 4294901760, %v9273_v23  ;;  %v9281_v20 = vand.u32 4294901760, %v9280_v33  ;;  %v26484_v45 = vld [vmem:[#allocation83_spill] sm:$0xff]  ;;  %v11885_v35 = vsel %vm22564_vm6, 1.0, %v26245_v13  ;;  %9206 = vmatmul.mubr.f32.vlgmr.msra.gmra.mrb[24].mxu1 %v26482_v52  ;;  %v26489_v23 = vld [vmem:[#allocation86_spill] sm:$0xff] }
 0x4b8   :  { %v8305_v37 = vsub.f32 %v22261_v30, %v26483_v43  ;;  %8226 = vmatprep.mubr.f32.mxu0 %v26484_v45  ;;  %v26485_v43 = vand.u32 4294901760, %v22266_v17  ;;  %v26486_v60 = vand.u32 4294901760, %v22268_v51  ;;  %v22800_v54 = vsub.f32 %v11793_v31, %v11793_v31  ;;  %13960 = vmatpush1.bf16.msra.mxu1 %v13959_v38 }
 0x4b9   :  { %v22802_v8 = vsub.f32 %v11794_v41, %v11794_v41  ;;  %v8299_v2 = vand.u32 4294901760, %v8298_v14  ;;  %9215 = vmatprep.mubr.f32.mxu1 %v26484_v45  ;;  %v11886_v52 = vsel %vm22607_vm14, 1.0, %v26245_v13  ;;  %13961 = vmatprep.subr.bf16.mxu1 %v24480_v34  ;;  %v8319_v38 = vsub.f32 %v22301_v56, %v24350_v1  ;;  %v26488_v14 = vld [vmem:[#allocation82_spill] sm:$0xff] }
 0x4ba   :  { %v9287_v48 = vsub.f32 %v22266_v17, %v26485_v43  ;;  %v9294_v15 = vsub.f32 %v22268_v51, %v26486_v60  ;;  %v8306_v43 = vand.u32 4294901760, %v8305_v37  ;;  %v26487_v60 = vand.u32 4294901760, %v22281_v18  ;;  %8232 = vmatmul.mubr.f32.gmra.mrb[26].mxu0 %v26488_v14 }
 0x4bb   :  { %v22817_v41 = vsub.f32 %v11885_v35, %v11885_v35  ;;  %13762 = vmatpush1.bf16.msra.mxu0 %v13761_v11  ;;  %v13764_v45 = vpack.c.bf16 %v8292_v3, %v8285_v4  ;;  %v24356_v5 = vand.u32 4294901760, %v22382_v62  ;;  %8241 = vmatprep.mubr.f32.mxu0 %v26489_v23  ;;  %v13965_v37 = vpack.c.bf16 %v9281_v20, %v9274_v53 }
 0x4bc   :  { %v8312_v31 = vsub.f32 %v22281_v18, %v26487_v60  ;;  %13763 = vmatprep.subr.bf16.mxu0 %v24480_v34  ;;  %v9288_v60 = vand.u32 4294901760, %v9287_v48  ;;  %v9295_v18 = vand.u32 4294901760, %v9294_v15  ;;  %v26490_v51 = vand.u32 4294901760, %v22340_v9  ;;  %9221 = vmatmul.mubr.f32.gmra.mrb[26].mxu1 %v26488_v14 }
 0x4bd   :  { %v22827_v35 = vsub.f32 %v11886_v52, %v11886_v52  ;;  %13963 = vmatpush1.bf16.msra.mxu1 %v13962_v10  ;;  %v26491_v3 = vand.u32 4294901760, %v22359_v32  ;;  %v24352_v4 = vand.u32 4294901760, %v22400_v42  ;;  %v24351_v33 = vand.u32 4294901760, %v22423_v40  ;;  %9230 = vmatprep.mubr.f32.mxu1 %v26489_v23  ;;  %v26492_v10 = vld [vmem:[#allocation87_spill] sm:$0xff] }
 0x4be   :  { %v9301_v1 = vsub.f32 %v22340_v9, %v26490_v51  ;;  %v11795_v20 = vsel %vm22663_vm3, 1.0, %v26245_v13  ;;  %13964 = vmatprep.subr.bf16.mxu1 %v24480_v34  ;;  %v13767_v51 = vpack.c.bf16 %v8306_v43, %v8299_v2  ;;  %v8313_v48 = vand.u32 4294901760, %v8312_v31  ;;  %8247 = vmatmul.mubr.f32.gmra.mrb[28].mxu0 %v26492_v10 }
 0x4bf   :  { %v9308_v11 = vsub.f32 %v22359_v32, %v26491_v3  ;;  %v8320_v53 = vand.u32 4294901760, %v8319_v38  ;;  %13765 = vmatpush1.bf16.msra.mxu0 %v13764_v45  ;;  %v8326_v15 = vsub.f32 %v22382_v62, %v24356_v5  ;;  %v26493_v52 = vand.u32 4294901760, %v22384_v36  ;;  %8427 = vmatprep.mubr.f32.mxu0 %v24793_v49 }
 0x4c0   :  { %v24353_v14 = vand.u32 4294901760, %v22461_v59  ;;  %v24354_v57 = vand.u32 4294901760, %v22475_v7  ;;  %v8118_v2 = vsel %vm26494_vm0, %v22647_v47, 0  ;;  %13766 = vmatprep.subr.bf16.mxu0 %v24480_v34  ;;  %v13968_v43 = vpack.c.bf16 %v9295_v18, %v9288_v60  ;;  %9236 = vmatmul.mubr.f32.gmra.mrb[28].mxu1 %v26492_v10 }
 0x4c1   :  { %v8333_v23 = vsub.f32 %v22384_v36, %v26493_v52  ;;  %v9302_v31 = vand.u32 4294901760, %v9301_v1  ;;  %v24355_v38 = vand.u32 4294901760, %v22574_v27  ;;  %13966 = vmatpush1.bf16.msra.mxu1 %v13965_v37  ;;  %v9309_v45 = vand.u32 4294901760, %v9308_v11  ;;  %9416 = vmatprep.mubr.f32.mxu1 %v24793_v49 }
 0x4c2   :  { %v9315_v3 = vsub.f32 %v22400_v42, %v24352_v4  ;;  %v9322_v52 = vsub.f32 %v22423_v40, %v24351_v33  ;;  %v24359_v47 = vand.u32 4294901760, %v22576_v21  ;;  %v22862_v18 = vsub.f32 %v11795_v20, %v11795_v20  ;;  %13967 = vmatprep.subr.bf16.mxu1 %v24480_v34 }
 0x4c3   :  { %v13770_v1 = vpack.c.bf16 %v8320_v53, %v8313_v48  ;;  %v24357_v37 = vand.u32 4294901760, %v22616_v29  ;;  %v24358_v60 = vand.u32 4294901760, %v22618_v46  ;;  %13768 = vmatpush1.bf16.msra.mxu0 %v13767_v51  ;;  %v8327_v11 = vand.u32 4294901760, %v8326_v15 }
 0x4c4   :  { %v8334_v10 = vand.u32 4294901760, %v8333_v23  ;;  %v8340_v33 = vsub.f32 %v22461_v59, %v24353_v14  ;;  %v8347_v4 = vsub.f32 %v22475_v7, %v24354_v57  ;;  %v22873_v20 = vsub.f32 %v8118_v2, %v8118_v2  ;;  %13769 = vmatprep.subr.bf16.mxu0 %v24480_v34 }
 0x4c5   :  { %v9329_v48 = vsub.f32 %v22574_v27, %v24355_v38  ;;  %v24360_v51 = vand.u32 4294901760, %v22633_v26  ;;  %v24361_v53 = vand.u32 4294901760, %v22649_v28  ;;  %13969 = vmatpush1.bf16.msra.mxu1 %v13968_v43  ;;  %v13971_v15 = vpack.c.bf16 %v9309_v45, %v9302_v31 }
 0x4c6   :  { %v9316_v23 = vand.u32 4294901760, %v9315_v3  ;;  %v9323_v14 = vand.u32 4294901760, %v9322_v52  ;;  %v9336_v57 = vsub.f32 %v22576_v21, %v24359_v47  ;;  %13970 = vmatprep.subr.bf16.mxu1 %v24480_v34  ;;  %v8354_v2 = vsub.f32 %v22616_v29, %v24357_v37 }
 0x4c7   :  { %v8361_v38 = vsub.f32 %v22618_v46, %v24358_v60  ;;  %v24362_v5 = vand.u32 4294901760, %v22711_v24  ;;  %v11887_v31 = vsel %vm22701_vm1, 1.0, %v26245_v13  ;;  %13771 = vmatpush1.bf16.msra.mxu0 %v13770_v1  ;;  %v13773_v45 = vpack.c.bf16 %v8334_v10, %v8327_v11  ;;  %v26537_v13 = vld [vmem:[#allocation23_spill] sm:$0xff] }
 0x4c8   :  { %v8341_v3 = vand.u32 4294901760, %v8340_v33  ;;  %v8348_v52 = vand.u32 4294901760, %v8347_v4  ;;  %13772 = vmatprep.subr.bf16.mxu0 %v24480_v34  ;;  %v9343_v37 = vsub.f32 %v22633_v26, %v24360_v51  ;;  %v9350_v60 = vsub.f32 %v22649_v28, %v24361_v53 }
 0x4c9   :  { %v9107_v58 = vsel %vm26495_vm9, %v22680_v50, 0  ;;  %13972 = vmatpush1.bf16.msra.mxu1 %v13971_v15  ;;  %v13974_v33 = vpack.c.bf16 %v9323_v14, %v9316_v23  ;;  %v9330_v4 = vand.u32 4294901760, %v9329_v48  ;;  %v9337_v1 = vand.u32 4294901760, %v9336_v57 }
 0x4ca   :  { %13973 = vmatprep.subr.bf16.mxu1 %v24480_v34  ;;  %v8355_v11 = vand.u32 4294901760, %v8354_v2  ;;  %v8362_v10 = vand.u32 4294901760, %v8361_v38  ;;  %v8368_v51 = vsub.f32 %v22711_v24, %v24362_v5  ;;  %v26496_v53 = vand.u32 4294901760, %v22759_v39 }
 0x4cb   :  { %v22914_v43 = vsub.f32 %v11887_v31, %v11887_v31  ;;  %13774 = vmatpush1.bf16.msra.mxu0 %v13773_v45  ;;  %v13776_v50 = vpack.c.bf16 %v8348_v52, %v8341_v3  ;;  %v24370_v14 = vand.u32 4294901760, %v22800_v54  ;;  %v24363_v57 = vand.u32 4294901760, %v22802_v8 }
 0x4cc   :  { %v8375_v47 = vsub.f32 %v22759_v39, %v26496_v53  ;;  %13775 = vmatprep.subr.bf16.mxu0 %v24480_v34  ;;  %v9344_v48 = vand.u32 4294901760, %v9343_v37  ;;  %v9351_v38 = vand.u32 4294901760, %v9350_v60  ;;  %v26497_v15 = vand.u32 4294901760, %v22761_v63 }
 0x4cd   :  { %v26498_v2 = vand.u32 4294901760, %v22766_v25  ;;  %v22925_v31 = vsub.f32 %v9107_v58, %v9107_v58  ;;  %13975 = vmatpush1.bf16.msra.mxu1 %v13974_v33  ;;  %v13977_v45 = vpack.c.bf16 %v9337_v1, %v9330_v4  ;;  %v24365_v3 = vand.u32 4294901760, %v22817_v41 }
 0x4ce   :  { %v9357_v23 = vsub.f32 %v22761_v63, %v26497_v15  ;;  %v24364_v52 = vand.u32 4294901760, %v22827_v35  ;;  %13976 = vmatprep.subr.bf16.mxu1 %v24480_v34  ;;  %v13779_v37 = vpack.c.bf16 %v8362_v10, %v8355_v11  ;;  %v8369_v60 = vand.u32 4294901760, %v8368_v51 }
 0x4cf   :  { %v9364_v53 = vsub.f32 %v22766_v25, %v26498_v2  ;;  %v8376_v5 = vand.u32 4294901760, %v8375_v47  ;;  %13777 = vmatpush1.bf16.msra.mxu0 %v13776_v50  ;;  %v8382_v15 = vsub.f32 %v22800_v54, %v24370_v14  ;;  %v8389_v58 = vsub.f32 %v22802_v8, %v24363_v57  ;;  %v26535_v14 = vld [vmem:[#allocation91_spill] sm:$0xff] }
 0x4d0   :  { %v24369_v33 = vand.u32 4294901760, %v22862_v18  ;;  %v24368_v4 = vand.u32 4294901760, %v22873_v20  ;;  %13778 = vmatprep.subr.bf16.mxu0 %v24480_v34  ;;  %v13980_v1 = vpack.c.bf16 %v9351_v38, %v9344_v48  ;;  %v9358_v2 = vand.u32 4294901760, %v9357_v23 }
 0x4d1   :  { %v9365_v11 = vand.u32 4294901760, %v9364_v53  ;;  %13978 = vmatpush1.bf16.msra.mxu1 %v13977_v45  ;;  %v9371_v47 = vsub.f32 %v22817_v41, %v24365_v3  ;;  %v9378_v51 = vsub.f32 %v22827_v35, %v24364_v52  ;;  %v24367_v10 = vand.u32 4294901760, %v22914_v43 }
 0x4d2   :  { %v24366_v50 = vand.u32 4294901760, %v22925_v31  ;;  %13979 = vmatprep.subr.bf16.mxu1 %v24480_v34  ;;  %v13782_v57 = vpack.c.bf16 %v8376_v5, %v8369_v60  ;;  %v8383_v48 = vand.u32 4294901760, %v8382_v15  ;;  %v8390_v38 = vand.u32 4294901760, %v8389_v58 }
 0x4d3   :  { %13780 = vmatpush1.bf16.msra.mxu0 %v13779_v37  ;;  %v8396_v23 = vsub.f32 %v22862_v18, %v24369_v33  ;;  %v8403_v53 = vsub.f32 %v22873_v20, %v24368_v4  ;;  %v13983_v45 = vpack.c.bf16 %v9365_v11, %v9358_v2  ;;  %v9372_v52 = vand.u32 4294901760, %v9371_v47  ;;  %v26527_v4 = vld [vmem:[#allocation58_spill] sm:$0xff] }
 0x4d4   :  { %13781 = vmatprep.subr.bf16.mxu0 %v24480_v34  ;;  %v9379_v3 = vand.u32 4294901760, %v9378_v51  ;;  %v9385_v5 = vsub.f32 %v22914_v43, %v24367_v10  ;;  %v9392_v37 = vsub.f32 %v22925_v31, %v24366_v50  ;;  %v13785_v60 = vpack.c.bf16 %v8390_v38, %v8383_v48  ;;  %v26500_v48 = vld [vmem:[#allocation13_spill] sm:$0xff]  ;;  %v26501_v38 = vld [vmem:[#allocation67_spill] sm:$0xff]  ;;  %v26521_v50 = vld [vmem:[#allocation80_spill] sm:$0xff] }
 0x4d5   :  { %13981 = vmatpush1.bf16.msra.mxu1 %v13980_v1  ;;  %v8397_v15 = vand.u32 4294901760, %v8396_v23  ;;  %v8404_v58 = vand.u32 4294901760, %v8403_v53  ;;  %v13794_v23 = vpack.c.bf16 %v26501_v38, %v26500_v48  ;;  %v26502_v53 = vld [vmem:[#allocation73_spill] sm:$0xff]  ;;  %v26525_v10 = vld [vmem:[#allocation60_spill] sm:$0xff]  ;;  %vm26536_vm9 = vnez %v26535_v14  ;;  %v26543_v14 = vld [vmem:[#allocation38_spill] sm:$0xff] }
 0x4d6   :  { %13982 = vmatprep.subr.bf16.mxu1 %v24480_v34  ;;  %v13986_v1 = vpack.c.bf16 %v9379_v3, %v9372_v52  ;;  %v9386_v2 = vand.u32 4294901760, %v9385_v5  ;;  %v9393_v11 = vand.u32 4294901760, %v9392_v37  ;;  %v13992_v3 = vpack.c.bf16 %v22014_v16, %v21985_v19  ;;  %v26499_v52 = vld [vmem:[#allocation55_spill] sm:$0xff]  ;;  %v26504_v37 = vld [vmem:[#allocation72_spill] sm:$0xff]  ;;  %v10934_v33 = vld [vmem:[%s23534_s5] sm:$0x1f] }
 0x4d7   :  { %13783 = vmatpush1.bf16.msra.mxu0 %v13782_v57  ;;  %v13788_v47 = vpack.c.bf16 %v8404_v58, %v8397_v15  ;;  %v13791_v57 = vpack.c.bf16 %v21962_v0, %v21934_v44  ;;  %v26505_v15 = vld [vmem:[#allocation78_spill] sm:$0xff]  ;;  %v13998_v58 = vpack.c.bf16 %v22243_v6, %v22241_v61  ;;  %vm26526_vm1 = vnez %v26525_v10 }
 0x4d8   :  { %13784 = vmatprep.subr.bf16.mxu0 %v24480_v34  ;;  %v13989_v51 = vpack.c.bf16 %v9393_v11, %v9386_v2  ;;  %v26507_v2 = vld [vmem:[#allocation71_spill] sm:$0xff]  ;;  %10937 = vperm.xlu1 %14503, %v10934_v33   ;;  %v26539_v33 = vld [vmem:[#allocation33_spill] sm:$0xff]  ;;  %v14664_v10 = vmov 2  }
 0x4d9   :  { %13984 = vmatpush1.bf16.msra.mxu1 %v13983_v45  ;;  %v26503_v45 = vld [vmem:[#allocation12_spill] sm:$0xff]  ;;  %v13800_v11 = vpack.c.bf16 %v22261_v30, %v26507_v2 }
 0x4da   :  { %13985 = vmatprep.subr.bf16.mxu1 %v24480_v34  ;;  %v13995_v5 = vpack.c.bf16 %v26503_v45, %v22217_v55 }
 0x4db   :  { %13786 = vmatpush1.bf16.msra.mxu0 %v13785_v60  ;;  %v13797_v60 = vpack.c.bf16 %v22239_v12, %v22221_v22 }
 0x4dc   :  { %13787 = vmatprep.subr.bf16.mxu0 %v24480_v34 }
 0x4dd   :  { %13987 = vmatpush1.bf16.msra.mxu1 %v13986_v1  ;;  %v26506_v1 = vld [vmem:[#allocation79_spill] sm:$0xff] }
 0x4de   :  { %13988 = vmatprep.subr.bf16.mxu1 %v24480_v34 }
 0x4df   :  { %13789 = vmatpush1.bf16.msra.mxu0 %v13788_v47  ;;  %v26508_v47 = vld [vmem:[#allocation57_spill] sm:$0xff] }
 0x4e0   :  { %13790 = vmatprep.subr.bf16.mxu0 %v24480_v34 }
 0x4e1   :  { %13990 = vmatpush1.bf16.msra.mxu1 %v13989_v51  ;;  %v26509_v51 = vld [vmem:[#allocation93_spill] sm:$0xff] }
 0x4e2   :  { %13991 = vmatprep.subr.bf16.mxu1 %v24480_v34  ;;  %8429 = vmatmul.mubr.f32.vlgmr.msra.gmra.mrb[24].mxu0 %v26499_v52 }
 0x4e3   :  { %13792 = vmatpush1.bf16.msra.mxu0 %v13791_v57  ;;  %8434 = vmatprep.mubr.f32.mxu0 %v26502_v53  ;;  %v14001_v57 = vpack.c.bf16 %v26509_v51, %v22266_v17 }
 0x4e4   :  { %9418 = vmatmul.mubr.f32.vlgmr.msra.gmra.mrb[24].mxu1 %v26499_v52  ;;  %13793 = vmatprep.subr.bf16.mxu0 %v24480_v34 }
 0x4e5   :  { %13993 = vmatpush1.bf16.msra.mxu1 %v13992_v3  ;;  %9423 = vmatprep.mubr.f32.mxu1 %v26502_v53  ;;  %v26510_v3 = vld [vmem:[#allocation47_spill] sm:$0xff] }
 0x4e6   :  { %13994 = vmatprep.subr.bf16.mxu1 %v24480_v34  ;;  %8436 = vmatmul.mubr.f32.gmra.mrb[26].mxu0 %v26504_v37 }
 0x4e7   :  { %13795 = vmatpush1.bf16.msra.mxu0 %v13794_v23  ;;  %8441 = vmatprep.mubr.f32.mxu0 %v26505_v15  ;;  %v13803_v23 = vpack.c.bf16 %v22301_v56, %v26510_v3 }
 0x4e8   :  { %13796 = vmatprep.subr.bf16.mxu0 %v24480_v34  ;;  %9425 = vmatmul.mubr.f32.gmra.mrb[26].mxu1 %v26504_v37 }
 0x4e9   :  { %13996 = vmatpush1.bf16.msra.mxu1 %v13995_v5  ;;  %9430 = vmatprep.mubr.f32.mxu1 %v26505_v15  ;;  %v14004_v5 = vpack.c.bf16 %v22359_v32, %v22340_v9 }
 0x4ea   :  { %13997 = vmatprep.subr.bf16.mxu1 %v24480_v34  ;;  %8443 = vmatmul.mubr.f32.gmra.mrb[28].mxu0 %v26506_v1 }
 0x4eb   :  { %13798 = vmatpush1.bf16.msra.mxu0 %v13797_v60  ;;  %8558 = vmatprep.mubr.f32.mxu0 %v26508_v47  ;;  %v13806_v60 = vpack.c.bf16 %v22384_v36, %v22382_v62 }
 0x4ec   :  { %13799 = vmatprep.subr.bf16.mxu0 %v24480_v34  ;;  %9432 = vmatmul.mubr.f32.gmra.mrb[28].mxu1 %v26506_v1  ;;  %v26561_v1 = vand.u32 4294901760, %v22014_v16  ;;  %v26567_v16 = vand.u32 4294901760, %v26503_v45  ;;  %v26573_v45 = vand.u32 4294901760, %v22243_v6  ;;  %v26577_v6 = vand.u32 4294901760, %v22266_v17 }
 0x4ed   :  { %13999 = vmatpush1.bf16.msra.mxu1 %v13998_v58  ;;  %9547 = vmatprep.mubr.f32.mxu1 %v26508_v47  ;;  %v14007_v58 = vpack.c.bf16 %v22423_v40, %v22400_v42  ;;  %v14010_v47 = vpack.c.bf16 %v22576_v21, %v22574_v27  ;;  %v26582_v17 = vand.u32 4294901760, %v22359_v32  ;;  %v26588_v32 = vand.u32 4294901760, %v22475_v7 }
 0x4ee   :  { %14000 = vmatprep.subr.bf16.mxu1 %v24480_v34 }
 0x4ef   :  { %13801 = vmatpush1.bf16.msra.mxu0 %v13800_v11  ;;  %v13809_v11 = vpack.c.bf16 %v22475_v7, %v22461_v59  ;;  %v26593_v7 = vld [vmem:[#allocation88_spill] sm:$0xff] }
 0x4f0   :  { %13802 = vmatprep.subr.bf16.mxu0 %v24480_v34 }
 0x4f1   :  { %14002 = vmatpush1.bf16.msra.mxu1 %v14001_v57  ;;  %v13812_v57 = vpack.c.bf16 %v22618_v46, %v22616_v29 }
 0x4f2   :  { %14003 = vmatprep.subr.bf16.mxu1 %v24480_v34 }
 0x4f3   :  { %13804 = vmatpush1.bf16.msra.mxu0 %v13803_v23  ;;  %v14013_v23 = vpack.c.bf16 %v22649_v28, %v22633_v26 }
 0x4f4   :  { %13805 = vmatprep.subr.bf16.mxu0 %v24480_v34 }
 0x4f5   :  { %14005 = vmatpush1.bf16.msra.mxu1 %v14004_v5  ;;  %v13815_v5 = vpack.c.bf16 %v22759_v39, %v22711_v24 }
 0x4f6   :  { %14006 = vmatprep.subr.bf16.mxu1 %v24480_v34 }
 0x4f7   :  { %13807 = vmatpush1.bf16.msra.mxu0 %v13806_v60  ;;  %v14016_v60 = vpack.c.bf16 %v22766_v25, %v22761_v63 }
 0x4f8   :  { %13808 = vmatprep.subr.bf16.mxu0 %v24480_v34 }
 0x4f9   :  { %14008 = vmatpush1.bf16.msra.mxu1 %v14007_v58  ;;  %v13818_v58 = vpack.c.bf16 %v22802_v8, %v22800_v54 }
 0x4fa   :  { %14009 = vmatprep.subr.bf16.mxu1 %v24480_v34 }
 0x4fb   :  { %13810 = vmatpush1.bf16.msra.mxu0 %v13809_v11  ;;  %v14019_v11 = vpack.c.bf16 %v22827_v35, %v22817_v41 }
 0x4fc   :  { %13811 = vmatprep.subr.bf16.mxu0 %v24480_v34 }
 0x4fd   :  { %14011 = vmatpush1.bf16.msra.mxu1 %v14010_v47  ;;  %v13821_v47 = vpack.c.bf16 %v22873_v20, %v22862_v18 }
 0x4fe   :  { %14012 = vmatprep.subr.bf16.mxu1 %v24480_v34 }
 0x4ff   :  { %13813 = vmatpush1.bf16.msra.mxu0 %v13812_v57  ;;  %v14022_v57 = vpack.c.bf16 %v22925_v31, %v22914_v43 }
 0x500   :  { %13814 = vmatprep.subr.bf16.mxu0 %v24480_v34 }
 0x501   :  { %14014 = vmatpush1.bf16.msra.mxu1 %v14013_v23  ;;  %v26511_v23 = vld [vmem:[#allocation59_spill] sm:$0xff] }
 0x502   :  { %14015 = vmatprep.subr.bf16.mxu1 %v24480_v34 }
 0x503   :  { %13816 = vmatpush1.bf16.msra.mxu0 %v13815_v5  ;;  %v26512_v5 = vmov 1.0|1.0  }
 0x504   :  { %13817 = vmatprep.subr.bf16.mxu0 %v24480_v34 }
 0x505   :  { %14017 = vmatpush1.bf16.msra.mxu1 %v14016_v60  ;;  %v26513_v60 = vld [vmem:[#allocation92_spill] sm:$0xff] }
 0x506   :  { %14018 = vmatprep.subr.bf16.mxu1 %v24480_v34  ;;  %vm26514_vm6 = vnez %v26513_v60 }
 0x507   :  { %13819 = vmatpush1.bf16.msra.mxu0 %v13818_v58  ;;  %v26515_v58 = vld [vmem:[#allocation75_spill] sm:$0xff] }
 0x508   :  { %13820 = vmatprep.subr.bf16.mxu0 %v24480_v34 }
 0x509   :  { %14020 = vmatpush1.bf16.msra.mxu1 %v14019_v11  ;;  %v26516_v11 = vld [vmem:[#allocation42_spill] sm:$0xff] }
 0x50a   :  { %14021 = vmatprep.subr.bf16.mxu1 %v24480_v34  ;;  %vm26517_vm12 = vnez %v26516_v11 }
 0x50b   :  { %13822 = vmatpush1.bf16.msra.mxu0 %v13821_v47  ;;  %v26518_v47 = vld [vmem:[#allocation74_spill] sm:$0xff] }
 0x50c   :  { %13823 = vmatprep.subr.bf16.mxu0 %v24480_v34 }
 0x50d   :  { %14023 = vmatpush1.bf16.msra.mxu1 %v14022_v57  ;;  %v26519_v57 = vld [vmem:[#allocation41_spill] sm:$0xff] }
 0x50e   :  { %14024 = vmatprep.subr.bf16.mxu1 %v24480_v34  ;;  %8561 = vmatmul.mubr.f32.vlgmr.msra.gmra.mrb[24].mxu0 %v26511_v23  ;;  %vm26520_vm14 = vnez %v26519_v57  ;;  %v26614_v57 = vld [vmem:[#allocation79_spill] sm:$0xff] }
 0x50f   :  { %13825 = vmatpush1.bf16.msk.msra.mxu0 %vm26514_vm6, %v26512_v5  ;;  %8567 = vmatprep.mubr.f32.mxu0 %v26515_v58 }
 0x510   :  { %9550 = vmatmul.mubr.f32.vlgmr.msra.gmra.mrb[24].mxu1 %v26511_v23  ;;  %13826 = vmatprep.subr.bf16.mxu0 %v24480_v34  ;;  %v26522_v23 = vld [vmem:[#allocation44_spill] sm:$0xff] }
 0x511   :  { %14026 = vmatpush1.bf16.msk.msra.mxu1 %vm26517_vm12, %v26512_v5  ;;  %9556 = vmatprep.mubr.f32.mxu1 %v26515_v58  ;;  %vm26523_vm3 = vnez %v26522_v23  ;;  %v26524_v58 = vld [vmem:[#allocation81_spill] sm:$0xff] }
 0x512   :  { %14027 = vmatprep.subr.bf16.mxu1 %v24480_v34  ;;  %8570 = vmatmul.mubr.f32.gmra.mrb[26].mxu0 %v26518_v47 }
 0x513   :  { %13828 = vmatpush1.bf16.msk.msra.mxu0 %vm26520_vm14, %v26512_v5  ;;  %8576 = vmatprep.mubr.f32.mxu0 %v26521_v50 }
 0x514   :  { %13829 = vmatprep.subr.bf16.mxu0 %v24480_v34  ;;  %9559 = vmatmul.mubr.f32.gmra.mrb[26].mxu1 %v26518_v47  ;;  %v26528_v47 = vld [vmem:[#allocation62_spill] sm:$0xff] }
 0x515   :  { %14029 = vmatpush1.bf16.msk.msra.mxu1 %vm26523_vm3, %v26512_v5  ;;  %9565 = vmatprep.mubr.f32.mxu1 %v26521_v50  ;;  %vm26529_vm8 = vnez %v26528_v47  ;;  %v26530_v50 = vld [vmem:[#allocation66_spill] sm:$0xff] }
 0x516   :  { %14030 = vmatprep.subr.bf16.mxu1 %v24480_v34  ;;  %8579 = vmatmul.mubr.f32.gmra.mrb[28].mxu0 %v26524_v58  ;;  %vm26531_vm11 = vnez %v26530_v50  ;;  %v26557_v50 = vand.u32 4294901760, %v21962_v0  ;;  %v26564_v0 = vand.u32 4294901760, %v26501_v38  ;;  %v26569_v38 = vand.u32 4294901760, %v22221_v22  ;;  %v26574_v22 = vld [vmem:[#allocation85_spill] sm:$0xff] }
 0x517   :  { %13831 = vmatpush1.bf16.msk.msra.mxu0 %vm26526_vm1, %v26512_v5  ;;  %8673 = vmatprep.mubr.f32.mxu0 %v26527_v4 }
 0x518   :  { %13832 = vmatprep.subr.bf16.mxu0 %v24480_v34  ;;  %9568 = vmatmul.mubr.f32.gmra.mrb[28].mxu1 %v26524_v58  ;;  %v26532_v58 = vld [vmem:[#allocation31_spill] sm:$0xff] }
 0x519   :  { %14032 = vmatpush1.bf16.msk.msra.mxu1 %vm26529_vm8, %v26512_v5  ;;  %9662 = vmatprep.mubr.f32.mxu1 %v26527_v4  ;;  %vm26533_vm0 = vnez %v26532_v58  ;;  %v23096_v4 = vld [vmem:[%s23535_s6] sm:$0x1] }
 0x51a   :  { %14033 = vmatprep.subr.bf16.mxu1 %v24480_v34  ;;  %26534 = vst [vmem:[#allocation36_spill] sm:$0xff] %v23096_v4  ;;  %10945 = vperm.xlu1 %14503, %v23096_v4   ;;  %v26541_v58 = vld [vmem:[#allocation65_spill] sm:$0xff]  ;;  %v26545_v4 = vld [vmem:[#allocation27_spill] sm:$0xff] }
 0x51b   :  { %13834 = vmatpush1.bf16.msk.msra.mxu0 %vm26531_vm11, %v26512_v5  ;;  %vm26538_vm11 = vnez %v26537_v13  ;;  %vm26542_vm8 = vnez %v26541_v58  ;;  %v26560_v58 = vand.u32 4294901760, %v21985_v19  ;;  %v26562_v13 = vld [vmem:[#allocation64_spill] sm:$0xff]  ;;  %v26566_v19 = vand.u32 4294901760, %v22217_v55 }
 0x51c   :  { %13835 = vmatprep.subr.bf16.mxu0 %v24480_v34  ;;  %v26572_v55 = vand.u32 4294901760, %v22241_v61  ;;  %v26578_v61 = vand.u32 4294901760, %v26509_v51  ;;  %v26583_v51 = vand.u32 4294901760, %v22382_v62  ;;  %v26589_v62 = vand.u32 4294901760, %v22574_v27 }
 0x51d   :  { %14035 = vmatpush1.bf16.msk.msra.mxu1 %vm26533_vm0, %v26512_v5  ;;  %vm26540_vm0 = vnez %v26539_v33  ;;  %v26547_v33 = vld [vmem:[#allocation51_spill] sm:$0xff]  ;;  %v14059_v23 = vpack.c.bf16 %v26561_v1, %v26560_v58  ;;  %v14062_v1 = vpack.c.bf16 %v26567_v16, %v26566_v19  ;;  %v26571_v58 = vld [vmem:[#allocation84_spill] sm:$0xff]  ;;  %v26581_v19 = vand.u32 4294901760, %v22340_v9 }
 0x51e   :  { %14036 = vmatprep.subr.bf16.mxu1 %v24480_v34  ;;  %v26587_v9 = vand.u32 4294901760, %v22461_v59  ;;  %v26594_v59 = vld [vmem:[#allocation17_spill] sm:$0xff]  ;;  %v26596_v27 = vand.u32 4294901760, %v22649_v28  ;;  %v26602_v28 = vand.u32 4294901760, %v22766_v25  ;;  %v26607_v25 = vand.u32 4294901760, %v22817_v41  ;;  %14505 = vset.pattern.permute.xlu1 %v14664_v10 }
 0x51f   :  { %13837 = vmatpush1.bf16.msk.msra.mxu0 %vm26536_vm9, %v26512_v5  ;;  %vm26544_vm9 = vnez %v26543_v14  ;;  %v26554_v14 = vld [vmem:[#allocation18_spill] sm:$0xff]  ;;  %v14071_v16 = vpack.c.bf16 %v26582_v17, %v26581_v19  ;;  %v26608_v19 = vand.u32 4294901760, %v22827_v35 }
 0x520   :  { %13838 = vmatprep.subr.bf16.mxu0 %v24480_v34 }
 0x521   :  { %14038 = vmatpush1.bf16.msk.msra.mxu1 %vm26538_vm11, %v26512_v5  ;;  %vm26546_vm11 = vnez %v26545_v4  ;;  %v26556_v4 = vand.u32 4294901760, %v21934_v44  ;;  %v26563_v44 = vand.u32 4294901760, %v26500_v48  ;;  %v26568_v48 = vld [vmem:[#allocation76_spill] sm:$0xff]  ;;  %v14086_v17 = vpack.c.bf16 %v26608_v19, %v26607_v25  ;;  %v26618_v25 = vld [vmem:[#allocation66_spill] sm:$0xff] }
 0x522   :  { %14039 = vmatprep.subr.bf16.mxu1 %v24480_v34 }
 0x523   :  { %13840 = vmatpush1.bf16.msk.msra.mxu0 %vm26540_vm0, %v26512_v5  ;;  %vm26548_vm0 = vnez %v26547_v33  ;;  %v13858_v47 = vpack.c.bf16 %v26557_v50, %v26556_v4  ;;  %v26558_v33 = vld [vmem:[#allocation9_spill] sm:$0xff]  ;;  %v13861_v50 = vpack.c.bf16 %v26564_v0, %v26563_v44  ;;  %v26576_v44 = vand.u32 4294901760, %v22261_v30 }
 0x524   :  { %13841 = vmatprep.subr.bf16.mxu0 %v24480_v34  ;;  %v26565_v4 = vld [vmem:[#allocation77_spill] sm:$0xff]  ;;  %v26579_v30 = vand.u32 4294901760, %v26510_v3  ;;  %v26586_v3 = vand.u32 4294901760, %v22423_v40  ;;  %v26592_v40 = vand.u32 4294901760, %v22618_v46 }
 0x525   :  { %14041 = vmatpush1.bf16.msk.msra.mxu1 %vm26542_vm8, %v26512_v5 }
 0x526   :  { %14042 = vmatprep.subr.bf16.mxu1 %v24480_v34 }
 0x527   :  { %13843 = vmatpush1.bf16.msk.msra.mxu0 %vm26544_vm9, %v26512_v5 }
 0x528   :  { %13844 = vmatprep.subr.bf16.mxu0 %v24480_v34 }
 0x529   :  { %14044 = vmatpush1.bf16.msk.msra.mxu1 %vm26546_vm11, %v26512_v5 }
 0x52a   :  { %14045 = vmatprep.subr.bf16.mxu1 %v24480_v34 }
 0x52b   :  { %13846 = vmatpush1.bf16.msk.msra.mxu0 %vm26548_vm0, %v26512_v5 }
 0x52c   :  { %13847 = vmatprep.subr.bf16.mxu0 %v24480_v34 }
 0x52d   :  { %14047 = vmatpush1.bf16.msk.msra.mxu1 %vm22467_vm7, %v26512_v5 }
 0x52e   :  { %14048 = vmatprep.subr.bf16.mxu1 %v24480_v34 }
 0x52f   :  { %13849 = vmatpush1.bf16.msk.msra.mxu0 %vm22482_vm10, %v26512_v5 }
 0x530   :  { %13850 = vmatprep.subr.bf16.mxu0 %v24480_v34 }
 0x531   :  { %14050 = vmatpush1.bf16.msk.msra.mxu1 %vm22500_vm5, %v26512_v5 }
 0x532   :  { %14051 = vmatprep.subr.bf16.mxu1 %v24480_v34 }
 0x533   :  { %13852 = vmatpush1.bf16.msk.msra.mxu0 %vm22640_vm2, %v26512_v5 }
 0x534   :  { %13853 = vmatprep.subr.bf16.mxu0 %v24480_v34 }
 0x535   :  { %14053 = vmatpush1.bf16.msk.msra.mxu1 %vm22673_vm4, %v26512_v5 }
 0x536   :  { %14054 = vmatprep.subr.bf16.mxu1 %v24480_v34 }
 0x537   :  { %13856 = vmatpush1.bf16.msk.msra.mxu0 %vm22717_vm15, %v26554_v14 }
 0x538   :  { %13857 = vmatprep.subr.bf16.mxu0 %v24480_v34 }
 0x539   :  { %14057 = vmatpush1.bf16.msk.msra.mxu1 %vm22742_vm13, %v26558_v33 }
 0x53a   :  { %14058 = vmatprep.subr.bf16.mxu1 %v24480_v34  ;;  %8677 = vmatmul.mubr.f32.vlgmr.msra.gmra.mrb[24].mxu0 %v26562_v13 }
 0x53b   :  { %13859 = vmatpush1.bf16.msra.mxu0 %v13858_v47  ;;  %8684 = vmatprep.mubr.f32.mxu0 %v26565_v4  ;;  %v26570_v47 = vand.u32 4294901760, %v22239_v12  ;;  %v26575_v12 = vand.u32 4294901760, %v26507_v2  ;;  %v26580_v2 = vand.u32 4294901760, %v22301_v56  ;;  %v26585_v56 = vand.u32 4294901760, %v22400_v42 }
 0x53c   :  { %9666 = vmatmul.mubr.f32.vlgmr.msra.gmra.mrb[24].mxu1 %v26562_v13  ;;  %13860 = vmatprep.subr.bf16.mxu0 %v24480_v34  ;;  %v26591_v42 = vand.u32 4294901760, %v22616_v29  ;;  %v26598_v29 = vand.u32 4294901760, %v22759_v39  ;;  %v26604_v39 = vand.u32 4294901760, %v22802_v8 }
 0x53d   :  { %14060 = vmatpush1.bf16.msra.mxu1 %v14059_v23  ;;  %9673 = vmatprep.mubr.f32.mxu1 %v26565_v4  ;;  %v13864_v13 = vpack.c.bf16 %v26570_v47, %v26569_v38  ;;  %v14065_v23 = vpack.c.bf16 %v26573_v45, %v26572_v55  ;;  %v13867_v0 = vpack.c.bf16 %v26576_v44, %v26575_v12  ;;  %v26595_v45 = vand.u32 4294901760, %v22633_v26  ;;  %v26599_v12 = vld [vmem:[#allocation89_spill] sm:$0xff]  ;;  %v26600_v44 = vld [vmem:[#allocation19_spill] sm:$0xff] }
 0x53e   :  { %14061 = vmatprep.subr.bf16.mxu1 %v24480_v34  ;;  %8688 = vmatmul.mubr.f32.gmra.mrb[26].mxu0 %v26568_v48  ;;  %v13870_v4 = vpack.c.bf16 %v26580_v2, %v26579_v30  ;;  %v14074_v38 = vpack.c.bf16 %v26586_v3, %v26585_v56  ;;  %v13876_v47 = vpack.c.bf16 %v26588_v32, %v26587_v9  ;;  %v26601_v26 = vand.u32 4294901760, %v22761_v63  ;;  %v26605_v30 = vld [vmem:[#allocation90_spill] sm:$0xff]  ;;  %v26606_v2 = vld [vmem:[#allocation11_spill] sm:$0xff] }
 0x53f   :  { %13862 = vmatpush1.bf16.msra.mxu0 %v13861_v50  ;;  %8695 = vmatprep.mubr.f32.mxu0 %v26571_v58  ;;  %v14068_v50 = vpack.c.bf16 %v26578_v61, %v26577_v6  ;;  %v14176_v55 = vadd.f32 %v26594_v59, %v26593_v7  ;;  %v26611_v9 = vand.u32 4294901760, %v22914_v43  ;;  %v26612_v32 = vand.u32 4294901760, %v22925_v31 }
 0x540   :  { %13863 = vmatprep.subr.bf16.mxu0 %v24480_v34  ;;  %9677 = vmatmul.mubr.f32.gmra.mrb[26].mxu1 %v26568_v48  ;;  %v14083_v6 = vpack.c.bf16 %v26602_v28, %v26601_v26 }
 0x541   :  { %14063 = vmatpush1.bf16.msra.mxu1 %v14062_v1  ;;  %9684 = vmatprep.mubr.f32.mxu1 %v26571_v58  ;;  %v26584_v1 = vand.u32 4294901760, %v22384_v36  ;;  %v26590_v36 = vand.u32 4294901760, %v22576_v21  ;;  %v13879_v58 = vpack.c.bf16 %v26592_v40, %v26591_v42  ;;  %v14080_v21 = vpack.c.bf16 %v26596_v27, %v26595_v45 }
 0x542   :  { %14064 = vmatprep.subr.bf16.mxu1 %v24480_v34  ;;  %8699 = vmatmul.mubr.f32.gmra.mrb[28].mxu0 %v26574_v22 }
 0x543   :  { %13865 = vmatpush1.bf16.msra.mxu0 %v13864_v13  ;;  %8835 = vmatprep.mubr.f32.mxu0 %v24793_v49  ;;  %v13873_v48 = vpack.c.bf16 %v26584_v1, %v26583_v51  ;;  %v14077_v13 = vpack.c.bf16 %v26590_v36, %v26589_v62  ;;  %v26609_v51 = vand.u32 4294901760, %v22862_v18  ;;  %v26610_v1 = vand.u32 4294901760, %v22873_v20 }
 0x544   :  { %13866 = vmatprep.subr.bf16.mxu0 %v24480_v34  ;;  %9688 = vmatmul.mubr.f32.gmra.mrb[28].mxu1 %v26574_v22  ;;  %v11587_v22 = vmul.f32 -1.442695, %v14176_v55 }
 0x545   :  { %14066 = vmatpush1.bf16.msra.mxu1 %v14065_v23  ;;  %9824 = vmatprep.mubr.f32.mxu1 %v24793_v49  ;;  %v26597_v23 = vand.u32 4294901760, %v22711_v24  ;;  %v26603_v24 = vand.u32 4294901760, %v22800_v54 }
 0x546   :  { %14067 = vmatprep.subr.bf16.mxu1 %v24480_v34  ;;  %14570 = vpow2.f32 %v11587_v22 }
 0x547   :  { %13868 = vmatpush1.bf16.msra.mxu0 %v13867_v0  ;;  %v13882_v46 = vpack.c.bf16 %v26598_v29, %v26597_v23  ;;  %v14177_v0 = vadd.f32 %v26600_v44, %v26599_v12  ;;  %v13885_v61 = vpack.c.bf16 %v26604_v39, %v26603_v24 }
 0x548   :  { %13869 = vmatprep.subr.bf16.mxu0 %v24480_v34 }
 0x549   :  { %14069 = vmatpush1.bf16.msra.mxu1 %v14068_v50  ;;  %v11588_v50 = vmul.f32 -1.442695, %v14177_v0 }
 0x54a   :  { %14070 = vmatprep.subr.bf16.mxu1 %v24480_v34 }
 0x54b   :  { %13871 = vmatpush1.bf16.msra.mxu0 %v13870_v4  ;;  %v14178_v4 = vadd.f32 %v26606_v2, %v26605_v30  ;;  %14572 = vpow2.f32 %v11588_v50  ;;  %v26616_v50 = vld [vmem:[#allocation62_spill] sm:$0xff] }
 0x54c   :  { %13872 = vmatprep.subr.bf16.mxu0 %v24480_v34 }
 0x54d   :  { %14072 = vmatpush1.bf16.msra.mxu1 %v14071_v16  ;;  %v11589_v41 = vmul.f32 -1.442695, %v14178_v4 }
 0x54e   :  { %14073 = vmatprep.subr.bf16.mxu1 %v24480_v34  ;;  %v6968_v63 = vpop.f32.mrb[18].mxu0 }
 0x54f   :  { %13874 = vmatpush1.bf16.msra.mxu0 %v13873_v48  ;;  %v14179_v16 = vadd.f32 %v6968_v63, %v26593_v7  ;;  %v6970_v54 = vpop.f32.mrb[19].mxu0  ;;  %v13888_v48 = vpack.c.bf16 %v26610_v1, %v26609_v51 }
 0x550   :  { %13875 = vmatprep.subr.bf16.mxu0 %v24480_v34  ;;  %v7957_v8 = vpop.f32.mrb[18].mxu1  ;;  %v14571_v55 = vpop.eup %14570 }
 0x551   :  { %14075 = vmatpush1.bf16.msra.mxu1 %v14074_v38  ;;  %v11679_v56 = vmul.f32 -1.442695, %v14179_v16  ;;  %v14182_v3 = vadd.f32 %v7957_v8, %v26593_v7  ;;  %v7959_v38 = vpop.f32.mrb[19].mxu1  ;;  %v6009_v29 = vadd.f32 1.0, %v14571_v55  ;;  %v26620_v16 = vld [vmem:[#allocation31_spill] sm:$0xff] }
 0x552   :  { %14076 = vmatprep.subr.bf16.mxu1 %v24480_v34  ;;  %v6975_v35 = vpop.f32.mrb[20].mxu0  ;;  %v26622_v8 = vld [vmem:[#allocation91_spill] sm:$0xff]  ;;  %v26626_v38 = vld [vmem:[#allocation33_spill] sm:$0xff] }
 0x553   :  { %13877 = vmatpush1.bf16.msra.mxu0 %v13876_v47  ;;  %v14089_v47 = vpack.c.bf16 %v26612_v32, %v26611_v9  ;;  %14574 = vpow2.f32 %v11679_v56  ;;  %v11771_v18 = vmul.f32 -1.442695, %v14182_v3  ;;  %v14180_v20 = vadd.f32 %v6975_v35, %v26599_v12  ;;  %v6977_v62 = vpop.f32.mrb[21].mxu0 }
 0x554   :  { %13878 = vmatprep.subr.bf16.mxu0 %v24480_v34  ;;  %v7964_v36 = vpop.f32.mrb[20].mxu1 }
 0x555   :  { %14078 = vmatpush1.bf16.msra.mxu1 %v14077_v13  ;;  %14576 = vpow2.f32 %v11771_v18  ;;  %v11680_v13 = vmul.f32 -1.442695, %v14180_v20  ;;  %v14183_v42 = vadd.f32 %v7964_v36, %v26599_v12  ;;  %v7966_v40 = vpop.f32.mrb[21].mxu1 }
 0x556   :  { %14079 = vmatprep.subr.bf16.mxu1 %v24480_v34  ;;  %14578 = vpow2.f32 %v11589_v41  ;;  %v6982_v43 = vpop.f32.mrb[22].mxu0 }
 0x557   :  { %13880 = vmatpush1.bf16.msra.mxu0 %v13879_v58  ;;  %14580 = vpow2.f32 %v11680_v13  ;;  %v11772_v31 = vmul.f32 -1.442695, %v14183_v42  ;;  %v14181_v58 = vadd.f32 %v6982_v43, %v26605_v30  ;;  %v6984_v59 = vpop.f32.mrb[23].mxu0 }
 0x558   :  { %13881 = vmatprep.subr.bf16.mxu0 %v24480_v34  ;;  %v7971_v45 = vpop.f32.mrb[22].mxu1 }
 0x559   :  { %14081 = vmatpush1.bf16.msra.mxu1 %v14080_v21  ;;  %14582 = vpow2.f32 %v11772_v31  ;;  %v11681_v27 = vmul.f32 -1.442695, %v14181_v58  ;;  %v14184_v21 = vadd.f32 %v7971_v45, %v26605_v30  ;;  %v7973_v23 = vpop.f32.mrb[23].mxu1 }
 0x55a   :  { %14082 = vmatprep.subr.bf16.mxu1 %v24480_v34 }
 0x55b   :  { %13883 = vmatpush1.bf16.msra.mxu0 %v13882_v46  ;;  %14584 = vpow2.f32 %v11681_v27  ;;  %v11773_v60 = vmul.f32 -1.442695, %v14184_v21  ;;  %v14573_v46 = vpop.eup %14572 }
 0x55c   :  { %13884 = vmatprep.subr.bf16.mxu0 %v24480_v34  ;;  %v6010_v26 = vadd.f32 1.0, %v14573_v46 }
 0x55d   :  { %14084 = vmatpush1.bf16.msra.mxu1 %v14083_v6  ;;  %v14575_v22 = vpop.eup %14574  ;;  %14586 = vpow2.f32 %v11773_v60 }
 0x55e   :  { %14085 = vmatprep.subr.bf16.mxu1 %v24480_v34  ;;  %v6995_v11 = vadd.f32 1.0, %v14575_v22  ;;  %14588 = vrcp.f32 %v6009_v29 }
 0x55f   :  { %13886 = vmatpush1.bf16.msra.mxu0 %v13885_v61  ;;  %v14577_v0 = vpop.eup %14576 }
 0x560   :  { %13887 = vmatprep.subr.bf16.mxu0 %v24480_v34  ;;  %v14579_v28 = vpop.eup %14578  ;;  %14590 = vrcp.f32 %v6995_v11  ;;  %v7984_v6 = vadd.f32 1.0, %v14577_v0 }
 0x561   :  { %14087 = vmatpush1.bf16.msra.mxu1 %v14086_v17  ;;  %v14581_v39 = vpop.eup %14580  ;;  %v6011_v4 = vadd.f32 1.0, %v14579_v28 }
 0x562   :  { %14088 = vmatprep.subr.bf16.mxu1 %v24480_v34  ;;  %14592 = vrcp.f32 %v7984_v6  ;;  %v6996_v61 = vadd.f32 1.0, %v14581_v39 }
 0x563   :  { %13889 = vmatpush1.bf16.msra.mxu0 %v13888_v48  ;;  %v14583_v2 = vpop.eup %14582  ;;  %14594 = vrcp.f32 %v6010_v26  ;;  %v26624_v48 = vld [vmem:[#allocation23_spill] sm:$0xff] }
 0x564   :  { %13890 = vmatprep.subr.bf16.mxu0 %v24480_v34  ;;  %14596 = vrcp.f32 %v6996_v61  ;;  %v7985_v63 = vadd.f32 1.0, %v14583_v2 }
 0x565   :  { %14090 = vmatpush1.bf16.msra.mxu1 %v14089_v47  ;;  %v14585_v19 = vpop.eup %14584 }
 0x566   :  { %14091 = vmatprep.subr.bf16.mxu1 %v24480_v34  ;;  %8837 = vmatmul.mubr.f32.vlgmr.msra.gmra.mrb[24].mxu0 %v26499_v52  ;;  %14598 = vrcp.f32 %v7985_v63  ;;  %v6997_v17 = vadd.f32 1.0, %v14585_v19 }
 0x567   :  { %13892 = vmatpush1.bf16.msk.msra.mxu0 %vm26514_vm6, %v26512_v5  ;;  %8842 = vmatprep.mubr.f32.mxu0 %v26502_v53  ;;  %vm26617_vm6 = vnez %v26616_v50  ;;  %14600 = vrcp.f32 %v6011_v4 }
 0x568   :  { %9826 = vmatmul.mubr.f32.vlgmr.msra.gmra.mrb[24].mxu1 %v26499_v52  ;;  %13893 = vmatprep.subr.bf16.mxu0 %v24480_v34  ;;  %14602 = vrcp.f32 %v6997_v17 }
 0x569   :  { %14093 = vmatpush1.bf16.msk.msra.mxu1 %vm26517_vm12, %v26512_v5  ;;  %9831 = vmatprep.mubr.f32.mxu1 %v26502_v53  ;;  %vm26619_vm12 = vnez %v26618_v25 }
 0x56a   :  { %14094 = vmatprep.subr.bf16.mxu1 %v24480_v34  ;;  %8844 = vmatmul.mubr.f32.gmra.mrb[26].mxu0 %v26504_v37 }
 0x56b   :  { %13895 = vmatpush1.bf16.msk.msra.mxu0 %vm26520_vm14, %v26512_v5  ;;  %8849 = vmatprep.mubr.f32.mxu0 %v26505_v15  ;;  %vm26621_vm14 = vnez %v26620_v16 }
 0x56c   :  { %13896 = vmatprep.subr.bf16.mxu0 %v24480_v34  ;;  %9833 = vmatmul.mubr.f32.gmra.mrb[26].mxu1 %v26504_v37 }
 0x56d   :  { %14096 = vmatpush1.bf16.msk.msra.mxu1 %vm26523_vm3, %v26512_v5  ;;  %9838 = vmatprep.mubr.f32.mxu1 %v26505_v15  ;;  %vm26623_vm3 = vnez %v26622_v8 }
 0x56e   :  { %14097 = vmatprep.subr.bf16.mxu1 %v24480_v34  ;;  %8851 = vmatmul.mubr.f32.gmra.mrb[28].mxu0 %v26614_v57 }
 0x56f   :  { %13898 = vmatpush1.bf16.msk.msra.mxu0 %vm26526_vm1, %v26512_v5  ;;  %8943 = vmatprep.mubr.f32.mxu0 %v24793_v49  ;;  %vm26625_vm1 = vnez %v26624_v48 }
 0x570   :  { %13899 = vmatprep.subr.bf16.mxu0 %v24480_v34  ;;  %9840 = vmatmul.mubr.f32.gmra.mrb[28].mxu1 %v26614_v57 }
 0x571   :  { %14099 = vmatpush1.bf16.msk.msra.mxu1 %vm26617_vm6, %v26512_v5  ;;  %9932 = vmatprep.mubr.f32.mxu1 %v24793_v49  ;;  %v14587_v49 = vpop.eup %14586  ;;  %vm26627_vm6 = vnez %v26626_v38 }
 0x572   :  { %14100 = vmatprep.subr.bf16.mxu1 %v24480_v34  ;;  %v7986_v54 = vadd.f32 1.0, %v14587_v49  ;;  %v14589_v51 = vpop.eup %14588 }
 0x573   :  { %13901 = vmatpush1.bf16.msk.msra.mxu0 %vm26619_vm12, %v26512_v5  ;;  %v14591_v1 = vpop.eup %14590 }
 0x574   :  { %13902 = vmatprep.subr.bf16.mxu0 %v24480_v34  ;;  %14604 = vrcp.f32 %v7986_v54  ;;  %v7004_v56 = vadd.f32 %v14591_v1, %v14589_v51  ;;  %v14593_v3 = vpop.eup %14592 }
 0x575   :  { %14102 = vmatpush1.bf16.msk.msra.mxu1 %vm26621_vm14, %v26512_v5  ;;  %v14595_v41 = vpop.eup %14594 }
 0x576   :  { %14103 = vmatprep.subr.bf16.mxu1 %v24480_v34  ;;  %v23345_v35 = vadd.f32 %v14593_v3, %v7004_v56  ;;  %v14597_v9 = vpop.eup %14596  ;;  %v9975_v56 = vld [vmem:[%s23533_s4] sm:$0x1f] }
 0x577   :  { %13904 = vmatpush1.bf16.msk.msra.mxu0 %vm26623_vm3, %v26512_v5  ;;  %v7005_v47 = vadd.f32 %v14597_v9, %v14595_v41  ;;  %v14599_v18 = vpop.eup %14598 }
 0x578   :  { %13905 = vmatprep.subr.bf16.mxu0 %v24480_v34  ;;  %v14601_v62 = vpop.eup %14600 }
 0x579   :  { %14105 = vmatpush1.bf16.msk.msra.mxu1 %vm26625_vm1, %v26512_v5  ;;  %v23355_v36 = vadd.f32 %v14599_v18, %v7005_v47  ;;  %v14603_v13 = vpop.eup %14602 }
 0x57a   :  { %14106 = vmatprep.subr.bf16.mxu1 %v24480_v34  ;;  %v7006_v40 = vadd.f32 %v14603_v13, %v14601_v62 }
 0x57b   :  { %13907 = vmatpush1.bf16.msk.msra.mxu0 %vm26627_vm6, %v26512_v5 }
 0x57c   :  { %13908 = vmatprep.subr.bf16.mxu0 %v24480_v34 }
 0x57d   :  { %14108 = vmatpush1.bf16.msk.msra.mxu1 %vm26542_vm8, %v26512_v5 }
 0x57e   :  { %14109 = vmatprep.subr.bf16.mxu1 %v24480_v34  ;;  %v14605_v43 = vpop.eup %14604 }
 0x57f   :  { %13910 = vmatpush1.bf16.msk.msra.mxu0 %vm26544_vm9, %v26512_v5  ;;  %v23365_v58 = vadd.f32 %v14605_v43, %v7006_v40 }
 0x580   :  { %13911 = vmatprep.subr.bf16.mxu0 %v24480_v34 }
 0x581   :  { %14111 = vmatpush1.bf16.msk.msra.mxu1 %vm26546_vm11, %v26512_v5 }
 0x582   :  { %14112 = vmatprep.subr.bf16.mxu1 %v24480_v34 }
 0x583   :  { %13913 = vmatpush1.bf16.msk.msra.mxu0 %vm26548_vm0, %v26512_v5 }
 0x584   :  { %13914 = vmatprep.subr.bf16.mxu0 %v24480_v34 }
 0x585   :  { %14114 = vmatpush1.bf16.msk.msra.mxu1 %vm22467_vm7, %v26512_v5  ;;  %vm9976_vm7 = vcmask 138240  }
 0x586   :  { %14115 = vmatprep.subr.bf16.mxu1 %v24480_v34  ;;  %v9978_v41 = vsel %vm9976_vm7, %v9975_v56, 0  ;;  %v26646_v56 = vld [vmem:[#allocation46_spill] sm:$0xff] }
 0x587   :  { %13916 = vmatpush1.bf16.msk.msra.mxu0 %vm22482_vm10, %v26512_v5  ;;  %vm14663_vm10 = vmmov 0   ;;  %v23425_v18 = vand.u32 4294901760, %v9978_v41 }
 0x588   :  { %13917 = vmatprep.subr.bf16.mxu0 %v24480_v34 }
 0x589   :  { %14117 = vmatpush1.bf16.msk.msra.mxu1 %vm22500_vm5, %v26512_v5  ;;  %v23429_v42 = vsub.f32 %v9978_v41, %v23425_v18  ;;  %vm9980_vm5 = vcmask 1040384  }
 0x58a   :  { %14118 = vmatprep.subr.bf16.mxu1 %v24480_v34 }
 0x58b   :  { %13919 = vmatpush1.bf16.msk.msra.mxu0 %vm22640_vm2, %v26512_v5  ;;  %v10054_v45 = vand.u32 4294901760, %v23429_v42  ;;  %vm11022_vm2 = vcmask 57344  }
 0x58c   :  { %13920 = vmatprep.subr.bf16.mxu0 %v24480_v34 }
 0x58d   :  { %14120 = vmatpush1.bf16.msk.msra.mxu1 %vm22673_vm4, %v26512_v5  ;;  %v11005_v5 = vld [vmem:[#allocation2] sm:$0x1] }
 0x58e   :  { %14121 = vmatprep.subr.bf16.mxu1 %v24480_v34 }
 0x58f   :  { %13923 = vmatpush1.bf16.msk.msra.mxu0 %vm22717_vm15, %v26554_v14  ;;  %v26638_v14 = vmov 0.0  }
 0x590   :  { %14125 = vmatprep.subr.bf16.mxu0 %v24480_v34 }
 0x591   :  { %14124 = vmatpush1.bf16.msk.msra.mxu1 %vm22742_vm13, %v26558_v33  ;;  %v26640_v33 = vmov 0  }
 0x592   :  { %8945 = vmatmul.mubr.f32.vlgmr.msra.gmra.mrb[24].mxu0 %v26499_v52  ;;  %14128 = vmatprep.subr.bf16.mxu1 %v24480_v34 }
 0x593   :  { %8950 = vmatprep.mubr.f32.mxu0 %v26502_v53 }
 0x594   :  { %9934 = vmatmul.mubr.f32.vlgmr.msra.gmra.mrb[24].mxu1 %v26499_v52  ;;  %v14665_v52 = vmov 1  }
 0x595   :  { %9939 = vmatprep.mubr.f32.mxu1 %v26502_v53  ;;  %14504 = vset.pattern.permute.xlu0 %v14665_v52  ;;  %v26639_v53 = vld [vmem:[#allocation36_spill] sm:$0xff] }
 0x596   :  { %8952 = vmatmul.mubr.f32.gmra.mrb[26].mxu0 %v26504_v37  ;;  %10967 = vperm.xlu1 %14505, %v26639_v53  }
 0x597   :  { %8957 = vmatprep.mubr.f32.mxu0 %v26505_v15  ;;  %10954 = vperm.xlu0 %14504, %v26639_v53  }
 0x598   :  { %9941 = vmatmul.mubr.f32.gmra.mrb[26].mxu1 %v26504_v37  ;;  %v14666_v37 = vmov 4  }
 0x599   :  { %9946 = vmatprep.mubr.f32.mxu1 %v26505_v15  ;;  %v14667_v15 = vmov 3  }
 0x59a   :  { %8959 = vmatmul.mubr.f32.gmra.mrb[28].mxu0 %v26614_v57  ;;  %14507 = vset.pattern.permute.xlu1 %v14666_v37 }
 0x59b   :  { %12013 = vmatprep.mubr.msk.f32.mxu0 %vm14663_vm10, %v26638_v14  ;;  %14506 = vset.pattern.permute.xlu0 %v14667_v15 }
 0x59c   :  { %9948 = vmatmul.mubr.f32.gmra.mrb[28].mxu1 %v26614_v57  ;;  %10993 = vperm.xlu1 %14507, %v26639_v53  }
 0x59d   :  { %12022 = vmatprep.mubr.msk.f32.mxu1 %vm14663_vm10, %v26638_v14  ;;  %10980 = vperm.xlu0 %14506, %v26639_v53  }
 0x5a0   :  { %14508 = vset.pattern.permute.xlu1 %v26640_v33 }
 0x5a1   :  { %14509 = vset.pattern.permute.xlu0 %v26640_v33  ;;  %11008 = vperm.xlu1 %14508, %v11005_v5  }
 0x665   :  { %v8946_v29 = vpop.f32.mrb[24].mxu0 }
 0x666   :  { %v14185_v60 = vadd.f32 %v8946_v29, %v26593_v7  ;;  %v8948_v46 = vpop.f32.mrb[25].mxu0 }
 0x667   :  { %v9935_v22 = vpop.f32.mrb[24].mxu1 }
 0x668   :  { %v11863_v11 = vmul.f32 -1.442695, %v14185_v60  ;;  %v14188_v44 = vadd.f32 %v9935_v22, %v26593_v7  ;;  %v9937_v0 = vpop.f32.mrb[25].mxu1 }
 0x669   :  { %v8953_v26 = vpop.f32.mrb[26].mxu0 }
 0x66a   :  { %14606 = vpow2.f32 %v11863_v11  ;;  %v11955_v57 = vmul.f32 -1.442695, %v14188_v44  ;;  %v14186_v28 = vadd.f32 %v8953_v26, %v26599_v12  ;;  %v8955_v6 = vpop.f32.mrb[27].mxu0 }
 0x66b   :  { %v9942_v24 = vpop.f32.mrb[26].mxu1 }
 0x66c   :  { %14608 = vpow2.f32 %v11955_v57  ;;  %v11864_v39 = vmul.f32 -1.442695, %v14186_v28  ;;  %v14189_v61 = vadd.f32 %v9942_v24, %v26599_v12  ;;  %v9944_v50 = vpop.f32.mrb[27].mxu1 }
 0x66d   :  { %v8960_v2 = vpop.f32.mrb[28].mxu0 }
 0x66e   :  { %14610 = vpow2.f32 %v11864_v39  ;;  %v11956_v4 = vmul.f32 -1.442695, %v14189_v61  ;;  %v14187_v63 = vadd.f32 %v8960_v2, %v26605_v30  ;;  %v8962_v25 = vpop.f32.mrb[29].mxu0 }
 0x66f   :  { %v9949_v7 = vpop.f32.mrb[28].mxu1 }
 0x670   :  { %14612 = vpow2.f32 %v11956_v4  ;;  %v11865_v19 = vmul.f32 -1.442695, %v14187_v63  ;;  %v14190_v17 = vadd.f32 %v9949_v7, %v26605_v30  ;;  %v9951_v16 = vpop.f32.mrb[29].mxu1  ;;  %v26641_v63 = vld [vmem:[#allocation28_spill] sm:$0xff] }
 0x671   :  { %v10460_v25 = vsel %vm9980_vm5, %v26641_v63, 0 }
 0x672   :  { %14614 = vpow2.f32 %v11865_v19  ;;  %v11957_v49 = vmul.f32 -1.442695, %v14190_v17  ;;  %v10469_v19 = vand.u32 4294901760, %v10460_v25 }
 0x674   :  { %v14607_v54 = vpop.eup %14606  ;;  %14616 = vpow2.f32 %v11957_v49  ;;  %v10556_v16 = vsub.f32 %v10460_v25, %v10469_v19  ;;  %v26642_v49 = vld [vmem:[#allocation20_spill] sm:$0xff] }
 0x675   :  { %v8973_v8 = vadd.f32 1.0, %v14607_v54 }
 0x676   :  { %v14609_v51 = vpop.eup %14608 }
 0x677   :  { %14618 = vrcp.f32 %v8973_v8  ;;  %v9962_v12 = vadd.f32 1.0, %v14609_v51  ;;  %v10557_v8 = vand.u32 4294901760, %v10556_v16  ;;  %v26643_v51 = vld [vmem:[#allocation24_spill] sm:$0xff] }
 0x678   :  { %v14611_v1 = vpop.eup %14610 }
 0x679   :  { %14620 = vrcp.f32 %v9962_v12  ;;  %v8974_v48 = vadd.f32 1.0, %v14611_v1  ;;  %v26644_v12 = vld [vmem:[#allocation14_spill] sm:$0xff] }
 0x67a   :  { %v14613_v3 = vpop.eup %14612  ;;  %v26645_v1 = vpack.c.bf16 %v26643_v51, %v26644_v12 }
 0x67b   :  { %14622 = vrcp.f32 %v8974_v48  ;;  %v9963_v30 = vadd.f32 1.0, %v14613_v3  ;;  %v10558_v48 = vsub.f32 %v10556_v16, %v10557_v8 }
 0x67c   :  { %v14615_v38 = vpop.eup %14614 }
 0x67d   :  { %14624 = vrcp.f32 %v9963_v30  ;;  %v8975_v9 = vadd.f32 1.0, %v14615_v38  ;;  %v10559_v3 = vand.u32 4294901760, %v10558_v48  ;;  %v26647_v30 = vld [vmem:[#allocation68_spill] sm:$0xff] }
 0x67e   :  { %v14617_v32 = vpop.eup %14616 }
 0x67f   :  { %14626 = vrcp.f32 %v8975_v9  ;;  %v9964_v47 = vadd.f32 1.0, %v14617_v32 }
 0x681   :  { %v14619_v20 = vpop.eup %14618  ;;  %14628 = vrcp.f32 %v9964_v47 }
 0x682   :  { %v8982_v62 = vadd.f32 %v14619_v20, %v23345_v35  ;;  %v9974_v35 = vld [vmem:[%s23532_s3] sm:$0x1f]  ;;  %s14668_s3 = smov [#allocation3]  }
 0x683   :  { %v14621_v13 = vpop.eup %14620  ;;  %v10457_v29 = vsel %vm9976_vm7, %v9974_v35, 0  ;;  %s11030_s18 = sshll.u32 %s14668_s3, 4  ;;  %s11031_s18 = int_to_ptr.vmem [resolvable:$true] %s11030_s18 }
 0x684   :  { %v9971_v40 = vadd.f32 %v14621_v13, %v8982_v62  ;;  %v23443_v28 = vand.u32 4294901760, %v10457_v29  ;;  %s14634_s19 = scalar_lea.vmem %s11031_s18, 16  ;;  %s14638_s20 = scalar_lea.vmem %s11031_s18, 32 }
 0x685   :  { %v14623_v43 = vpop.eup %14622  ;;  %p14635_p0 = scmp.ne.s32.totalorder %s11031_s18, %s14634_s19  ;;  %p14639_p1 = scmp.lt.s32.totalorder %s11031_s18, %s11031_s18 }
 0x686   :  { %v8983_v31 = vadd.f32 %v14623_v43, %v23355_v36  ;;  %v9985_v59 = vand.u32 4294901760, %v9971_v40  ;;  %v10055_v36 = vsub.f32 %v23429_v42, %v10054_v45  ;;  %v23450_v2 = vsub.f32 %v10457_v29, %v23443_v28  ;;  %p14640_p2 = scmp.lt.s32.totalorder %s14638_s20, %s14634_s19 }
 0x687   :  { %v14625_v55 = vpop.eup %14624 }
 0x688   :  { %v9972_v27 = vadd.f32 %v14625_v55, %v8983_v31  ;;  %v10064_v21 = vsub.f32 %v9971_v40, %v9985_v59  ;;  %v10056_v44 = vand.u32 4294901760, %v10055_v36  ;;  %v10532_v7 = vand.u32 4294901760, %v23450_v2  ;;  %p14641_p3 = por %p14640_p2, %p14639_p1 }
 0x689   :  { %v14627_v23 = vpop.eup %14626 }
 0x68a   :  { %v9988_v10 = vand.u32 4294901760, %v9972_v27  ;;  %v8984_v52 = vadd.f32 %v14627_v23, %v23365_v58  ;;  %v10065_v53 = vand.u32 4294901760, %v10064_v21  ;;  %v10533_v17 = vsub.f32 %v23450_v2, %v10532_v7  ;;  %p14642_p4 = pnand %p14641_p3, %p14635_p0 }
 0x68b   :  { %v14629_v37 = vpop.eup %14628 }
 0x68c   :  { %v14126_v15 = vpack.c.bf16 %v9988_v10, %v9985_v59  ;;  %v10071_v5 = vsub.f32 %v9972_v27, %v9988_v10  ;;  %v9973_v33 = vadd.f32 %v14629_v37, %v8984_v52  ;;  %v10066_v46 = vsub.f32 %v10064_v21, %v10065_v53  ;;  %v10938_v52 = vpop.permute.xlu1 %10937 }
 0x68d   :  { %v10534_v54 = vand.u32 4294901760, %v10533_v17 }
 0x68e   :  { %14127 = vmatpush3.bf16.msra.mxu0 %v14126_v15  ;;  %v9982_v60 = vsel %vm9980_vm5, %v9973_v33, 0  ;;  %v14132_v58 = vpack.c.bf16 %v10071_v5, %v10064_v21  ;;  %v10072_v22 = vand.u32 4294901760, %v10071_v5  ;;  %v10067_v6 = vand.u32 4294901760, %v10066_v46  ;;  %v10955_v46 = vpop.permute.xlu0 %10954 }
 0x68f   :  { %12011 = vmatprep.subr.mxu0 %v26638_v14  ;;  %v9991_v11 = vand.u32 4294901760, %v9982_v60 }
 0x690   :  { %v10073_v0 = vsub.f32 %v10071_v5, %v10072_v22  ;;  %v14138_v26 = vpack.c.bf16 %v10072_v22, %v10065_v53  ;;  %v10946_v33 = vpop.permute.xlu1 %10945 }
 0x691   :  { %v10078_v57 = vsub.f32 %v9982_v60, %v9991_v11 }
 0x692   :  { %12012 = vmatpush3.msra.mxu0 %v9991_v11  ;;  %v10074_v24 = vand.u32 4294901760, %v10073_v0 }
 0x693   :  { %14131 = vmatprep.subr.bf16.mxu0 %v24480_v34  ;;  %12014 = vmatmul.mubr.f32.vlgmr.msra.gmra.mrb[30].mxu0 %v10056_v44  ;;  %v10079_v39 = vand.u32 4294901760, %v10078_v57 }
 0x694   :  { %14133 = vmatpush3.bf16.msra.mxu0 %v14132_v58  ;;  %v14129_v61 = vpack.c.bf16 %v10074_v24, %v10067_v6  ;;  %12031 = vmatprep.mubr.msk.f32.mxu0 %vm14663_vm10, %v26638_v14 }
 0x695   :  { %12029 = vmatprep.subr.mxu0 %v26638_v14  ;;  %v10080_v50 = vsub.f32 %v10078_v57, %v10079_v39 }
 0x696   :  { %14130 = vmatpush3.bf16.msra.mxu1 %v14129_v61 }
 0x697   :  { %12020 = vmatprep.subr.mxu1 %v26638_v14  ;;  %v10081_v4 = vand.u32 4294901760, %v10080_v50 }
 0x698   :  { %12030 = vmatpush3.msra.mxu0 %v10078_v57  ;;  %v10981_v57 = vpop.permute.xlu0 %10980 }
 0x699   :  { %14137 = vmatprep.subr.bf16.mxu0 %v24480_v34  ;;  %12032 = vmatmul.mubr.f32.vlgmr.msra.gmra.mrb[32].mxu0 %v23429_v42 }
 0x69a   :  { %12021 = vmatpush3.msra.mxu1 %v10081_v4  ;;  %14139 = vmatpush3.bf16.msra.mxu0 %v14138_v26 }
 0x69b   :  { %14134 = vmatprep.subr.bf16.mxu1 %v24480_v34  ;;  %12023 = vmatmul.mubr.f32.vlgmr.msra.gmra.mrb[30].mxu1 %v23425_v18 }
 0x69c   :  { %14136 = vmatpush3.bf16.msra.mxu1 %v14126_v15  ;;  %12047 = vmatprep.subr.mxu0 %v26638_v14 }
 0x69d   :  { %12038 = vmatprep.subr.mxu1 %v26638_v14  ;;  %12049 = vmatprep.mubr.msk.f32.mxu0 %vm14663_vm10, %v26638_v14 }
 0x69e   :  { %12048 = vmatpush3.msra.mxu0 %v10079_v39  ;;  %12040 = vmatprep.mubr.msk.f32.mxu1 %vm14663_vm10, %v26638_v14 }
 0x69f   :  { %14143 = vmatprep.subr.bf16.mxu0 %v24480_v34  ;;  %12050 = vmatmul.mubr.f32.vlgmr.msra.gmra.mrb[34].mxu0 %v23425_v18 }
 0x6a0   :  { %12039 = vmatpush3.msra.mxu1 %v9991_v11  ;;  %14145 = vmatpush3.bf16.msra.mxu0 %v26642_v49 }
 0x6a1   :  { %14140 = vmatprep.subr.bf16.mxu1 %v24480_v34  ;;  %12041 = vmatmul.mubr.f32.vlgmr.msra.gmra.mrb[32].mxu1 %v10054_v45 }
 0x6a2   :  { %14142 = vmatpush3.bf16.msra.mxu1 %v14126_v15  ;;  %12065 = vmatprep.subr.mxu0 %v26638_v14 }
 0x6a3   :  { %12056 = vmatprep.subr.mxu1 %v26638_v14  ;;  %12067 = vmatprep.mubr.msk.f32.mxu0 %vm14663_vm10, %v26638_v14 }
 0x6a4   :  { %12066 = vmatpush3.msra.mxu0 %v10469_v19  ;;  %12058 = vmatprep.mubr.msk.f32.mxu1 %vm14663_vm10, %v26638_v14 }
 0x6a5   :  { %14149 = vmatprep.subr.bf16.mxu0 %v24480_v34  ;;  %12068 = vmatmul.mubr.f32.vlgmr.msra.gmra.mrb[36].mxu0 %v10534_v54 }
 0x6a6   :  { %12057 = vmatpush3.msra.mxu1 %v9991_v11  ;;  %14151 = vmatpush3.bf16.msra.mxu0 %v26645_v1  ;;  %v10968_v11 = vpop.permute.xlu1 %10967 }
 0x6a7   :  { %12059 = vmatmul.mubr.f32.vlgmr.msra.gmra.mrb[34].mxu1 %v23425_v18  ;;  %14146 = vmatprep.subr.bf16.mxu1 %v24480_v34 }
 0x6a8   :  { %14148 = vmatpush3.bf16.msra.mxu1 %v26646_v56  ;;  %12083 = vmatprep.subr.mxu0 %v26638_v14 }
 0x6a9   :  { %12074 = vmatprep.subr.mxu1 %v26638_v14  ;;  %12085 = vmatprep.mubr.msk.f32.mxu0 %vm14663_vm10, %v26638_v14 }
 0x6aa   :  { %12084 = vmatpush3.msra.mxu0 %v10556_v16  ;;  %12076 = vmatprep.mubr.msk.f32.mxu1 %vm14663_vm10, %v26638_v14  ;;  %v10994_v61 = vpop.permute.xlu1 %10993 }
 0x6ab   :  { %14155 = vmatprep.subr.bf16.mxu0 %v24480_v34  ;;  %12086 = vmatmul.mubr.f32.vlgmr.msra.gmra.mrb[38].mxu0 %v23450_v2 }
 0x6ac   :  { %12075 = vmatpush3.msra.mxu1 %v10559_v3  ;;  %14157 = vmatpush3.bf16.msra.mxu0 %v26647_v30 }
 0x6ad   :  { %12077 = vmatmul.mubr.f32.vlgmr.msra.gmra.mrb[36].mxu1 %v23443_v28  ;;  %14152 = vmatprep.subr.bf16.mxu1 %v24480_v34 }
 0x6ae   :  { %14154 = vmatpush3.bf16.msra.mxu1 %v26642_v49  ;;  %12101 = vmatprep.subr.mxu0 %v26638_v14  ;;  %v11009_v51 = vpop.permute.xlu1 %11008 }
 0x6af   :  { %12092 = vmatprep.subr.mxu1 %v26638_v14  ;;  %12094 = vmatprep.mubr.msk.f32.mxu1 %vm14663_vm10, %v26638_v14 }
 0x6b0   :  { %12102 = vmatpush3.msra.mxu0 %v10557_v8  ;;  %12103 = vmatprep.mubr.msk.f32.mxu0 %vm14663_vm10, %v26638_v14 }
 0x6b1   :  { %12104 = vmatmul.mubr.f32.vlgmr.msra.gmra.mrb[40].mxu0 %v23443_v28 }
 0x6b2   :  { %12093 = vmatpush3.msra.mxu1 %v10469_v19 }
 0x6b3   :  { %12095 = vmatmul.mubr.f32.vlgmr.msra.gmra.mrb[38].mxu1 %v10532_v7  ;;  %14158 = vmatprep.subr.bf16.mxu1 %v24480_v34 }
 0x6b4   :  { %14160 = vmatpush3.bf16.msra.mxu1 %v26642_v49  ;;  %12112 = vmatprep.mubr.msk.f32.mxu1 %vm14663_vm10, %v26638_v14 }
 0x6b5   :  { %12110 = vmatprep.subr.mxu1 %v26638_v14 }
 0x6b8   :  { %12111 = vmatpush3.msra.mxu1 %v10469_v19 }
 0x6b9   :  { %12113 = vmatmul.mubr.f32.vlgmr.msra.gmra.mrb[40].mxu1 %v23443_v28  ;;  %v26648_v28 = vld [vmem:[#allocation8_spill] sm:$0xff] }
 0x6ba   :  { %v10973_v6 = vrot.slane %v10968_v11, %v26648_v28  ;;  %v10960_v24 = vrot.slane %v10955_v46, %v26648_v28  ;;  %v10986_v2 = vrot.slane %v10981_v57, %v26648_v28  ;;  %v10951_v4 = vrot.slane %v10946_v33, %v26648_v28 }
 0x6bb   :  { %v10999_v63 = vrot.slane %v10994_v61, %v26648_v28  ;;  %v11014_v3 = vrot.slane %v11009_v51, %v26648_v28 }
 0x766   :  { %v10058_v38 = vpop.f32.mrb[30].mxu0 }
 0x767   :  { %v12015_v41 = vpop.f32.mrb[31].mxu0 }
 0x76c   :  { %v10222_v9 = vpop.f32.mrb[32].mxu0 }
 0x76d   :  { %v12033_v32 = vpop.f32.mrb[33].mxu0 }
 0x76e   :  { %v10144_v47 = vpop.f32.mrb[30].mxu1 }
 0x76f   :  { %v10145_v18 = vadd.f32 %v10144_v47, %v10058_v38  ;;  %v12024_v20 = vpop.f32.mrb[31].mxu1 }
 0x771   :  { %v10223_v62 = vadd.f32 %v10222_v9, %v10145_v18 }
 0x772   :  { %v10378_v13 = vpop.f32.mrb[34].mxu0 }
 0x773   :  { %v12051_v34 = vpop.f32.mrb[35].mxu0 }
 0x774   :  { %v10298_v42 = vpop.f32.mrb[32].mxu1 }
 0x775   :  { %v10299_v40 = vadd.f32 %v10298_v42, %v10223_v62  ;;  %v12042_v43 = vpop.f32.mrb[33].mxu1 }
 0x777   :  { %v10379_v31 = vadd.f32 %v10378_v13, %v10299_v40 }
 0x778   :  { %v10536_v59 = vpop.f32.mrb[36].mxu0 }
 0x779   :  { %v12069_v55 = vpop.f32.mrb[37].mxu0 }
 0x77a   :  { %v10452_v14 = vpop.f32.mrb[34].mxu1 }
 0x77b   :  { %v10453_v45 = vadd.f32 %v10452_v14, %v10379_v31  ;;  %v12060_v27 = vpop.f32.mrb[35].mxu1 }
 0x77d   :  { %v10537_v21 = vadd.f32 %v10536_v59, %v10453_v45 }
 0x77e   :  { %v10700_v23 = vpop.f32.mrb[38].mxu0 }
 0x77f   :  { %v12087_v10 = vpop.f32.mrb[39].mxu0 }
 0x780   :  { %v10622_v53 = vpop.f32.mrb[36].mxu1 }
 0x781   :  { %v10623_v35 = vadd.f32 %v10622_v53, %v10537_v21  ;;  %v12078_v37 = vpop.f32.mrb[37].mxu1 }
 0x783   :  { %v10701_v36 = vadd.f32 %v10700_v23, %v10623_v35 }
 0x784   :  { %v10856_v15 = vpop.f32.mrb[40].mxu0 }
 0x785   :  { %v12105_v5 = vpop.f32.mrb[41].mxu0 }
 0x786   :  { %v10776_v29 = vpop.f32.mrb[38].mxu1 }
 0x787   :  { %v10777_v60 = vadd.f32 %v10776_v29, %v10701_v36  ;;  %v12096_v58 = vpop.f32.mrb[39].mxu1 }
 0x789   :  { %v10857_v22 = vadd.f32 %v10856_v15, %v10777_v60 }
 0x78c   :  { %v10930_v44 = vpop.f32.mrb[40].mxu1 }
 0x78d   :  { %v10931_v0 = vadd.f32 %v10930_v44, %v10857_v22  ;;  %v12114_v26 = vpop.f32.mrb[41].mxu1 }
 0x78f   :  { %v10940_v39 = vadd.f32 %v10938_v52, %v10931_v0 }
 0x791   :  { %v10941_v50 = vmax.f32 %v10940_v39, 0.0 }
 0x793   :  { %v10961_v25 = vmul.f32 %v10960_v24, %v10941_v50  ;;  %v10974_v7 = vmul.f32 %v10973_v6, %v10941_v50  ;;  %v10952_v19 = vmul.f32 %v10951_v4, %v10941_v50  ;;  %v10987_v16 = vmul.f32 %v10986_v2, %v10941_v50 }
 0x794   :  { %v11000_v49 = vmul.f32 %v10999_v63, %v10941_v50 }
 0x795   :  { %v10963_v17 = vrot.slane %v10961_v25, 1  ;;  %v10976_v8 = vrot.slane %v10974_v7, 2  ;;  %v10989_v1 = vrot.slane %v10987_v16, 3 }
 0x796   :  { %v11002_v48 = vrot.slane %v11000_v49, 4 }
 0x797   :  { %v10965_v54 = vadd.f32 %v10963_v17, %v10952_v19 }
 0x799   :  { %v10978_v12 = vadd.f32 %v10976_v8, %v10965_v54 }
 0x79b   :  { %v10991_v56 = vadd.f32 %v10989_v1, %v10978_v12 }
 0x79d   :  { %v11004_v30 = vadd.f32 %v11002_v48, %v10991_v56 }
 0x79f   :  { %v11015_v38 = vadd.f32 %v11014_v3, %v11004_v30 }
 0x7a1   :  { %v11958_v41 = vmul.f32 -1.442695, %v11015_v38 }
 0x7a3   :  { %14630 = vpow2.f32 %v11958_v41 }
 0x7ad   :  { %v14631_v9 = vpop.eup %14630 }
 0x7ae   :  { %v11019_v32 = vadd.f32 1.0, %v14631_v9 }
 0x7b0   :  { %14632 = vrcp.f32 %v11019_v32 }
 0x7ba   :  { %v14633_v47 = vpop.eup %14632 }
 0x7bb   :  { %11023 = vst.msk [vmem:[#allocation3] sm:$0x1] %vm11022_vm2, %v14633_v47 }
 0x7bc   :  { %14645 = shalt.err (!%p14642_p4)
}
 0x7bd   :  { %s14646_s23 = scalar_lea.hbm %s23537_s8, 16 }
 0x7be   :  { %p14647_p5 = scmp.ne.s32.totalorder %s23537_s8, %s14646_s23  ;;  %p14650_p6 = scmp.lt.u32.totalorder %s14646_s23, %s23537_s8 }
 0x7c0   :  { %p14652_p7 = pnand %p14650_p6, %p14647_p5 }
 0x7c2   :  { %14655 = shalt.err (!%p14652_p7)
}
 0x7c3   :  { %11033 = dma.vmem_to_hbm [thread:$0]  %s11031_s18, 16, %s23537_s8, [#allocation4]  }
 0x7c4   :  { %14656 = dma.done.wait [#allocation4], 16  }
 0x7c5   :  { %14657 = vsyncadd [#allocation4], 4294967280 }
 0x7c6   :  { %11037 = vsyncpa [#allocation4], 1 }

</bundles_post_ra>
